<compile_context>
chip_gen: v5e
topology: v5e:2x2
jax: 0.10.0
libtpu: 0.0.40
codegen_flags: <defaults>
</compile_context>

<pallas_src>
import math

import numpy as np
import jax
import jax.numpy as jnp
from jax.experimental import pallas as pl
from jax.experimental.pallas import tpu as pltpu

# Model hyper-parameters (small, consistent with the module's forward).
B = 8            # batch size
N = 5            # num_inputs
E = 32           # embedding_size (constructor arg; default 300 shrunk for demo)
V = 4            # output_vocab
CHAR_EMB = 10    # character_embeddings_size
H1 = 1024        # hidden_size_1 (hard-coded in the module)
H2 = 256         # hidden_size_2 (hard-coded in the module)
CHAIN = E * N                                   # 160
DENSE_IN = 4 * CHAIN                            # 640 = 5 * 128 (lane aligned)
IN_DIM = 4 * CHAIN + 2 * CHAR_EMB * N           # 740 (original input_layer K)
P2N = 2 * N                                     # 10 char "positions" (subj+obj)
CHAR_ROWS = P2N * B                             # 80 batched char rows
CHAR_COLS = P2N * CHAR_EMB                      # 100 char feature columns

VMEM_SPEC = pl.BlockSpec(memory_space=pltpu.MemorySpace.VMEM)

# Static cost model for the fused kernel (advisory).
_FLOPS = 2 * (
    CHAR_ROWS * (26 * 128 + 128 * CHAR_COLS)                     # batched char MLP
    + B * (CHAR_COLS * H1 + DENSE_IN * H1 + H1 * H1 + H1 * H2 + H2 * V)
    + 2 * B * V * E                                              # head matmuls
)
_TRANSC = CHAR_ROWS * (128 + CHAR_COLS) + B * (2 * H1 + H2) + 4 * B * V


# --------------------------------------------------------------------------
# Fused kernel: char MLP + input_layer + output_layer + loss/similarity head
# --------------------------------------------------------------------------
def _eventy_kernel(chars_ref, dx_ref, le_ref, lab_ref,
                   cw1_ref, cb1_ref, cw2w_ref, cb2w_ref, cmask_ref,
                   w1d_ref, w1c_ref, b1_ref,
                   w2_ref, b2_ref, w3_ref, b3_ref, wo_ref, bo_ref,
                   vocab_ref, vocab_t_ref,
                   logits_ref, sims_ref, loss_ref, eucl_ref, emb_ref):
    bf16 = jnp.bfloat16
    f32 = jnp.float32

    # ---- char-embedding MLP, batched over both streams and all N positions.
    # chars rows are (stream, position, batch)-major: row p*B + b, p = s*N + n.
    xc = chars_ref[...].astype(bf16)                               # (80, 26)
    hc = jax.nn.sigmoid(
        jnp.dot(xc, cw1_ref[...], preferred_element_type=f32) + cb1_ref[...])
    # Second layer against a column-replicated weight (every 10-wide column
    # block holds the same (128,10) weight), so row p*B+b carries its own
    # char embedding replicated in every column block.
    cwide = jax.nn.sigmoid(
        jnp.dot(hc.astype(bf16), cw2w_ref[...], preferred_element_type=f32)
        + cb2w_ref[...])                                           # (80, 100)
    # Keep only the diagonal block (row block p -> column block p), then fold
    # the 10 row blocks together with sublane-aligned slices + adds.  Result
    # is the (B, 100) char feature matrix whose column order matches the
    # concatenated char rows of in_w1 (subject positions 0..4, then object).
    cdiag = cwide * cmask_ref[...]
    cfeat = cdiag[0:B, :]
    for p in range(1, P2N):
        cfeat = cfeat + cdiag[p * B:(p + 1) * B, :]                # (8, 100)

    # ---- input_layer ------------------------------------------------------
    acc = (jnp.dot(dx_ref[...].astype(bf16), w1d_ref[...],
                   preferred_element_type=f32)
           + jnp.dot(cfeat.astype(bf16), w1c_ref[...],
                     preferred_element_type=f32)
           + b1_ref[...])
    h1 = jax.nn.sigmoid(acc)
    h2 = jax.nn.sigmoid(
        jnp.dot(h1.astype(bf16), w2_ref[...], preferred_element_type=f32)
        + b2_ref[...])
    h3 = jax.nn.sigmoid(
        jnp.dot(h2.astype(bf16), w3_ref[...], preferred_element_type=f32)
        + b3_ref[...])
    emb_ref[...] = h3                                              # "embeddings"

    # ---- output_layer -----------------------------------------------------
    logits = (jnp.dot(h3.astype(bf16), wo_ref[...],
                      preferred_element_type=f32) + bo_ref[...])
    logits_ref[...] = logits

    # ---- loss / similarity head ------------------------------------------
    vocab = vocab_ref[...]                                         # (V, E) unit rows

    # embedding_mixes = normalize((vocab * softmax(logits**2)[...,None]).mean(1))
    # the /V of mean() cancels under the normalization, so it is dropped.
    w = jax.nn.softmax(logits * logits, axis=-1)                   # (B, V)
    mix = jnp.dot(w, vocab, preferred_element_type=f32)            # (B, E)
    # clamp ~ (F.normalize eps=1e-12)^2
    mixn = mix * jax.lax.rsqrt(
        jnp.maximum(jnp.sum(mix * mix, axis=-1, keepdims=True), 1e-24))

    # CosineEmbeddingLoss(target=+1, reduction='none').mean() = mean(1 - cos)
    # ||mixn|| == 1 by construction, so only the label-embedding norm is needed.
    le = le_ref[...]                                               # (B, E)
    le_inv = jax.lax.rsqrt(
        jnp.maximum(jnp.sum(le * le, axis=-1, keepdims=True), 1e-16))
    cos = jnp.sum(mixn * le, axis=-1, keepdims=True) * le_inv
    emb_loss = jnp.sum(1.0 - cos) / B

    # MSELoss(reduction='none') -> elementwise squared error (B, E)
    diff = mixn - le
    eucl_ref[...] = diff * diff

    # CrossEntropyLoss (mean over batch, integer labels)
    m = jnp.max(logits, axis=-1, keepdims=True)
    lse = m + jnp.log(jnp.sum(jnp.exp(logits - m), axis=-1, keepdims=True))
    logp = logits - lse
    onehot = (jax.lax.broadcasted_iota(jnp.int32, (B, V), 1)
              == lab_ref[...]).astype(f32)
    ce = -jnp.sum(onehot * logp) / B

    # similarities = 1 - cosine_similarity(mixes, vocab); both unit norm.
    # vocab is fed pre-transposed -> no in-kernel transpose in the epilogue.
    sims_ref[...] = 1.0 - jnp.dot(mixn, vocab_t_ref[...],
                                  preferred_element_type=f32)

    # Pack the two scalar losses into a single lane-padded slab.
    lane = jax.lax.broadcasted_iota(jnp.int32, (1, 128), 1)
    loss_ref[...] = (jnp.where(lane == 0, ce, 0.0)
                     + jnp.where(lane == 1, emb_loss, 0.0)).astype(f32)


# --------------------------------------------------------------------------
# Parameter init (deterministic, synthetic).  in_w1 is created at the
# original (IN_DIM, H1) shape and split ONCE into the dense-text block and a
# single concatenated (100, H1) char block whose row order matches the
# batched char-activation layout produced in the kernel.
# --------------------------------------------------------------------------
def init_params(key):
    bf16 = jnp.bfloat16

    def linear(key, fan_in, fan_out):
        kw, kb = jax.random.split(key)
        bound = 1.0 / jnp.sqrt(fan_in)
        w = jax.random.uniform(kw, (fan_in, fan_out), jnp.float32, -bound, bound)
        b = jax.random.uniform(kb, (1, fan_out), jnp.float32, -bound, bound)
        return w, b

    keys = jax.random.split(key, 8)
    p = {}

    cw1, cb1 = linear(keys[0], 26, 128)
    cw2, cb2 = linear(keys[1], 128, CHAR_EMB)
    p["char_w1"], p["char_b1"] = cw1.astype(bf16), cb1
    p["char_w2"], p["char_b2"] = cw2.astype(bf16), cb2          # reference copy
    # Column-replicated second char layer: lets one (80,128)@(128,100) matmul
    # produce every position's 10-wide embedding (no lane-crossing reshape).
    p["char_w2_wide"] = jnp.tile(cw2, (1, P2N)).astype(bf16)    # (128, 100)
    p["char_b2_wide"] = jnp.tile(cb2, (1, P2N))                 # (1, 100) f32
    # Block-diagonal 0/1 mask: row block p keeps only column block p.
    p["char_block_mask"] = jnp.kron(
        jnp.eye(P2N, dtype=jnp.float32),
        jnp.ones((B, CHAR_EMB), jnp.float32))                   # (80, 100)

    # Full input_layer first linear, row order matching the PyTorch concat:
    # [subject_text(160), subj_char(50), reshaped(160),
    #  object_text(160), obj_char(50), iobject(160)]
    w1_full, b1 = linear(keys[2], IN_DIM, H1)
    o0 = 0
    s_text = w1_full[o0:o0 + CHAIN];                 o0 += CHAIN
    s_char = w1_full[o0:o0 + CHAR_EMB * N];          o0 += CHAR_EMB * N
    resh   = w1_full[o0:o0 + CHAIN];                 o0 += CHAIN
    o_text = w1_full[o0:o0 + CHAIN];                 o0 += CHAIN
    o_char = w1_full[o0:o0 + CHAR_EMB * N];          o0 += CHAR_EMB * N
    iobj   = w1_full[o0:o0 + CHAIN];                 o0 += CHAIN
    assert o0 == IN_DIM
    # Dense block order must match dense_x = [subject_text, reshaped,
    # object_text, iobject] built in the wrapper (K = 640 = 5*128, lane dense).
    p["in_w1_dense"] = jnp.concatenate([s_text, resh, o_text, iobj],
                                       axis=0).astype(bf16)          # (640, H1)
    # Char rows: subject positions 0..4 (n-major, 10 each) then object 0..4.
    p["in_w1_char"] = jnp.concatenate([s_char, o_char],
                                      axis=0).astype(bf16)           # (100, H1)
    p["in_b1"] = b1

    w2, b2 = linear(keys[3], H1, H1)
    w3, b3 = linear(keys[4], H1, H2)
    wo, bo = linear(keys[5], H2, V)
    p["in_w2"], p["in_b2"] = w2.astype(bf16), b2
    p["in_w3"], p["in_b3"] = w3.astype(bf16), b3
    p["out_w"], p["out_b"] = wo.astype(bf16), bo

    vocab = jax.random.normal(keys[6], (V, E), jnp.float32)
    vocab = vocab / jnp.maximum(
        jnp.sqrt(jnp.sum(vocab * vocab, axis=-1, keepdims=True)), 1e-12)
    p["vocab_embeddings"] = vocab                       # (V, E), unit rows
    p["vocab_embeddings_t"] = vocab.T                   # (E, V), for sims matmul
    p["class_distribution"] = jnp.zeros((V,), jnp.float32)  # unused in forward
    return p


# --------------------------------------------------------------------------
# Forward glue (jit-compiled): only two cheap input reshuffles happen outside
# the single fused pallas_call.
# --------------------------------------------------------------------------
@jax.jit
def eventy_forward(params, embeddings, subject_hot, object_hot, labels,
                   label_embeddings, object_text, subject_text, iobject):
    # (2, B, N, 26) -> (2, N, B, 26) -> (2*N*B, 26); rows ordered
    # (stream, position, batch) so the kernel's row block p = stream*N + n.
    chars = jnp.stack([subject_hot, object_hot], axis=0)
    chars = jnp.transpose(chars, (0, 2, 1, 3)).reshape(CHAR_ROWS, 26)
    dense_x = jnp.concatenate(                     # (B, 640), lane-dense K
        [subject_text.reshape(B, CHAIN), embeddings.reshape(B, CHAIN),
         object_text.reshape(B, CHAIN), iobject.reshape(B, CHAIN)], axis=1)
    labels2d = labels.astype(jnp.int32).reshape(B, 1)

    args = (chars, dense_x, label_embeddings, labels2d,
            params["char_w1"], params["char_b1"],
            params["char_w2_wide"], params["char_b2_wide"],
            params["char_block_mask"],
            params["in_w1_dense"], params["in_w1_char"], params["in_b1"],
            params["in_w2"], params["in_b2"],
            params["in_w3"], params["in_b3"],
            params["out_w"], params["out_b"],
            params["vocab_embeddings"], params["vocab_embeddings_t"])

    out_shape = (
        jax.ShapeDtypeStruct((B, V), jnp.float32),     # logits
        jax.ShapeDtypeStruct((B, V), jnp.float32),     # cosine similarities
        jax.ShapeDtypeStruct((1, 128), jnp.float32),   # packed scalar losses
        jax.ShapeDtypeStruct((B, E), jnp.float32),     # euclidean loss
        jax.ShapeDtypeStruct((B, H2), jnp.float32),    # embeddings (hidden)
    )
    bytes_accessed = sum(int(a.size) * a.dtype.itemsize for a in args)
    bytes_accessed += sum(int(math.prod(s.shape)) * np.dtype(s.dtype).itemsize
                          for s in out_shape)

    logits, sims, losses, eucl, hidden = pl.pallas_call(
        _eventy_kernel,
        out_shape=out_shape,
        in_specs=[VMEM_SPEC] * len(args),
        out_specs=(VMEM_SPEC,) * 5,
        cost_estimate=pl.CostEstimate(flops=_FLOPS, transcendentals=_TRANSC,
                                      bytes_accessed=bytes_accessed),
    )(*args)

    return {
        "logits": logits,
        "cosine_similarities": sims,
        "classification_loss": losses[0, 0],
        "embedding_loss": losses[0, 1],
        "euclidean_loss": eucl,
        "embeddings": hidden,
    }


# --------------------------------------------------------------------------
# Pure-JAX reference (natural per-position formulation, same bf16 weights)
# for a sanity check of the batched/refactored kernel math.
# --------------------------------------------------------------------------
def eventy_reference(params, embeddings, subject_hot, object_hot, labels,
                     label_embeddings, object_text, subject_text, iobject):
    f32 = jnp.float32

    def dot(a, b):
        return jnp.dot(a.astype(jnp.bfloat16), b, preferred_element_type=f32)

    cw1, cb1 = params["char_w1"], params["char_b1"]
    cw2, cb2 = params["char_w2"], params["char_b2"]
    w1c = params["in_w1_char"]

    dense_x = jnp.concatenate(
        [subject_text.reshape(B, CHAIN), embeddings.reshape(B, CHAIN),
         object_text.reshape(B, CHAIN), iobject.reshape(B, CHAIN)], axis=1)
    acc = dot(dense_x, params["in_w1_dense"]) + params["in_b1"]
    for s, hot in enumerate((subject_hot, object_hot)):
        for n in range(N):
            p = s * N + n
            x = hot[:, n, :]
            h = jax.nn.sigmoid(dot(x, cw1) + cb1)
            c = jax.nn.sigmoid(dot(h, cw2) + cb2)
            acc = acc + dot(c, w1c[p * CHAR_EMB:(p + 1) * CHAR_EMB, :])
    h1 = jax.nn.sigmoid(acc)
    h2 = jax.nn.sigmoid(dot(h1, params["in_w2"]) + params["in_b2"])
    h3 = jax.nn.sigmoid(dot(h2, params["in_w3"]) + params["in_b3"])
    logits = dot(h3, params["out_w"]) + params["out_b"]

    vocab = params["vocab_embeddings"]
    w = jax.nn.softmax(logits * logits, axis=-1)
    mix = jnp.dot(w, vocab, preferred_element_type=f32)
    mixn = mix * jax.lax.rsqrt(
        jnp.maximum(jnp.sum(mix * mix, axis=-1, keepdims=True), 1e-24))
    le = label_embeddings
    cos = jnp.sum(mixn * le, axis=-1) * jax.lax.rsqrt(
        jnp.maximum(jnp.sum(le * le, axis=-1), 1e-16))
    emb_loss = jnp.mean(1.0 - cos)
    eucl = (mixn - le) ** 2
    m = jnp.max(logits, axis=-1, keepdims=True)
    lse = m + jnp.log(jnp.sum(jnp.exp(logits - m), axis=-1, keepdims=True))
    logp = logits - lse
    onehot = jax.nn.one_hot(labels, V, dtype=f32)
    ce = -jnp.sum(onehot * logp) / B
    sims = 1.0 - jnp.dot(mixn, vocab.T, preferred_element_type=f32)
    return {"logits": logits, "cosine_similarities": sims,
            "classification_loss": ce, "embedding_loss": emb_loss,
            "euclidean_loss": eucl, "embeddings": h3}


if __name__ == "__main__":
    key = jax.random.PRNGKey(0)
    kp, k1, k2, k3, k4, k5, k6, k7, k8 = jax.random.split(key, 9)

    params = init_params(kp)

    embeddings = jax.random.normal(k1, (B, N, E), jnp.float32)
    subject_hot = (jax.random.uniform(k2, (B, N, 26)) < 0.2).astype(jnp.float32)
    object_hot = (jax.random.uniform(k3, (B, N, 26)) < 0.2).astype(jnp.float32)
    labels = jax.random.randint(k4, (B,), 0, V, jnp.int32)
    label_embeddings = jax.random.normal(k5, (B, E), jnp.float32)
    object_text = jax.random.normal(k6, (B, N, E), jnp.float32)
    subject_text = jax.random.normal(k7, (B, N, E), jnp.float32)
    iobject = jax.random.normal(k8, (B, N, E), jnp.float32)

    out = eventy_forward(params, embeddings, subject_hot, object_hot, labels,
                         label_embeddings, object_text, subject_text, iobject)
    jax.block_until_ready(out)

    ref = eventy_reference(params, embeddings, subject_hot, object_hot, labels,
                           label_embeddings, object_text, subject_text, iobject)
    for name in ("logits", "cosine_similarities", "classification_loss",
                 "embedding_loss", "euclidean_loss", "embeddings"):
        np.testing.assert_allclose(np.asarray(out[name]), np.asarray(ref[name]),
                                   rtol=5e-2, atol=5e-2)

    assert out["logits"].shape == (B, V)
    assert out["cosine_similarities"].shape == (B, V)
    assert out["euclidean_loss"].shape == (B, E)
    assert out["embeddings"].shape == (B, H2)
    print("KERNEL_OK")
</pallas_src>

<mosaic_0001>
module attributes {stable_mosaic.version = 11 : i64} {
  func.func @_eventy_kernel(%arg0: memref<80x26xf32, #tpu.memory_space<vmem>>, %arg1: memref<8x640xf32, #tpu.memory_space<vmem>>, %arg2: memref<8x32xf32, #tpu.memory_space<vmem>>, %arg3: memref<8x1xi32, #tpu.memory_space<vmem>>, %arg4: memref<26x128xbf16, #tpu.memory_space<vmem>>, %arg5: memref<1x128xf32, #tpu.memory_space<vmem>>, %arg6: memref<128x100xbf16, #tpu.memory_space<vmem>>, %arg7: memref<1x100xf32, #tpu.memory_space<vmem>>, %arg8: memref<80x100xf32, #tpu.memory_space<vmem>>, %arg9: memref<640x1024xbf16, #tpu.memory_space<vmem>>, %arg10: memref<100x1024xbf16, #tpu.memory_space<vmem>>, %arg11: memref<1x1024xf32, #tpu.memory_space<vmem>>, %arg12: memref<1024x1024xbf16, #tpu.memory_space<vmem>>, %arg13: memref<1x1024xf32, #tpu.memory_space<vmem>>, %arg14: memref<1024x256xbf16, #tpu.memory_space<vmem>>, %arg15: memref<1x256xf32, #tpu.memory_space<vmem>>, %arg16: memref<256x4xbf16, #tpu.memory_space<vmem>>, %arg17: memref<1x4xf32, #tpu.memory_space<vmem>>, %arg18: memref<4x32xf32, #tpu.memory_space<vmem>>, %arg19: memref<32x4xf32, #tpu.memory_space<vmem>>, %arg20: memref<8x4xf32, #tpu.memory_space<vmem>>, %arg21: memref<8x4xf32, #tpu.memory_space<vmem>>, %arg22: memref<1x128xf32, #tpu.memory_space<vmem>>, %arg23: memref<8x32xf32, #tpu.memory_space<vmem>>, %arg24: memref<8x256xf32, #tpu.memory_space<vmem>>) attributes {dimension_semantics = [], scalar_prefetch = 0 : i64, scratch_operands = 0 : i64, tpu.core_type = #tpu.core_type<tc>} {
    %c0 = arith.constant 0 : index
    %c0_0 = arith.constant 0 : index
    %0 = vector.load %arg0[%c0, %c0_0] : memref<80x26xf32, #tpu.memory_space<vmem>>, vector<80x26xf32>
    %1 = arith.truncf %0 : vector<80x26xf32> to vector<80x26xbf16>
    %c0_1 = arith.constant 0 : index
    %c0_2 = arith.constant 0 : index
    %2 = vector.load %arg4[%c0_1, %c0_2] : memref<26x128xbf16, #tpu.memory_space<vmem>>, vector<26x128xbf16>
    %cst = arith.constant dense<0.000000e+00> : vector<80x128xf32>
    %3 = tpu.matmul %1, %2, %cst {dimension_numbers = #tpu.dot_dimension_numbers<[1], [0], [0], [1], [0, 0, 1, 1], [], []>} : vector<80x26xbf16>, vector<26x128xbf16>, vector<80x128xf32> -> vector<80x128xf32>
    %c0_3 = arith.constant 0 : index
    %c0_4 = arith.constant 0 : index
    %4 = vector.load %arg5[%c0_3, %c0_4] : memref<1x128xf32, #tpu.memory_space<vmem>>, vector<1x128xf32>
    %5 = vector.broadcast %4 : vector<1x128xf32> to vector<80x128xf32>
    %6 = arith.addf %3, %5 : vector<80x128xf32>
    %7 = arith.negf %6 : vector<80x128xf32>
    %8 = math.exp %7 : vector<80x128xf32>
    %cst_5 = arith.constant 1.000000e+00 : f32
    %9 = vector.broadcast %cst_5 : f32 to vector<80x128xf32>
    %10 = arith.addf %9, %8 : vector<80x128xf32>
    %11 = arith.divf %9, %10 : vector<80x128xf32>
    %12 = arith.truncf %11 : vector<80x128xf32> to vector<80x128xbf16>
    %c0_6 = arith.constant 0 : index
    %c0_7 = arith.constant 0 : index
    %13 = vector.load %arg6[%c0_6, %c0_7] : memref<128x100xbf16, #tpu.memory_space<vmem>>, vector<128x100xbf16>
    %cst_8 = arith.constant dense<0.000000e+00> : vector<80x100xf32>
    %14 = tpu.matmul %12, %13, %cst_8 {dimension_numbers = #tpu.dot_dimension_numbers<[1], [0], [0], [1], [0, 0, 1, 1], [], []>} : vector<80x128xbf16>, vector<128x100xbf16>, vector<80x100xf32> -> vector<80x100xf32>
    %c0_9 = arith.constant 0 : index
    %c0_10 = arith.constant 0 : index
    %15 = vector.load %arg7[%c0_9, %c0_10] : memref<1x100xf32, #tpu.memory_space<vmem>>, vector<1x100xf32>
    %16 = vector.broadcast %15 : vector<1x100xf32> to vector<80x100xf32>
    %17 = arith.addf %14, %16 : vector<80x100xf32>
    %18 = arith.negf %17 : vector<80x100xf32>
    %19 = math.exp %18 : vector<80x100xf32>
    %cst_11 = arith.constant 1.000000e+00 : f32
    %20 = vector.broadcast %cst_11 : f32 to vector<80x100xf32>
    %21 = arith.addf %20, %19 : vector<80x100xf32>
    %22 = arith.divf %20, %21 : vector<80x100xf32>
    %c0_12 = arith.constant 0 : index
    %c0_13 = arith.constant 0 : index
    %23 = vector.load %arg8[%c0_12, %c0_13] : memref<80x100xf32, #tpu.memory_space<vmem>>, vector<80x100xf32>
    %24 = arith.mulf %22, %23 : vector<80x100xf32>
    %25 = vector.extract_strided_slice %24 {offsets = [0, 0], sizes = [8, 100], strides = [1, 1]} : vector<80x100xf32> to vector<8x100xf32>
    %26 = vector.extract_strided_slice %24 {offsets = [8, 0], sizes = [8, 100], strides = [1, 1]} : vector<80x100xf32> to vector<8x100xf32>
    %27 = arith.addf %25, %26 : vector<8x100xf32>
    %28 = vector.extract_strided_slice %24 {offsets = [16, 0], sizes = [8, 100], strides = [1, 1]} : vector<80x100xf32> to vector<8x100xf32>
    %29 = arith.addf %27, %28 : vector<8x100xf32>
    %30 = vector.extract_strided_slice %24 {offsets = [24, 0], sizes = [8, 100], strides = [1, 1]} : vector<80x100xf32> to vector<8x100xf32>
    %31 = arith.addf %29, %30 : vector<8x100xf32>
    %32 = vector.extract_strided_slice %24 {offsets = [32, 0], sizes = [8, 100], strides = [1, 1]} : vector<80x100xf32> to vector<8x100xf32>
    %33 = arith.addf %31, %32 : vector<8x100xf32>
    %34 = vector.extract_strided_slice %24 {offsets = [40, 0], sizes = [8, 100], strides = [1, 1]} : vector<80x100xf32> to vector<8x100xf32>
    %35 = arith.addf %33, %34 : vector<8x100xf32>
    %36 = vector.extract_strided_slice %24 {offsets = [48, 0], sizes = [8, 100], strides = [1, 1]} : vector<80x100xf32> to vector<8x100xf32>
    %37 = arith.addf %35, %36 : vector<8x100xf32>
    %38 = vector.extract_strided_slice %24 {offsets = [56, 0], sizes = [8, 100], strides = [1, 1]} : vector<80x100xf32> to vector<8x100xf32>
    %39 = arith.addf %37, %38 : vector<8x100xf32>
    %40 = vector.extract_strided_slice %24 {offsets = [64, 0], sizes = [8, 100], strides = [1, 1]} : vector<80x100xf32> to vector<8x100xf32>
    %41 = arith.addf %39, %40 : vector<8x100xf32>
    %42 = vector.extract_strided_slice %24 {offsets = [72, 0], sizes = [8, 100], strides = [1, 1]} : vector<80x100xf32> to vector<8x100xf32>
    %43 = arith.addf %41, %42 : vector<8x100xf32>
    %c0_14 = arith.constant 0 : index
    %c0_15 = arith.constant 0 : index
    %44 = vector.load %arg1[%c0_14, %c0_15] : memref<8x640xf32, #tpu.memory_space<vmem>>, vector<8x640xf32>
    %45 = arith.truncf %44 : vector<8x640xf32> to vector<8x640xbf16>
    %c0_16 = arith.constant 0 : index
    %c0_17 = arith.constant 0 : index
    %46 = vector.load %arg9[%c0_16, %c0_17] : memref<640x1024xbf16, #tpu.memory_space<vmem>>, vector<640x1024xbf16>
    %cst_18 = arith.constant dense<0.000000e+00> : vector<8x1024xf32>
    %47 = tpu.matmul %45, %46, %cst_18 {dimension_numbers = #tpu.dot_dimension_numbers<[1], [0], [0], [1], [0, 0, 1, 1], [], []>} : vector<8x640xbf16>, vector<640x1024xbf16>, vector<8x1024xf32> -> vector<8x1024xf32>
    %48 = arith.truncf %43 : vector<8x100xf32> to vector<8x100xbf16>
    %c0_19 = arith.constant 0 : index
    %c0_20 = arith.constant 0 : index
    %49 = vector.load %arg10[%c0_19, %c0_20] : memref<100x1024xbf16, #tpu.memory_space<vmem>>, vector<100x1024xbf16>
    %cst_21 = arith.constant dense<0.000000e+00> : vector<8x1024xf32>
    %50 = tpu.matmul %48, %49, %cst_21 {dimension_numbers = #tpu.dot_dimension_numbers<[1], [0], [0], [1], [0, 0, 1, 1], [], []>} : vector<8x100xbf16>, vector<100x1024xbf16>, vector<8x1024xf32> -> vector<8x1024xf32>
    %51 = arith.addf %47, %50 : vector<8x1024xf32>
    %c0_22 = arith.constant 0 : index
    %c0_23 = arith.constant 0 : index
    %52 = vector.load %arg11[%c0_22, %c0_23] : memref<1x1024xf32, #tpu.memory_space<vmem>>, vector<1x1024xf32>
    %53 = vector.broadcast %52 : vector<1x1024xf32> to vector<8x1024xf32>
    %54 = arith.addf %51, %53 : vector<8x1024xf32>
    %55 = arith.negf %54 : vector<8x1024xf32>
    %56 = math.exp %55 : vector<8x1024xf32>
    %cst_24 = arith.constant 1.000000e+00 : f32
    %57 = vector.broadcast %cst_24 : f32 to vector<8x1024xf32>
    %58 = arith.addf %57, %56 : vector<8x1024xf32>
    %59 = arith.divf %57, %58 : vector<8x1024xf32>
    %60 = arith.truncf %59 : vector<8x1024xf32> to vector<8x1024xbf16>
    %c0_25 = arith.constant 0 : index
    %c0_26 = arith.constant 0 : index
    %61 = vector.load %arg12[%c0_25, %c0_26] : memref<1024x1024xbf16, #tpu.memory_space<vmem>>, vector<1024x1024xbf16>
    %cst_27 = arith.constant dense<0.000000e+00> : vector<8x1024xf32>
    %62 = tpu.matmul %60, %61, %cst_27 {dimension_numbers = #tpu.dot_dimension_numbers<[1], [0], [0], [1], [0, 0, 1, 1], [], []>} : vector<8x1024xbf16>, vector<1024x1024xbf16>, vector<8x1024xf32> -> vector<8x1024xf32>
    %c0_28 = arith.constant 0 : index
    %c0_29 = arith.constant 0 : index
    %63 = vector.load %arg13[%c0_28, %c0_29] : memref<1x1024xf32, #tpu.memory_space<vmem>>, vector<1x1024xf32>
    %64 = vector.broadcast %63 : vector<1x1024xf32> to vector<8x1024xf32>
    %65 = arith.addf %62, %64 : vector<8x1024xf32>
    %66 = arith.negf %65 : vector<8x1024xf32>
    %67 = math.exp %66 : vector<8x1024xf32>
    %cst_30 = arith.constant 1.000000e+00 : f32
    %68 = vector.broadcast %cst_30 : f32 to vector<8x1024xf32>
    %69 = arith.addf %68, %67 : vector<8x1024xf32>
    %70 = arith.divf %68, %69 : vector<8x1024xf32>
    %71 = arith.truncf %70 : vector<8x1024xf32> to vector<8x1024xbf16>
    %c0_31 = arith.constant 0 : index
    %c0_32 = arith.constant 0 : index
    %72 = vector.load %arg14[%c0_31, %c0_32] : memref<1024x256xbf16, #tpu.memory_space<vmem>>, vector<1024x256xbf16>
    %cst_33 = arith.constant dense<0.000000e+00> : vector<8x256xf32>
    %73 = tpu.matmul %71, %72, %cst_33 {dimension_numbers = #tpu.dot_dimension_numbers<[1], [0], [0], [1], [0, 0, 1, 1], [], []>} : vector<8x1024xbf16>, vector<1024x256xbf16>, vector<8x256xf32> -> vector<8x256xf32>
    %c0_34 = arith.constant 0 : index
    %c0_35 = arith.constant 0 : index
    %74 = vector.load %arg15[%c0_34, %c0_35] : memref<1x256xf32, #tpu.memory_space<vmem>>, vector<1x256xf32>
    %75 = vector.broadcast %74 : vector<1x256xf32> to vector<8x256xf32>
    %76 = arith.addf %73, %75 : vector<8x256xf32>
    %77 = arith.negf %76 : vector<8x256xf32>
    %78 = math.exp %77 : vector<8x256xf32>
    %cst_36 = arith.constant 1.000000e+00 : f32
    %79 = vector.broadcast %cst_36 : f32 to vector<8x256xf32>
    %80 = arith.addf %79, %78 : vector<8x256xf32>
    %81 = arith.divf %79, %80 : vector<8x256xf32>
    %c0_37 = arith.constant 0 : index
    %c0_38 = arith.constant 0 : index
    %82 = vector.load %arg24[%c0_37, %c0_38] : memref<8x256xf32, #tpu.memory_space<vmem>>, vector<8x256xf32>
    tpu.vector_store %arg24[%c0_37, %c0_38], %81 {strides = array<i32>} : memref<8x256xf32, #tpu.memory_space<vmem>>, vector<8x256xf32>,
    %83 = arith.truncf %81 : vector<8x256xf32> to vector<8x256xbf16>
    %c0_39 = arith.constant 0 : index
    %c0_40 = arith.constant 0 : index
    %84 = vector.load %arg16[%c0_39, %c0_40] : memref<256x4xbf16, #tpu.memory_space<vmem>>, vector<256x4xbf16>
    %cst_41 = arith.constant dense<0.000000e+00> : vector<8x4xf32>
    %85 = tpu.matmul %83, %84, %cst_41 {dimension_numbers = #tpu.dot_dimension_numbers<[1], [0], [0], [1], [0, 0, 1, 1], [], []>} : vector<8x256xbf16>, vector<256x4xbf16>, vector<8x4xf32> -> vector<8x4xf32>
    %c0_42 = arith.constant 0 : index
    %c0_43 = arith.constant 0 : index
    %86 = vector.load %arg17[%c0_42, %c0_43] : memref<1x4xf32, #tpu.memory_space<vmem>>, vector<1x4xf32>
    %87 = vector.broadcast %86 : vector<1x4xf32> to vector<8x4xf32>
    %88 = arith.addf %85, %87 : vector<8x4xf32>
    %c0_44 = arith.constant 0 : index
    %c0_45 = arith.constant 0 : index
    %89 = vector.load %arg20[%c0_44, %c0_45] : memref<8x4xf32, #tpu.memory_space<vmem>>, vector<8x4xf32>
    tpu.vector_store %arg20[%c0_44, %c0_45], %88 {strides = array<i32>} : memref<8x4xf32, #tpu.memory_space<vmem>>, vector<8x4xf32>,
    %c0_46 = arith.constant 0 : index
    %c0_47 = arith.constant 0 : index
    %90 = vector.load %arg18[%c0_46, %c0_47] : memref<4x32xf32, #tpu.memory_space<vmem>>, vector<4x32xf32>
    %91 = arith.mulf %88, %88 : vector<8x4xf32>
    %cst_48 = arith.constant dense<0xFF800000> : vector<8xf32>
    %92 = vector.multi_reduction <maximumf>, %91, %cst_48 [1] : vector<8x4xf32> to vector<8xf32>
    %cst_49 = arith.constant 0xFF800000 : f32
    %93 = vector.broadcast %cst_49 : f32 to vector<8xf32>
    %94 = arith.maximumf %93, %92 : vector<8xf32>
    %95 = vector.shape_cast %94 : vector<8xf32> to vector<8x1xf32>
    %96 = vector.broadcast %95 : vector<8x1xf32> to vector<8x4xf32>
    %97 = arith.subf %91, %96 : vector<8x4xf32>
    %98 = math.exp %97 : vector<8x4xf32>
    %cst_50 = arith.constant dense<0.000000e+00> : vector<8xf32>
    %99 = vector.multi_reduction <add>, %98, %cst_50 [1] : vector<8x4xf32> to vector<8xf32>
    %100 = vector.shape_cast %99 : vector<8xf32> to vector<8x1xf32>
    %101 = vector.broadcast %100 : vector<8x1xf32> to vector<8x4xf32>
    %102 = arith.divf %98, %101 : vector<8x4xf32>
    %cst_51 = arith.constant dense<0.000000e+00> : vector<8x32xf32>
    %103 = tpu.matmul %102, %90, %cst_51 {dimension_numbers = #tpu.dot_dimension_numbers<[1], [0], [0], [1], [0, 0, 1, 1], [], []>} : vector<8x4xf32>, vector<4x32xf32>, vector<8x32xf32> -> vector<8x32xf32>
    %104 = arith.mulf %103, %103 : vector<8x32xf32>
    %cst_52 = arith.constant dense<0.000000e+00> : vector<8xf32>
    %105 = vector.multi_reduction <add>, %104, %cst_52 [1] : vector<8x32xf32> to vector<8xf32>
    %106 = vector.shape_cast %105 : vector<8xf32> to vector<8x1xf32>
    %cst_53 = arith.constant 1.000000e-24 : f32
    %107 = vector.broadcast %cst_53 : f32 to vector<8x1xf32>
    %108 = arith.maximumf %106, %107 : vector<8x1xf32>
    %109 = math.rsqrt %108 : vector<8x1xf32>
    %110 = vector.broadcast %109 : vector<8x1xf32> to vector<8x32xf32>
    %111 = arith.mulf %103, %110 : vector<8x32xf32>
    %c0_54 = arith.constant 0 : index
    %c0_55 = arith.constant 0 : index
    %112 = vector.load %arg2[%c0_54, %c0_55] : memref<8x32xf32, #tpu.memory_space<vmem>>, vector<8x32xf32>
    %113 = arith.mulf %112, %112 : vector<8x32xf32>
    %cst_56 = arith.constant dense<0.000000e+00> : vector<8xf32>
    %114 = vector.multi_reduction <add>, %113, %cst_56 [1] : vector<8x32xf32> to vector<8xf32>
    %115 = vector.shape_cast %114 : vector<8xf32> to vector<8x1xf32>
    %cst_57 = arith.constant 1.000000e-16 : f32
    %116 = vector.broadcast %cst_57 : f32 to vector<8x1xf32>
    %117 = arith.maximumf %115, %116 : vector<8x1xf32>
    %118 = math.rsqrt %117 : vector<8x1xf32>
    %119 = arith.mulf %111, %112 : vector<8x32xf32>
    %cst_58 = arith.constant dense<0.000000e+00> : vector<8xf32>
    %120 = vector.multi_reduction <add>, %119, %cst_58 [1] : vector<8x32xf32> to vector<8xf32>
    %121 = vector.shape_cast %120 : vector<8xf32> to vector<8x1xf32>
    %122 = arith.mulf %121, %118 : vector<8x1xf32>
    %cst_59 = arith.constant 1.000000e+00 : f32
    %123 = vector.broadcast %cst_59 : f32 to vector<8x1xf32>
    %124 = arith.subf %123, %122 : vector<8x1xf32>
    %125 = vector.shape_cast %124 : vector<8x1xf32> to vector<1x8x1xf32>
    %cst_60 = arith.constant dense<0.000000e+00> : vector<1xf32>
    %126 = vector.multi_reduction <add>, %125, %cst_60 [1, 2] : vector<1x8x1xf32> to vector<1xf32>
    %127 = vector.shape_cast %126 : vector<1xf32> to vector<1x1x1xf32>
    %128 = vector.extract %127[0, 0, 0] : f32 from vector<1x1x1xf32>
    %cst_61 = arith.constant 8.000000e+00 : f32
    %129 = arith.divf %128, %cst_61 : f32
    %130 = arith.subf %111, %112 : vector<8x32xf32>
    %131 = arith.mulf %130, %130 : vector<8x32xf32>
    %c0_62 = arith.constant 0 : index
    %c0_63 = arith.constant 0 : index
    %132 = vector.load %arg23[%c0_62, %c0_63] : memref<8x32xf32, #tpu.memory_space<vmem>>, vector<8x32xf32>
    tpu.vector_store %arg23[%c0_62, %c0_63], %131 {strides = array<i32>} : memref<8x32xf32, #tpu.memory_space<vmem>>, vector<8x32xf32>,
    %cst_64 = arith.constant dense<0xFF800000> : vector<8xf32>
    %133 = vector.multi_reduction <maximumf>, %88, %cst_64 [1] : vector<8x4xf32> to vector<8xf32>
    %134 = vector.shape_cast %133 : vector<8xf32> to vector<8x1xf32>
    %135 = vector.broadcast %134 : vector<8x1xf32> to vector<8x4xf32>
    %136 = arith.subf %88, %135 : vector<8x4xf32>
    %137 = math.exp %136 : vector<8x4xf32>
    %cst_65 = arith.constant dense<0.000000e+00> : vector<8xf32>
    %138 = vector.multi_reduction <add>, %137, %cst_65 [1] : vector<8x4xf32> to vector<8xf32>
    %139 = vector.shape_cast %138 : vector<8xf32> to vector<8x1xf32>
    %140 = math.log %139 : vector<8x1xf32>
    %141 = arith.addf %134, %140 : vector<8x1xf32>
    %142 = vector.broadcast %141 : vector<8x1xf32> to vector<8x4xf32>
    %143 = arith.subf %88, %142 : vector<8x4xf32>
    %144 = tpu.iota {dimensions = array<i32: 1>} : vector<8x4xi32>
    %c0_66 = arith.constant 0 : index
    %c0_67 = arith.constant 0 : index
    %145 = vector.load %arg3[%c0_66, %c0_67] : memref<8x1xi32, #tpu.memory_space<vmem>>, vector<8x1xi32>
    %146 = vector.broadcast %145 : vector<8x1xi32> to vector<8x4xi32>
    %147 = arith.cmpi eq, %144, %146 : vector<8x4xi32>
    %148 = arith.extui %147 : vector<8x4xi1> to vector<8x4xi32>
    %149 = arith.sitofp %148 : vector<8x4xi32> to vector<8x4xf32>
    %150 = arith.mulf %149, %143 : vector<8x4xf32>
    %151 = vector.shape_cast %150 : vector<8x4xf32> to vector<1x8x4xf32>
    %cst_68 = arith.constant dense<0.000000e+00> : vector<1xf32>
    %152 = vector.multi_reduction <add>, %151, %cst_68 [1, 2] : vector<1x8x4xf32> to vector<1xf32>
    %153 = vector.shape_cast %152 : vector<1xf32> to vector<1x1x1xf32>
    %154 = vector.extract %153[0, 0, 0] : f32 from vector<1x1x1xf32>
    %cst_69 = arith.constant 0.000000e+00 : f32
    %155 = arith.subf %cst_69, %154 : f32
    %cst_70 = arith.constant 8.000000e+00 : f32
    %156 = arith.divf %155, %cst_70 : f32
    %c0_71 = arith.constant 0 : index
    %c0_72 = arith.constant 0 : index
    %157 = vector.load %arg19[%c0_71, %c0_72] : memref<32x4xf32, #tpu.memory_space<vmem>>, vector<32x4xf32>
    %cst_73 = arith.constant dense<0.000000e+00> : vector<8x4xf32>
    %158 = tpu.matmul %111, %157, %cst_73 {dimension_numbers = #tpu.dot_dimension_numbers<[1], [0], [0], [1], [0, 0, 1, 1], [], []>} : vector<8x32xf32>, vector<32x4xf32>, vector<8x4xf32> -> vector<8x4xf32>
    %cst_74 = arith.constant 1.000000e+00 : f32
    %159 = vector.broadcast %cst_74 : f32 to vector<8x4xf32>
    %160 = arith.subf %159, %158 : vector<8x4xf32>
    %c0_75 = arith.constant 0 : index
    %c0_76 = arith.constant 0 : index
    %161 = vector.load %arg21[%c0_75, %c0_76] : memref<8x4xf32, #tpu.memory_space<vmem>>, vector<8x4xf32>
    tpu.vector_store %arg21[%c0_75, %c0_76], %160 {strides = array<i32>} : memref<8x4xf32, #tpu.memory_space<vmem>>, vector<8x4xf32>,
    %162 = tpu.iota {dimensions = array<i32: 1>} : vector<1x128xi32>
    %c0_i32 = arith.constant 0 : i32
    %163 = vector.broadcast %c0_i32 : i32 to vector<1x128xi32>
    %164 = arith.cmpi eq, %162, %163 : vector<1x128xi32>
    %cst_77 = arith.constant 0.000000e+00 : f32
    %165 = vector.broadcast %156 : f32 to vector<1x128xf32>
    %166 = vector.broadcast %cst_77 : f32 to vector<1x128xf32>
    %167 = arith.select %164, %165, %166 : vector<1x128xi1>, vector<1x128xf32>
    %c1_i32 = arith.constant 1 : i32
    %168 = vector.broadcast %c1_i32 : i32 to vector<1x128xi32>
    %169 = arith.cmpi eq, %162, %168 : vector<1x128xi32>
    %cst_78 = arith.constant 0.000000e+00 : f32
    %170 = vector.broadcast %129 : f32 to vector<1x128xf32>
    %171 = vector.broadcast %cst_78 : f32 to vector<1x128xf32>
    %172 = arith.select %169, %170, %171 : vector<1x128xi1>, vector<1x128xf32>
    %173 = arith.addf %167, %172 : vector<1x128xf32>
    %c0_79 = arith.constant 0 : index
    %c0_80 = arith.constant 0 : index
    %174 = vector.load %arg22[%c0_79, %c0_80] : memref<1x128xf32, #tpu.memory_space<vmem>>, vector<1x128xf32>
    tpu.vector_store %arg22[%c0_79, %c0_80], %173 {strides = array<i32>} : memref<1x128xf32, #tpu.memory_space<vmem>>, vector<1x128xf32>,
    return
  }
}

</mosaic_0001>

<bundles_post_ra>
// kernel: eventy_forward.1
= control target key start
LH: loop header
LB: loop body
LE: loop exit
PB: predicated region body
PF: predicated region fallthrough
CT: control target
= control target key end

     0   :  { %s16751_s0 = inlined_call_operand.vmem [shape: f32[80,26], index: 0, kind: input, shape index: {}]   ;;  %s16752_s1 = inlined_call_operand.vmem [shape: f32[8,640], index: 1, kind: input, shape index: {}]   ;;  %s16753_s2 = inlined_call_operand.hbm [shape: f32[8,32], index: 2, kind: input, shape index: {}]   ;;  %s16754_s3 = inlined_call_operand.vmem [shape: s32[8,1], index: 3, kind: input, shape index: {}]   ;;  %s16755_s4 = inlined_call_operand.hbm [shape: bf16[26,128], index: 4, kind: input, shape index: {}]   ;;  %s16756_s5 = inlined_call_operand.hbm [shape: f32[1,128], index: 5, kind: input, shape index: {}]   ;;  %s16757_s6 = inlined_call_operand.vmem [shape: bf16[128,100], index: 6, kind: input, shape index: {}]   ;;  %s16758_s7 = inlined_call_operand.hbm [shape: f32[1,100], index: 7, kind: input, shape index: {}]   ;;  %s16759_s8 = inlined_call_operand.hbm [shape: f32[80,100], index: 8, kind: input, shape index: {}]   ;;  %s16760_s9 = inlined_call_operand.hbm [shape: bf16[640,1024], index: 9, kind: input, shape index: {}]   ;;  %s16761_s10 = inlined_call_operand.hbm [shape: bf16[100,1024], index: 10, kind: input, shape index: {}]   ;;  %s16762_s11 = inlined_call_operand.hbm [shape: f32[1,1024], index: 11, kind: input, shape index: {}]   ;;  %s16763_s12 = inlined_call_operand.hbm [shape: bf16[1024,1024], index: 12, kind: input, shape index: {}]   ;;  %s16764_s13 = inlined_call_operand.hbm [shape: f32[1,1024], index: 13, kind: input, shape index: {}]   ;;  %s16765_s14 = inlined_call_operand.hbm [shape: bf16[1024,256], index: 14, kind: input, shape index: {}]   ;;  %s16766_s15 = inlined_call_operand.hbm [shape: f32[1,256], index: 15, kind: input, shape index: {}]   ;;  %s16767_s16 = inlined_call_operand.vmem [shape: bf16[256,4], index: 16, kind: input, shape index: {}]   ;;  %s16768_s17 = inlined_call_operand.hbm [shape: f32[1,4], index: 17, kind: input, shape index: {}]   ;;  %s16769_s18 = inlined_call_operand.hbm [shape: f32[4,32], index: 18, kind: input, shape index: {}]   ;;  %s16770_s19 = inlined_call_operand.vmem [shape: f32[32,4], index: 19, kind: input, shape index: {}]   ;;  %s16771_s20 = inlined_call_operand.vmem [shape: f32[8,4], index: 20, kind: output, shape index: {0}]   ;;  %s16772_s21 = inlined_call_operand.vmem [shape: f32[8,4], index: 21, kind: output, shape index: {1}]   ;;  %s16773_s22 = inlined_call_operand.vmem [shape: f32[1,128], index: 22, kind: output, shape index: {2}]   ;;  %s16774_s23 = inlined_call_operand.hbm [shape: f32[8,32], index: 23, kind: output, shape index: {3}]   ;;  %s16775_s24 = inlined_call_operand.hbm [shape: f32[8,256], index: 24, kind: output, shape index: {4}]  }
   0x1   :  { %16779 = sst [smem:[#allocation38_spill]] %s16751_s0 }
   0x2   :  { %16780 = sst [smem:[#allocation39_spill]] %s16752_s1 }
   0x3   :  { %16781 = sst [smem:[#allocation40_spill]] %s16753_s2 }
   0x4   :  { %16782 = sst [smem:[#allocation41_spill]] %s16754_s3 }
   0x5   :  { %16783 = sst [smem:[#allocation42_spill]] %s16755_s4 }
   0x6   :  { %16784 = sst [smem:[#allocation43_spill]] %s16756_s5 }
   0x7   :  { %16785 = sst [smem:[#allocation44_spill]] %s16757_s6 }
   0x8   :  { %16786 = sst [smem:[#allocation45_spill]] %s16758_s7 }
   0x9   :  { %16787 = sst [smem:[#allocation46_spill]] %s16759_s8 }
   0xa   :  { %16788 = sst [smem:[#allocation47_spill]] %s16773_s22 }
   0xb   :  { %16789 = sst [smem:[#allocation48_spill]] %s16775_s24 }
   0xc   :  { %30 = vsyncpa [#allocation3], 0 }
   0xd   :  { %31 = vsyncpa [#allocation6], 0 }
   0xe   :  { %32 = vsyncpa [#allocation9], 0 }
   0xf   :  { %33 = vsyncpa [#allocation12], 0 }
  0x10   :  { %34 = vsyncpa [#allocation15], 0 }
  0x11   :  { %35 = vsyncpa [#allocation18], 0 }
  0x12   :  { %36 = vsyncpa [#allocation21], 0 }
  0x13   :  { %37 = vsyncpa [#allocation24], 0 }
  0x14   :  { %38 = vsyncpa [#allocation4], 0  ;;  %s16790_s27 = sld [smem:[#allocation42_spill]] }
  0x1a   :  { %s61_s28 = sshll.u32 %s16790_s27, 4  ;;  %s62_s28 = int_to_ptr.hbm [resolvable:$true] %s61_s28 }
  0x1b   :  { %39 = vsyncpa [#allocation27], 0  ;;  %s15309_s6 = smov [#allocation5]   ;;  %s16791_s7 = sld [smem:[#allocation45_spill]] }
  0x1c   :  { %s63_s2 = sshll.u32 %s15309_s6, 4  ;;  %s15310_s3 = smov 64   ;;  %s64_s2 = int_to_ptr.vmem [resolvable:$true] %s63_s2 }
  0x1d   :  { %s15311_s25 = smov 4   ;;  %s15312_s8 = smov [#allocation8]  }
  0x1e   :  { %69 = dma.hbm_to_vmem [thread:$0]  %s62_s28, 256, %s64_s2, [#allocation6], %s15310_s3, %s15310_s3, %s15311_s25  }
  0x1f   :  { %s90_s4 = sshll.u32 %s15312_s8, 4  ;;  %s111_s5 = sshll.u32 %s16760_s9, 4  ;;  %s91_s4 = int_to_ptr.vmem [resolvable:$true] %s90_s4  ;;  %s112_s5 = int_to_ptr.hbm [resolvable:$true] %s111_s5 }
  0x20   :  { %s15313_s26 = smov [#allocation11]   ;;  %s138_s29 = sshll.u32 %s16762_s11, 4  ;;  %s139_s29 = int_to_ptr.hbm [resolvable:$true] %s138_s29 }
  0x21   :  { %s88_s30 = sshll.u32 %s16791_s7, 4  ;;  %s113_s27 = sshll.u32 %s15313_s26, 4  ;;  %s89_s30 = int_to_ptr.hbm [resolvable:$true] %s88_s30  ;;  %s114_s27 = int_to_ptr.vmem [resolvable:$true] %s113_s27 }
  0x22   :  { %93 = dma.hbm_to_vmem [thread:$0]  %s89_s30, 16, %s91_s4, [#allocation9]  }
  0x23   :  { %s15314_s0 = smov 512   ;;  %s15315_s7 = smov 32  }
  0x24   :  { %119 = dma.hbm_to_vmem [thread:$0]  %s112_s5, 40960, %s114_s27, [#allocation12], %s15314_s0, %s15314_s0, %s15315_s7  }
  0x25   :  { %s15316_s28 = smov [#allocation14]   ;;  %s162_s30 = sshll.u32 %s16764_s13, 4  ;;  %s163_s30 = int_to_ptr.hbm [resolvable:$true] %s162_s30 }
  0x26   :  { %s140_s22 = sshll.u32 %s15316_s28, 4  ;;  %s186_s11 = sshll.u32 %s16766_s15, 4  ;;  %s141_s22 = int_to_ptr.vmem [resolvable:$true] %s140_s22  ;;  %s187_s11 = int_to_ptr.hbm [resolvable:$true] %s186_s11 }
  0x27   :  { %143 = dma.hbm_to_vmem [thread:$0]  %s139_s29, 128, %s141_s22, [#allocation15]  }
  0x28   :  { %s15317_s24 = smov [#allocation17]   ;;  %s15318_s4 = smov [#allocation20]  }
  0x29   :  { %s164_s8 = sshll.u32 %s15317_s24, 4  ;;  %s188_s1 = sshll.u32 %s15318_s4, 4  ;;  %s165_s8 = int_to_ptr.vmem [resolvable:$true] %s164_s8  ;;  %s189_s1 = int_to_ptr.vmem [resolvable:$true] %s188_s1 }
  0x2a   :  { %167 = dma.hbm_to_vmem [thread:$0]  %s163_s30, 128, %s165_s8, [#allocation18]  }
  0x2b   :  { %s16792_s27 = sld [smem:[#allocation40_spill]]  ;;  %s15319_s9 = smov [#allocation2]  }
  0x2c   :  { %191 = dma.hbm_to_vmem [thread:$0]  %s187_s11, 32, %s189_s1, [#allocation21]  }
  0x2d   :  { %s16793_s28 = sld [smem:[#allocation43_spill]]  ;;  %s51_s15 = sshll.u32 %s15319_s9, 4  ;;  %s52_s15 = int_to_ptr.vmem [resolvable:$true] %s51_s15 }
  0x2e   :  { %s15320_s2 = smov [#allocation7]   ;;  %s16794_s24 = sld [smem:[#allocation46_spill]] }
  0x2f   :  { %s77_s30 = sshll.u32 %s15320_s2, 4  ;;  %s15321_s4 = smov [#allocation10]   ;;  %s78_s30 = int_to_ptr.vmem [resolvable:$true] %s77_s30 }
  0x30   :  { %s100_s11 = sshll.u32 %s15321_s4, 4  ;;  %s124_s26 = sshll.u32 %s16761_s10, 4  ;;  %s101_s11 = int_to_ptr.vmem [resolvable:$true] %s100_s11  ;;  %s125_s26 = int_to_ptr.hbm [resolvable:$true] %s124_s26 }
  0x31   :  { %s49_s6 = sshll.u32 %s16792_s27, 4  ;;  %s15322_s27 = smov 128   ;;  %s50_s6 = int_to_ptr.hbm [resolvable:$true] %s49_s6 }
  0x32   :  { %54 = dma.hbm_to_vmem [thread:$0]  %s50_s6, 128, %s52_s15, [#allocation3]  }
  0x33   :  { %s75_s22 = sshll.u32 %s16793_s28, 4  ;;  %s15323_s13 = smov 8   ;;  %s76_s22 = int_to_ptr.hbm [resolvable:$true] %s75_s22 }
  0x34   :  { %s98_s8 = sshll.u32 %s16794_s24, 4  ;;  %s15324_s6 = smov [#allocation13]   ;;  %s99_s8 = int_to_ptr.hbm [resolvable:$true] %s98_s8 }
  0x35   :  { %80 = dma.hbm_to_vmem [thread:$0]  %s76_s22, 16, %s78_s30, [#allocation6]  }
  0x36   :  { %106 = dma.hbm_to_vmem [thread:$0]  %s99_s8, 1280, %s101_s11, [#allocation9], %s15322_s27, %s15322_s27, %s15323_s13  }
  0x37   :  { %s126_s29 = sshll.u32 %s15324_s6, 4  ;;  %s148_s15 = sshll.u32 %s16763_s12, 4  ;;  %s127_s29 = int_to_ptr.vmem [resolvable:$true] %s126_s29  ;;  %s149_s15 = int_to_ptr.hbm [resolvable:$true] %s148_s15 }
  0x38   :  { %132 = dma.hbm_to_vmem [thread:$0]  %s125_s26, 6656, %s127_s29, [#allocation12], %s15314_s0, %s15314_s0, %s15315_s7  }
  0x39   :  { %s172_s10 = sshll.u32 %s16765_s14, 4  ;;  %s15325_s30 = smov [#allocation16]   ;;  %s173_s10 = int_to_ptr.hbm [resolvable:$true] %s172_s10 }
  0x3a   :  { %s150_s3 = sshll.u32 %s15325_s30, 4  ;;  %s15326_s25 = smov [#allocation19]   ;;  %s151_s3 = int_to_ptr.vmem [resolvable:$true] %s150_s3 }
  0x3b   :  { %156 = dma.hbm_to_vmem [thread:$0]  %s149_s15, 65536, %s151_s3, [#allocation15], %s15314_s0, %s15314_s0, %s15315_s7  }
  0x3c   :  { %s174_s12 = sshll.u32 %s15326_s25, 4  ;;  %s199_s4 = sshll.u32 %s16768_s17, 4  ;;  %s175_s12 = int_to_ptr.vmem [resolvable:$true] %s174_s12  ;;  %s200_s4 = int_to_ptr.hbm [resolvable:$true] %s199_s4 }
  0x3d   :  { %180 = dma.hbm_to_vmem [thread:$0]  %s173_s10, 16384, %s175_s12, [#allocation18], %s15322_s27, %s15322_s27, %s15323_s13  }
  0x3e   :  { %s210_s14 = sshll.u32 %s16769_s18, 4  ;;  %s15327_s5 = smov [#allocation22]   ;;  %s211_s14 = int_to_ptr.hbm [resolvable:$true] %s210_s14 }
  0x3f   :  { %s201_s26 = sshll.u32 %s15327_s5, 4  ;;  %s15328_s6 = smov [#allocation23]   ;;  %s202_s26 = int_to_ptr.vmem [resolvable:$true] %s201_s26 }
  0x40   :  { %204 = dma.hbm_to_vmem [thread:$0]  %s200_s4, 16, %s202_s26, [#allocation21]  }
  0x41   :  { %s212_s0 = sshll.u32 %s15328_s6, 4  ;;  %s213_s0 = int_to_ptr.vmem [resolvable:$true] %s212_s0 }
  0x42   :  { %215 = dma.hbm_to_vmem [thread:$0]  %s211_s14, 64, %s213_s0, [#allocation24]  }
  0x43   :  { %15289 = dma.done.wait [#allocation3], 128  }
  0x44   :  { %15290 = vsyncadd [#allocation3], 4294967168 }
  0x45   :  { %15291 = dma.done.wait [#allocation6], 272  }
  0x46   :  { %15292 = vsyncadd [#allocation6], 4294967024 }
  0x47   :  { %15293 = dma.done.wait [#allocation9], 1296  }
  0x48   :  { %15294 = vsyncadd [#allocation9], 4294966000 }
  0x49   :  { %15295 = dma.done.wait [#allocation12], 47616  }
  0x4a   :  { %15296 = vsyncadd [#allocation12], 4294919680 }
  0x4b   :  { %15297 = dma.done.wait [#allocation15], 65664  }
  0x4c   :  { %15298 = vsyncadd [#allocation15], 4294901632 }
  0x4d   :  { %15299 = dma.done.wait [#allocation18], 16512  }
  0x4e   :  { %15300 = vsyncadd [#allocation18], 4294950784 }
  0x4f   :  { %15301 = dma.done.wait [#allocation21], 48  }
  0x50   :  { %15302 = vsyncadd [#allocation21], 4294967248 }
  0x51   :  { %15303 = dma.done.wait [#allocation24], 64  }
  0x52   :  { %15304 = vsyncadd [#allocation24], 4294967232  ;;  %v9480_v0 = vld [vmem:[#allocation5 + $0x8] sm:$0xf]  ;;  %v13666_v1 = vld [vmem:[#allocation5 + $0x8] sm:$0x10] }
  0x53   :  { %vm325_vm0 = vcmask 1044480   ;;  %v9481_v2 = vor.u32 %v13666_v1, %v9480_v0  ;;  %v13665_v4 = vld [vmem:[#allocation5] sm:$0xff]  ;;  %s16795_s7 = sld [smem:[#allocation38_spill]]  ;;  %vm309_vm1 = vcmask 211968   ;;  %v15563_v26 = vld [vmem:[#allocation7] ss:$0 sm:$0xff] }
  0x54   :  { %s16796_s26 = sld [smem:[#allocation44_spill]]  ;;  %s15331_s12 = smov [#allocation25]  }
  0x55   :  { %v327_v3 = vsel %vm325_vm0, %v9481_v2, 0  ;;  %s16831_s25 = sld [smem:[#allocation39_spill]]  ;;  %s9433_s24 = sshll.u32 %s15331_s12, 4  ;;  %s9434_s24 = int_to_ptr.vmem [resolvable:$true] %s9433_s24 }
  0x56   :  { %335 = vmatpush.bf16.msra.mxu0 %v327_v3  ;;  %s16848_s3 = sld [smem:[#allocation41_spill]]  ;;  %s9435_s11 = sshll.u32 %s16774_s23, 4  ;;  %s9436_s11 = int_to_ptr.hbm [resolvable:$true] %s9435_s11 }
  0x57   :  { %s15332_s1 = smov [#allocation26]   ;;  %s16849_s6 = sld [smem:[#allocation48_spill]] }
  0x58   :  { %s9444_s14 = sshll.u32 %s15332_s1, 4  ;;  %s16850_s13 = sld [smem:[#allocation47_spill]]  ;;  %s9445_s14 = int_to_ptr.vmem [resolvable:$true] %s9444_s14 }
  0x59   :  { %v275_v5 = vld [vmem:[%s16795_s7] sm:$0xff]  ;;  %v276_v6 = vld [vmem:[%s16795_s7 + $0x8] sm:$0xff]  ;;  %v277_v8 = vld [vmem:[%s16795_s7 + $0x10] sm:$0xff] }
  0x5a   :  { %v285_v7 = vpack.c.bf16 %v276_v6, %v275_v5  ;;  %336 = vmatpush.bf16.msra.mxu0 %v13665_v4  ;;  %v278_v9 = vld [vmem:[%s16795_s7 + $0x18] sm:$0xff]  ;;  %v279_v11 = vld [vmem:[%s16795_s7 + $0x20] sm:$0xff]  ;;  %v280_v12 = vld [vmem:[%s16795_s7 + $0x28] sm:$0xff] }
  0x5b   :  { %v286_v10 = vpack.c.bf16 %v278_v9, %v277_v8  ;;  %v287_v13 = vpack.c.bf16 %v280_v12, %v279_v11  ;;  %v281_v14 = vld [vmem:[%s16795_s7 + $0x30] sm:$0xff]  ;;  %v282_v15 = vld [vmem:[%s16795_s7 + $0x38] sm:$0xff]  ;;  %v283_v17 = vld [vmem:[%s16795_s7 + $0x40] sm:$0xff] }
  0x5c   :  { %v288_v16 = vpack.c.bf16 %v282_v15, %v281_v14  ;;  %v284_v18 = vld [vmem:[%s16795_s7 + $0x48] sm:$0xff]  ;;  %v13674_v20 = vld [vmem:[%s16796_s26 + $0x38] sm:$0xff]  ;;  %v13673_v21 = vld [vmem:[%s16796_s26 + $0x30] sm:$0xff] }
  0x5d   :  { %9482 = vmatmul.msk.bf16.vlgmr.msra.gmra.mxu0 %vm309_vm1, %v285_v7  ;;  %v289_v19 = vpack.c.bf16 %v284_v18, %v283_v17  ;;  %626 = vmatpush.bf16.msra.mxu1 %v13674_v20  ;;  %v13672_v22 = vld [vmem:[%s16796_s26 + $0x28] sm:$0xff]  ;;  %v13671_v23 = vld [vmem:[%s16796_s26 + $0x20] sm:$0xff]  ;;  %v13670_v24 = vld [vmem:[%s16796_s26 + $0x18] sm:$0xff]  ;;  %s9446_s0 = sshll.u32 %s16849_s6, 4  ;;  %s9447_s0 = int_to_ptr.hbm [resolvable:$true] %s9446_s0 }
  0x5e   :  { %v13669_v25 = vld [vmem:[%s16796_s26 + $0x10] sm:$0xff]  ;;  %v13668_v28 = vld [vmem:[%s16796_s26 + $0x8] sm:$0xff]  ;;  %v13667_v31 = vld [vmem:[%s16796_s26] sm:$0xff] }
  0x61   :  { %627 = vmatpush.bf16.msra.mxu1 %v13673_v21 }
  0x65   :  { %628 = vmatpush.bf16.msra.mxu1 %v13672_v22 }
  0x69   :  { %629 = vmatpush.bf16.msra.mxu1 %v13671_v23 }
  0x6d   :  { %9483 = vmatmul.msk.bf16.gmra.mxu0 %vm309_vm1, %v286_v10  ;;  %630 = vmatpush.bf16.msra.mxu1 %v13670_v24 }
  0x71   :  { %631 = vmatpush.bf16.msra.mxu1 %v13669_v25 }
  0x75   :  { %632 = vmatpush.bf16.msra.mxu1 %v13668_v28 }
  0x79   :  { %633 = vmatpush.bf16.msra.mxu1 %v13667_v31 }
  0x7d   :  { %9484 = vmatmul.msk.bf16.gmra.mxu0 %vm309_vm1, %v287_v13 }
  0x8d   :  { %9485 = vmatmul.msk.bf16.gmra.mxu0 %vm309_vm1, %v288_v16 }
  0x9d   :  { %9486 = vmatmul.msk.bf16.gmra.mxu0 %vm309_vm1, %v289_v19 }
  0xda   :  { %v338_v27 = vpop.f32.mrf.mxu0 }
  0xdb   :  { %v339_v29 = vadd.f32 %v15563_v26, %v338_v27 }
  0xdd   :  { %v9487_v30 = vmul.f32 -1.442695, %v339_v29 }
  0xdf   :  { %14735 = vpow2.f32 %v9487_v30 }
  0xe2   :  { %v340_v32 = vpop.f32.mrf.mxu0 }
  0xe3   :  { %v341_v33 = vadd.f32 %v15563_v26, %v340_v32 }
  0xe5   :  { %v14736_v34 = vpop.eup %14735  ;;  %v9488_v35 = vmul.f32 -1.442695, %v341_v33 }
  0xe6   :  { %v393_v36 = vadd.f32 1.0, %v14736_v34 }
  0xe7   :  { %14737 = vpow2.f32 %v9488_v35 }
  0xe8   :  { %14739 = vrcp.f32 %v393_v36  ;;  %vm408_vm3 = vweird.f32 %v393_v36  ;;  %v412_v56 = vand.u32 2147483647, %v393_v36  ;;  %v414_v57 = vand.u32 2147483648, %v393_v36 }
  0xea   :  { %v343_v37 = vpop.f32.mrf.mxu0  ;;  %vm413_vm7 = vcmp.eq.f32.partialorder %v412_v56, 8.507059e+37  ;;  %v415_v5 = vor.u32 1.1754944e-38, %v414_v57 }
  0xeb   :  { %v344_v38 = vadd.f32 %v15563_v26, %v343_v37 }
  0xed   :  { %v14738_v39 = vpop.eup %14737  ;;  %v9489_v40 = vmul.f32 -1.442695, %v344_v38 }
  0xee   :  { %v14740_v41 = vpop.eup %14739  ;;  %v394_v42 = vadd.f32 1.0, %v14738_v39 }
  0xef   :  { %14741 = vpow2.f32 %v9489_v40  ;;  %v404_v43 = vmul.f32 %v14740_v41, %v393_v36  ;;  %vm409_vm2 = vweird.f32 %v14740_v41 }
  0xf0   :  { %14743 = vrcp.f32 %v394_v42  ;;  %v429_v58 = vand.u32 2147483648, %v394_v42  ;;  %v427_v61 = vand.u32 2147483647, %v394_v42  ;;  %vm15579_vm5 = vmor %vm408_vm3, %vm409_vm2  ;;  %vm423_vm6 = vweird.f32 %v394_v42 }
  0xf1   :  { %v405_v44 = vsub.f32 1.0, %v404_v43 }
  0xf2   :  { %v345_v45 = vpop.f32.mrf.mxu0  ;;  %v430_v6 = vor.u32 1.1754944e-38, %v429_v58  ;;  %vm428_vm9 = vcmp.eq.f32.partialorder %v427_v61, 8.507059e+37 }
  0xf3   :  { %v346_v46 = vadd.f32 %v15563_v26, %v345_v45  ;;  %v406_v49 = vmul.f32 %v14740_v41, %v405_v44 }
  0xf5   :  { %v14742_v47 = vpop.eup %14741  ;;  %v9490_v48 = vmul.f32 -1.442695, %v346_v46  ;;  %v407_v53 = vadd.f32 %v14740_v41, %v406_v49 }
  0xf6   :  { %v14744_v50 = vpop.eup %14743  ;;  %v15575_v51 = vadd.f32 1.0, %v14742_v47 }
  0xf7   :  { %14745 = vpow2.f32 %v9490_v48  ;;  %v419_v52 = vmul.f32 %v14744_v50, %v394_v42  ;;  %vm424_vm4 = vweird.f32 %v14744_v50  ;;  %v411_v1 = vsel %vm15579_vm5, %v14740_v41, %v407_v53 }
  0xf8   :  { %14747 = vrcp.f32 %v15575_v51  ;;  %vm425_vm8 = vmor %vm423_vm6, %vm424_vm4  ;;  %v416_v9 = vsel %vm413_vm7, %v415_v5, %v411_v1  ;;  %vm438_vm11 = vweird.f32 %v15575_v51  ;;  %v442_v24 = vand.u32 2147483647, %v15575_v51 }
  0xf9   :  { %v420_v54 = vsub.f32 1.0, %v419_v52  ;;  %v444_v25 = vand.u32 2147483648, %v15575_v51 }
  0xfa   :  { %v348_v55 = vpop.f32.mrf.mxu0  ;;  %vm443_vm15 = vcmp.eq.f32.partialorder %v442_v24, 8.507059e+37 }
  0xfb   :  { %v349_v59 = vadd.f32 %v15563_v26, %v348_v55  ;;  %v421_v60 = vmul.f32 %v14744_v50, %v420_v54  ;;  %v445_v38 = vor.u32 1.1754944e-38, %v444_v25 }
  0xfd   :  { %v14746_v63 = vpop.eup %14745  ;;  %v9491_v0 = vmul.f32 -1.442695, %v349_v59  ;;  %v422_v2 = vadd.f32 %v14744_v50, %v421_v60 }
  0xfe   :  { %v14748_v3 = vpop.eup %14747  ;;  %v396_v4 = vadd.f32 1.0, %v14746_v63  ;;  %v15626_v63 = vld [vmem:[#allocation8] ss:$0 sm:$0xff] }
  0xff   :  { %14749 = vpow2.f32 %v9491_v0  ;;  %v426_v7 = vsel %vm425_vm8, %v14744_v50, %v422_v2  ;;  %v434_v8 = vmul.f32 %v14748_v3, %v15575_v51  ;;  %vm439_vm10 = vweird.f32 %v14748_v3 }
 0x100   :  { %14751 = vrcp.f32 %v396_v4  ;;  %v431_v10 = vsel %vm428_vm9, %v430_v6, %v426_v7  ;;  %v459_v27 = vand.u32 2147483648, %v396_v4  ;;  %v457_v30 = vand.u32 2147483647, %v396_v4  ;;  %vm15594_vm13 = vmor %vm438_vm11, %vm439_vm10 }
 0x101   :  { %v553_v11 = vpack.c.bf16 %v431_v10, %v416_v9  ;;  %v435_v12 = vsub.f32 1.0, %v434_v8  ;;  %vm453_vm14 = vweird.f32 %v396_v4 }
 0x102   :  { %v350_v13 = vpop.f32.mrf.mxu0  ;;  %v460_v39 = vor.u32 1.1754944e-38, %v459_v27  ;;  %vm458_vm1 = vcmp.eq.f32.partialorder %v457_v30, 8.507059e+37 }
 0x103   :  { %v351_v14 = vadd.f32 %v15563_v26, %v350_v13  ;;  %634 = vmatmul.bf16.vlgmr.msra.gmra.mxu1 %v553_v11  ;;  %v436_v17 = vmul.f32 %v14748_v3, %v435_v12 }
 0x105   :  { %v14750_v15 = vpop.eup %14749  ;;  %v9492_v16 = vmul.f32 -1.442695, %v351_v14  ;;  %v437_v21 = vadd.f32 %v14748_v3, %v436_v17 }
 0x106   :  { %v14752_v18 = vpop.eup %14751  ;;  %v15587_v19 = vadd.f32 1.0, %v14750_v15 }
 0x107   :  { %14753 = vpow2.f32 %v9492_v16  ;;  %v449_v20 = vmul.f32 %v14752_v18, %v396_v4  ;;  %vm454_vm12 = vweird.f32 %v14752_v18  ;;  %v441_v34 = vsel %vm15594_vm13, %v14748_v3, %v437_v21 }
 0x108   :  { %14755 = vrcp.f32 %v15587_v19  ;;  %vm455_vm0 = vmor %vm453_vm14, %vm454_vm12  ;;  %v446_v42 = vsel %vm443_vm15, %v445_v38, %v441_v34  ;;  %vm468_vm3 = vweird.f32 %v15587_v19  ;;  %v472_v57 = vand.u32 2147483647, %v15587_v19 }
 0x109   :  { %v450_v22 = vsub.f32 1.0, %v449_v20  ;;  %v474_v58 = vand.u32 2147483648, %v15587_v19 }
 0x10a   :  { %v353_v23 = vpop.f32.mrf.mxu0  ;;  %vm473_vm7 = vcmp.eq.f32.partialorder %v472_v57, 8.507059e+37 }
 0x10b   :  { %v354_v28 = vadd.f32 %v15563_v26, %v353_v23  ;;  %v451_v29 = vmul.f32 %v14752_v18, %v450_v22  ;;  %v475_v6 = vor.u32 1.1754944e-38, %v474_v58 }
 0x10d   :  { %v14754_v32 = vpop.eup %14753  ;;  %v9493_v33 = vmul.f32 -1.442695, %v354_v28  ;;  %v452_v35 = vadd.f32 %v14752_v18, %v451_v29 }
 0x10e   :  { %v14756_v36 = vpop.eup %14755  ;;  %v398_v37 = vadd.f32 1.0, %v14754_v32 }
 0x10f   :  { %14757 = vpow2.f32 %v9493_v33  ;;  %v456_v40 = vsel %vm455_vm0, %v14752_v18, %v452_v35  ;;  %v464_v41 = vmul.f32 %v14756_v36, %v15587_v19  ;;  %vm469_vm2 = vweird.f32 %v14756_v36 }
 0x110   :  { %14759 = vrcp.f32 %v398_v37  ;;  %v461_v43 = vsel %vm458_vm1, %v460_v39, %v456_v40  ;;  %v489_v59 = vand.u32 2147483648, %v398_v37  ;;  %v487_v62 = vand.u32 2147483647, %v398_v37  ;;  %vm15609_vm5 = vmor %vm468_vm3, %vm469_vm2 }
 0x111   :  { %v554_v44 = vpack.c.bf16 %v461_v43, %v446_v42  ;;  %v465_v45 = vsub.f32 1.0, %v464_v41  ;;  %vm483_vm6 = vweird.f32 %v398_v37 }
 0x112   :  { %v355_v46 = vpop.f32.mrf.mxu0  ;;  %v490_v7 = vor.u32 1.1754944e-38, %v489_v59  ;;  %vm488_vm9 = vcmp.eq.f32.partialorder %v487_v62, 8.507059e+37 }
 0x113   :  { %v356_v47 = vadd.f32 %v15563_v26, %v355_v46  ;;  %639 = vmatmul.bf16.gmra.mxu1 %v554_v44  ;;  %v466_v50 = vmul.f32 %v14756_v36, %v465_v45 }
 0x115   :  { %v14758_v48 = vpop.eup %14757  ;;  %v9494_v49 = vmul.f32 -1.442695, %v356_v47  ;;  %v467_v54 = vadd.f32 %v14756_v36, %v466_v50 }
 0x116   :  { %v14760_v51 = vpop.eup %14759  ;;  %v15602_v52 = vadd.f32 1.0, %v14758_v48 }
 0x117   :  { %14761 = vpow2.f32 %v9494_v49  ;;  %v479_v53 = vmul.f32 %v14760_v51, %v398_v37  ;;  %vm484_vm4 = vweird.f32 %v14760_v51  ;;  %v471_v2 = vsel %vm15609_vm5, %v14756_v36, %v467_v54 }
 0x118   :  { %14763 = vrcp.f32 %v15602_v52  ;;  %vm485_vm8 = vmor %vm483_vm6, %vm484_vm4  ;;  %v476_v10 = vsel %vm473_vm7, %v475_v6, %v471_v2  ;;  %vm498_vm11 = vweird.f32 %v15602_v52  ;;  %v504_v24 = vand.u32 2147483648, %v15602_v52 }
 0x119   :  { %v480_v55 = vsub.f32 1.0, %v479_v53  ;;  %v502_v27 = vand.u32 2147483647, %v15602_v52 }
 0x11a   :  { %v358_v56 = vpop.f32.mrf.mxu0  ;;  %v505_v35 = vor.u32 1.1754944e-38, %v504_v24  ;;  %v9727_v24 = vld [vmem:[#allocation13 + $0x178] sm:$0xf0] }
 0x11b   :  { %v359_v60 = vadd.f32 %v15563_v26, %v358_v56  ;;  %v481_v61 = vmul.f32 %v14760_v51, %v480_v55  ;;  %vm503_vm0 = vcmp.eq.f32.partialorder %v502_v27, 8.507059e+37 }
 0x11d   :  { %v14762_v0 = vpop.eup %14761  ;;  %v9495_v1 = vmul.f32 -1.442695, %v359_v60  ;;  %v482_v3 = vadd.f32 %v14760_v51, %v481_v61 }
 0x11e   :  { %v14764_v4 = vpop.eup %14763  ;;  %v400_v5 = vadd.f32 1.0, %v14762_v0 }
 0x11f   :  { %14765 = vpow2.f32 %v9495_v1  ;;  %v486_v8 = vsel %vm485_vm8, %v14760_v51, %v482_v3  ;;  %v494_v9 = vmul.f32 %v14764_v4, %v15602_v52  ;;  %vm499_vm10 = vweird.f32 %v14764_v4 }
 0x120   :  { %14767 = vrcp.f32 %v400_v5  ;;  %v491_v11 = vsel %vm488_vm9, %v490_v7, %v486_v8  ;;  %v519_v25 = vand.u32 2147483648, %v400_v5  ;;  %v517_v28 = vand.u32 2147483647, %v400_v5  ;;  %vm15620_vm13 = vmor %vm498_vm11, %vm499_vm10 }
 0x121   :  { %v555_v12 = vpack.c.bf16 %v491_v11, %v476_v10  ;;  %v495_v13 = vsub.f32 1.0, %v494_v9  ;;  %vm513_vm14 = vweird.f32 %v400_v5  ;;  %v1258_v10 = vld [vmem:[#allocation13 + $0x180] sm:$0x33]  ;;  %vm1526_vm10 = vcmask 1041408  }
 0x122   :  { %v360_v14 = vpop.f32.mrf.mxu0  ;;  %v520_v36 = vor.u32 1.1754944e-38, %v519_v25  ;;  %vm518_vm1 = vcmp.eq.f32.partialorder %v517_v28, 8.507059e+37 }
 0x123   :  { %v361_v15 = vadd.f32 %v15563_v26, %v360_v14  ;;  %644 = vmatmul.bf16.gmra.mxu1 %v555_v12  ;;  %v496_v18 = vmul.f32 %v14764_v4, %v495_v13  ;;  %v1410_v12 = vunpack.c.l.b16 %v1258_v10 }
 0x125   :  { %v14766_v16 = vpop.eup %14765  ;;  %v9496_v17 = vmul.f32 -1.442695, %v361_v15  ;;  %v497_v22 = vadd.f32 %v14764_v4, %v496_v18  ;;  %v1411_v15 = vunpack.c.h.b16 %v1258_v10  ;;  %v9725_v18 = vld [vmem:[#allocation13 + $0x158] sm:$0xf]  ;;  %v9631_v10 = vld [vmem:[#allocation13 + $0xb8] sm:$0xf0] }
 0x126   :  { %v14768_v19 = vpop.eup %14767  ;;  %v401_v20 = vadd.f32 1.0, %v14766_v16 }
 0x127   :  { %14769 = vpow2.f32 %v9496_v17  ;;  %v509_v21 = vmul.f32 %v14768_v19, %v400_v5  ;;  %vm514_vm12 = vweird.f32 %v14768_v19  ;;  %v501_v31 = vsel %vm15620_vm13, %v14764_v4, %v497_v22  ;;  %v1261_v4 = vld [vmem:[#allocation13 + $0x198] sm:$0x33] }
 0x128   :  { %14771 = vrcp.f32 %v401_v20  ;;  %vm515_vm15 = vmor %vm513_vm14, %vm514_vm12  ;;  %v506_v39 = vsel %vm503_vm0, %v505_v35, %v501_v31  ;;  %vm528_vm3 = vweird.f32 %v401_v20  ;;  %v534_v48 = vand.u32 2147483648, %v401_v20  ;;  %v9701_v31 = vld [vmem:[#allocation13 + $0x140] sm:$0xf] }
 0x129   :  { %v510_v23 = vsub.f32 1.0, %v509_v21  ;;  %v532_v50 = vand.u32 2147483647, %v401_v20  ;;  %v1416_v6 = vunpack.c.l.b16 %v1261_v4  ;;  %v1417_v7 = vunpack.c.h.b16 %v1261_v4  ;;  %v14018_v4 = vld [vmem:[#allocation13 + $0xb4] sm:$0xf0] }
 0x12a   :  { %v535_v55 = vor.u32 1.1754944e-38, %v534_v48  ;;  %v1466_v17 = vpack.c.b16 %v1410_v12, %v1410_v12  ;;  %v1467_v21 = vpack.c.b16 %v1411_v15, %v1411_v15  ;;  %v14031_v48 = vld [vmem:[#allocation13 + $0x11c] sm:$0xf0] }
 0x12b   :  { %v511_v26 = vmul.f32 %v14768_v19, %v510_v23  ;;  %vm533_vm8 = vcmp.eq.f32.partialorder %v532_v50, 8.507059e+37  ;;  %v1472_v8 = vpack.c.b16 %v1416_v6, %v1416_v6  ;;  %v1473_v11 = vpack.c.b16 %v1417_v7, %v1417_v7  ;;  %v14038_v23 = vld [vmem:[#allocation13 + $0x15c] sm:$0xf]  ;;  %v14027_v50 = vld [vmem:[#allocation13 + $0x104] sm:$0xf] }
 0x12c   :  { %v1528_v25 = vsel %vm1526_vm10, %v1466_v17, 0  ;;  %v9730_v27 = vor.u32 %v14038_v23, %v9727_v24  ;;  %v1531_v28 = vsel %vm1526_vm10, %v1467_v21, 0  ;;  %v14015_v15 = vld [vmem:[#allocation13 + $0x9c] sm:$0xf0]  ;;  %v9597_v21 = vld [vmem:[#allocation13 + $0x58] sm:$0xf] }
 0x12d   :  { %v14770_v30 = vpop.eup %14769  ;;  %v512_v32 = vadd.f32 %v14768_v19, %v511_v26  ;;  %v1546_v14 = vsel %vm1526_vm10, %v1472_v8, 0  ;;  %v1549_v16 = vsel %vm1526_vm10, %v1473_v11, 0  ;;  %1552 = vmatpush.bf16.msra.mxu2 %v1528_v25  ;;  %1565 = vmatpush.bf16.msra.mxu3 %v1531_v28  ;;  %v14010_v25 = vld [vmem:[#allocation13 + $0x74] sm:$0xf0]  ;;  %v9599_v28 = vld [vmem:[#allocation13 + $0x78] sm:$0xf0] }
 0x12e   :  { %v14772_v33 = vpop.eup %14771  ;;  %v402_v34 = vadd.f32 1.0, %v14770_v30  ;;  %1630 = vmatpush.bf16.msrb.mxu0 %v1546_v14  ;;  %1643 = vmatpush.bf16.msrb.mxu1 %v1549_v16  ;;  %v9605_v14 = vld [vmem:[#allocation13 + $0x80] sm:$0xf] }
 0x12f   :  { %v516_v37 = vsel %vm515_vm15, %v14768_v19, %v512_v32  ;;  %v524_v38 = vmul.f32 %v14772_v33, %v401_v20  ;;  %vm529_vm2 = vweird.f32 %v14772_v33  ;;  %v14042_v19 = vld [vmem:[#allocation13 + $0x174] sm:$0xf0]  ;;  %v14039_v32 = vld [vmem:[#allocation13 + $0x15c] sm:$0xf0] }
 0x130   :  { %14773 = vrcp.f32 %v402_v34  ;;  %v521_v40 = vsel %vm518_vm1, %v520_v36, %v516_v37  ;;  %v549_v49 = vand.u32 2147483648, %v402_v34  ;;  %v547_v52 = vand.u32 2147483647, %v402_v34  ;;  %vm530_vm5 = vmor %vm528_vm3, %vm529_vm2  ;;  %v9693_v37 = vld [vmem:[#allocation13 + $0x118] sm:$0xf] }
 0x131   :  { %v556_v41 = vpack.c.bf16 %v521_v40, %v506_v39  ;;  %v525_v42 = vsub.f32 1.0, %v524_v38  ;;  %vm543_vm6 = vweird.f32 %v402_v34  ;;  %v9726_v22 = vor.u32 %v14042_v19, %v9725_v18  ;;  %v14034_v38 = vld [vmem:[#allocation13 + $0x134] sm:$0xf0]  ;;  %v14011_v19 = vld [vmem:[#allocation13 + $0x84] sm:$0xf] }
 0x132   :  { %v550_v56 = vor.u32 1.1754944e-38, %v549_v49  ;;  %vm548_vm9 = vcmp.eq.f32.partialorder %v547_v52, 8.507059e+37  ;;  %1644 = vmatpush.bf16.msrb.mxu1 %v9730_v27  ;;  %v9702_v36 = vor.u32 %v14039_v32, %v9701_v31  ;;  %v9661_v52 = vld [vmem:[#allocation13 + $0xd8] sm:$0xf]  ;;  %v9606_v18 = vor.u32 %v14015_v15, %v9605_v14  ;;  %v9573_v31 = vld [vmem:[#allocation13 + $0x40] sm:$0xf] }
 0x133   :  { %649 = vmatmul.bf16.gmra.mxu1 %v556_v41  ;;  %v526_v43 = vmul.f32 %v14772_v33, %v525_v42  ;;  %1631 = vmatpush.bf16.msrb.mxu0 %v9726_v22  ;;  %v9694_v42 = vor.u32 %v14034_v38, %v9693_v37  ;;  %v9598_v27 = vor.u32 %v14010_v25, %v9597_v21  ;;  %v14007_v32 = vld [vmem:[#allocation13 + $0x5c] sm:$0xf0]  ;;  %v9565_v38 = vld [vmem:[#allocation13 + $0x18] sm:$0xf] }
 0x134   :  { %1553 = vmatpush.bf16.msra.mxu2 %v9702_v36  ;;  %v9575_v36 = vld [vmem:[#allocation13 + $0x60] sm:$0xf0] }
 0x135   :  { %v527_v46 = vadd.f32 %v14772_v33, %v526_v43  ;;  %v14030_v43 = vld [vmem:[#allocation13 + $0x11c] sm:$0xf] }
 0x136   :  { %v14774_v44 = vpop.eup %14773 }
 0x137   :  { %v539_v45 = vmul.f32 %v14774_v44, %v402_v34  ;;  %vm544_vm4 = vweird.f32 %v14774_v44  ;;  %v531_v53 = vsel %vm530_vm5, %v14772_v33, %v527_v46  ;;  %v14035_v33 = vld [vmem:[#allocation13 + $0x144] sm:$0xf]  ;;  %1632 = vmatpush.bf16.msrb.mxu0 %v9694_v42 }
 0x138   :  { %vm545_vm7 = vmor %vm543_vm6, %vm544_vm4  ;;  %v536_v58 = vsel %vm533_vm8, %v535_v55, %v531_v53  ;;  %v9703_v34 = vld [vmem:[#allocation13 + $0x160] sm:$0xf0] }
 0x139   :  { %v540_v47 = vsub.f32 1.0, %v539_v45  ;;  %v9706_v41 = vor.u32 %v14035_v33, %v9703_v34  ;;  %v14003_v33 = vld [vmem:[#allocation13 + $0x44] sm:$0xf] }
 0x13b   :  { %v541_v51 = vmul.f32 %v14774_v44, %v540_v47  ;;  %v9669_v47 = vld [vmem:[#allocation13 + $0x100] sm:$0xf]  ;;  %1566 = vmatpush.bf16.msra.mxu3 %v9706_v41 }
 0x13c   :  { %v9670_v49 = vor.u32 %v14031_v48, %v9669_v47  ;;  %v9567_v47 = vld [vmem:[#allocation13 + $0x38] sm:$0xf0] }
 0x13d   :  { %v542_v54 = vadd.f32 %v14774_v44, %v541_v51  ;;  %v9671_v51 = vld [vmem:[#allocation13 + $0x120] sm:$0xf0] }
 0x13e   :  { %v9674_v53 = vor.u32 %v14027_v50, %v9671_v51  ;;  %1554 = vmatpush.bf16.msra.mxu2 %v9670_v49 }
 0x13f   :  { %v546_v57 = vsel %vm545_vm7, %v14774_v44, %v542_v54  ;;  %v9695_v44 = vld [vmem:[#allocation13 + $0x138] sm:$0xf0]  ;;  %v14026_v54 = vld [vmem:[#allocation13 + $0xf4] sm:$0xf0] }
 0x140   :  { %v551_v59 = vsel %vm548_vm9, %v550_v56, %v546_v57  ;;  %v9698_v46 = vor.u32 %v14030_v43, %v9695_v44  ;;  %v9662_v56 = vor.u32 %v14026_v54, %v9661_v52  ;;  %v14022_v57 = vld [vmem:[#allocation13 + $0xdc] sm:$0xf]  ;;  %1567 = vmatpush.bf16.msra.mxu3 %v9674_v53  ;;  %v9574_v43 = vor.u32 %v14007_v32, %v9573_v31  ;;  %v10477_v52 = vld [vmem:[#allocation11 + $0x5c0] sm:$0xf]  ;;  %v15687_v31 = vld [vmem:[#allocation13 + $0x164] sm:$0xf0] }
 0x141   :  { %v557_v60 = vpack.c.bf16 %v551_v59, %v536_v58  ;;  %v9663_v58 = vld [vmem:[#allocation13 + $0xf8] sm:$0xf0]  ;;  %v9578_v44 = vor.u32 %v14003_v33, %v9575_v36  ;;  %v13863_v53 = vld [vmem:[#allocation11 + $0x5dc] sm:$0xf0] }
 0x142   :  { %1645 = vmatpush.bf16.msrb.mxu1 %v9698_v46  ;;  %1633 = vmatpush.bf16.msrb.mxu0 %v9662_v56  ;;  %v13998_v46 = vld [vmem:[#allocation13 + $0x1c] sm:$0xf]  ;;  %v10733_v56 = vld [vmem:[#allocation11 + $0x7c0] sm:$0xf] }
 0x143   :  { %654 = vmatmul.bf16.gmra.mxu1 %v557_v60  ;;  %v9637_v60 = vld [vmem:[#allocation13 + $0xc0] sm:$0xf]  ;;  %v9570_v54 = vor.u32 %v13998_v46, %v9567_v47  ;;  %v9711_v46 = vld [vmem:[#allocation13 + $0x168] sm:$0xf0] }
 0x144   :  { %v10669_v47 = vld [vmem:[#allocation11 + $0x740] sm:$0xf] }
 0x180   :  { %v635_v61 = vpop.f32.mrf.mxu1 }
 0x181   :  { %v636_v0 = vadd.f32 %v15626_v63, %v635_v61  ;;  %v14023_v61 = vld [vmem:[#allocation13 + $0xdc] sm:$0xf0] }
 0x182   :  { %v9638_v6 = vor.u32 %v14023_v61, %v9637_v60 }
 0x183   :  { %v9529_v3 = vmul.f32 -1.442695, %v636_v0  ;;  %v9639_v0 = vld [vmem:[#allocation13 + $0xe0] sm:$0xf0] }
 0x184   :  { %1555 = vmatpush.bf16.msra.mxu2 %v9638_v6  ;;  %v13995_v6 = vld [vmem:[#allocation13 + $0x4] sm:$0xf] }
 0x185   :  { %14775 = vpow2.f32 %v9529_v3  ;;  %v9629_v3 = vld [vmem:[#allocation13 + $0x98] sm:$0xf] }
 0x186   :  { %v9630_v8 = vor.u32 %v14018_v4, %v9629_v3 }
 0x188   :  { %v637_v62 = vpop.f32.mrf.mxu1  ;;  %1634 = vmatpush.bf16.msrb.mxu0 %v9630_v8  ;;  %1556 = vmatpush.bf16.msra.mxu2 %v9606_v18 }
 0x189   :  { %v638_v1 = vadd.f32 %v15626_v63, %v637_v62  ;;  %v14019_v62 = vld [vmem:[#allocation13 + $0xc4] sm:$0xf] }
 0x18a   :  { %v9642_v7 = vor.u32 %v14019_v62, %v9639_v0  ;;  %v13999_v0 = vld [vmem:[#allocation13 + $0x1c] sm:$0xf0] }
 0x18b   :  { %v9530_v5 = vmul.f32 -1.442695, %v638_v1  ;;  %v14776_v26 = vpop.eup %14775 }
 0x18c   :  { %v15636_v35 = vadd.f32 1.0, %v14776_v26  ;;  %1568 = vmatpush.bf16.msra.mxu3 %v9642_v7  ;;  %v14006_v26 = vld [vmem:[#allocation13 + $0x5c] sm:$0xf]  ;;  %1635 = vmatpush.bf16.msrb.mxu0 %v9598_v27  ;;  %v9543_v7 = vld [vmem:[#allocation13 + $0x20] sm:$0xf0] }
 0x18d   :  { %14777 = vpow2.f32 %v9530_v5  ;;  %v9602_v37 = vor.u32 %v14006_v26, %v9599_v28  ;;  %1557 = vmatpush.bf16.msra.mxu2 %v9574_v43  ;;  %v9546_v21 = vor.u32 %v13995_v6, %v9543_v7 }
 0x18e   :  { %v711_v41 = vand.u32 2147483648, %v15636_v35  ;;  %v709_v3 = vand.u32 2147483647, %v15636_v35  ;;  %vm705_vm11 = vweird.f32 %v15636_v35 }
 0x190   :  { %v640_v2 = vpop.f32.mrf.mxu1  ;;  %v15671_v14 = vor.u32 1.1754944e-38, %v711_v41  ;;  %vm15692_vm13 = vcmp.eq.f32.partialorder %v709_v3, 8.507059e+37  ;;  %v13847_v41 = vld [vmem:[#allocation11 + $0x55c] sm:$0xf0]  ;;  %v14028_v3 = vld [vmem:[#allocation13 + $0x10c] sm:$0xf] }
 0x191   :  { %v641_v9 = vadd.f32 %v15626_v63, %v640_v2  ;;  %v9666_v2 = vor.u32 %v14022_v57, %v9663_v58  ;;  %v13927_v57 = vld [vmem:[#allocation11 + $0x7dc] sm:$0xf0] }
 0x192   :  { %v9541_v58 = vld [vmem:[#allocation13] sm:$0xf]  ;;  %v10734_v62 = vor.u32 %v13927_v57, %v10733_v56 }
 0x193   :  { %v9531_v20 = vmul.f32 -1.442695, %v641_v9  ;;  %v14778_v29 = vpop.eup %14777  ;;  %v14014_v9 = vld [vmem:[#allocation13 + $0x9c] sm:$0xf]  ;;  %1646 = vmatpush.bf16.msrb.mxu1 %v9666_v2 }
 0x194   :  { %v15638_v39 = vadd.f32 1.0, %v14778_v29  ;;  %v9634_v17 = vor.u32 %v14014_v9, %v9631_v10  ;;  %v1259_v10 = vld [vmem:[#allocation13 + $0x188] sm:$0x33] }
 0x195   :  { %14779 = vpow2.f32 %v9531_v20  ;;  %v9607_v20 = vld [vmem:[#allocation13 + $0xa0] sm:$0xf0]  ;;  %v1412_v26 = vunpack.c.l.b16 %v1259_v10  ;;  %v1413_v28 = vunpack.c.h.b16 %v1259_v10  ;;  %v850_v10 = vld [vmem:[#allocation10] sm:$0xff] }
 0x196   :  { %14781 = vrcp.f32 %v15636_v35  ;;  %v9610_v24 = vor.u32 %v14011_v19, %v9607_v20  ;;  %v726_v60 = vand.u32 2147483648, %v15638_v39  ;;  %v724_v15 = vand.u32 2147483647, %v15638_v39 }
 0x197   :  { %14783 = vrcp.f32 %v15638_v39  ;;  %1647 = vmatpush.bf16.msrb.mxu1 %v9634_v17  ;;  %v1468_v43 = vpack.c.b16 %v1412_v26, %v1412_v26  ;;  %vm720_vm1 = vweird.f32 %v15638_v39 }
 0x198   :  { %v642_v13 = vpop.f32.mrf.mxu1  ;;  %1569 = vmatpush.bf16.msra.mxu3 %v9610_v24  ;;  %v15678_v19 = vor.u32 1.1754944e-38, %v726_v60  ;;  %vm15701_vm15 = vcmp.eq.f32.partialorder %v724_v15, 8.507059e+37  ;;  %v15725_v60 = vld [vmem:[#allocation13 + $0x124] sm:$0xf0] }
 0x199   :  { %v643_v30 = vadd.f32 %v15626_v63, %v642_v13  ;;  %v1534_v56 = vsel %vm1526_vm10, %v1468_v43, 0  ;;  %v851_v43 = vld [vmem:[#allocation10 + $0x8] sm:$0xff] }
 0x19b   :  { %v9532_v45 = vmul.f32 -1.442695, %v643_v30  ;;  %v14780_v55 = vpop.eup %14779  ;;  %1648 = vmatpush.bf16.msrb.mxu1 %v9602_v37 }
 0x19c   :  { %v15643_v1 = vadd.f32 1.0, %v14780_v55  ;;  %v15645_v11 = vpop.eup %14781  ;;  %1570 = vmatpush.bf16.msra.mxu3 %v9578_v44  ;;  %v10478_v55 = vor.u32 %v13863_v53, %v10477_v52  ;;  %v1469_v44 = vpack.c.b16 %v1413_v28, %v1413_v28 }
 0x19d   :  { %14785 = vpow2.f32 %v9532_v45  ;;  %v15648_v16 = vpop.eup %14783  ;;  %v701_v29 = vmul.f32 %v15645_v11, %v15636_v35  ;;  %vm706_vm12 = vweird.f32 %v15645_v11 }
 0x19e   :  { %14787 = vrcp.f32 %v15643_v1  ;;  %v716_v30 = vmul.f32 %v15648_v16, %v15638_v39  ;;  %v739_v17 = vand.u32 2147483647, %v15643_v1  ;;  %vm721_vm14 = vweird.f32 %v15648_v16  ;;  %vm15715_vm0 = vmor %vm705_vm11, %vm706_vm12 }
 0x19f   :  { %v702_v49 = vsub.f32 1.0, %v701_v29  ;;  %1649 = vmatpush.bf16.msrb.mxu1 %v9570_v54  ;;  %v1537_v57 = vsel %vm1526_vm10, %v1469_v44, 0  ;;  %vm15736_vm2 = vmor %vm720_vm1, %vm721_vm14  ;;  %vm735_vm5 = vweird.f32 %v15643_v1  ;;  %v13823_v54 = vld [vmem:[#allocation11 + $0x49c] sm:$0xf0] }
 0x1a0   :  { %v645_v40 = vpop.f32.mrf.mxu1  ;;  %v717_v50 = vsub.f32 1.0, %v716_v30  ;;  %v15685_v30 = vld [vmem:[#allocation13 + $0x148] sm:$0xf]  ;;  %1571 = vmatpush.bf16.msra.mxu3 %v9546_v21  ;;  %vm15759_vm4 = vcmp.eq.f32.partialorder %v739_v17, 8.507059e+37  ;;  %v9647_v17 = vld [vmem:[#allocation13 + $0xe8] sm:$0xf0] }
 0x1a1   :  { %v646_v59 = vadd.f32 %v15626_v63, %v645_v40  ;;  %v14002_v40 = vld [vmem:[#allocation13 + $0x34] sm:$0xf0]  ;;  %v703_v8 = vmul.f32 %v15645_v11, %v702_v49  ;;  %v13911_v49 = vld [vmem:[#allocation11 + $0x75c] sm:$0xf0]  ;;  %v9710_v35 = vor.u32 %v15687_v31, %v15685_v30 }
 0x1a2   :  { %v9566_v45 = vor.u32 %v14002_v40, %v9565_v38  ;;  %v718_v9 = vmul.f32 %v15648_v16, %v717_v50  ;;  %v14036_v38 = vld [vmem:[#allocation13 + $0x14c] sm:$0xf]  ;;  %v10413_v40 = vld [vmem:[#allocation11 + $0x540] sm:$0xf] }
 0x1a3   :  { %v9533_v12 = vmul.f32 -1.442695, %v646_v59  ;;  %v14786_v22 = vpop.eup %14785  ;;  %3294 = vmatpush.bf16.msra.mxu1 %v10734_v62  ;;  %v15690_v32 = vadd.f32 %v15645_v11, %v703_v8  ;;  %v10414_v53 = vor.u32 %v13847_v41, %v10413_v40  ;;  %v10381_v62 = vld [vmem:[#allocation11 + $0x500] sm:$0xf] }
 0x1a4   :  { %v15655_v34 = vadd.f32 1.0, %v14786_v22  ;;  %v15658_v48 = vpop.eup %14787  ;;  %1636 = vmatpush.bf16.msrb.mxu0 %v9566_v45  ;;  %v10701_v22 = vld [vmem:[#allocation11 + $0x780] sm:$0xf]  ;;  %v15697_v36 = vadd.f32 %v15648_v16, %v718_v9  ;;  %1591 = vmatpush.bf16.msrb.mxu3 %v1537_v57  ;;  %v741_v9 = vand.u32 2147483648, %v15643_v1 }
 0x1a5   :  { %14789 = vpow2.f32 %v9533_v12  ;;  %v15666_v4 = vmul.f32 %v15658_v48, %v15643_v1  ;;  %v10445_v12 = vld [vmem:[#allocation11 + $0x580] sm:$0xf]  ;;  %v708_v6 = vsel %vm15715_vm0, %v15645_v11, %v15690_v32  ;;  %vm736_vm3 = vweird.f32 %v15658_v48 }
 0x1a6   :  { %v723_v11 = vsel %vm15736_vm2, %v15648_v16, %v15697_v36  ;;  %v10349_v30 = vld [vmem:[#allocation11 + $0x4c0] sm:$0xf]  ;;  %v713_v32 = vsel %vm15692_vm13, %v15671_v14, %v708_v6  ;;  %vm15778_vm6 = vmor %vm735_vm5, %vm736_vm3  ;;  %v742_v14 = vor.u32 1.1754944e-38, %v741_v9  ;;  %vm750_vm7 = vweird.f32 %v15655_v34  ;;  %v9581_v9 = vld [vmem:[#allocation13 + $0x48] sm:$0xf] }
 0x1a7   :  { %v732_v25 = vsub.f32 1.0, %v15666_v4  ;;  %v9679_v4 = vld [vmem:[#allocation13 + $0x128] sm:$0xf0]  ;;  %v13831_v31 = vld [vmem:[#allocation11 + $0x4dc] sm:$0xf0]  ;;  %v728_v41 = vsel %vm15701_vm15, %v15678_v19, %v723_v11 }
 0x1a8   :  { %v647_v5 = vpop.f32.mrf.mxu1  ;;  %3281 = vmatpush.bf16.msra.mxu0 %v10478_v55  ;;  %v9682_v28 = vor.u32 %v14028_v3, %v9679_v4  ;;  %v10350_v36 = vor.u32 %v13831_v31, %v10349_v30  ;;  %v13887_v57 = vld [vmem:[#allocation11 + $0x69c] sm:$0xf0] }
 0x1a9   :  { %v648_v13 = vadd.f32 %v15626_v63, %v647_v5  ;;  %v9542_v5 = vor.u32 %v13999_v0, %v9541_v58  ;;  %v10670_v58 = vor.u32 %v13911_v49, %v10669_v47  ;;  %v13839_v0 = vld [vmem:[#allocation11 + $0x51c] sm:$0xf0]  ;;  %v733_v8 = vmul.f32 %v15658_v48, %v732_v25 }
 0x1aa   :  { %v10382_v15 = vor.u32 %v13839_v0, %v10381_v62  ;;  %v10317_v49 = vld [vmem:[#allocation11 + $0x480] sm:$0xf]  ;;  %v754_v0 = vand.u32 2147483647, %v15655_v34 }
 0x1ab   :  { %v9534_v23 = vmul.f32 -1.442695, %v648_v13  ;;  %v14790_v59 = vpop.eup %14789  ;;  %v13855_v13 = vld [vmem:[#allocation11 + $0x59c] sm:$0xf0]  ;;  %1558 = vmatpush.bf16.msra.mxu2 %v9542_v5  ;;  %v734_v44 = vadd.f32 %v15658_v48, %v733_v8  ;;  %v10318_v7 = vor.u32 %v13823_v54, %v10317_v49  ;;  %v13996_v54 = vld [vmem:[#allocation13 + $0xc] sm:$0xf] }
 0x1ac   :  { %v15675_v18 = vadd.f32 1.0, %v14790_v59  ;;  %v10446_v29 = vor.u32 %v13855_v13, %v10445_v12  ;;  %v15723_v59 = vld [vmem:[#allocation13 + $0x108] sm:$0xf]  ;;  %v13903_v5 = vld [vmem:[#allocation11 + $0x71c] sm:$0xf0]  ;;  %vm755_vm14 = vcmp.eq.f32.partialorder %v754_v0, 8.507059e+37 }
 0x1ad   :  { %14791 = vpow2.f32 %v9534_v23  ;;  %v13919_v23 = vld [vmem:[#allocation11 + $0x79c] sm:$0xf0]  ;;  %v9678_v26 = vor.u32 %v15725_v60, %v15723_v59  ;;  %v14016_v60 = vld [vmem:[#allocation13 + $0xa4] sm:$0xf0]  ;;  %v738_v62 = vsel %vm15778_vm6, %v15658_v48, %v734_v44 }
 0x1ae   :  { %14793 = vrcp.f32 %v15655_v34  ;;  %3282 = vmatpush.bf16.msra.mxu0 %v10446_v29  ;;  %v10702_v45 = vor.u32 %v13919_v23, %v10701_v22  ;;  %v15750_v22 = vld [vmem:[#allocation13 + $0xc8] sm:$0xf]  ;;  %v14020_v29 = vld [vmem:[#allocation13 + $0xcc] sm:$0xf]  ;;  %v852_v31 = vld [vmem:[#allocation10 + $0x10] sm:$0xff]  ;;  %vm765_vm11 = vweird.f32 %v15675_v18 }
 0x1af   :  { %1578 = vmatpush.bf16.msrb.mxu2 %v1534_v56  ;;  %v15752_v23 = vld [vmem:[#allocation13 + $0xe4] sm:$0xf0]  ;;  %v10573_v56 = vld [vmem:[#allocation11 + $0x680] sm:$0xf] }
 0x1b0   :  { %v650_v42 = vpop.f32.mrf.mxu1  ;;  %3295 = vmatpush.bf16.msra.mxu1 %v10702_v45  ;;  %v10574_v8 = vor.u32 %v13887_v57, %v10573_v56  ;;  %v13871_v49 = vld [vmem:[#allocation11 + $0x61c] sm:$0xf0]  ;;  %v9551_v56 = vld [vmem:[#allocation13 + $0x28] sm:$0xf0] }
 0x1b1   :  { %v651_v51 = vadd.f32 %v15626_v63, %v650_v42  ;;  %v15786_v42 = vld [vmem:[#allocation13 + $0x88] sm:$0xf] }
 0x1b2   :  { %3283 = vmatpush.bf16.msra.mxu0 %v10414_v53  ;;  %v9650_v53 = vor.u32 %v14020_v29, %v9647_v17  ;;  %v9614_v11 = vor.u32 %v14016_v60, %v15786_v42  ;;  %v769_v17 = vand.u32 2147483647, %v15675_v18  ;;  %v10509_v42 = vld [vmem:[#allocation11 + $0x600] sm:$0xf] }
 0x1b3   :  { %v9535_v61 = vmul.f32 -1.442695, %v651_v51  ;;  %v14792_v2 = vpop.eup %14791  ;;  %1579 = vmatpush.bf16.msrb.mxu2 %v9710_v35  ;;  %v14012_v35 = vld [vmem:[#allocation13 + $0x8c] sm:$0xf] }
 0x1b4   :  { %v15680_v20 = vadd.f32 1.0, %v14792_v2  ;;  %v15682_v24 = vpop.eup %14793  ;;  %v10637_v2 = vld [vmem:[#allocation11 + $0x700] sm:$0xf]  ;;  %3296 = vmatpush.bf16.msra.mxu1 %v10670_v58  ;;  %v861_v58 = vmul.f32 %v851_v43, %v728_v41  ;;  %vm15856_vm0 = vcmp.eq.f32.partialorder %v769_v17, 8.507059e+37 }
 0x1b5   :  { %14795 = vpow2.f32 %v9535_v61  ;;  %v15708_v51 = vmul.f32 %v15682_v24, %v15655_v34  ;;  %v9714_v61 = vor.u32 %v14036_v38, %v9711_v46  ;;  %v10638_v21 = vor.u32 %v13903_v5, %v10637_v2  ;;  %v13895_v38 = vld [vmem:[#allocation11 + $0x6dc] sm:$0xf0] }
 0x1b6   :  { %14797 = vrcp.f32 %v15675_v18  ;;  %3284 = vmatpush.bf16.msra.mxu0 %v10382_v15  ;;  %v756_v2 = vand.u32 2147483648, %v15655_v34  ;;  %vm751_vm8 = vweird.f32 %v15682_v24  ;;  %v13815_v15 = vld [vmem:[#allocation11 + $0x45c] sm:$0xf0]  ;;  %vm780_vm1 = vweird.f32 %v15680_v20 }
 0x1b7   :  { %14799 = vrcp.f32 %v15680_v20  ;;  %v747_v12 = vsub.f32 1.0, %v15708_v51  ;;  %1592 = vmatpush.bf16.msrb.mxu3 %v9714_v61  ;;  %v860_v51 = vmul.f32 %v850_v10, %v713_v32  ;;  %1580 = vmatpush.bf16.msrb.mxu2 %v9678_v26  ;;  %v9615_v61 = vld [vmem:[#allocation13 + $0xa8] sm:$0xf0]  ;;  %v10285_v10 = vld [vmem:[#allocation11 + $0x440] sm:$0xf]  ;;  %vm15821_vm9 = vmor %vm750_vm7, %vm751_vm8 }
 0x1b8   :  { %v652_v27 = vpop.f32.mrf.mxu1  ;;  %3297 = vmatpush.bf16.msra.mxu1 %v10638_v21  ;;  %v10541_v21 = vld [vmem:[#allocation11 + $0x640] sm:$0xf]  ;;  %v14004_v26 = vld [vmem:[#allocation13 + $0x4c] sm:$0xf]  ;;  %v10286_v29 = vor.u32 %v13815_v15, %v10285_v10 }
 0x1b9   :  { %v653_v37 = vadd.f32 %v15626_v63, %v652_v27  ;;  %v748_v59 = vmul.f32 %v15682_v24, %v747_v12  ;;  %v9618_v12 = vor.u32 %v14012_v35, %v9615_v61  ;;  %v784_v35 = vand.u32 2147483647, %v15680_v20 }
 0x1ba   :  { %3285 = vmatpush.bf16.msra.mxu0 %v10350_v36  ;;  %v771_v36 = vand.u32 2147483648, %v15675_v18  ;;  %v10510_v61 = vor.u32 %v13871_v49, %v10509_v42 }
 0x1bb   :  { %v14796_v50 = vpop.eup %14795  ;;  %v9536_v52 = vmul.f32 -1.442695, %v653_v37  ;;  %v10605_v37 = vld [vmem:[#allocation11 + $0x6c0] sm:$0xf]  ;;  %1593 = vmatpush.bf16.msrb.mxu3 %v9682_v28  ;;  %v9583_v28 = vld [vmem:[#allocation13 + $0x68] sm:$0xf0] }
 0x1bc   :  { %v15719_v55 = vadd.f32 1.0, %v14796_v50  ;;  %v15743_v39 = vpop.eup %14797  ;;  %v10606_v19 = vor.u32 %v13895_v38, %v10605_v37  ;;  %v772_v34 = vor.u32 1.1754944e-38, %v771_v36  ;;  %vm15873_vm3 = vcmp.eq.f32.partialorder %v784_v35, 8.507059e+37 }
 0x1bd   :  { %14801 = vpow2.f32 %v9536_v52  ;;  %v15754_v25 = vpop.eup %14799  ;;  %v761_v45 = vmul.f32 %v15743_v39, %v15675_v18  ;;  %v9646_v52 = vor.u32 %v15752_v23, %v15750_v22  ;;  %v870_v22 = vadd.f32 %v861_v58, %v860_v51 }
 0x1be   :  { %14803 = vrcp.f32 %v15719_v55  ;;  %v776_v46 = vmul.f32 %v15754_v25, %v15680_v20  ;;  %3298 = vmatpush.bf16.msra.mxu1 %v10606_v19  ;;  %v743_v23 = vsel %vm15759_vm4, %v742_v14, %v738_v62  ;;  %3286 = vmatpush.bf16.msra.mxu0 %v10318_v7  ;;  %v9549_v19 = vld [vmem:[#allocation13 + $0x8] sm:$0xf]  ;;  %vm766_vm12 = vweird.f32 %v15743_v39 }
 0x1bf   :  { %v762_v3 = vsub.f32 1.0, %v761_v45  ;;  %1581 = vmatpush.bf16.msrb.mxu2 %v9646_v52  ;;  %1594 = vmatpush.bf16.msrb.mxu3 %v9650_v53  ;;  %v10253_v45 = vld [vmem:[#allocation11 + $0x400] sm:$0xf]  ;;  %v862_v51 = vmul.f32 %v852_v31, %v743_v23  ;;  %v14000_v53 = vld [vmem:[#allocation13 + $0x24] sm:$0xf0]  ;;  %vm781_vm13 = vweird.f32 %v15754_v25  ;;  %vm15852_vm15 = vmor %vm765_vm11, %vm766_vm12  ;;  %vm795_vm5 = vweird.f32 %v15719_v55 }
 0x1c0   :  { %v655_v13 = vpop.f32.mrf.mxu1  ;;  %v777_v4 = vsub.f32 1.0, %v776_v46  ;;  %v9586_v46 = vor.u32 %v14004_v26, %v9583_v28  ;;  %vm15869_vm2 = vmor %vm780_vm1, %vm781_vm13  ;;  %v799_v23 = vand.u32 2147483647, %v15719_v55  ;;  %v854_v26 = vld [vmem:[#allocation10 + $0x20] sm:$0xff] }
 0x1c1   :  { %v656_v16 = vadd.f32 %v15626_v63, %v655_v13  ;;  %v14008_v13 = vld [vmem:[#allocation13 + $0x64] sm:$0xf0]  ;;  %v763_v32 = vmul.f32 %v15743_v39, %v762_v3  ;;  %v9550_v3 = vor.u32 %v14000_v53, %v9549_v19 }
 0x1c2   :  { %3299 = vmatpush.bf16.msra.mxu1 %v10574_v8  ;;  %v9582_v14 = vor.u32 %v14008_v13, %v9581_v9  ;;  %3287 = vmatpush.bf16.msra.mxu0 %v10286_v29  ;;  %vm800_vm11 = vcmp.eq.f32.partialorder %v799_v23, 8.507059e+37  ;;  %v859_v8 = vld [vmem:[#allocation10 + $0x48] sm:$0xff] }
 0x1c3   :  { %v14802_v40 = vpop.eup %14801  ;;  %v9537_v33 = vmul.f32 -1.442695, %v656_v16  ;;  %v15810_v16 = vadd.f32 %v15682_v24, %v748_v59  ;;  %1582 = vmatpush.bf16.msrb.mxu2 %v9614_v11  ;;  %1595 = vmatpush.bf16.msrb.mxu3 %v9618_v12  ;;  %v764_v57 = vadd.f32 %v15743_v39, %v763_v32  ;;  %v13795_v11 = vld [vmem:[#allocation11 + $0x3c4] sm:$0xf] }
 0x1c4   :  { %v15784_v47 = vadd.f32 1.0, %v14802_v40  ;;  %v15788_v50 = vpop.eup %14803  ;;  %v778_v40 = vmul.f32 %v15754_v25, %v777_v4  ;;  %v9554_v4 = vor.u32 %v13996_v54, %v9551_v56  ;;  %v1260_v56 = vld [vmem:[#allocation13 + $0x190] sm:$0x33] }
 0x1c5   :  { %14805 = vpow2.f32 %v9537_v33  ;;  %v15802_v5 = vmul.f32 %v15788_v50, %v15719_v55  ;;  %v13807_v33 = vld [vmem:[#allocation11 + $0x41c] sm:$0xf0]  ;;  %v753_v52 = vsel %vm15821_vm9, %v15682_v24, %v15810_v16  ;;  %v786_v24 = vand.u32 2147483648, %v15680_v20  ;;  %v853_v20 = vld [vmem:[#allocation10 + $0x18] sm:$0xff] }
 0x1c6   :  { %14807 = vrcp.f32 %v15784_v47  ;;  %v10254_v59 = vor.u32 %v13807_v33, %v10253_v45  ;;  %v779_v60 = vadd.f32 %v15754_v25, %v778_v40  ;;  %v768_v0 = vsel %vm15852_vm15, %v15743_v39, %v764_v57  ;;  %v9687_v40 = vld [vmem:[#allocation13 + $0x130] sm:$0xf0] }
 0x1c7   :  { %v792_v41 = vsub.f32 1.0, %v15802_v5  ;;  %1583 = vmatpush.bf16.msrb.mxu2 %v9582_v14  ;;  %1596 = vmatpush.bf16.msrb.mxu3 %v9586_v46  ;;  %v871_v5 = vadd.f32 %v870_v22, %v862_v51  ;;  %v787_v12 = vor.u32 1.1754944e-38, %v786_v24  ;;  %vm796_vm4 = vweird.f32 %v15788_v50  ;;  %v856_v46 = vld [vmem:[#allocation10 + $0x30] sm:$0xff] }
 0x1c8   :  { %v657_v6 = vpop.f32.mrf.mxu1  ;;  %3288 = vmatpush.bf16.msra.mxu0 %v10254_v59  ;;  %v783_v13 = vsel %vm15869_vm2, %v15754_v25, %v779_v60  ;;  %v773_v22 = vsel %vm15856_vm0, %v772_v34, %v768_v0  ;;  %v801_v16 = vand.u32 2147483648, %v15719_v55  ;;  %vm15898_vm7 = vmor %vm795_vm5, %vm796_vm4  ;;  %vm810_vm8 = vweird.f32 %v15784_v47  ;;  %v855_v55 = vld [vmem:[#allocation10 + $0x28] sm:$0xff]  ;;  %v858_v59 = vld [vmem:[#allocation10 + $0x40] sm:$0xff] }
 0x1c9   :  { %v658_v48 = vadd.f32 %v15626_v63, %v657_v6  ;;  %v13879_v63 = vld [vmem:[#allocation11 + $0x65c] sm:$0xf0]  ;;  %v793_v62 = vmul.f32 %v15788_v50, %v792_v41  ;;  %v757_v6 = vor.u32 1.1754944e-38, %v756_v2  ;;  %v816_v31 = vand.u32 2147483648, %v15784_v47 }
 0x1ca   :  { %v10542_v44 = vor.u32 %v13879_v63, %v10541_v21  ;;  %v788_v63 = vsel %vm15873_vm3, %v787_v12, %v783_v13  ;;  %v814_v17 = vand.u32 2147483647, %v15784_v47  ;;  %v802_v27 = vor.u32 1.1754944e-38, %v801_v16  ;;  %v13859_v13 = vld [vmem:[#allocation11 + $0x5c4] sm:$0xf] }
 0x1cb   :  { %v14806_v30 = vpop.eup %14805  ;;  %v9538_v37 = vmul.f32 -1.442695, %v658_v48  ;;  %v758_v10 = vsel %vm755_vm14, %v757_v6, %v753_v52  ;;  %v794_v15 = vadd.f32 %v15788_v50, %v793_v62  ;;  %1584 = vmatpush.bf16.msrb.mxu2 %v9550_v3  ;;  %1597 = vmatpush.bf16.msrb.mxu3 %v9554_v4  ;;  %v817_v19 = vor.u32 1.1754944e-38, %v816_v31  ;;  %v857_v52 = vld [vmem:[#allocation10 + $0x38] sm:$0xff]  ;;  %v13851_v31 = vld [vmem:[#allocation11 + $0x584] sm:$0xf] }
 0x1cc   :  { %v15815_v38 = vpop.eup %14807  ;;  %v15827_v43 = vadd.f32 1.0, %v14806_v30  ;;  %3300 = vmatpush.bf16.msra.mxu1 %v10542_v44  ;;  %v863_v29 = vmul.f32 %v853_v20, %v758_v10  ;;  %vm815_vm15 = vcmp.eq.f32.partialorder %v814_v17, 8.507059e+37  ;;  %v1414_v62 = vunpack.c.l.b16 %v1260_v56  ;;  %v10223_v20 = vld [vmem:[#allocation11 + $0x3e0] sm:$0xf0] }
 0x1cd   :  { %v806_v1 = vmul.f32 %v15815_v38, %v15784_v47  ;;  %14809 = vpow2.f32 %v9538_v37  ;;  %vm811_vm6 = vweird.f32 %v15815_v38  ;;  %v798_v32 = vsel %vm15898_vm7, %v15788_v50, %v794_v15  ;;  %v10479_v15 = vld [vmem:[#allocation11 + $0x5e0] sm:$0xf0] }
 0x1ce   :  { %14811 = vrcp.f32 %v15827_v43  ;;  %v864_v37 = vmul.f32 %v854_v26, %v773_v22  ;;  %vm15912_vm12 = vmor %vm810_vm8, %vm811_vm6  ;;  %v831_v41 = vand.u32 2147483648, %v15827_v43  ;;  %vm825_vm13 = vweird.f32 %v15827_v43  ;;  %v14041_v22 = vld [vmem:[#allocation13 + $0x16c] sm:$0xf0]  ;;  %v14037_v26 = vld [vmem:[#allocation13 + $0x154] sm:$0xf] }
 0x1cf   :  { %v807_v58 = vsub.f32 1.0, %v806_v1  ;;  %v829_v44 = vand.u32 2147483647, %v15827_v43  ;;  %v872_v33 = vadd.f32 %v871_v5, %v863_v29  ;;  %v865_v1 = vmul.f32 %v855_v55, %v788_v63  ;;  %v13787_v63 = vld [vmem:[#allocation11 + $0x384] sm:$0xf] }
 0x1d0   :  { %3301 = vmatpush.bf16.msra.mxu1 %v10510_v61  ;;  %v803_v14 = vsel %vm800_vm11, %v802_v27, %v798_v32  ;;  %v832_v53 = vor.u32 1.1754944e-38, %v831_v41  ;;  %v1415_v3 = vunpack.c.h.b16 %v1260_v56  ;;  %v1470_v10 = vpack.c.b16 %v1414_v62, %v1414_v62  ;;  %v10191_v30 = vld [vmem:[#allocation11 + $0x3a0] sm:$0xf0]  ;;  %v14029_v27 = vld [vmem:[#allocation13 + $0x114] sm:$0xf] }
 0x1d1   :  { %v808_v2 = vmul.f32 %v15815_v38, %v807_v58  ;;  %v873_v49 = vadd.f32 %v872_v33, %v864_v37  ;;  %v866_v54 = vmul.f32 %v856_v46, %v803_v14  ;;  %vm830_vm0 = vcmp.eq.f32.partialorder %v829_v44, 8.507059e+37  ;;  %v10447_v55 = vld [vmem:[#allocation11 + $0x5a0] sm:$0xf0]  ;;  %v14033_v37 = vld [vmem:[#allocation13 + $0x12c] sm:$0xf0] }
 0x1d2   :  { %v1471_v48 = vpack.c.b16 %v1415_v3, %v1415_v3  ;;  %vm1522_vm5 = vcmask 818176   ;;  %v1540_v23 = vsel %vm1526_vm10, %v1470_v10, 0  ;;  %v10482_v29 = vor.u32 %v13859_v13, %v10479_v15  ;;  %v10159_v44 = vld [vmem:[#allocation11 + $0x360] sm:$0xf0]  ;;  %v9653_v46 = vld [vmem:[#allocation13 + $0xd0] sm:$0xf] }
 0x1d3   :  { %v14810_v9 = vpop.eup %14809  ;;  %v809_v25 = vadd.f32 %v15815_v38, %v808_v2  ;;  %v874_v57 = vadd.f32 %v873_v49, %v865_v1  ;;  %v10194_v41 = vor.u32 %v13787_v63, %v10191_v30  ;;  %v10415_v33 = vld [vmem:[#allocation11 + $0x560] sm:$0xf0]  ;;  %v9690_v14 = vor.u32 %v14029_v27, %v9687_v40  ;;  %v9965_v63 = vld [vmem:[#allocation11 + $0x1c0] sm:$0xf] }
 0x1d4   :  { %v15865_v18 = vpop.eup %14811  ;;  %v15877_v39 = vadd.f32 1.0, %v14810_v9  ;;  %v1543_v16 = vsel %vm1526_vm10, %v1471_v48, 0  ;;  %v13763_v62 = vld [vmem:[#allocation11 + $0x2c4] sm:$0xf] }
 0x1d5   :  { %v821_v21 = vmul.f32 %v15865_v18, %v15827_v43  ;;  %vm826_vm9 = vweird.f32 %v15865_v18  ;;  %v813_v50 = vsel %vm15912_vm12, %v15815_v38, %v809_v25  ;;  %v875_v4 = vadd.f32 %v874_v57, %v866_v54  ;;  %v9719_v25 = vld [vmem:[#allocation13 + $0x170] sm:$0xf0]  ;;  %v13835_v54 = vld [vmem:[#allocation11 + $0x504] sm:$0xf] }
 0x1d6   :  { %14813 = vrcp.f32 %v15877_v39  ;;  %vm827_vm14 = vmor %vm825_vm13, %vm826_vm9  ;;  %v818_v51 = vsel %vm815_vm15, %v817_v19, %v813_v50  ;;  %v846_v60 = vand.u32 2147483648, %v15877_v39  ;;  %v844_v61 = vand.u32 2147483647, %v15877_v39  ;;  %v14025_v19 = vld [vmem:[#allocation13 + $0xec] sm:$0xf0]  ;;  %v881_v3 = vld [vmem:[%s16831_s25 + $0x10] sm:$0xff] }
 0x1d7   :  { %v822_v28 = vsub.f32 1.0, %v821_v21  ;;  %v867_v35 = vmul.f32 %v857_v52, %v818_v51  ;;  %vm840_vm2 = vweird.f32 %v15877_v39  ;;  %v9717_v21 = vld [vmem:[#allocation13 + $0x150] sm:$0xf]  ;;  %v9722_v17 = vor.u32 %v14037_v26, %v9719_v25  ;;  %v13771_v52 = vld [vmem:[#allocation11 + $0x304] sm:$0xf] }
 0x1d8   :  { %v847_v7 = vor.u32 1.1754944e-38, %v846_v60  ;;  %vm845_vm4 = vcmp.eq.f32.partialorder %v844_v61, 8.507059e+37  ;;  %v9718_v32 = vor.u32 %v14041_v22, %v9717_v21  ;;  %v10450_v50 = vor.u32 %v13851_v31, %v10447_v55  ;;  %v14013_v60 = vld [vmem:[#allocation13 + $0x94] sm:$0xf]  ;;  %v10063_v13 = vld [vmem:[#allocation11 + $0x2a0] sm:$0xf0] }
 0x1d9   :  { %v823_v36 = vmul.f32 %v15865_v18, %v822_v28  ;;  %v876_v9 = vadd.f32 %v875_v4, %v867_v35  ;;  %v10226_v28 = vor.u32 %v13795_v11, %v10223_v20  ;;  %v9654_v56 = vor.u32 %v14025_v19, %v9653_v46  ;;  %v9623_v35 = vld [vmem:[#allocation13 + $0xb0] sm:$0xf0]  ;;  %v882_v4 = vld [vmem:[%s16831_s25 + $0x18] sm:$0xff]  ;;  %v13755_v20 = vld [vmem:[#allocation11 + $0x284] sm:$0xf] }
 0x1da   :  { %v15948_v10 = vpack.c.bf16 %v881_v3, %v881_v3  ;;  %v15950_v48 = vpack.c.bf16 %v882_v4, %v882_v4  ;;  %v13819_v15 = vld [vmem:[#allocation11 + $0x484] sm:$0xf]  ;;  %v14001_v26 = vld [vmem:[#allocation13 + $0x2c] sm:$0xf0]  ;;  %v13997_v25 = vld [vmem:[#allocation13 + $0x14] sm:$0xf]  ;;  %v10066_v30 = vor.u32 %v13755_v20, %v10063_v13 }
 0x1db   :  { %v824_v47 = vadd.f32 %v15865_v18, %v823_v36  ;;  %v9685_v36 = vld [vmem:[#allocation13 + $0x110] sm:$0xf]  ;;  %v10319_v21 = vld [vmem:[#allocation11 + $0x4a0] sm:$0xf0]  ;;  %v13735_v55 = vld [vmem:[#allocation11 + $0x1dc] sm:$0xf0] }
 0x1dc   :  { %v14814_v45 = vpop.eup %14813  ;;  %v9686_v1 = vor.u32 %v14033_v37, %v9685_v36  ;;  %v10322_v31 = vor.u32 %v13819_v15, %v10319_v21  ;;  %v10031_v36 = vld [vmem:[#allocation11 + $0x260] sm:$0xf0]  ;;  %v13727_v46 = vld [vmem:[#allocation11 + $0x19c] sm:$0xf0]  ;;  %v9941_v3 = vld [vmem:[#allocation11 + $0x188] sm:$0xf] }
 0x1dd   :  { %v828_v42 = vsel %vm827_vm14, %v15865_v18, %v824_v47  ;;  %v836_v38 = vmul.f32 %v14814_v45, %v15877_v39  ;;  %vm841_vm1 = vweird.f32 %v14814_v45  ;;  %v13779_v47 = vld [vmem:[#allocation11 + $0x344] sm:$0xf]  ;;  %v10189_v19 = vld [vmem:[#allocation11 + $0x380] sm:$0xf]  ;;  %v9909_v13 = vld [vmem:[#allocation11 + $0x148] sm:$0xf] }
 0x1de   :  { %v833_v58 = vsel %vm830_vm0, %v832_v53, %v828_v42  ;;  %vm842_vm3 = vmor %vm840_vm2, %vm841_vm1  ;;  %v14021_v42 = vld [vmem:[#allocation13 + $0xd4] sm:$0xf]  ;;  %v10162_v49 = vor.u32 %v13779_v47, %v10159_v44  ;;  %v10127_v53 = vld [vmem:[#allocation11 + $0x320] sm:$0xf0] }
 0x1df   :  { %v837_v43 = vsub.f32 1.0, %v836_v38  ;;  %v868_v5 = vmul.f32 %v858_v59, %v833_v58  ;;  %v9655_v38 = vld [vmem:[#allocation13 + $0xf0] sm:$0xf0]  ;;  %v9621_v58 = vld [vmem:[#allocation13 + $0x90] sm:$0xf]  ;;  %v880_v4 = vld [vmem:[%s16831_s25 + $0x8] sm:$0xff] }
 0x1e0   :  { %v9658_v57 = vor.u32 %v14021_v42, %v9655_v38  ;;  %v14017_v59 = vld [vmem:[#allocation13 + $0xac] sm:$0xf0]  ;;  %v13811_v37 = vld [vmem:[#allocation11 + $0x444] sm:$0xf]  ;;  %v13791_v42 = vld [vmem:[#allocation11 + $0x39c] sm:$0xf0] }
 0x1e1   :  { %v838_v24 = vmul.f32 %v14814_v45, %v837_v43  ;;  %v877_v2 = vadd.f32 %v876_v9, %v868_v5  ;;  %v10383_v43 = vld [vmem:[#allocation11 + $0x520] sm:$0xf0]  ;;  %v9626_v9 = vor.u32 %v14013_v60, %v9623_v35  ;;  %v13719_v60 = vld [vmem:[#allocation11 + $0x15c] sm:$0xf0]  ;;  %v13720_v15 = vld [vmem:[#allocation11 + $0x164] sm:$0xf0] }
 0x1e2   :  { %v10386_v61 = vor.u32 %v13835_v54, %v10383_v43  ;;  %v10095_v5 = vld [vmem:[#allocation11 + $0x2e0] sm:$0xf0]  ;;  %v13800_v54 = vld [vmem:[#allocation11 + $0x3e4] sm:$0xf0]  ;;  %v10157_v35 = vld [vmem:[#allocation11 + $0x340] sm:$0xf] }
 0x1e3   :  { %v839_v6 = vadd.f32 %v14814_v45, %v838_v24  ;;  %v10130_v24 = vor.u32 %v13771_v52, %v10127_v53  ;;  %v10098_v11 = vor.u32 %v13763_v62, %v10095_v5  ;;  %v10287_v27 = vld [vmem:[#allocation11 + $0x460] sm:$0xf0]  ;;  %v13736_v52 = vld [vmem:[#allocation11 + $0x1e4] sm:$0xf0] }
 0x1e4   :  { %v13739_v44 = vld [vmem:[#allocation11 + $0x204] sm:$0xf]  ;;  %v10229_v53 = vld [vmem:[#allocation11 + $0x3c8] sm:$0xf] }
 0x1e5   :  { %v843_v0 = vsel %vm842_vm3, %v14814_v45, %v839_v6  ;;  %v13843_v45 = vld [vmem:[#allocation11 + $0x544] sm:$0xf]  ;;  %v10230_v62 = vor.u32 %v13800_v54, %v10229_v53  ;;  %v13728_v5 = vld [vmem:[#allocation11 + $0x1a4] sm:$0xf0] }
 0x1e6   :  { %v848_v34 = vsel %vm845_vm4, %v847_v7, %v843_v0  ;;  %v10418_v51 = vor.u32 %v13843_v45, %v10415_v33  ;;  %v13827_v6 = vld [vmem:[#allocation11 + $0x4c4] sm:$0xf]  ;;  %v9589_v0 = vld [vmem:[#allocation13 + $0x50] sm:$0xf]  ;;  %v9933_v33 = vld [vmem:[#allocation11 + $0x180] sm:$0xf] }
 0x1e7   :  { %v869_v18 = vmul.f32 %v859_v8, %v848_v34  ;;  %v10351_v7 = vld [vmem:[#allocation11 + $0x4e0] sm:$0xf0]  ;;  %v9622_v8 = vor.u32 %v14017_v59, %v9621_v58  ;;  %v14009_v34 = vld [vmem:[#allocation13 + $0x6c] sm:$0xf0]  ;;  %v9934_v43 = vor.u32 %v13727_v46, %v9933_v33  ;;  %v10165_v21 = vld [vmem:[#allocation11 + $0x348] sm:$0xf] }
 0x1e8   :  { %v9590_v22 = vor.u32 %v14009_v34, %v9589_v0  ;;  %v9999_v45 = vld [vmem:[#allocation11 + $0x220] sm:$0xf0]  ;;  %v9869_v0 = vld [vmem:[#allocation11 + $0x100] sm:$0xf]  ;;  %v10101_v33 = vld [vmem:[#allocation11 + $0x2c8] sm:$0xf] }
 0x1e9   :  { %v878_v12 = vadd.f32 %v877_v2, %v869_v18  ;;  %v14005_v2 = vld [vmem:[#allocation13 + $0x54] sm:$0xf]  ;;  %v13803_v38 = vld [vmem:[#allocation11 + $0x404] sm:$0xf]  ;;  %v10002_v58 = vor.u32 %v13739_v44, %v9999_v45  ;;  %v13711_v34 = vld [vmem:[#allocation11 + $0x11c] sm:$0xf0] }
 0x1ea   :  { %v9591_v18 = vld [vmem:[#allocation13 + $0x70] sm:$0xf0]  ;;  %v9845_v44 = vld [vmem:[#allocation11 + $0xc8] sm:$0xf] }
 0x1eb   :  { %v15930_v39 = vpack.c.bf16 %v878_v12, %v878_v12  ;;  %v10354_v12 = vor.u32 %v13827_v6, %v10351_v7  ;;  %v10197_v6 = vld [vmem:[#allocation11 + $0x388] sm:$0xf] }
 0x1ec   :  { %v13792_v7 = vld [vmem:[#allocation11 + $0x3a4] sm:$0xf0] }
 0x1ed   :  { %9731 = vmatmul.msk.bf16.vlgmr.msra.gmra.mxu2 %vm1522_vm5, %v15930_v39  ;;  %9732 = vmatmul.msk.bf16.vlgmr.msra.gmra.mxu3 %vm1522_vm5, %v15930_v39  ;;  %v10198_v20 = vor.u32 %v13792_v7, %v10197_v6  ;;  %v13704_v45 = vld [vmem:[#allocation11 + $0xe4] sm:$0xf0]  ;;  %v13731_v6 = vld [vmem:[#allocation11 + $0x1c4] sm:$0xf] }
 0x1ee   :  { %1604 = vmatpush.bf16.msra.mxu2 %v1540_v23  ;;  %1617 = vmatpush.bf16.msra.mxu3 %v1543_v16  ;;  %v9594_v23 = vor.u32 %v14005_v2, %v9591_v18  ;;  %v9557_v16 = vld [vmem:[#allocation13 + $0x10] sm:$0xf]  ;;  %v10125_v2 = vld [vmem:[#allocation11 + $0x300] sm:$0xf]  ;;  %v9813_v53 = vld [vmem:[#allocation11 + $0x88] sm:$0xf] }
 0x1ef   :  { %9737 = vmatmul.msk.bf16.vlgmr.msrb.gmra.mxu0 %vm1522_vm5, %v15930_v39  ;;  %9738 = vmatmul.msk.bf16.vlgmr.msrb.gmra.mxu1 %vm1522_vm5, %v15930_v39  ;;  %v9558_v40 = vor.u32 %v14001_v26, %v9557_v16  ;;  %v13775_v18 = vld [vmem:[#allocation11 + $0x31c] sm:$0xf0]  ;;  %v13696_v54 = vld [vmem:[#allocation11 + $0xa4] sm:$0xf0]  ;;  %v9967_v7 = vld [vmem:[#allocation11 + $0x1e0] sm:$0xf0] }
 0x1f0   :  { %3333 = vmatpush.bf16.msrb.mxu0 %v10226_v28  ;;  %3346 = vmatpush.bf16.msrb.mxu1 %v10482_v29  ;;  %v9559_v28 = vld [vmem:[#allocation13 + $0x30] sm:$0xf0]  ;;  %v13747_v29 = vld [vmem:[#allocation11 + $0x244] sm:$0xf]  ;;  %v10126_v16 = vor.u32 %v13775_v18, %v10125_v2  ;;  %v9837_v26 = vld [vmem:[#allocation11 + $0xc0] sm:$0xf] }
 0x1f1   :  { %v879_v18 = vld [vmem:[%s16831_s25] sm:$0xff] }
 0x1f2   :  { %1605 = vmatpush.bf16.msra.mxu2 %v9718_v32  ;;  %1618 = vmatpush.bf16.msra.mxu3 %v9722_v17  ;;  %v10221_v32 = vld [vmem:[#allocation11 + $0x3c0] sm:$0xf] }
 0x1f3   :  { %v13799_v17 = vld [vmem:[#allocation11 + $0x3dc] sm:$0xf0] }
 0x1f4   :  { %3334 = vmatpush.bf16.msrb.mxu0 %v10194_v41  ;;  %3347 = vmatpush.bf16.msrb.mxu1 %v10450_v50  ;;  %v9562_v41 = vor.u32 %v13997_v25, %v9559_v28  ;;  %v9966_v50 = vor.u32 %v13735_v55, %v9965_v63  ;;  %v10222_v47 = vor.u32 %v13799_v17, %v10221_v32  ;;  %v13703_v25 = vld [vmem:[#allocation11 + $0xdc] sm:$0xf0]  ;;  %v10133_v55 = vld [vmem:[#allocation11 + $0x308] sm:$0xf] }
 0x1f5   :  { %v10093_v28 = vld [vmem:[#allocation11 + $0x2c0] sm:$0xf]  ;;  %v9910_v63 = vor.u32 %v13720_v15, %v9909_v13  ;;  %v13776_v32 = vld [vmem:[#allocation11 + $0x324] sm:$0xf0]  ;;  %v9838_v17 = vor.u32 %v13703_v25, %v9837_v26  ;;  %v13723_v26 = vld [vmem:[#allocation11 + $0x184] sm:$0xf] }
 0x1f6   :  { %1606 = vmatpush.bf16.msra.mxu2 %v9686_v1  ;;  %1619 = vmatpush.bf16.msra.mxu3 %v9690_v14  ;;  %v10034_v1 = vor.u32 %v13747_v29, %v10031_v36  ;;  %v10290_v14 = vor.u32 %v13811_v37, %v10287_v27  ;;  %v13767_v29 = vld [vmem:[#allocation11 + $0x2dc] sm:$0xf0]  ;;  %v9749_v13 = vld [vmem:[#allocation11 + $0x8] sm:$0xf]  ;;  %v9935_v25 = vld [vmem:[#allocation11 + $0x1a0] sm:$0xf0] }
 0x1f7   :  { %v10094_v36 = vor.u32 %v13767_v29, %v10093_v28  ;;  %v9805_v37 = vld [vmem:[#allocation11 + $0x80] sm:$0xf]  ;;  %v13680_v15 = vld [vmem:[#allocation11 + $0x24] sm:$0xf0]  ;;  %v15972_v28 = vpack.c.bf16 %v879_v18, %v879_v18 }
 0x1f8   :  { %3335 = vmatpush.bf16.msrb.mxu0 %v10162_v49  ;;  %3348 = vmatpush.bf16.msrb.mxu1 %v10418_v51  ;;  %v10255_v49 = vld [vmem:[#allocation11 + $0x420] sm:$0xf0]  ;;  %v9973_v51 = vld [vmem:[#allocation11 + $0x1c8] sm:$0xf]  ;;  %v13695_v27 = vld [vmem:[#allocation11 + $0x9c] sm:$0xf0] }
 0x1f9   :  { %v10258_v59 = vor.u32 %v13803_v38, %v10255_v49  ;;  %v10029_v38 = vld [vmem:[#allocation11 + $0x240] sm:$0xf]  ;;  %v10005_v29 = vld [vmem:[#allocation11 + $0x208] sm:$0xf] }
 0x1fa   :  { %1607 = vmatpush.bf16.msra.mxu2 %v9654_v56  ;;  %1620 = vmatpush.bf16.msra.mxu3 %v9658_v57  ;;  %v10190_v56 = vor.u32 %v13791_v42, %v10189_v19  ;;  %v9901_v57 = vld [vmem:[#allocation11 + $0x140] sm:$0xf] }
 0x1fb   :  { %v9773_v19 = vld [vmem:[#allocation11 + $0x40] sm:$0xf] }
 0x1fc   :  { %3336 = vmatpush.bf16.msrb.mxu0 %v10130_v24  ;;  %3349 = vmatpush.bf16.msrb.mxu1 %v10386_v61  ;;  %v13783_v24 = vld [vmem:[#allocation11 + $0x35c] sm:$0xf0]  ;;  %v9974_v61 = vor.u32 %v13736_v52, %v9973_v51  ;;  %v9846_v51 = vor.u32 %v13704_v45, %v9845_v44  ;;  %v9903_v44 = vld [vmem:[#allocation11 + $0x160] sm:$0xf0]  ;;  %v10965_v45 = vld [vmem:[#allocation11 + $0x988] sm:$0xf] }
 0x1fd   :  { %9733 = vmatmul.msk.bf16.vlgmr.msrb.gmra.mxu2 %vm1522_vm5, %v15930_v39  ;;  %9734 = vmatmul.msk.bf16.vlgmr.msrb.gmra.mxu3 %vm1522_vm5, %v15930_v39  ;;  %v13687_v42 = vld [vmem:[#allocation11 + $0x5c] sm:$0xf0] }
 0x1fe   :  { %1608 = vmatpush.bf16.msra.mxu2 %v9622_v8  ;;  %1621 = vmatpush.bf16.msra.mxu3 %v9626_v9  ;;  %v9902_v8 = vor.u32 %v13719_v60, %v9901_v57  ;;  %v10158_v9 = vor.u32 %v13783_v24, %v10157_v35  ;;  %v13751_v49 = vld [vmem:[#allocation11 + $0x25c] sm:$0xf0]  ;;  %v9774_v57 = vor.u32 %v13687_v42, %v9773_v19 }
 0x1ff   :  { %3289 = vmatmul.bf16.vlgmr.msra.gmra.mxu0 %v15948_v10  ;;  %3302 = vmatmul.bf16.vlgmr.msra.gmra.mxu1 %v15950_v48  ;;  %v13679_v60 = vld [vmem:[#allocation11 + $0x1c] sm:$0xf0] }
 0x200   :  { %3337 = vmatpush.bf16.msrb.mxu0 %v10098_v11  ;;  %3350 = vmatpush.bf16.msrb.mxu1 %v10354_v12  ;;  %v15961_v11 = vpack.c.bf16 %v880_v4, %v880_v4  ;;  %v9942_v12 = vor.u32 %v13728_v5, %v9941_v3  ;;  %v9997_v35 = vld [vmem:[#allocation11 + $0x200] sm:$0xf]  ;;  %v9814_v3 = vor.u32 %v13696_v54, %v9813_v53  ;;  %v9871_v53 = vld [vmem:[#allocation11 + $0x120] sm:$0xf0]  ;;  %v10933_v54 = vld [vmem:[#allocation11 + $0x948] sm:$0xf] }
 0x201   :  { %v13743_v24 = vld [vmem:[#allocation11 + $0x21c] sm:$0xf0] }
 0x202   :  { %1609 = vmatpush.bf16.msra.mxu2 %v9590_v22  ;;  %1622 = vmatpush.bf16.msra.mxu3 %v9594_v23  ;;  %v13784_v22 = vld [vmem:[#allocation11 + $0x364] sm:$0xf0]  ;;  %v9870_v23 = vor.u32 %v13711_v34, %v9869_v0  ;;  %v13991_v5 = vld [vmem:[#allocation11 + $0x9dc] sm:$0xf0]  ;;  %v9998_v2 = vor.u32 %v13743_v24, %v9997_v35 }
 0x203   :  { %v13752_v0 = vld [vmem:[#allocation11 + $0x264] sm:$0xf0]  ;;  %v10893_v42 = vld [vmem:[#allocation11 + $0x900] sm:$0xf] }
 0x204   :  { %3338 = vmatpush.bf16.msrb.mxu0 %v10066_v30  ;;  %3351 = vmatpush.bf16.msrb.mxu1 %v10322_v31  ;;  %v10166_v30 = vor.u32 %v13784_v22, %v10165_v21  ;;  %v13712_v31 = vld [vmem:[#allocation11 + $0x124] sm:$0xf0]  ;;  %v10957_v21 = vld [vmem:[#allocation11 + $0x980] sm:$0xf] }
 0x205   :  { %v13959_v35 = vld [vmem:[#allocation11 + $0x8dc] sm:$0xf0] }
 0x206   :  { %1610 = vmatpush.bf16.msra.mxu2 %v9558_v40  ;;  %1623 = vmatpush.bf16.msra.mxu3 %v9562_v41  ;;  %v10061_v40 = vld [vmem:[#allocation11 + $0x280] sm:$0xf] }
 0x207   :  { %v13759_v41 = vld [vmem:[#allocation11 + $0x29c] sm:$0xf0] }
 0x208   :  { %3339 = vmatpush.bf16.msrb.mxu0 %v10034_v1  ;;  %3352 = vmatpush.bf16.msrb.mxu1 %v10290_v14  ;;  %v13768_v1 = vld [vmem:[#allocation11 + $0x2e4] sm:$0xf0]  ;;  %v9806_v14 = vor.u32 %v13695_v27, %v9805_v37  ;;  %v10062_v46 = vor.u32 %v13759_v41, %v10061_v40  ;;  %v10925_v27 = vld [vmem:[#allocation11 + $0x940] sm:$0xf] }
 0x209   :  { %v10102_v52 = vor.u32 %v13768_v1, %v10101_v33  ;;  %v13975_v40 = vld [vmem:[#allocation11 + $0x95c] sm:$0xf0]  ;;  %v13984_v33 = vld [vmem:[#allocation11 + $0x9a4] sm:$0xf0]  ;;  %v13724_v1 = vld [vmem:[#allocation11 + $0x18c] sm:$0xf] }
 0x20a   :  { %3255 = vmatpush.bf16.msrb.mxu2 %v9966_v50  ;;  %3268 = vmatpush.bf16.msrb.mxu3 %v10222_v47  ;;  %v10134_v47 = vor.u32 %v13776_v32, %v10133_v55  ;;  %v9975_v55 = vld [vmem:[#allocation11 + $0x1e8] sm:$0xf0] }
 0x20c   :  { %3340 = vmatpush.bf16.msrb.mxu0 %v10002_v58  ;;  %3353 = vmatpush.bf16.msrb.mxu1 %v10258_v59  ;;  %v10030_v58 = vor.u32 %v13751_v49, %v10029_v38  ;;  %v9741_v59 = vld [vmem:[#allocation11] sm:$0xf]  ;;  %v10966_v49 = vor.u32 %v13984_v33, %v10965_v45  ;;  %v10805_v45 = vld [vmem:[#allocation11 + $0x848] sm:$0xf]  ;;  %v13923_v33 = vld [vmem:[#allocation11 + $0x7c4] sm:$0xf] }
 0x20d   :  { %9735 = vmatmul.msk.bf16.vlgmr.msra.gmra.mxu2 %vm1522_vm5, %v15930_v39  ;;  %9736 = vmatmul.msk.bf16.vlgmr.msra.gmra.mxu3 %vm1522_vm5, %v15930_v39  ;;  %v9877_v39 = vld [vmem:[#allocation11 + $0x108] sm:$0xf]  ;;  %v9742_v34 = vor.u32 %v13679_v60, %v9741_v59  ;;  %v13967_v38 = vld [vmem:[#allocation11 + $0x91c] sm:$0xf0] }
 0x20e   :  { %3256 = vmatpush.bf16.msrb.mxu2 %v9934_v43  ;;  %3269 = vmatpush.bf16.msrb.mxu3 %v10190_v56  ;;  %v9878_v50 = vor.u32 %v13712_v31, %v9877_v39  ;;  %v10069_v43 = vld [vmem:[#allocation11 + $0x288] sm:$0xf]  ;;  %v13732_v31 = vld [vmem:[#allocation11 + $0x1cc] sm:$0xf]  ;;  %v10861_v60 = vld [vmem:[#allocation11 + $0x8c0] sm:$0xf] }
 0x20f   :  { %3341 = vmatmul.bf16.vlgmr.msrb.gmra.mxu0 %v15961_v11  ;;  %3354 = vmatmul.bf16.vlgmr.msrb.gmra.mxu1 %v15948_v10  ;;  %v13760_v56 = vld [vmem:[#allocation11 + $0x2a4] sm:$0xf0] }
 0x210   :  { %3385 = vmatpush.bf16.msra.mxu0 %v9974_v61  ;;  %3398 = vmatpush.bf16.msra.mxu1 %v10230_v62  ;;  %v9781_v61 = vld [vmem:[#allocation11 + $0x48] sm:$0xf]  ;;  %v10989_v62 = vld [vmem:[#allocation11 + $0x9c0] sm:$0xf]  ;;  %v10070_v4 = vor.u32 %v13760_v56, %v10069_v43  ;;  %v13716_v56 = vld [vmem:[#allocation11 + $0x14c] sm:$0xf] }
 0x211   :  { %v13992_v39 = vld [vmem:[#allocation11 + $0x9e4] sm:$0xf0] }
 0x212   :  { %3257 = vmatpush.bf16.msrb.mxu2 %v9902_v8  ;;  %3270 = vmatpush.bf16.msrb.mxu3 %v10158_v9  ;;  %v13688_v8 = vld [vmem:[#allocation11 + $0x64] sm:$0xf0] }
 0x213   :  { %v10037_v9 = vld [vmem:[#allocation11 + $0x248] sm:$0xf]  ;;  %v9782_v22 = vor.u32 %v13688_v8, %v9781_v61  ;;  %v10862_v8 = vor.u32 %v13959_v35, %v10861_v60 }
 0x214   :  { %3386 = vmatpush.bf16.msra.mxu0 %v9942_v12  ;;  %3399 = vmatpush.bf16.msra.mxu1 %v10198_v20  ;;  %v10990_v12 = vor.u32 %v13991_v5, %v10989_v62  ;;  %v9970_v20 = vor.u32 %v13731_v6, %v9967_v7  ;;  %v13976_v43 = vld [vmem:[#allocation11 + $0x964] sm:$0xf0]  ;;  %v13699_v62 = vld [vmem:[#allocation11 + $0xc4] sm:$0xf]  ;;  %v13708_v6 = vld [vmem:[#allocation11 + $0x10c] sm:$0xf] }
 0x215   :  { %v10934_v24 = vor.u32 %v13976_v43, %v10933_v54  ;;  %v13968_v5 = vld [vmem:[#allocation11 + $0x924] sm:$0xf0]  ;;  %v9879_v7 = vld [vmem:[#allocation11 + $0x128] sm:$0xf0] }
 0x216   :  { %3258 = vmatpush.bf16.msrb.mxu2 %v9870_v23  ;;  %3271 = vmatpush.bf16.msrb.mxu3 %v10126_v16  ;;  %v10038_v23 = vor.u32 %v13752_v0, %v10037_v9  ;;  %v13983_v16 = vld [vmem:[#allocation11 + $0x99c] sm:$0xf0]  ;;  %v9882_v18 = vor.u32 %v13708_v6, %v9879_v7  ;;  %v10773_v54 = vld [vmem:[#allocation11 + $0x808] sm:$0xf]  ;;  %v13988_v7 = vld [vmem:[#allocation11 + $0x9cc] sm:$0xf] }
 0x217   :  { %v10958_v32 = vor.u32 %v13983_v16, %v10957_v21  ;;  %v10829_v0 = vld [vmem:[#allocation11 + $0x880] sm:$0xf]  ;;  %v13700_v21 = vld [vmem:[#allocation11 + $0xcc] sm:$0xf] }
 0x218   :  { %3387 = vmatpush.bf16.msra.mxu0 %v9910_v63  ;;  %3400 = vmatpush.bf16.msra.mxu1 %v10166_v30  ;;  %v13744_v63 = vld [vmem:[#allocation11 + $0x224] sm:$0xf0] }
 0x219   :  { %v10997_v30 = vld [vmem:[#allocation11 + $0x9c8] sm:$0xf]  ;;  %v10006_v37 = vor.u32 %v13744_v63, %v10005_v29 }
 0x21a   :  { %3259 = vmatpush.bf16.msrb.mxu2 %v9838_v17  ;;  %3272 = vmatpush.bf16.msrb.mxu3 %v10094_v36  ;;  %v9938_v17 = vor.u32 %v13723_v26, %v9935_v25  ;;  %v9750_v36 = vor.u32 %v13680_v15, %v9749_v13  ;;  %v10998_v41 = vor.u32 %v13992_v39, %v10997_v30  ;;  %v10869_v13 = vld [vmem:[#allocation11 + $0x8c8] sm:$0xf]  ;;  %v10797_v26 = vld [vmem:[#allocation11 + $0x840] sm:$0xf]  ;;  %v13683_v30 = vld [vmem:[#allocation11 + $0x44] sm:$0xf] }
 0x21b   :  { %v13960_v15 = vld [vmem:[#allocation11 + $0x8e4] sm:$0xf0]  ;;  %v13943_v25 = vld [vmem:[#allocation11 + $0x85c] sm:$0xf0]  ;;  %v9775_v39 = vld [vmem:[#allocation11 + $0x60] sm:$0xf0] }
 0x21c   :  { %3388 = vmatpush.bf16.msra.mxu0 %v9878_v50  ;;  %3401 = vmatpush.bf16.msra.mxu1 %v10134_v47  ;;  %v9978_v50 = vor.u32 %v13732_v31, %v9975_v55  ;;  %v13715_v47 = vld [vmem:[#allocation11 + $0x144] sm:$0xf]  ;;  %v10870_v29 = vor.u32 %v13960_v15, %v10869_v13  ;;  %v10837_v31 = vld [vmem:[#allocation11 + $0x888] sm:$0xf] }
 0x21d   :  { %v9906_v19 = vor.u32 %v13715_v47, %v9903_v44  ;;  %v13952_v55 = vld [vmem:[#allocation11 + $0x8a4] sm:$0xf0]  ;;  %v10927_v15 = vld [vmem:[#allocation11 + $0x960] sm:$0xf0] }
 0x21e   :  { %3260 = vmatpush.bf16.msrb.mxu2 %v9806_v14  ;;  %3273 = vmatpush.bf16.msrb.mxu3 %v10062_v46  ;;  %v9943_v14 = vld [vmem:[#allocation11 + $0x1a8] sm:$0xf0]  ;;  %v10926_v46 = vor.u32 %v13975_v40, %v10925_v27  ;;  %v9778_v27 = vor.u32 %v13683_v30, %v9775_v39  ;;  %v13935_v40 = vld [vmem:[#allocation11 + $0x81c] sm:$0xf0]  ;;  %v10838_v47 = vor.u32 %v13952_v55, %v10837_v31  ;;  %v13963_v39 = vld [vmem:[#allocation11 + $0x904] sm:$0xf] }
 0x21f   :  { %v10895_v55 = vld [vmem:[#allocation11 + $0x920] sm:$0xf0] }
 0x220   :  { %3389 = vmatpush.bf16.msra.mxu0 %v9846_v51  ;;  %3402 = vmatpush.bf16.msra.mxu1 %v10102_v52  ;;  %v9946_v51 = vor.u32 %v13724_v1, %v9943_v14  ;;  %v13707_v52 = vld [vmem:[#allocation11 + $0x104] sm:$0xf]  ;;  %v13944_v14 = vld [vmem:[#allocation11 + $0x864] sm:$0xf0] }
 0x221   :  { %v9874_v59 = vor.u32 %v13707_v52, %v9871_v53  ;;  %v10735_v1 = vld [vmem:[#allocation11 + $0x7e0] sm:$0xf0]  ;;  %v10806_v43 = vor.u32 %v13944_v14, %v10805_v45  ;;  %v10647_v14 = vld [vmem:[#allocation11 + $0x728] sm:$0xf0] }
 0x222   :  { %3261 = vmatpush.bf16.msrb.mxu2 %v9774_v57  ;;  %3274 = vmatpush.bf16.msrb.mxu3 %v10030_v58  ;;  %v9911_v57 = vld [vmem:[#allocation11 + $0x168] sm:$0xf0]  ;;  %v10894_v58 = vor.u32 %v13967_v38, %v10893_v42  ;;  %v13987_v38 = vld [vmem:[#allocation11 + $0x9c4] sm:$0xf]  ;;  %v10738_v53 = vor.u32 %v13923_v33, %v10735_v1 }
 0x223   :  { %v9914_v61 = vor.u32 %v13716_v56, %v9911_v57  ;;  %v13936_v57 = vld [vmem:[#allocation11 + $0x824] sm:$0xf0]  ;;  %v10863_v33 = vld [vmem:[#allocation11 + $0x8e0] sm:$0xf0]  ;;  %v13900_v1 = vld [vmem:[#allocation11 + $0x70c] sm:$0xf] }
 0x224   :  { %3390 = vmatpush.bf16.msra.mxu0 %v9814_v3  ;;  %3403 = vmatpush.bf16.msra.mxu1 %v10070_v4  ;;  %v9839_v3 = vld [vmem:[#allocation11 + $0xe0] sm:$0xf0]  ;;  %v10901_v4 = vld [vmem:[#allocation11 + $0x908] sm:$0xf] }
 0x225   :  { %v9842_v9 = vor.u32 %v13699_v62, %v9839_v3  ;;  %v13979_v62 = vld [vmem:[#allocation11 + $0x984] sm:$0xf] }
 0x226   :  { %3262 = vmatpush.bf16.msrb.mxu2 %v9742_v34  ;;  %3275 = vmatpush.bf16.msrb.mxu3 %v9998_v2  ;;  %v13951_v34 = vld [vmem:[#allocation11 + $0x89c] sm:$0xf0]  ;;  %v10902_v2 = vor.u32 %v13968_v5, %v10901_v4  ;;  %v10959_v3 = vld [vmem:[#allocation11 + $0x9a0] sm:$0xf0]  ;;  %v13924_v4 = vld [vmem:[#allocation11 + $0x7cc] sm:$0xf] }
 0x227   :  { %v10743_v5 = vld [vmem:[#allocation11 + $0x7e8] sm:$0xf0] }
 0x228   :  { %3391 = vmatpush.bf16.msra.mxu0 %v9782_v22  ;;  %3404 = vmatpush.bf16.msra.mxu1 %v10038_v23  ;;  %v9847_v22 = vld [vmem:[#allocation11 + $0xe8] sm:$0xf0]  ;;  %v10830_v23 = vor.u32 %v13951_v34, %v10829_v0  ;;  %v13907_v34 = vld [vmem:[#allocation11 + $0x744] sm:$0xf] }
 0x229   :  { %3263 = vmatmul.bf16.vlgmr.msrb.gmra.mxu2 %v15972_v28  ;;  %3276 = vmatmul.bf16.vlgmr.msrb.gmra.mxu3 %v15961_v11  ;;  %v9850_v63 = vor.u32 %v13700_v21, %v9847_v22  ;;  %v13916_v21 = vld [vmem:[#allocation11 + $0x78c] sm:$0xf] }
 0x22a   :  { %3307 = vmatpush.bf16.msra.mxu2 %v10990_v12  ;;  %3320 = vmatpush.bf16.msra.mxu3 %v9970_v20  ;;  %v13691_v12 = vld [vmem:[#allocation11 + $0x84] sm:$0xf]  ;;  %v10711_v22 = vld [vmem:[#allocation11 + $0x7a8] sm:$0xf0] }
 0x22b   :  { %v9807_v20 = vld [vmem:[#allocation11 + $0xa0] sm:$0xf0]  ;;  %v10714_v30 = vor.u32 %v13916_v21, %v10711_v22  ;;  %v10485_v21 = vld [vmem:[#allocation11 + $0x5c8] sm:$0xf] }
 0x22c   :  { %3392 = vmatpush.bf16.msra.mxu0 %v9750_v36  ;;  %3405 = vmatpush.bf16.msra.mxu1 %v10006_v37  ;;  %v9810_v16 = vor.u32 %v13691_v12, %v9807_v20  ;;  %v10798_v36 = vor.u32 %v13943_v25, %v10797_v26  ;;  %v10765_v37 = vld [vmem:[#allocation11 + $0x800] sm:$0xf]  ;;  %v10746_v12 = vor.u32 %v13924_v4, %v10743_v5  ;;  %v13971_v20 = vld [vmem:[#allocation11 + $0x944] sm:$0xf]  ;;  %v10967_v26 = vld [vmem:[#allocation11 + $0x9a8] sm:$0xf0] }
 0x22d   :  { %v10766_v42 = vor.u32 %v13935_v40, %v10765_v37  ;;  %v13899_v25 = vld [vmem:[#allocation11 + $0x704] sm:$0xf]  ;;  %v13972_v37 = vld [vmem:[#allocation11 + $0x94c] sm:$0xf]  ;;  %v13864_v22 = vld [vmem:[#allocation11 + $0x5e4] sm:$0xf0] }
 0x22e   :  { %3308 = vmatpush.bf16.msra.mxu2 %v10958_v32  ;;  %3321 = vmatpush.bf16.msra.mxu3 %v9938_v17  ;;  %v13692_v32 = vld [vmem:[#allocation11 + $0x8c] sm:$0xf]  ;;  %v13891_v40 = vld [vmem:[#allocation11 + $0x6c4] sm:$0xf] }
 0x22f   :  { %3393 = vmatmul.bf16.vlgmr.msra.gmra.mxu0 %v15972_v28  ;;  %3406 = vmatmul.bf16.vlgmr.msra.gmra.mxu1 %v15961_v11  ;;  %v9815_v17 = vld [vmem:[#allocation11 + $0xa8] sm:$0xf0]  ;;  %v13939_v4 = vld [vmem:[#allocation11 + $0x844] sm:$0xf] }
 0x230   :  { %3437 = vmatpush.bf16.msrb.mxu0 %v10998_v41  ;;  %3450 = vmatpush.bf16.msrb.mxu1 %v9978_v50  ;;  %v13675_v41 = vld [vmem:[#allocation11 + $0x4] sm:$0xf]  ;;  %v9818_v44 = vor.u32 %v13692_v32, %v9815_v17  ;;  %v13908_v32 = vld [vmem:[#allocation11 + $0x74c] sm:$0xf] }
 0x231   :  { %v9743_v50 = vld [vmem:[#allocation11 + $0x20] sm:$0xf0]  ;;  %v10679_v17 = vld [vmem:[#allocation11 + $0x768] sm:$0xf0] }
 0x232   :  { %3309 = vmatpush.bf16.msra.mxu2 %v10926_v46  ;;  %3322 = vmatpush.bf16.msra.mxu3 %v9906_v19  ;;  %v13684_v46 = vld [vmem:[#allocation11 + $0x4c] sm:$0xf]  ;;  %v9746_v52 = vor.u32 %v13675_v41, %v9743_v50  ;;  %v10607_v41 = vld [vmem:[#allocation11 + $0x6e0] sm:$0xf0]  ;;  %v10898_v50 = vor.u32 %v13963_v39, %v10895_v55  ;;  %v13928_v39 = vld [vmem:[#allocation11 + $0x7e4] sm:$0xf0] }
 0x233   :  { %v9783_v19 = vld [vmem:[#allocation11 + $0x68] sm:$0xf0] }
 0x234   :  { %3438 = vmatpush.bf16.msrb.mxu0 %v10966_v49  ;;  %3451 = vmatpush.bf16.msrb.mxu1 %v9946_v51  ;;  %v10991_v49 = vld [vmem:[#allocation11 + $0x9e0] sm:$0xf0]  ;;  %v883_v51 = vld [vmem:[%s16831_s25 + $0x20] sm:$0xff]  ;;  %v9786_v56 = vor.u32 %v13684_v46, %v9783_v19  ;;  %v10610_v46 = vor.u32 %v13891_v40, %v10607_v41  ;;  %v13964_v19 = vld [vmem:[#allocation11 + $0x90c] sm:$0xf] }
 0x235   :  { %v10994_v60 = vor.u32 %v13987_v38, %v10991_v49  ;;  %v15981_v35 = vpack.c.bf16 %v883_v51, %v883_v51  ;;  %v13883_v38 = vld [vmem:[#allocation11 + $0x684] sm:$0xf]  ;;  %v10519_v41 = vld [vmem:[#allocation11 + $0x628] sm:$0xf0] }
 0x236   :  { %3310 = vmatpush.bf16.msra.mxu2 %v10894_v58  ;;  %3323 = vmatpush.bf16.msra.mxu3 %v9874_v59  ;;  %v13915_v58 = vld [vmem:[#allocation11 + $0x784] sm:$0xf] }
 0x237   :  { %v10703_v59 = vld [vmem:[#allocation11 + $0x7a0] sm:$0xf0] }
 0x238   :  { %3439 = vmatpush.bf16.msrb.mxu0 %v10934_v24  ;;  %3452 = vmatpush.bf16.msrb.mxu1 %v9914_v61  ;;  %v13676_v24 = vld [vmem:[#allocation11 + $0xc] sm:$0xf]  ;;  %v10706_v6 = vor.u32 %v13915_v58, %v10703_v59  ;;  %v10575_v49 = vld [vmem:[#allocation11 + $0x6a0] sm:$0xf0] }
 0x239   :  { %v9751_v61 = vld [vmem:[#allocation11 + $0x28] sm:$0xf0]  ;;  %v10578_v58 = vor.u32 %v13883_v38, %v10575_v49  ;;  %v10421_v38 = vld [vmem:[#allocation11 + $0x548] sm:$0xf] }
 0x23a   :  { %3311 = vmatpush.bf16.msra.mxu2 %v10862_v8  ;;  %3324 = vmatpush.bf16.msra.mxu3 %v9842_v9  ;;  %v10999_v8 = vld [vmem:[#allocation11 + $0x9e8] sm:$0xf0]  ;;  %v10774_v9 = vor.u32 %v13936_v57, %v10773_v54  ;;  %v9754_v0 = vor.u32 %v13676_v24, %v9751_v61  ;;  %v13875_v24 = vld [vmem:[#allocation11 + $0x644] sm:$0xf]  ;;  %v13848_v49 = vld [vmem:[#allocation11 + $0x564] sm:$0xf0] }
 0x23b   :  { %v11002_v13 = vor.u32 %v13988_v7, %v10999_v8  ;;  %v10615_v57 = vld [vmem:[#allocation11 + $0x6e8] sm:$0xf0]  ;;  %v10543_v61 = vld [vmem:[#allocation11 + $0x660] sm:$0xf0] }
 0x23c   :  { %3440 = vmatpush.bf16.msrb.mxu0 %v10902_v2  ;;  %3453 = vmatpush.bf16.msrb.mxu1 %v9882_v18  ;;  %v10671_v2 = vld [vmem:[#allocation11 + $0x760] sm:$0xf0]  ;;  %v10962_v18 = vor.u32 %v13979_v62, %v10959_v3  ;;  %v13956_v59 = vld [vmem:[#allocation11 + $0x8cc] sm:$0xf] }
 0x23d   :  { %v13884_v7 = vld [vmem:[#allocation11 + $0x68c] sm:$0xf] }
 0x23e   :  { %3312 = vmatpush.bf16.msra.mxu2 %v10830_v23  ;;  %3325 = vmatpush.bf16.msra.mxu3 %v9810_v16  ;;  %v10674_v23 = vor.u32 %v13907_v34, %v10671_v2  ;;  %v13980_v16 = vld [vmem:[#allocation11 + $0x98c] sm:$0xf]  ;;  %v13867_v2 = vld [vmem:[#allocation11 + $0x604] sm:$0xf] }
 0x23f   :  { %v10970_v31 = vor.u32 %v13980_v16, %v10967_v26  ;;  %v10583_v8 = vld [vmem:[#allocation11 + $0x6a8] sm:$0xf0] }
 0x240   :  { %3441 = vmatpush.bf16.msrb.mxu0 %v10870_v29  ;;  %3454 = vmatpush.bf16.msrb.mxu1 %v9850_v63  ;;  %v10639_v29 = vld [vmem:[#allocation11 + $0x720] sm:$0xf0]  ;;  %v10930_v63 = vor.u32 %v13971_v20, %v10927_v15  ;;  %v10839_v34 = vld [vmem:[#allocation11 + $0x8a8] sm:$0xf0] }
 0x241   :  { %v10767_v15 = vld [vmem:[#allocation11 + $0x820] sm:$0xf0]  ;;  %v13876_v16 = vld [vmem:[#allocation11 + $0x64c] sm:$0xf] }
 0x242   :  { %3313 = vmatpush.bf16.msra.mxu2 %v10798_v36  ;;  %3326 = vmatpush.bf16.msra.mxu3 %v9778_v27  ;;  %v10642_v36 = vor.u32 %v13899_v25, %v10639_v29  ;;  %v10935_v27 = vld [vmem:[#allocation11 + $0x968] sm:$0xf0] }
 0x243   :  { %v10938_v45 = vor.u32 %v13972_v37, %v10935_v27  ;;  %v10551_v26 = vld [vmem:[#allocation11 + $0x668] sm:$0xf0]  ;;  %v13856_v37 = vld [vmem:[#allocation11 + $0x5a4] sm:$0xf0] }
 0x244   :  { %3442 = vmatpush.bf16.msrb.mxu0 %v10838_v47  ;;  %3455 = vmatpush.bf16.msrb.mxu1 %v9818_v44  ;;  %v10682_v47 = vor.u32 %v13908_v32, %v10679_v17  ;;  %v13955_v44 = vld [vmem:[#allocation11 + $0x8c4] sm:$0xf]  ;;  %v13940_v25 = vld [vmem:[#allocation11 + $0x84c] sm:$0xf]  ;;  %v10554_v32 = vor.u32 %v13876_v16, %v10551_v26  ;;  %v13841_v26 = vld [vmem:[#allocation11 + $0x52c] sm:$0xf0] }
 0x245   :  { %v10866_v51 = vor.u32 %v13955_v44, %v10863_v33  ;;  %v13868_v17 = vld [vmem:[#allocation11 + $0x60c] sm:$0xf]  ;;  %v10709_v44 = vld [vmem:[#allocation11 + $0x788] sm:$0xf]  ;;  %v10493_v33 = vld [vmem:[#allocation11 + $0x5d0] sm:$0xf] }
 0x246   :  { %3314 = vmatpush.bf16.msra.mxu2 %v10766_v42  ;;  %3327 = vmatpush.bf16.msra.mxu3 %v9746_v52  ;;  %v10903_v42 = vld [vmem:[#allocation11 + $0x928] sm:$0xf0]  ;;  %v10650_v52 = vor.u32 %v13900_v1, %v10647_v14  ;;  %v13865_v14 = vld [vmem:[#allocation11 + $0x5ec] sm:$0xf0] }
 0x247   :  { %v10906_v54 = vor.u32 %v13964_v19, %v10903_v42  ;;  %v13929_v19 = vld [vmem:[#allocation11 + $0x7ec] sm:$0xf0]  ;;  %v10522_v42 = vor.u32 %v13868_v17, %v10519_v41 }
 0x248   :  { %3443 = vmatpush.bf16.msrb.mxu0 %v10806_v43  ;;  %3456 = vmatpush.bf16.msrb.mxu1 %v9786_v56  ;;  %v10831_v43 = vld [vmem:[#allocation11 + $0x8a0] sm:$0xf0]  ;;  %v13892_v56 = vld [vmem:[#allocation11 + $0x6cc] sm:$0xf]  ;;  %v13833_v41 = vld [vmem:[#allocation11 + $0x4ec] sm:$0xf0] }
 0x249   :  { %3315 = vmatmul.bf16.vlgmr.msra.gmra.mxu2 %v15981_v35  ;;  %3328 = vmatmul.bf16.vlgmr.msra.gmra.mxu3 %v15972_v28  ;;  %v10618_v3 = vor.u32 %v13892_v56, %v10615_v57  ;;  %v13912_v56 = vld [vmem:[#allocation11 + $0x764] sm:$0xf0]  ;;  %v10461_v57 = vld [vmem:[#allocation11 + $0x590] sm:$0xf] }
 0x24a   :  { %3359 = vmatpush.bf16.msrb.mxu2 %v10738_v53  ;;  %3372 = vmatpush.bf16.msrb.mxu3 %v10994_v60  ;;  %v13947_v53 = vld [vmem:[#allocation11 + $0x884] sm:$0xf]  ;;  %v10871_v60 = vld [vmem:[#allocation11 + $0x8e8] sm:$0xf0] }
 0x24b   :  { %v10834_v62 = vor.u32 %v13947_v53, %v10831_v43  ;;  %v10874_v5 = vor.u32 %v13956_v59, %v10871_v60  ;;  %v10494_v53 = vor.u32 %v13865_v14, %v10493_v33  ;;  %v10677_v43 = vld [vmem:[#allocation11 + $0x748] sm:$0xf]  ;;  %v13857_v59 = vld [vmem:[#allocation11 + $0x5ac] sm:$0xf0] }
 0x24c   :  { %3444 = vmatpush.bf16.msrb.mxu0 %v10774_v9  ;;  %3457 = vmatpush.bf16.msrb.mxu1 %v9754_v0  ;;  %v10546_v9 = vor.u32 %v13875_v24, %v10543_v61  ;;  %v13948_v0 = vld [vmem:[#allocation11 + $0x88c] sm:$0xf]  ;;  %v10717_v60 = vld [vmem:[#allocation11 + $0x790] sm:$0xf]  ;;  %v10389_v61 = vld [vmem:[#allocation11 + $0x508] sm:$0xf] }
 0x24d   :  { %v13921_v24 = vld [vmem:[#allocation11 + $0x7ac] sm:$0xf0] }
 0x24e   :  { %3360 = vmatpush.bf16.msrb.mxu2 %v10706_v6  ;;  %3373 = vmatpush.bf16.msrb.mxu3 %v10962_v18  ;;  %v10799_v6 = vld [vmem:[#allocation11 + $0x860] sm:$0xf0] }
 0x24f   :  { %3458 = vmatmul.bf16.vlgmr.msrb.gmra.mxu1 %v15972_v28  ;;  %3445 = vmatmul.bf16.vlgmr.msrb.gmra.mxu0 %v15981_v35  ;;  %v10511_v18 = vld [vmem:[#allocation11 + $0x620] sm:$0xf0]  ;;  %v10802_v20 = vor.u32 %v13939_v4, %v10799_v6  ;;  %v10462_v4 = vor.u32 %v13857_v59, %v10461_v57  ;;  %v10645_v6 = vld [vmem:[#allocation11 + $0x708] sm:$0xf] }
 0x250   :  { %3489 = vmatpush.bf16.msra.mxu0 %v10746_v12  ;;  %3502 = vmatpush.bf16.msra.mxu1 %v11002_v13  ;;  %v13931_v12 = vld [vmem:[#allocation11 + $0x804] sm:$0xf]  ;;  %v10586_v13 = vor.u32 %v13884_v7, %v10583_v8  ;;  %v10514_v29 = vor.u32 %v13867_v2, %v10511_v18  ;;  %v13904_v7 = vld [vmem:[#allocation11 + $0x724] sm:$0xf0]  ;;  %v10429_v8 = vld [vmem:[#allocation11 + $0x550] sm:$0xf] }
 0x251   :  { %v10770_v55 = vor.u32 %v13931_v12, %v10767_v15  ;;  %v13913_v2 = vld [vmem:[#allocation11 + $0x76c] sm:$0xf0]  ;;  %v10357_v18 = vld [vmem:[#allocation11 + $0x4c8] sm:$0xf] }
 0x252   :  { %3361 = vmatpush.bf16.msrb.mxu2 %v10674_v23  ;;  %3374 = vmatpush.bf16.msrb.mxu3 %v10930_v63  ;;  %v10842_v23 = vor.u32 %v13948_v0, %v10839_v34  ;;  %v10807_v63 = vld [vmem:[#allocation11 + $0x868] sm:$0xf0]  ;;  %v13849_v0 = vld [vmem:[#allocation11 + $0x56c] sm:$0xf0]  ;;  %v13832_v12 = vld [vmem:[#allocation11 + $0x4e4] sm:$0xf0] }
 0x253   :  { %v10810_v27 = vor.u32 %v13940_v25, %v10807_v63  ;;  %v10685_v34 = vld [vmem:[#allocation11 + $0x750] sm:$0xf]  ;;  %v10358_v16 = vor.u32 %v13832_v12, %v10357_v18  ;;  %v10325_v63 = vld [vmem:[#allocation11 + $0x488] sm:$0xf] }
 0x254   :  { %3490 = vmatpush.bf16.msra.mxu0 %v10714_v30  ;;  %3503 = vmatpush.bf16.msra.mxu1 %v10970_v31  ;;  %v10741_v30 = vld [vmem:[#allocation11 + $0x7c8] sm:$0xf]  ;;  %v10486_v31 = vor.u32 %v13864_v22, %v10485_v21  ;;  %v10686_v15 = vor.u32 %v13913_v2, %v10685_v34  ;;  %v10653_v25 = vld [vmem:[#allocation11 + $0x710] sm:$0xf]  ;;  %v13860_v34 = vld [vmem:[#allocation11 + $0x5cc] sm:$0xf] }
 0x255   :  { %v10742_v40 = vor.u32 %v13928_v39, %v10741_v30  ;;  %v10613_v21 = vld [vmem:[#allocation11 + $0x6c8] sm:$0xf]  ;;  %v10487_v2 = vld [vmem:[#allocation11 + $0x5e8] sm:$0xf0] }
 0x256   :  { %3362 = vmatpush.bf16.msrb.mxu2 %v10642_v36  ;;  %3375 = vmatpush.bf16.msrb.mxu3 %v10898_v50  ;;  %v10453_v36 = vld [vmem:[#allocation11 + $0x588] sm:$0xf]  ;;  %v13932_v50 = vld [vmem:[#allocation11 + $0x80c] sm:$0xf] }
 0x257   :  { %v10454_v1 = vor.u32 %v13856_v37, %v10453_v36  ;;  %v13896_v22 = vld [vmem:[#allocation11 + $0x6e4] sm:$0xf0] }
 0x258   :  { %3491 = vmatpush.bf16.msra.mxu0 %v10682_v47  ;;  %3504 = vmatpush.bf16.msra.mxu1 %v10938_v45  ;;  %v10775_v47 = vld [vmem:[#allocation11 + $0x828] sm:$0xf0]  ;;  %v13920_v45 = vld [vmem:[#allocation11 + $0x7a4] sm:$0xf0] }
 0x259   :  { %v13824_v30 = vld [vmem:[#allocation11 + $0x4a4] sm:$0xf0] }
 0x25a   :  { %3363 = vmatpush.bf16.msrb.mxu2 %v10610_v46  ;;  %3376 = vmatpush.bf16.msrb.mxu3 %v10866_v51  ;;  %v10749_v46 = vld [vmem:[#allocation11 + $0x7d0] sm:$0xf]  ;;  %v10778_v51 = vor.u32 %v13932_v50, %v10775_v47  ;;  %v10581_v36 = vld [vmem:[#allocation11 + $0x688] sm:$0xf] }
 0x25b   :  { %v13888_v37 = vld [vmem:[#allocation11 + $0x6a4] sm:$0xf0]  ;;  %v10621_v50 = vld [vmem:[#allocation11 + $0x6d0] sm:$0xf] }
 0x25c   :  { %3492 = vmatpush.bf16.msra.mxu0 %v10650_v52  ;;  %3505 = vmatpush.bf16.msra.mxu1 %v10906_v54  ;;  %v10710_v52 = vor.u32 %v13920_v45, %v10709_v44  ;;  %v10750_v54 = vor.u32 %v13929_v19, %v10749_v46  ;;  %v13897_v47 = vld [vmem:[#allocation11 + $0x6ec] sm:$0xf0]  ;;  %v10293_v44 = vld [vmem:[#allocation11 + $0x448] sm:$0xf]  ;;  %v10582_v14 = vor.u32 %v13888_v37, %v10581_v36  ;;  %v13861_v36 = vld [vmem:[#allocation11 + $0x5d4] sm:$0xf] }
 0x25d   :  { %v13816_v45 = vld [vmem:[#allocation11 + $0x464] sm:$0xf0]  ;;  %v10622_v19 = vor.u32 %v13897_v47, %v10621_v50  ;;  %v10495_v37 = vld [vmem:[#allocation11 + $0x5f0] sm:$0xf0] }
 0x25e   :  { %3364 = vmatpush.bf16.msrb.mxu2 %v10578_v58  ;;  %3377 = vmatpush.bf16.msrb.mxu3 %v10834_v62  ;;  %v10422_v58 = vor.u32 %v13848_v49, %v10421_v38  ;;  %v13840_v62 = vld [vmem:[#allocation11 + $0x524] sm:$0xf0]  ;;  %v10333_v49 = vld [vmem:[#allocation11 + $0x490] sm:$0xf] }
 0x25f   :  { %v13880_v38 = vld [vmem:[#allocation11 + $0x664] sm:$0xf0] }
 0x260   :  { %3493 = vmatpush.bf16.msra.mxu0 %v10618_v3  ;;  %3506 = vmatpush.bf16.msra.mxu1 %v10874_v5  ;;  %v10678_v3 = vor.u32 %v13912_v56, %v10677_v43  ;;  %v10718_v5 = vor.u32 %v13921_v24, %v10717_v60  ;;  %v10261_v43 = vld [vmem:[#allocation11 + $0x408] sm:$0xf]  ;;  %v13796_v60 = vld [vmem:[#allocation11 + $0x3cc] sm:$0xf] }
 0x261   :  { %v13808_v56 = vld [vmem:[#allocation11 + $0x424] sm:$0xf0]  ;;  %v10231_v24 = vld [vmem:[#allocation11 + $0x3e8] sm:$0xf0] }
 0x262   :  { %3365 = vmatpush.bf16.msrb.mxu2 %v10546_v9  ;;  %3378 = vmatpush.bf16.msrb.mxu3 %v10802_v20  ;;  %v10390_v9 = vor.u32 %v13840_v62, %v10389_v61  ;;  %v10646_v20 = vor.u32 %v13904_v7, %v10645_v6  ;;  %v10262_v6 = vor.u32 %v13808_v56, %v10261_v43  ;;  %v13817_v7 = vld [vmem:[#allocation11 + $0x46c] sm:$0xf0]  ;;  %v10463_v43 = vld [vmem:[#allocation11 + $0x5b0] sm:$0xf0]  ;;  %v13772_v56 = vld [vmem:[#allocation11 + $0x30c] sm:$0xf] }
 0x264   :  { %3494 = vmatpush.bf16.msra.mxu0 %v10586_v13  ;;  %3507 = vmatpush.bf16.msra.mxu1 %v10842_v23  ;;  %v10430_v13 = vor.u32 %v13849_v0, %v10429_v8  ;;  %v10397_v23 = vld [vmem:[#allocation11 + $0x510] sm:$0xf]  ;;  %v10234_v0 = vor.u32 %v13796_v60, %v10231_v24  ;;  %v13836_v60 = vld [vmem:[#allocation11 + $0x50c] sm:$0xf] }
 0x265   :  { %v10557_v8 = vld [vmem:[#allocation11 + $0x650] sm:$0xf]  ;;  %v10391_v24 = vld [vmem:[#allocation11 + $0x528] sm:$0xf0] }
 0x266   :  { %3366 = vmatpush.bf16.msrb.mxu2 %v10514_v29  ;;  %3379 = vmatpush.bf16.msrb.mxu3 %v10770_v55  ;;  %v13905_v29 = vld [vmem:[#allocation11 + $0x72c] sm:$0xf0]  ;;  %v10614_v55 = vor.u32 %v13896_v22, %v10613_v21 }
 0x267   :  { %v10654_v17 = vor.u32 %v13905_v29, %v10653_v25  ;;  %v10490_v25 = vor.u32 %v13860_v34, %v10487_v2  ;;  %v13873_v29 = vld [vmem:[#allocation11 + $0x62c] sm:$0xf0]  ;;  %v10394_v34 = vor.u32 %v13836_v60, %v10391_v24  ;;  %v10007_v60 = vld [vmem:[#allocation11 + $0x228] sm:$0xf0] }
 0x268   :  { %3495 = vmatpush.bf16.msra.mxu0 %v10554_v32  ;;  %3508 = vmatpush.bf16.msra.mxu1 %v10810_v27  ;;  %v10398_v32 = vor.u32 %v13841_v26, %v10397_v23  ;;  %v10365_v27 = vld [vmem:[#allocation11 + $0x4d0] sm:$0xf] }
 0x269   :  { %3367 = vmatmul.bf16.vlgmr.msrb.gmra.mxu2 %v15950_v48  ;;  %3380 = vmatmul.bf16.vlgmr.msrb.gmra.mxu3 %v15981_v35  ;;  %v10366_v46 = vor.u32 %v13833_v41, %v10365_v27  ;;  %v10269_v23 = vld [vmem:[#allocation11 + $0x410] sm:$0xf]  ;;  %v13780_v27 = vld [vmem:[#allocation11 + $0x34c] sm:$0xf] }
 0x26a   :  { %3411 = vmatpush.bf16.msra.mxu2 %v10486_v31  ;;  %3424 = vmatpush.bf16.msra.mxu3 %v10742_v40  ;;  %v10326_v40 = vor.u32 %v13824_v30, %v10325_v63  ;;  %v10525_v26 = vld [vmem:[#allocation11 + $0x610] sm:$0xf]  ;;  %v13852_v63 = vld [vmem:[#allocation11 + $0x58c] sm:$0xf] }
 0x26b   :  { %v10455_v30 = vld [vmem:[#allocation11 + $0x5a8] sm:$0xf0] }
 0x26c   :  { %3496 = vmatpush.bf16.msra.mxu0 %v10522_v42  ;;  %3509 = vmatpush.bf16.msra.mxu1 %v10778_v51  ;;  %v15991_v39 = vpop.f32.mrf.mxu0  ;;  %v15993_v31 = vpop.f32.mrf.mxu1  ;;  %v10549_v42 = vld [vmem:[#allocation11 + $0x648] sm:$0xf]  ;;  %v10294_v51 = vor.u32 %v13816_v45, %v10293_v44  ;;  %v10526_v44 = vor.u32 %v13873_v29, %v10525_v26  ;;  %v10458_v45 = vor.u32 %v13852_v63, %v10455_v30  ;;  %v10399_v26 = vld [vmem:[#allocation11 + $0x530] sm:$0xf0]  ;;  %v10071_v29 = vld [vmem:[#allocation11 + $0x2a8] sm:$0xf0] }
 0x26d   :  { %v10550_v59 = vor.u32 %v13880_v38, %v10549_v42  ;;  %v10498_v42 = vor.u32 %v13861_v36, %v10495_v37  ;;  %v13765_v37 = vld [vmem:[#allocation11 + $0x2d4] sm:$0xf] }
 0x26e   :  { %3412 = vmatpush.bf16.msra.mxu2 %v10454_v1  ;;  %3425 = vmatpush.bf16.msra.mxu3 %v10710_v52  ;;  %v13825_v52 = vld [vmem:[#allocation11 + $0x4ac] sm:$0xf0] }
 0x26f   :  { %3497 = vmatmul.bf16.vlgmr.msra.gmra.mxu0 %v15950_v48  ;;  %3510 = vmatmul.bf16.vlgmr.msra.gmra.mxu1 %v15981_v35  ;;  %v10334_v61 = vor.u32 %v13825_v52, %v10333_v49  ;;  %v13789_v49 = vld [vmem:[#allocation11 + $0x394] sm:$0xf] }
 0x270   :  { %3541 = vmatpush.bf16.msrb.mxu0 %v10494_v53  ;;  %3554 = vmatpush.bf16.msrb.mxu1 %v10750_v54  ;;  %v15995_v33 = vpop.f32.mrf.mxu2  ;;  %v15997_v1 = vpop.f32.mrf.mxu3  ;;  %v10589_v53 = vld [vmem:[#allocation11 + $0x690] sm:$0xf]  ;;  %v13853_v52 = vld [vmem:[#allocation11 + $0x594] sm:$0xf] }
 0x271   :  { %v13889_v54 = vld [vmem:[#allocation11 + $0x6ac] sm:$0xf0] }
 0x272   :  { %3413 = vmatpush.bf16.msra.mxu2 %v10422_v58  ;;  %3426 = vmatpush.bf16.msra.mxu3 %v10678_v3  ;;  %v10590_v62 = vor.u32 %v13889_v54, %v10589_v53  ;;  %v10517_v3 = vld [vmem:[#allocation11 + $0x608] sm:$0xf] }
 0x274   :  { %3542 = vmatpush.bf16.msrb.mxu0 %v10462_v4  ;;  %3555 = vmatpush.bf16.msrb.mxu1 %v10718_v5  ;;  %v1640_v57 = vpop.f32.mrf.mxu0  ;;  %v1653_v58 = vpop.f32.mrf.mxu1  ;;  %v13872_v4 = vld [vmem:[#allocation11 + $0x624] sm:$0xf0]  ;;  %v10301_v5 = vld [vmem:[#allocation11 + $0x450] sm:$0xf] }
 0x275   :  { %v10302_v21 = vor.u32 %v13817_v7, %v10301_v5  ;;  %v10135_v57 = vld [vmem:[#allocation11 + $0x328] sm:$0xf0]  ;;  %v13845_v5 = vld [vmem:[#allocation11 + $0x554] sm:$0xf] }
 0x276   :  { %3414 = vmatpush.bf16.msra.mxu2 %v10390_v9  ;;  %3427 = vmatpush.bf16.msra.mxu3 %v10646_v20  ;;  %v13881_v9 = vld [vmem:[#allocation11 + $0x66c] sm:$0xf0]  ;;  %v10518_v20 = vor.u32 %v13872_v4, %v10517_v3  ;;  %v13781_v3 = vld [vmem:[#allocation11 + $0x354] sm:$0xf]  ;;  %v13764_v7 = vld [vmem:[#allocation11 + $0x2cc] sm:$0xf] }
 0x277   :  { %v10558_v22 = vor.u32 %v13881_v9, %v10557_v8  ;;  %v10175_v4 = vld [vmem:[#allocation11 + $0x370] sm:$0xf0]  ;;  %v10103_v8 = vld [vmem:[#allocation11 + $0x2e8] sm:$0xf0] }
 0x278   :  { %3543 = vmatpush.bf16.msrb.mxu0 %v10430_v13  ;;  %3556 = vmatpush.bf16.msrb.mxu1 %v10686_v15  ;;  %v1562_v18 = vpop.f32.mrf.mxu2  ;;  %v1575_v12 = vpop.f32.mrf.mxu3  ;;  %v13788_v13 = vld [vmem:[#allocation11 + $0x38c] sm:$0xf]  ;;  %v10178_v2 = vor.u32 %v13781_v3, %v10175_v4  ;;  %v13737_v3 = vld [vmem:[#allocation11 + $0x1ec] sm:$0xf0] }
 0x279   :  { %v10199_v15 = vld [vmem:[#allocation11 + $0x3a8] sm:$0xf0] }
 0x27a   :  { %3415 = vmatpush.bf16.msra.mxu2 %v10358_v16  ;;  %3428 = vmatpush.bf16.msra.mxu3 %v10614_v55  ;;  %v13809_v16 = vld [vmem:[#allocation11 + $0x42c] sm:$0xf0]  ;;  %v10202_v55 = vor.u32 %v13788_v13, %v10199_v15  ;;  %v13828_v18 = vld [vmem:[#allocation11 + $0x4cc] sm:$0xf]  ;;  %v10106_v13 = vor.u32 %v13764_v7, %v10103_v8  ;;  %v13773_v15 = vld [vmem:[#allocation11 + $0x314] sm:$0xf] }
 0x27b   :  { %v10270_v47 = vor.u32 %v13809_v16, %v10269_v23  ;;  %v10359_v12 = vld [vmem:[#allocation11 + $0x4e8] sm:$0xf0] }
 0x27c   :  { %3544 = vmatpush.bf16.msrb.mxu0 %v10398_v32  ;;  %3557 = vmatpush.bf16.msrb.mxu1 %v10654_v17  ;;  %v13797_v32 = vld [vmem:[#allocation11 + $0x3d4] sm:$0xf]  ;;  %v15999_v41 = vpop.f32.mrf.mxu0  ;;  %v16001_v50 = vpop.f32.mrf.mxu1  ;;  %v10362_v63 = vor.u32 %v13828_v18, %v10359_v12  ;;  %v10263_v7 = vld [vmem:[#allocation11 + $0x428] sm:$0xf0] }
 0x27d   :  { %v10239_v17 = vld [vmem:[#allocation11 + $0x3f0] sm:$0xf0] }
 0x27e   :  { %3416 = vmatpush.bf16.msra.mxu2 %v10326_v40  ;;  %3429 = vmatpush.bf16.msra.mxu3 %v10582_v14  ;;  %v10167_v40 = vld [vmem:[#allocation11 + $0x368] sm:$0xf0]  ;;  %v10242_v14 = vor.u32 %v13797_v32, %v10239_v17  ;;  %v10303_v18 = vld [vmem:[#allocation11 + $0x470] sm:$0xf0] }
 0x27f   :  { %v10170_v38 = vor.u32 %v13780_v27, %v10167_v40  ;;  %v10327_v32 = vld [vmem:[#allocation11 + $0x4a8] sm:$0xf0]  ;;  %v10111_v27 = vld [vmem:[#allocation11 + $0x2f0] sm:$0xf0] }
 0x280   :  { %3545 = vmatpush.bf16.msrb.mxu0 %v10366_v46  ;;  %3558 = vmatpush.bf16.msrb.mxu1 %v10622_v19  ;;  %v13844_v46 = vld [vmem:[#allocation11 + $0x54c] sm:$0xf]  ;;  %v16005_v53 = vpop.f32.mrf.mxu2  ;;  %v16007_v54 = vpop.f32.mrf.mxu3  ;;  %v13829_v40 = vld [vmem:[#allocation11 + $0x4d4] sm:$0xf] }
 0x281   :  { %v10423_v19 = vld [vmem:[#allocation11 + $0x568] sm:$0xf0] }
 0x282   :  { %3417 = vmatpush.bf16.msra.mxu2 %v10294_v51  ;;  %3430 = vmatpush.bf16.msra.mxu3 %v10550_v59  ;;  %v10207_v51 = vld [vmem:[#allocation11 + $0x3b0] sm:$0xf0]  ;;  %v10426_v58 = vor.u32 %v13844_v46, %v10423_v19 }
 0x283   :  { %v10210_v59 = vor.u32 %v13789_v49, %v10207_v51  ;;  %v10295_v49 = vld [vmem:[#allocation11 + $0x468] sm:$0xf0] }
 0x284   :  { %3546 = vmatpush.bf16.msrb.mxu0 %v10334_v61  ;;  %3559 = vmatpush.bf16.msrb.mxu1 %v10590_v62  ;;  %v10466_v61 = vor.u32 %v13853_v52, %v10463_v43  ;;  %v10138_v62 = vor.u32 %v13772_v56, %v10135_v57  ;;  %v3292_v9 = vpop.f32.mrf.mxu0  ;;  %v13757_v43 = vld [vmem:[#allocation11 + $0x294] sm:$0xf] }
 0x285   :  { %v10079_v56 = vld [vmem:[#allocation11 + $0x2b0] sm:$0xf0] }
 0x286   :  { %3418 = vmatpush.bf16.msra.mxu2 %v10262_v6  ;;  %3431 = vmatpush.bf16.msra.mxu3 %v10518_v20  ;;  %v10431_v6 = vld [vmem:[#allocation11 + $0x570] sm:$0xf0] }
 0x287   :  { %v10434_v20 = vor.u32 %v13845_v5, %v10431_v6  ;;  %v13821_v57 = vld [vmem:[#allocation11 + $0x494] sm:$0xf]  ;;  %v10082_v5 = vor.u32 %v13757_v43, %v10079_v56  ;;  %v13804_v6 = vld [vmem:[#allocation11 + $0x40c] sm:$0xf] }
 0x288   :  { %3547 = vmatpush.bf16.msrb.mxu0 %v10302_v21  ;;  %3560 = vmatpush.bf16.msrb.mxu1 %v10558_v22  ;;  %v10143_v21 = vld [vmem:[#allocation11 + $0x330] sm:$0xf0]  ;;  %v1588_v23 = vpop.f32.mrf.mxu2  ;;  %v1601_v16 = vpop.f32.mrf.mxu3 }
 0x289   :  { %3419 = vmatmul.bf16.vlgmr.msra.gmra.mxu2 %v15948_v10  ;;  %3432 = vmatmul.bf16.vlgmr.msra.gmra.mxu3 %v15950_v48  ;;  %v13837_v22 = vld [vmem:[#allocation11 + $0x514] sm:$0xf]  ;;  %v10146_v30 = vor.u32 %v13773_v15, %v10143_v21 }
 0x28a   :  { %3463 = vmatpush.bf16.msrb.mxu2 %v10234_v0  ;;  %3476 = vmatpush.bf16.msrb.mxu3 %v10490_v25  ;;  %v3305_v0 = vpop.f32.mrf.mxu1  ;;  %v13756_v25 = vld [vmem:[#allocation11 + $0x28c] sm:$0xf]  ;;  %v10402_v17 = vor.u32 %v13837_v22, %v10399_v26  ;;  %v10266_v22 = vor.u32 %v13804_v6, %v10263_v7  ;;  %v13741_v16 = vld [vmem:[#allocation11 + $0x214] sm:$0xf]  ;;  %v9949_v26 = vld [vmem:[#allocation11 + $0x190] sm:$0xf] }
 0x28b   :  { %v10074_v36 = vor.u32 %v13756_v25, %v10071_v29  ;;  %v13749_v0 = vld [vmem:[#allocation11 + $0x254] sm:$0xf]  ;;  %v13729_v25 = vld [vmem:[#allocation11 + $0x1ac] sm:$0xf0] }
 0x28c   :  { %3548 = vmatpush.bf16.msrb.mxu0 %v10270_v47  ;;  %3561 = vmatpush.bf16.msrb.mxu1 %v10526_v44  ;;  %v10367_v47 = vld [vmem:[#allocation11 + $0x4f0] sm:$0xf0]  ;;  %v13748_v44 = vld [vmem:[#allocation11 + $0x24c] sm:$0xf]  ;;  %v13713_v6 = vld [vmem:[#allocation11 + $0x12c] sm:$0xf0] }
 0x28d   :  { %v10370_v51 = vor.u32 %v13829_v40, %v10367_v47  ;;  %v9950_v47 = vor.u32 %v13729_v25, %v9949_v26  ;;  %v10109_v26 = vld [vmem:[#allocation11 + $0x2d0] sm:$0xf] }
 0x28e   :  { %3464 = vmatpush.bf16.msrb.mxu2 %v10202_v55  ;;  %3477 = vmatpush.bf16.msrb.mxu3 %v10458_v45  ;;  %v13820_v55 = vld [vmem:[#allocation11 + $0x48c] sm:$0xf]  ;;  %v13769_v25 = vld [vmem:[#allocation11 + $0x2ec] sm:$0xf0] }
 0x28f   :  { %3549 = vmatmul.bf16.vlgmr.msrb.gmra.mxu0 %v15948_v10  ;;  %3562 = vmatmul.bf16.vlgmr.msrb.gmra.mxu1 %v15950_v48  ;;  %v10039_v45 = vld [vmem:[#allocation11 + $0x268] sm:$0xf0]  ;;  %v10330_v19 = vor.u32 %v13820_v55, %v10327_v32  ;;  %v13805_v55 = vld [vmem:[#allocation11 + $0x414] sm:$0xf] }
 0x290   :  { %3593 = vmatpush.bf16.msra.mxu0 %v10242_v14  ;;  %3606 = vmatpush.bf16.msra.mxu1 %v10498_v42  ;;  %v16011_v14 = vpop.f32.mrf.mxu0  ;;  %v10114_v42 = vor.u32 %v13765_v37, %v10111_v27  ;;  %v10042_v52 = vor.u32 %v13748_v44, %v10039_v45  ;;  %v16015_v24 = vpop.f32.mrf.mxu2  ;;  %v10271_v32 = vld [vmem:[#allocation11 + $0x430] sm:$0xf0]  ;;  %v9989_v37 = vld [vmem:[#allocation11 + $0x1d8] sm:$0xf] }
 0x291   :  { %v13738_v44 = vld [vmem:[#allocation11 + $0x1f4] sm:$0xf0] }
 0x292   :  { %3465 = vmatpush.bf16.msrb.mxu2 %v10170_v38  ;;  %3478 = vmatpush.bf16.msrb.mxu3 %v10426_v58  ;;  %v16013_v46 = vpop.f32.mrf.mxu1  ;;  %v13812_v38 = vld [vmem:[#allocation11 + $0x44c] sm:$0xf]  ;;  %v10335_v58 = vld [vmem:[#allocation11 + $0x4b0] sm:$0xf0]  ;;  %v10245_v45 = vld [vmem:[#allocation11 + $0x3d8] sm:$0xf]  ;;  %v9990_v43 = vor.u32 %v13738_v44, %v9989_v37  ;;  %v10110_v37 = vor.u32 %v13769_v25, %v10109_v26 }
 0x293   :  { %v10298_v4 = vor.u32 %v13812_v38, %v10295_v49  ;;  %v10338_v8 = vor.u32 %v13821_v57, %v10335_v58  ;;  %v9917_v38 = vld [vmem:[#allocation11 + $0x150] sm:$0xf]  ;;  %v9797_v26 = vld [vmem:[#allocation11 + $0x58] sm:$0xf] }
 0x294   :  { %3594 = vmatpush.bf16.msra.mxu0 %v10210_v59  ;;  %3607 = vmatpush.bf16.msra.mxu1 %v10466_v61  ;;  %v13740_v59 = vld [vmem:[#allocation11 + $0x20c] sm:$0xf]  ;;  %v16017_v61 = vpop.f32.mrf.mxu3  ;;  %v13721_v49 = vld [vmem:[#allocation11 + $0x16c] sm:$0xf0] }
 0x295   :  { %v10010_v9 = vor.u32 %v13740_v59, %v10007_v60  ;;  %v10173_v57 = vld [vmem:[#allocation11 + $0x350] sm:$0xf]  ;;  %v9957_v59 = vld [vmem:[#allocation11 + $0x198] sm:$0xf]  ;;  %v9918_v60 = vor.u32 %v13721_v49, %v9917_v38 }
 0x296   :  { %3466 = vmatpush.bf16.msrb.mxu2 %v10138_v62  ;;  %3479 = vmatpush.bf16.msrb.mxu3 %v10394_v34  ;;  %v9981_v62 = vld [vmem:[#allocation11 + $0x1d0] sm:$0xf]  ;;  %v10047_v34 = vld [vmem:[#allocation11 + $0x270] sm:$0xf0] }
 0x297   :  { %v9982_v12 = vor.u32 %v13737_v3, %v9981_v62  ;;  %v10050_v23 = vor.u32 %v13749_v0, %v10047_v34  ;;  %v13785_v58 = vld [vmem:[#allocation11 + $0x36c] sm:$0xf0]  ;;  %v13730_v62 = vld [vmem:[#allocation11 + $0x1b4] sm:$0xf0] }
 0x298   :  { %3595 = vmatpush.bf16.msra.mxu0 %v10178_v2  ;;  %3608 = vmatpush.bf16.msra.mxu1 %v10434_v20  ;;  %v13813_v2 = vld [vmem:[#allocation11 + $0x454] sm:$0xf]  ;;  %v10237_v20 = vld [vmem:[#allocation11 + $0x3d0] sm:$0xf]  ;;  %v3344_v15 = vpop.f32.mrf.mxu0  ;;  %v1614_v27 = vpop.f32.mrf.mxu2  ;;  %v10213_v3 = vld [vmem:[#allocation11 + $0x398] sm:$0xf]  ;;  %v10174_v7 = vor.u32 %v13785_v58, %v10173_v57 }
 0x299   :  { %v10306_v29 = vor.u32 %v13813_v2, %v10303_v18  ;;  %v10141_v0 = vld [vmem:[#allocation11 + $0x310] sm:$0xf]  ;;  %v9925_v2 = vld [vmem:[#allocation11 + $0x158] sm:$0xf] }
 0x29a   :  { %3467 = vmatpush.bf16.msrb.mxu2 %v10106_v13  ;;  %3480 = vmatpush.bf16.msrb.mxu3 %v10362_v63  ;;  %v13801_v13 = vld [vmem:[#allocation11 + $0x3ec] sm:$0xf0]  ;;  %v3357_v21 = vpop.f32.mrf.mxu1 }
 0x29b   :  { %v10238_v63 = vor.u32 %v13801_v13, %v10237_v20  ;;  %v13777_v34 = vld [vmem:[#allocation11 + $0x32c] sm:$0xf0]  ;;  %v10181_v20 = vld [vmem:[#allocation11 + $0x358] sm:$0xf] }
 0x29c   :  { %3596 = vmatpush.bf16.msra.mxu0 %v10146_v30  ;;  %3609 = vmatpush.bf16.msra.mxu1 %v10402_v17  ;;  %v10015_v30 = vld [vmem:[#allocation11 + $0x230] sm:$0xf0]  ;;  %v10205_v17 = vld [vmem:[#allocation11 + $0x390] sm:$0xf]  ;;  %v1627_v40 = vpop.f32.mrf.mxu3  ;;  %v13786_v13 = vld [vmem:[#allocation11 + $0x374] sm:$0xf0] }
 0x29d   :  { %v9853_v15 = vld [vmem:[#allocation11 + $0xd0] sm:$0xf] }
 0x29e   :  { %3468 = vmatpush.bf16.msrb.mxu2 %v10074_v36  ;;  %3481 = vmatpush.bf16.msrb.mxu3 %v10330_v19  ;;  %v13793_v36 = vld [vmem:[#allocation11 + $0x3ac] sm:$0xf0]  ;;  %v13802_v19 = vld [vmem:[#allocation11 + $0x3f4] sm:$0xf0] }
 0x29f   :  { %v10246_v56 = vor.u32 %v13802_v19, %v10245_v45  ;;  %v13705_v21 = vld [vmem:[#allocation11 + $0xec] sm:$0xf0]  ;;  %v9861_v45 = vld [vmem:[#allocation11 + $0xd8] sm:$0xf] }
 0x2a0   :  { %3597 = vmatpush.bf16.msra.mxu0 %v10114_v42  ;;  %3610 = vmatpush.bf16.msra.mxu1 %v10370_v51  ;;  %v10018_v42 = vor.u32 %v13741_v16, %v10015_v30  ;;  %v10274_v51 = vor.u32 %v13805_v55, %v10271_v32  ;;  %v10182_v16 = vor.u32 %v13786_v13, %v10181_v20  ;;  %v13714_v30 = vld [vmem:[#allocation11 + $0x134] sm:$0xf0]  ;;  %v10077_v27 = vld [vmem:[#allocation11 + $0x290] sm:$0xf] }
 0x2a1   :  { %v10149_v55 = vld [vmem:[#allocation11 + $0x318] sm:$0xf]  ;;  %v13761_v44 = vld [vmem:[#allocation11 + $0x2ac] sm:$0xf0] }
 0x2a2   :  { %3469 = vmatpush.bf16.msrb.mxu2 %v10042_v52  ;;  %3482 = vmatpush.bf16.msrb.mxu3 %v10298_v4  ;;  %v10206_v52 = vor.u32 %v13793_v36, %v10205_v17  ;;  %v13794_v4 = vld [vmem:[#allocation11 + $0x3b4] sm:$0xf0]  ;;  %v9821_v17 = vld [vmem:[#allocation11 + $0x90] sm:$0xf] }
 0x2a3   :  { %v13778_v32 = vld [vmem:[#allocation11 + $0x334] sm:$0xf0]  ;;  %v13697_v36 = vld [vmem:[#allocation11 + $0xac] sm:$0xf0] }
 0x2a4   :  { %3598 = vmatpush.bf16.msra.mxu0 %v10082_v5  ;;  %3611 = vmatpush.bf16.msra.mxu1 %v10338_v8  ;;  %v9885_v5 = vld [vmem:[#allocation11 + $0x110] sm:$0xf]  ;;  %v9958_v8 = vor.u32 %v13730_v62, %v9957_v59  ;;  %v13706_v19 = vld [vmem:[#allocation11 + $0xf4] sm:$0xf0]  ;;  %v9822_v49 = vor.u32 %v13697_v36, %v9821_v17  ;;  %v10078_v62 = vor.u32 %v13761_v44, %v10077_v27  ;;  %v13733_v36 = vld [vmem:[#allocation11 + $0x1d4] sm:$0xf] }
 0x2a5   :  { %v9886_v18 = vor.u32 %v13713_v6, %v9885_v5  ;;  %v9789_v59 = vld [vmem:[#allocation11 + $0x50] sm:$0xf] }
 0x2a6   :  { %3470 = vmatpush.bf16.msrb.mxu2 %v10010_v9  ;;  %3483 = vmatpush.bf16.msrb.mxu3 %v10266_v22  ;;  %v10214_v9 = vor.u32 %v13794_v4, %v10213_v3  ;;  %v10142_v22 = vor.u32 %v13777_v34, %v10141_v0  ;;  %v9862_v3 = vor.u32 %v13706_v19, %v9861_v45  ;;  %v13698_v0 = vld [vmem:[#allocation11 + $0xb4] sm:$0xf0]  ;;  %v11005_v13 = vld [vmem:[#allocation11 + $0x9d0] sm:$0xf] }
 0x2a7   :  { %v13762_v34 = vld [vmem:[#allocation11 + $0x2b4] sm:$0xf0]  ;;  %v10973_v44 = vld [vmem:[#allocation11 + $0x990] sm:$0xf] }
 0x2a8   :  { %3599 = vmatpush.bf16.msra.mxu0 %v10050_v23  ;;  %3612 = vmatpush.bf16.msra.mxu1 %v10306_v29  ;;  %v9893_v29 = vld [vmem:[#allocation11 + $0x118] sm:$0xf]  ;;  %v13985_v45 = vld [vmem:[#allocation11 + $0x9ac] sm:$0xf0] }
 0x2a9   :  { %3471 = vmatmul.bf16.vlgmr.msrb.gmra.mxu2 %v15961_v11  ;;  %3484 = vmatmul.bf16.vlgmr.msrb.gmra.mxu3 %v15948_v10  ;;  %v9894_v40 = vor.u32 %v13714_v30, %v9893_v29  ;;  %v13754_v30 = vld [vmem:[#allocation11 + $0x274] sm:$0xf0] }
 0x2aa   :  { %3515 = vmatpush.bf16.msra.mxu2 %v9982_v12  ;;  %3528 = vmatpush.bf16.msra.mxu3 %v10238_v63  ;;  %v13722_v12 = vld [vmem:[#allocation11 + $0x174] sm:$0xf0]  ;;  %v9854_v63 = vor.u32 %v13705_v21, %v9853_v15  ;;  %v13993_v15 = vld [vmem:[#allocation11 + $0x9ec] sm:$0xf0] }
 0x2ab   :  { %v9926_v23 = vor.u32 %v13722_v12, %v9925_v2  ;;  %v13681_v12 = vld [vmem:[#allocation11 + $0x2c] sm:$0xf0]  ;;  %v11006_v17 = vor.u32 %v13993_v15, %v11005_v13  ;;  %v10981_v13 = vld [vmem:[#allocation11 + $0x998] sm:$0xf] }
 0x2ac   :  { %3600 = vmatpush.bf16.msra.mxu0 %v10018_v42  ;;  %3613 = vmatpush.bf16.msra.mxu1 %v10274_v51  ;;  %v3394_v42 = vpop.f32.mrf.mxu0  ;;  %v3264_v38 = vpop.f32.mrf.mxu2  ;;  %v10117_v51 = vld [vmem:[#allocation11 + $0x2d8] sm:$0xf] }
 0x2ad   :  { %v3407_v57 = vpop.f32.mrf.mxu1  ;;  %v3277_v58 = vpop.f32.mrf.mxu3  ;;  %v13986_v15 = vld [vmem:[#allocation11 + $0x9b4] sm:$0xf0] }
 0x2ae   :  { %3516 = vmatpush.bf16.msra.mxu2 %v9950_v47  ;;  %3529 = vmatpush.bf16.msra.mxu3 %v10206_v52  ;;  %v10150_v47 = vor.u32 %v13778_v32, %v10149_v55  ;;  %v13770_v52 = vld [vmem:[#allocation11 + $0x2f4] sm:$0xf0] }
 0x2af   :  { %3601 = vmatmul.bf16.vlgmr.msra.gmra.mxu0 %v15961_v11  ;;  %3614 = vmatmul.bf16.vlgmr.msra.gmra.mxu1 %v15948_v10  ;;  %v10118_v6 = vor.u32 %v13770_v52, %v10117_v51  ;;  %v13746_v52 = vld [vmem:[#allocation11 + $0x234] sm:$0xf0] }
 0x2b0   :  { %3645 = vmatpush.bf16.msrb.mxu0 %v9990_v43  ;;  %3658 = vmatpush.bf16.msrb.mxu1 %v10246_v56  ;;  %v3395_v43 = vadd.f32 %v3394_v42, %v16005_v53  ;;  %v3265_v56 = vadd.f32 %v3264_v38, %v15995_v33  ;;  %v10085_v33 = vld [vmem:[#allocation11 + $0x298] sm:$0xf] }
 0x2b1   :  { %v9765_v42 = vld [vmem:[#allocation11 + $0x18] sm:$0xf] }
 0x2b2   :  { %3517 = vmatpush.bf16.msra.mxu2 %v9918_v60  ;;  %3530 = vmatpush.bf16.msra.mxu3 %v10174_v7  ;;  %v13689_v60 = vld [vmem:[#allocation11 + $0x6c] sm:$0xf0]  ;;  %v16025_v4 = vadd.f32 %v3407_v57, %v3395_v43  ;;  %v3278_v5 = vadd.f32 %v3277_v58, %v3265_v56  ;;  %v13682_v38 = vld [vmem:[#allocation11 + $0x34] sm:$0xf0]  ;;  %v13725_v43 = vld [vmem:[#allocation11 + $0x194] sm:$0xf]  ;;  %v10974_v57 = vor.u32 %v13985_v45, %v10973_v44 }
 0x2b3   :  { %v10045_v7 = vld [vmem:[#allocation11 + $0x250] sm:$0xf]  ;;  %v9790_v53 = vor.u32 %v13689_v60, %v9789_v59  ;;  %v9951_v56 = vld [vmem:[#allocation11 + $0x1b0] sm:$0xf0]  ;;  %v13734_v58 = vld [vmem:[#allocation11 + $0x1dc] sm:$0xf] }
 0x2b4   :  { %3646 = vmatpush.bf16.msrb.mxu0 %v9958_v8  ;;  %3659 = vmatpush.bf16.msrb.mxu1 %v10214_v9  ;;  %v13753_v8 = vld [vmem:[#allocation11 + $0x26c] sm:$0xf0]  ;;  %v9829_v9 = vld [vmem:[#allocation11 + $0x98] sm:$0xf]  ;;  %v3291_v2 = vadd.f32 %v15999_v41, %v3278_v5  ;;  %v3266_v55 = vpop.f32.mrf.mxu2  ;;  %v3396_v32 = vpop.f32.mrf.mxu0  ;;  %v9991_v59 = vld [vmem:[#allocation11 + $0x1f8] sm:$0xf0] }
 0x2b5   :  { %v10046_v20 = vor.u32 %v13753_v8, %v10045_v7  ;;  %v9830_v21 = vor.u32 %v13698_v0, %v9829_v9  ;;  %v10053_v41 = vld [vmem:[#allocation11 + $0x258] sm:$0xf]  ;;  %v3409_v27 = vpop.f32.mrf.mxu1  ;;  %v10941_v60 = vld [vmem:[#allocation11 + $0x950] sm:$0xf]  ;;  %v9954_v8 = vor.u32 %v13725_v43, %v9951_v56  ;;  %v9994_v9 = vor.u32 %v13734_v58, %v9991_v59  ;;  %v9919_v0 = vld [vmem:[#allocation11 + $0x170] sm:$0xf0] }
 0x2b6   :  { %3518 = vmatpush.bf16.msra.mxu2 %v9886_v18  ;;  %3531 = vmatpush.bf16.msra.mxu3 %v10142_v22  ;;  %v9757_v18 = vld [vmem:[#allocation11 + $0x10] sm:$0xf]  ;;  %v10086_v22 = vor.u32 %v13762_v34, %v10085_v33  ;;  %v16029_v25 = vadd.f32 %v16001_v50, %v3291_v2  ;;  %v10054_v19 = vor.u32 %v13754_v30, %v10053_v41  ;;  %v13994_v5 = vld [vmem:[#allocation11 + $0x9f4] sm:$0xf0]  ;;  %v13726_v34 = vld [vmem:[#allocation11 + $0x19c] sm:$0xf] }
 0x2b7   :  { %v9758_v29 = vor.u32 %v13681_v12, %v9757_v18  ;;  %v9959_v2 = vld [vmem:[#allocation11 + $0x1b8] sm:$0xf0]  ;;  %v10909_v18 = vld [vmem:[#allocation11 + $0x910] sm:$0xf]  ;;  %v10982_v30 = vor.u32 %v13986_v15, %v10981_v13  ;;  %v10949_v32 = vld [vmem:[#allocation11 + $0x958] sm:$0xf] }
 0x2b8   :  { %3647 = vmatpush.bf16.msrb.mxu0 %v9926_v23  ;;  %3660 = vmatpush.bf16.msrb.mxu1 %v10182_v16  ;;  %v10013_v23 = vld [vmem:[#allocation11 + $0x210] sm:$0xf]  ;;  %v13701_v27 = vld [vmem:[#allocation11 + $0xd4] sm:$0xf]  ;;  %v13710_v44 = vld [vmem:[#allocation11 + $0x11c] sm:$0xf] }
 0x2b9   :  { %v13745_v16 = vld [vmem:[#allocation11 + $0x22c] sm:$0xf0]  ;;  %v9895_v45 = vld [vmem:[#allocation11 + $0x138] sm:$0xf0]  ;;  %v13693_v43 = vld [vmem:[#allocation11 + $0x94] sm:$0xf] }
 0x2ba   :  { %3519 = vmatpush.bf16.msra.mxu2 %v9854_v63  ;;  %3532 = vmatpush.bf16.msra.mxu3 %v10110_v37  ;;  %v13690_v63 = vld [vmem:[#allocation11 + $0x74] sm:$0xf0]  ;;  %v9983_v37 = vld [vmem:[#allocation11 + $0x1f0] sm:$0xf0]  ;;  %v10877_v41 = vld [vmem:[#allocation11 + $0x8d0] sm:$0xf] }
 0x2bb   :  { %v9798_v50 = vor.u32 %v13690_v63, %v9797_v26  ;;  %v9986_v51 = vor.u32 %v13733_v36, %v9983_v37  ;;  %v9927_v63 = vld [vmem:[#allocation11 + $0x178] sm:$0xf0]  ;;  %v13961_v55 = vld [vmem:[#allocation11 + $0x8ec] sm:$0xf0]  ;;  %v9823_v56 = vld [vmem:[#allocation11 + $0xb0] sm:$0xf0] }
 0x2bc   :  { %3648 = vmatpush.bf16.msrb.mxu0 %v9894_v40  ;;  %3661 = vmatpush.bf16.msrb.mxu1 %v10150_v47  ;;  %v3279_v40 = vpop.f32.mrf.mxu3  ;;  %v10014_v47 = vor.u32 %v13745_v16, %v10013_v23  ;;  %v13709_v23 = vld [vmem:[#allocation11 + $0x114] sm:$0xf]  ;;  %v13694_v13 = vld [vmem:[#allocation11 + $0x9c] sm:$0xf] }
 0x2bd   :  { %v9887_v16 = vld [vmem:[#allocation11 + $0x130] sm:$0xf0]  ;;  %v9831_v15 = vld [vmem:[#allocation11 + $0xb8] sm:$0xf0] }
 0x2be   :  { %3520 = vmatpush.bf16.msra.mxu2 %v9822_v49  ;;  %3533 = vmatpush.bf16.msra.mxu3 %v10078_v62  ;;  %v10021_v49 = vld [vmem:[#allocation11 + $0x218] sm:$0xf]  ;;  %v13977_v62 = vld [vmem:[#allocation11 + $0x96c] sm:$0xf0]  ;;  %v9890_v36 = vor.u32 %v13709_v23, %v9887_v16  ;;  %v9855_v40 = vld [vmem:[#allocation11 + $0xf0] sm:$0xf0] }
 0x2bf   :  { %v10022_v7 = vor.u32 %v13746_v52, %v10021_v49  ;;  %v10942_v33 = vor.u32 %v13977_v62, %v10941_v60  ;;  %v13970_v49 = vld [vmem:[#allocation11 + $0x934] sm:$0xf0]  ;;  %v9898_v52 = vor.u32 %v13710_v44, %v9895_v45  ;;  %v13702_v60 = vld [vmem:[#allocation11 + $0xdc] sm:$0xf]  ;;  %v11007_v44 = vld [vmem:[#allocation11 + $0x9f0] sm:$0xf0] }
 0x2c0   :  { %3649 = vmatpush.bf16.msrb.mxu0 %v9862_v3  ;;  %3662 = vmatpush.bf16.msrb.mxu1 %v10118_v6  ;;  %v11013_v3 = vld [vmem:[#allocation11 + $0x9d8] sm:$0xf]  ;;  %v9766_v6 = vor.u32 %v13682_v38, %v9765_v42  ;;  %v13953_v42 = vld [vmem:[#allocation11 + $0x8ac] sm:$0xf0]  ;;  %v9863_v62 = vld [vmem:[#allocation11 + $0xf8] sm:$0xf0] }
 0x2c1   :  { %v11014_v12 = vor.u32 %v13994_v5, %v11013_v3  ;;  %v10917_v38 = vld [vmem:[#allocation11 + $0x918] sm:$0xf]  ;;  %v10813_v3 = vld [vmem:[#allocation11 + $0x850] sm:$0xf]  ;;  %v13917_v45 = vld [vmem:[#allocation11 + $0x794] sm:$0xf] }
 0x2c2   :  { %3521 = vmatpush.bf16.msra.mxu2 %v9790_v53  ;;  %3534 = vmatpush.bf16.msra.mxu3 %v10046_v20  ;;  %v13717_v53 = vld [vmem:[#allocation11 + $0x154] sm:$0xf]  ;;  %v13969_v20 = vld [vmem:[#allocation11 + $0x92c] sm:$0xf0]  ;;  %v10918_v5 = vor.u32 %v13970_v49, %v10917_v38  ;;  %v10853_v23 = vld [vmem:[#allocation11 + $0x898] sm:$0xf] }
 0x2c3   :  { %v10910_v26 = vor.u32 %v13969_v20, %v10909_v18  ;;  %v13685_v18 = vld [vmem:[#allocation11 + $0x54] sm:$0xf]  ;;  %v13954_v16 = vld [vmem:[#allocation11 + $0x8b4] sm:$0xf0] }
 0x2c4   :  { %3650 = vmatpush.bf16.msrb.mxu0 %v9830_v21  ;;  %3663 = vmatpush.bf16.msrb.mxu1 %v10086_v22  ;;  %v9922_v21 = vor.u32 %v13717_v53, %v9919_v0  ;;  %v9962_v22 = vor.u32 %v13726_v34, %v9959_v2  ;;  %v10885_v53 = vld [vmem:[#allocation11 + $0x8d8] sm:$0xf]  ;;  %v9826_v34 = vor.u32 %v13693_v43, %v9823_v56  ;;  %v9767_v43 = vld [vmem:[#allocation11 + $0x38] sm:$0xf0] }
 0x2c5   :  { %v13962_v0 = vld [vmem:[#allocation11 + $0x8f4] sm:$0xf0]  ;;  %v9866_v2 = vor.u32 %v13702_v60, %v9863_v62  ;;  %v10687_v62 = vld [vmem:[#allocation11 + $0x770] sm:$0xf0] }
 0x2c6   :  { %3522 = vmatpush.bf16.msra.mxu2 %v9758_v29  ;;  %3535 = vmatpush.bf16.msra.mxu3 %v10014_v47  ;;  %v13718_v29 = vld [vmem:[#allocation11 + $0x15c] sm:$0xf]  ;;  %v10878_v47 = vor.u32 %v13961_v55, %v10877_v41  ;;  %v9834_v41 = vor.u32 %v13694_v13, %v9831_v15  ;;  %v9759_v55 = vld [vmem:[#allocation11 + $0x30] sm:$0xf0] }
 0x2c7   :  { %v9930_v37 = vor.u32 %v13718_v29, %v9927_v63  ;;  %v13918_v13 = vld [vmem:[#allocation11 + $0x79c] sm:$0xf] }
 0x2c8   :  { %3651 = vmatpush.bf16.msrb.mxu0 %v9798_v50  ;;  %3664 = vmatpush.bf16.msrb.mxu1 %v10054_v19  ;;  %v10845_v50 = vld [vmem:[#allocation11 + $0x890] sm:$0xf]  ;;  %v10727_v15 = vld [vmem:[#allocation11 + $0x7b8] sm:$0xf0] }
 0x2c9   :  { %3523 = vmatmul.bf16.vlgmr.msra.gmra.mxu2 %v15972_v28  ;;  %3536 = vmatmul.bf16.vlgmr.msra.gmra.mxu3 %v15961_v11  ;;  %v10846_v59 = vor.u32 %v13953_v42, %v10845_v50  ;;  %v10719_v50 = vld [vmem:[#allocation11 + $0x7b0] sm:$0xf0]  ;;  %v13946_v42 = vld [vmem:[#allocation11 + $0x874] sm:$0xf0] }
 0x2ca   :  { %3567 = vmatpush.bf16.msrb.mxu2 %v11006_v17  ;;  %3580 = vmatpush.bf16.msrb.mxu3 %v9986_v51  ;;  %v13978_v17 = vld [vmem:[#allocation11 + $0x974] sm:$0xf0]  ;;  %v9858_v51 = vor.u32 %v13701_v27, %v9855_v40  ;;  %v10722_v56 = vor.u32 %v13917_v45, %v10719_v50  ;;  %v13949_v45 = vld [vmem:[#allocation11 + $0x894] sm:$0xf] }
 0x2cb   :  { %v10950_v19 = vor.u32 %v13978_v17, %v10949_v32  ;;  %v13686_v32 = vld [vmem:[#allocation11 + $0x5c] sm:$0xf] }
 0x2cc   :  { %3652 = vmatpush.bf16.msrb.mxu0 %v9766_v6  ;;  %3665 = vmatpush.bf16.msrb.mxu1 %v10022_v7  ;;  %v3316_v58 = vpop.f32.mrf.mxu2  ;;  %v9799_v17 = vld [vmem:[#allocation11 + $0x78] sm:$0xf0] }
 0x2cd   :  { %v16039_v7 = vadd.f32 %v3316_v58, %v16029_v25  ;;  %v10781_v25 = vld [vmem:[#allocation11 + $0x810] sm:$0xf]  ;;  %v9802_v49 = vor.u32 %v13686_v32, %v9799_v17  ;;  %v10975_v58 = vld [vmem:[#allocation11 + $0x9b0] sm:$0xf0] }
 0x2ce   :  { %3568 = vmatpush.bf16.msrb.mxu2 %v10974_v57  ;;  %3581 = vmatpush.bf16.msrb.mxu3 %v9954_v8  ;;  %v3459_v57 = vpop.f32.mrf.mxu1  ;;  %v3329_v8 = vpop.f32.mrf.mxu3  ;;  %v13957_v32 = vld [vmem:[#allocation11 + $0x8d4] sm:$0xf] }
 0x2cf   :  { %3653 = vmatmul.bf16.vlgmr.msrb.gmra.mxu0 %v15972_v28  ;;  %3666 = vmatmul.bf16.vlgmr.msrb.gmra.mxu1 %v15961_v11  ;;  %v16036_v6 = vadd.f32 %v3459_v57, %v16007_v54  ;;  %v13981_v57 = vld [vmem:[#allocation11 + $0x994] sm:$0xf] }
 0x2d0   :  { %3710 = vmatpush.bf16.msra.mxu1 %v9994_v9  ;;  %3697 = vmatpush.bf16.msra.mxu0 %v11014_v12  ;;  %v13945_v9 = vld [vmem:[#allocation11 + $0x86c] sm:$0xf0]  ;;  %v9791_v12 = vld [vmem:[#allocation11 + $0x70] sm:$0xf0] }
 0x2d1   :  { %v10814_v54 = vor.u32 %v13945_v9, %v10813_v3  ;;  %v9794_v63 = vor.u32 %v13685_v18, %v9791_v12  ;;  %v10789_v3 = vld [vmem:[#allocation11 + $0x818] sm:$0xf]  ;;  %v13926_v9 = vld [vmem:[#allocation11 + $0x7dc] sm:$0xf]  ;;  %v13901_v12 = vld [vmem:[#allocation11 + $0x714] sm:$0xf] }
 0x2d2   :  { %3569 = vmatpush.bf16.msrb.mxu2 %v10942_v33  ;;  %3582 = vmatpush.bf16.msrb.mxu3 %v9922_v21  ;;  %v3330_v33 = vadd.f32 %v3329_v8, %v15997_v1  ;;  %v10886_v21 = vor.u32 %v13962_v0, %v10885_v53  ;;  %v10751_v1 = vld [vmem:[#allocation11 + $0x7f0] sm:$0xf0]  ;;  %v10759_v53 = vld [vmem:[#allocation11 + $0x7f8] sm:$0xf0]  ;;  %v10978_v0 = vor.u32 %v13981_v57, %v10975_v58 }
 0x2d3   :  { %v10879_v17 = vld [vmem:[#allocation11 + $0x8f0] sm:$0xf0] }
 0x2d4   :  { %3711 = vmatpush.bf16.msra.mxu1 %v9962_v22  ;;  %3698 = vmatpush.bf16.msra.mxu0 %v10982_v30  ;;  %v3343_v20 = vadd.f32 %v16011_v14, %v3330_v33  ;;  %v13937_v22 = vld [vmem:[#allocation11 + $0x82c] sm:$0xf0]  ;;  %v13677_v14 = vld [vmem:[#allocation11 + $0x14] sm:$0xf] }
 0x2d5   :  { %v10782_v30 = vor.u32 %v13937_v22, %v10781_v25  ;;  %v9762_v38 = vor.u32 %v13677_v14, %v9759_v55  ;;  %v13965_v22 = vld [vmem:[#allocation11 + $0x914] sm:$0xf]  ;;  %v10695_v14 = vld [vmem:[#allocation11 + $0x778] sm:$0xf0] }
 0x2d6   :  { %3570 = vmatpush.bf16.msrb.mxu2 %v10910_v26  ;;  %3583 = vmatpush.bf16.msrb.mxu3 %v9890_v36  ;;  %v13925_v26 = vld [vmem:[#allocation11 + $0x7d4] sm:$0xf]  ;;  %v16044_v29 = vadd.f32 %v16013_v46, %v3343_v20  ;;  %v3318_v36 = vpop.f32.mrf.mxu2  ;;  %v3461_v27 = vpop.f32.mrf.mxu1 }
 0x2d7   :  { %v10754_v40 = vor.u32 %v13925_v26, %v10751_v1  ;;  %v3331_v46 = vpop.f32.mrf.mxu3  ;;  %v10655_v20 = vld [vmem:[#allocation11 + $0x730] sm:$0xf0]  ;;  %v10730_v1 = vor.u32 %v13918_v13, %v10727_v15  ;;  %v13902_v27 = vld [vmem:[#allocation11 + $0x71c] sm:$0xf]  ;;  %v10757_v13 = vld [vmem:[#allocation11 + $0x7d8] sm:$0xf] }
 0x2d8   :  { %3712 = vmatpush.bf16.msra.mxu1 %v9930_v37  ;;  %3699 = vmatpush.bf16.msra.mxu0 %v10950_v19  ;;  %v10854_v37 = vor.u32 %v13954_v16, %v10853_v23  ;;  %v10821_v19 = vld [vmem:[#allocation11 + $0x858] sm:$0xf]  ;;  %v10911_v23 = vld [vmem:[#allocation11 + $0x930] sm:$0xf0] }
 0x2d9   :  { %v10822_v60 = vor.u32 %v13946_v42, %v10821_v19  ;;  %v13893_v16 = vld [vmem:[#allocation11 + $0x6d4] sm:$0xf]  ;;  %v13930_v15 = vld [vmem:[#allocation11 + $0x7f4] sm:$0xf0] }
 0x2da   :  { %3571 = vmatpush.bf16.msrb.mxu2 %v10878_v47  ;;  %3584 = vmatpush.bf16.msrb.mxu3 %v9858_v51  ;;  %v13989_v47 = vld [vmem:[#allocation11 + $0x9d4] sm:$0xf] }
 0x2db   :  { %v11010_v51 = vor.u32 %v13989_v47, %v11007_v44  ;;  %v10623_v26 = vld [vmem:[#allocation11 + $0x6f0] sm:$0xf0]  ;;  %v10882_v47 = vor.u32 %v13957_v32, %v10879_v17  ;;  %v10758_v32 = vor.u32 %v13930_v15, %v10757_v13  ;;  %v13982_v17 = vld [vmem:[#allocation11 + $0x99c] sm:$0xf]  ;;  %v11701_v15 = vld [vmem:[#allocation16 + $0x540] sm:$0xf] }
 0x2dc   :  { %3713 = vmatpush.bf16.msra.mxu1 %v9898_v52  ;;  %3700 = vmatpush.bf16.msra.mxu0 %v10918_v5  ;;  %v13678_v52 = vld [vmem:[#allocation11 + $0x1c] sm:$0xf]  ;;  %v13938_v5 = vld [vmem:[#allocation11 + $0x834] sm:$0xf0]  ;;  %v10626_v55 = vor.u32 %v13893_v16, %v10623_v26  ;;  %v13885_v36 = vld [vmem:[#allocation11 + $0x694] sm:$0xf] }
 0x2dd   :  { %v9770_v8 = vor.u32 %v13678_v52, %v9767_v43  ;;  %v10790_v18 = vor.u32 %v13938_v5, %v10789_v3  ;;  %v10847_v46 = vld [vmem:[#allocation11 + $0x8b0] sm:$0xf0]  ;;  %v13894_v43 = vld [vmem:[#allocation11 + $0x6dc] sm:$0xf]  ;;  %v13858_v26 = vld [vmem:[#allocation11 + $0x5b4] sm:$0xf0] }
 0x2de   :  { %3572 = vmatpush.bf16.msrb.mxu2 %v10846_v59  ;;  %3585 = vmatpush.bf16.msrb.mxu3 %v9826_v34  ;;  %v13909_v59 = vld [vmem:[#allocation11 + $0x754] sm:$0xf]  ;;  %v10850_v57 = vor.u32 %v13949_v45, %v10847_v46  ;;  %v13850_v45 = vld [vmem:[#allocation11 + $0x574] sm:$0xf0]  ;;  %v13870_v46 = vld [vmem:[#allocation11 + $0x61c] sm:$0xf] }
 0x2df   :  { %v10690_v33 = vor.u32 %v13909_v59, %v10687_v62  ;;  %v13973_v34 = vld [vmem:[#allocation11 + $0x954] sm:$0xf] }
 0x2e0   :  { %3714 = vmatpush.bf16.msra.mxu1 %v9866_v2  ;;  %3701 = vmatpush.bf16.msra.mxu0 %v10886_v21  ;;  %v10943_v2 = vld [vmem:[#allocation11 + $0x970] sm:$0xf0]  ;;  %v10658_v21 = vor.u32 %v13901_v12, %v10655_v20  ;;  %v13990_v12 = vld [vmem:[#allocation11 + $0x9dc] sm:$0xf] }
 0x2e1   :  { %v10946_v25 = vor.u32 %v13973_v34, %v10943_v2  ;;  %v13877_v19 = vld [vmem:[#allocation11 + $0x654] sm:$0xf]  ;;  %v11015_v20 = vld [vmem:[#allocation11 + $0x9f8] sm:$0xf0] }
 0x2e2   :  { %3573 = vmatpush.bf16.msrb.mxu2 %v10814_v54  ;;  %3586 = vmatpush.bf16.msrb.mxu3 %v9794_v63  ;;  %v10762_v54 = vor.u32 %v13926_v9, %v10759_v53  ;;  %v16049_v63 = vpop.f32.mrf.mxu0  ;;  %v10559_v42 = vld [vmem:[#allocation11 + $0x670] sm:$0xf0]  ;;  %v13866_v53 = vld [vmem:[#allocation11 + $0x5f4] sm:$0xf0]  ;;  %v11018_v16 = vor.u32 %v13990_v12, %v11015_v20 }
 0x2e3   :  { %v10562_v59 = vor.u32 %v13877_v19, %v10559_v42  ;;  %v10815_v62 = vld [vmem:[#allocation11 + $0x870] sm:$0xf0]  ;;  %v11765_v19 = vld [vmem:[#allocation16 + $0x5c0] sm:$0xf]  ;;  %v10373_v12 = vld [vmem:[#allocation11 + $0x4d8] sm:$0xf] }
 0x2e4   :  { %3715 = vmatpush.bf16.msra.mxu1 %v9834_v41  ;;  %3702 = vmatpush.bf16.msra.mxu0 %v10854_v37  ;;  %v13910_v41 = vld [vmem:[#allocation11 + $0x75c] sm:$0xf]  ;;  %v10591_v37 = vld [vmem:[#allocation11 + $0x6b0] sm:$0xf0]  ;;  %v14231_v42 = vld [vmem:[#allocation16 + $0x5dc] sm:$0xf0] }
 0x2e5   :  { %v10594_v44 = vor.u32 %v13885_v36, %v10591_v37  ;;  %v13869_v3 = vld [vmem:[#allocation11 + $0x614] sm:$0xf]  ;;  %v10983_v36 = vld [vmem:[#allocation11 + $0x9b8] sm:$0xf0]  ;;  %v13834_v20 = vld [vmem:[#allocation11 + $0x4f4] sm:$0xf0] }
 0x2e6   :  { %3574 = vmatpush.bf16.msrb.mxu2 %v10782_v30  ;;  %3587 = vmatpush.bf16.msrb.mxu3 %v9762_v38  ;;  %v10914_v30 = vor.u32 %v13965_v22, %v10911_v23  ;;  %v10527_v5 = vld [vmem:[#allocation11 + $0x630] sm:$0xf0] }
 0x2e7   :  { %v13933_v34 = vld [vmem:[#allocation11 + $0x814] sm:$0xf]  ;;  %v10530_v2 = vor.u32 %v13869_v3, %v10527_v5  ;;  %v13842_v3 = vld [vmem:[#allocation11 + $0x534] sm:$0xf0]  ;;  %v11766_v5 = vor.u32 %v14231_v42, %v11765_v19 }
 0x2e8   :  { %3716 = vmatpush.bf16.msra.mxu1 %v9802_v49  ;;  %3703 = vmatpush.bf16.msra.mxu0 %v10822_v60  ;;  %v13941_v60 = vld [vmem:[#allocation11 + $0x854] sm:$0xf]  ;;  %v13818_v19 = vld [vmem:[#allocation11 + $0x474] sm:$0xf0] }
 0x2e9   :  { %3575 = vmatmul.bf16.vlgmr.msrb.gmra.mxu2 %v15981_v35  ;;  %3588 = vmatmul.bf16.vlgmr.msrb.gmra.mxu3 %v15972_v28 }
 0x2ea   :  { %3619 = vmatpush.bf16.msra.mxu2 %v10754_v40  ;;  %3632 = vmatpush.bf16.msra.mxu3 %v11010_v51  ;;  %v10663_v40 = vld [vmem:[#allocation11 + $0x738] sm:$0xf0]  ;;  %v3448_v49 = vpop.f32.mrf.mxu0 }
 0x2eb   :  { %v10666_v38 = vor.u32 %v13902_v27, %v10663_v40  ;;  %v13922_v27 = vld [vmem:[#allocation11 + $0x7b4] sm:$0xf0]  ;;  %v13974_v49 = vld [vmem:[#allocation11 + $0x95c] sm:$0xf] }
 0x2ec   :  { %3717 = vmatpush.bf16.msra.mxu1 %v9770_v8  ;;  %3704 = vmatpush.bf16.msra.mxu0 %v10790_v18  ;;  %v3368_v50 = vpop.f32.mrf.mxu2  ;;  %v3381_v52 = vpop.f32.mrf.mxu3  ;;  %v10501_v8 = vld [vmem:[#allocation11 + $0x5d8] sm:$0xf]  ;;  %v10783_v18 = vld [vmem:[#allocation11 + $0x830] sm:$0xf0] }
 0x2ed   :  { %v3369_v51 = vadd.f32 %v3368_v50, %v16044_v29  ;;  %v10818_v29 = vor.u32 %v13941_v60, %v10815_v62  ;;  %v10437_v40 = vld [vmem:[#allocation11 + $0x558] sm:$0xf]  ;;  %v10535_v50 = vld [vmem:[#allocation11 + $0x638] sm:$0xf0] }
 0x2ee   :  { %3620 = vmatpush.bf16.msra.mxu2 %v10722_v56  ;;  %3633 = vmatpush.bf16.msra.mxu3 %v10978_v0  ;;  %v10631_v56 = vld [vmem:[#allocation11 + $0x6f8] sm:$0xf0]  ;;  %v10405_v62 = vld [vmem:[#allocation11 + $0x518] sm:$0xf] }
 0x2ef   :  { %3718 = vmatmul.bf16.vlgmr.msra.gmra.mxu1 %v15972_v28  ;;  %3705 = vmatmul.bf16.vlgmr.msra.gmra.mxu0 %v15981_v35  ;;  %v10698_v28 = vor.u32 %v13910_v41, %v10695_v14  ;;  %v16053_v58 = vadd.f32 %v3381_v52, %v3369_v51  ;;  %v10634_v9 = vor.u32 %v13894_v43, %v10631_v56  ;;  %v13886_v0 = vld [vmem:[#allocation11 + $0x69c] sm:$0xf]  ;;  %v10693_v43 = vld [vmem:[#allocation11 + $0x758] sm:$0xf] }
 0x2f0   :  { %3749 = vmatpush.bf16.msrb.mxu0 %v10762_v54  ;;  %v10502_v54 = vor.u32 %v13866_v53, %v10501_v8  ;;  %v13878_v41 = vld [vmem:[#allocation11 + $0x65c] sm:$0xf]  ;;  %3762 = vmatpush.bf16.msrb.mxu1 %v11018_v16  ;;  %v10438_v52 = vor.u32 %v13850_v45, %v10437_v40  ;;  %v13914_v56 = vld [vmem:[#allocation11 + $0x774] sm:$0xf0]  ;;  %v11733_v8 = vld [vmem:[#allocation16 + $0x580] sm:$0xf] }
 0x2f1   :  { %v10567_v14 = vld [vmem:[#allocation11 + $0x678] sm:$0xf0] }
 0x2f2   :  { %3621 = vmatpush.bf16.msra.mxu2 %v10690_v33  ;;  %3634 = vmatpush.bf16.msra.mxu3 %v10946_v25  ;;  %v10599_v33 = vld [vmem:[#allocation11 + $0x6b8] sm:$0xf0]  ;;  %v10469_v25 = vld [vmem:[#allocation11 + $0x598] sm:$0xf]  ;;  %v16055_v23 = vpop.f32.mrf.mxu0 }
 0x2f3   :  { %v10602_v22 = vor.u32 %v13886_v0, %v10599_v33  ;;  %v10470_v37 = vor.u32 %v13858_v26, %v10469_v25  ;;  %v10951_v51 = vld [vmem:[#allocation11 + $0x978] sm:$0xf0]  ;;  %v10694_v0 = vor.u32 %v13914_v56, %v10693_v43  ;;  %v14215_v25 = vld [vmem:[#allocation16 + $0x55c] sm:$0xf0]  ;;  %v10374_v26 = vor.u32 %v13834_v20, %v10373_v12  ;;  %v10533_v12 = vld [vmem:[#allocation11 + $0x618] sm:$0xf] }
 0x2f4   :  { %3750 = vmatpush.bf16.msrb.mxu0 %v10730_v1  ;;  %v3383_v1 = vpop.f32.mrf.mxu3  ;;  %v10954_v60 = vor.u32 %v13974_v49, %v10951_v51  ;;  %v13966_v33 = vld [vmem:[#allocation11 + $0x91c] sm:$0xf]  ;;  %v11637_v43 = vld [vmem:[#allocation16 + $0x4c0] sm:$0xf] }
 0x2f5   :  { %v10887_v16 = vld [vmem:[#allocation11 + $0x8f8] sm:$0xf0]  ;;  %v10629_v1 = vld [vmem:[#allocation11 + $0x6d8] sm:$0xf]  ;;  %v14199_v56 = vld [vmem:[#allocation16 + $0x4dc] sm:$0xf0] }
 0x2f6   :  { %3622 = vmatpush.bf16.msra.mxu2 %v10658_v21  ;;  %3635 = vmatpush.bf16.msra.mxu3 %v10914_v30  ;;  %v3370_v21 = vpop.f32.mrf.mxu2  ;;  %v10786_v30 = vor.u32 %v13933_v34, %v10783_v18  ;;  %v10661_v34 = vld [vmem:[#allocation11 + $0x718] sm:$0xf]  ;;  %v10919_v18 = vld [vmem:[#allocation11 + $0x938] sm:$0xf0] }
 0x2f7   :  { %v10922_v13 = vor.u32 %v13966_v33, %v10919_v18  ;;  %v10855_v45 = vld [vmem:[#allocation11 + $0x8b8] sm:$0xf0]  ;;  %v10277_v33 = vld [vmem:[#allocation11 + $0x418] sm:$0xf] }
 0x2f8   :  { %3751 = vmatpush.bf16.msrb.mxu0 %v10698_v28  ;;  %v10725_v28 = vld [vmem:[#allocation11 + $0x798] sm:$0xf]  ;;  %v10247_v20 = vld [vmem:[#allocation11 + $0x3f8] sm:$0xf0] }
 0x2fa   :  { %3623 = vmatpush.bf16.msra.mxu2 %v10626_v55  ;;  %3636 = vmatpush.bf16.msra.mxu3 %v10882_v47  ;;  %v16057_v55 = vpop.f32.mrf.mxu1  ;;  %v10570_v47 = vor.u32 %v13878_v41, %v10567_v14  ;;  %v13898_v41 = vld [vmem:[#allocation11 + $0x6f4] sm:$0xf0] }
 0x2fc   :  { %3752 = vmatpush.bf16.msrb.mxu0 %v10666_v38  ;;  %v10726_v38 = vor.u32 %v13922_v27, %v10725_v28  ;;  %v10630_v28 = vor.u32 %v13898_v41, %v10629_v1  ;;  %v13950_v27 = vld [vmem:[#allocation11 + $0x89c] sm:$0xf] }
 0x2fd   :  { %v10858_v49 = vor.u32 %v13950_v27, %v10855_v45  ;;  %v13862_v1 = vld [vmem:[#allocation11 + $0x5dc] sm:$0xf]  ;;  %v11573_v45 = vld [vmem:[#allocation16 + $0x440] sm:$0xf] }
 0x2fe   :  { %3624 = vmatpush.bf16.msra.mxu2 %v10594_v44  ;;  %3637 = vmatpush.bf16.msra.mxu3 %v10850_v57  ;;  %v10986_v44 = vor.u32 %v13982_v17, %v10983_v36  ;;  %v10538_v57 = vor.u32 %v13870_v46, %v10535_v50  ;;  %v11702_v17 = vor.u32 %v14215_v25, %v11701_v15  ;;  %v11669_v36 = vld [vmem:[#allocation16 + $0x500] sm:$0xf]  ;;  %v10309_v50 = vld [vmem:[#allocation11 + $0x458] sm:$0xf] }
 0x2ff   :  { %v13874_v25 = vld [vmem:[#allocation11 + $0x634] sm:$0xf0] }
 0x300   :  { %3753 = vmatpush.bf16.msrb.mxu0 %v10634_v9  ;;  %3763 = vmatpush.bf16.msrb.mxu1 %v10986_v44  ;;  %v14223_v9 = vld [vmem:[#allocation16 + $0x59c] sm:$0xf0]  ;;  %v13890_v44 = vld [vmem:[#allocation11 + $0x6b4] sm:$0xf0] }
 0x302   :  { %3625 = vmatpush.bf16.msra.mxu2 %v10562_v59  ;;  %3638 = vmatpush.bf16.msra.mxu3 %v10818_v29  ;;  %v3500_v59 = vpop.f32.mrf.mxu0  ;;  %v3513_v53 = vpop.f32.mrf.mxu1  ;;  %v10406_v29 = vor.u32 %v13842_v3, %v10405_v62  ;;  %v13942_v62 = vld [vmem:[#allocation11 + $0x85c] sm:$0xf] }
 0x303   :  { %v16067_v59 = vld [vmem:[#allocation14] sm:$0xff]  ;;  %v10823_v3 = vld [vmem:[#allocation11 + $0x878] sm:$0xf0]  ;;  %v10565_v53 = vld [vmem:[#allocation11 + $0x658] sm:$0xf] }
 0x304   :  { %3754 = vmatpush.bf16.msrb.mxu0 %v10602_v22  ;;  %3764 = vmatpush.bf16.msrb.mxu1 %v10954_v60  ;;  %v13958_v22 = vld [vmem:[#allocation11 + $0x8dc] sm:$0xf] }
 0x305   :  { %v10890_v14 = vor.u32 %v13958_v22, %v10887_v16  ;;  %v10791_v22 = vld [vmem:[#allocation11 + $0x838] sm:$0xf0] }
 0x306   :  { %3626 = vmatpush.bf16.msra.mxu2 %v10530_v2  ;;  %3639 = vmatpush.bf16.msra.mxu3 %v10786_v30  ;;  %v13906_v2 = vld [vmem:[#allocation11 + $0x734] sm:$0xf0] }
 0x307   :  { %v10662_v21 = vor.u32 %v13906_v2, %v10661_v34  ;;  %v10341_v30 = vld [vmem:[#allocation11 + $0x498] sm:$0xf]  ;;  %v13798_v34 = vld [vmem:[#allocation11 + $0x3dc] sm:$0xf]  ;;  %v11638_v2 = vor.u32 %v14199_v56, %v11637_v43 }
 0x308   :  { %3755 = vmatpush.bf16.msrb.mxu0 %v10570_v47  ;;  %3765 = vmatpush.bf16.msrb.mxu1 %v10922_v13  ;;  %v10597_v47 = vld [vmem:[#allocation11 + $0x698] sm:$0xf]  ;;  %v14191_v13 = vld [vmem:[#allocation16 + $0x49c] sm:$0xf0]  ;;  %v13854_v56 = vld [vmem:[#allocation11 + $0x59c] sm:$0xf] }
 0x309   :  { %3627 = vmatmul.bf16.vlgmr.msra.gmra.mxu2 %v15950_v48  ;;  %3640 = vmatmul.bf16.vlgmr.msra.gmra.mxu3 %v15981_v35  ;;  %v10598_v60 = vor.u32 %v13890_v44, %v10597_v47 }
 0x30a   :  { %3671 = vmatpush.bf16.msrb.mxu2 %v10502_v54  ;;  %3684 = vmatpush.bf16.msrb.mxu3 %v10758_v32  ;;  %v11734_v54 = vor.u32 %v14223_v9, %v11733_v8  ;;  %v13826_v32 = vld [vmem:[#allocation11 + $0x4b4] sm:$0xf0]  ;;  %v3779_v8 = vperm.slane %v16067_v59, 2  ;;  %v10310_v9 = vor.u32 %v13818_v19, %v10309_v50  ;;  %v10534_v19 = vor.u32 %v13874_v25, %v10533_v12 }
 0x30b   :  { %v10342_v40 = vor.u32 %v13826_v32, %v10341_v30  ;;  %v14295_v30 = vld [vmem:[#allocation16 + $0x7dc] sm:$0xf0]  ;;  %v10250_v32 = vor.u32 %v13798_v34, %v10247_v20 }
 0x30c   :  { %3756 = vmatpush.bf16.msrb.mxu0 %v10538_v57  ;;  %3766 = vmatpush.bf16.msrb.mxu1 %v10890_v14  ;;  %v3420_v46 = vpop.f32.mrf.mxu2  ;;  %v16065_v57 = vpop.f32.mrf.mxu1  ;;  %v12021_v14 = vld [vmem:[#allocation16 + $0x7c0] sm:$0xf] }
 0x30d   :  { %v3421_v51 = vadd.f32 %v3420_v46, %v16025_v4  ;;  %v10826_v4 = vor.u32 %v13942_v62, %v10823_v3  ;;  %v14183_v46 = vld [vmem:[#allocation16 + $0x45c] sm:$0xf0]  ;;  %v13782_v62 = vld [vmem:[#allocation11 + $0x35c] sm:$0xf] }
 0x30e   :  { %3672 = vmatpush.bf16.msrb.mxu2 %v10470_v37  ;;  %3685 = vmatpush.bf16.msrb.mxu3 %v10726_v38  ;;  %v14207_v37 = vld [vmem:[#allocation16 + $0x51c] sm:$0xf0]  ;;  %v16062_v38 = vpop.f32.mrf.mxu0  ;;  %v11574_v3 = vor.u32 %v14183_v46, %v11573_v45  ;;  %v10087_v45 = vld [vmem:[#allocation11 + $0x2b8] sm:$0xf0] }
 0x30f   :  { %3757 = vmatmul.bf16.vlgmr.msrb.gmra.mxu0 %v15950_v48  ;;  %v11670_v42 = vor.u32 %v14207_v37, %v11669_v36  ;;  %v10215_v36 = vld [vmem:[#allocation11 + $0x3b8] sm:$0xf0] }
 0x310   :  { %7077 = vmatpush.bf16.msra.mxu0 %v11766_v5  ;;  %3767 = vmatpush.bf16.msrb.mxu1 %v10858_v49 }
 0x312   :  { %3673 = vmatpush.bf16.msrb.mxu2 %v10438_v52  ;;  %3686 = vmatpush.bf16.msrb.mxu3 %v10694_v0  ;;  %v3433_v52 = vpop.f32.mrf.mxu3  ;;  %v13882_v0 = vld [vmem:[#allocation11 + $0x674] sm:$0xf0] }
 0x313   :  { %v3434_v5 = vadd.f32 %v3433_v52, %v3421_v51  ;;  %v10566_v15 = vor.u32 %v13882_v0, %v10565_v53  ;;  %v11989_v51 = vld [vmem:[#allocation16 + $0x780] sm:$0xf] }
 0x314   :  { %7078 = vmatpush.bf16.msra.mxu0 %v11734_v54  ;;  %v11605_v54 = vld [vmem:[#allocation16 + $0x480] sm:$0xf]  ;;  %3768 = vmatpush.bf16.msrb.mxu1 %v10826_v4  ;;  %v3422_v37 = vpop.f32.mrf.mxu2  ;;  %v3565_v50 = vpop.f32.mrf.mxu1 }
 0x315   :  { %v3447_v18 = vadd.f32 %v16049_v63, %v3434_v5  ;;  %v13790_v63 = vld [vmem:[#allocation11 + $0x39c] sm:$0xf]  ;;  %v14287_v52 = vld [vmem:[#allocation16 + $0x79c] sm:$0xf0] }
 0x316   :  { %3674 = vmatpush.bf16.msrb.mxu2 %v10406_v29  ;;  %3687 = vmatpush.bf16.msrb.mxu3 %v10662_v21  ;;  %v13810_v29 = vld [vmem:[#allocation11 + $0x434] sm:$0xf0]  ;;  %v13934_v21 = vld [vmem:[#allocation11 + $0x81c] sm:$0xf]  ;;  %v3552_v27 = vpop.f32.mrf.mxu0  ;;  %v10218_v43 = vor.u32 %v13790_v63, %v10215_v36  ;;  %v11990_v5 = vor.u32 %v14287_v52, %v11989_v51  ;;  %v14175_v53 = vld [vmem:[#allocation16 + $0x41c] sm:$0xf0] }
 0x317   :  { %v3795_v16 = vadd.f32 %v3779_v8, %v3447_v18  ;;  %v10794_v41 = vor.u32 %v13934_v21, %v10791_v22  ;;  %v10183_v8 = vld [vmem:[#allocation11 + $0x378] sm:$0xf0]  ;;  %v11925_v22 = vld [vmem:[#allocation16 + $0x700] sm:$0xf] }
 0x318   :  { %7079 = vmatpush.bf16.msra.mxu0 %v11702_v17  ;;  %v10503_v17 = vld [vmem:[#allocation11 + $0x5f8] sm:$0xf0]  ;;  %v10186_v34 = vor.u32 %v13782_v62, %v10183_v8  ;;  %v11893_v63 = vld [vmem:[#allocation16 + $0x6c0] sm:$0xf] }
 0x319   :  { %v11021_v47 = vmul.f32 -1.442695, %v3795_v16  ;;  %3769 = vmatpush.bf16.msrb.mxu1 %v10794_v41  ;;  %v10506_v49 = vor.u32 %v13862_v1, %v10503_v17  ;;  %v10439_v18 = vld [vmem:[#allocation11 + $0x578] sm:$0xf0]  ;;  %v14271_v16 = vld [vmem:[#allocation16 + $0x71c] sm:$0xf0] }
 0x31a   :  { %3675 = vmatpush.bf16.msrb.mxu2 %v10374_v26  ;;  %3688 = vmatpush.bf16.msrb.mxu3 %v10630_v28  ;;  %v10278_v26 = vor.u32 %v13810_v29, %v10277_v33  ;;  %v11606_v28 = vor.u32 %v14191_v13, %v11605_v54  ;;  %v3435_v44 = vpop.f32.mrf.mxu3  ;;  %v11957_v33 = vld [vmem:[#allocation16 + $0x740] sm:$0xf]  ;;  %v13774_v13 = vld [vmem:[#allocation11 + $0x31c] sm:$0xf] }
 0x31b   :  { %14815 = vpow2.f32 %v11021_v47  ;;  %v14279_v29 = vld [vmem:[#allocation16 + $0x75c] sm:$0xf0]  ;;  %v13838_v1 = vld [vmem:[#allocation11 + $0x51c] sm:$0xf] }
 0x31c   :  { %7080 = vmatpush.bf16.msra.mxu0 %v11670_v42  ;;  %v3777_v42 = vperm.slane %v16067_v59, 0  ;;  %3770 = vmatmul.bf16.vlgmr.msrb.gmra.mxu1 %v15981_v35  ;;  %v11958_v20 = vor.u32 %v14279_v29, %v11957_v33  ;;  %v3778_v35 = vperm.slane %v16067_v59, 1  ;;  %v10407_v41 = vld [vmem:[#allocation11 + $0x538] sm:$0xf0]  ;;  %v14263_v36 = vld [vmem:[#allocation16 + $0x6dc] sm:$0xf0] }
 0x31d   :  { %v10410_v17 = vor.u32 %v13838_v1, %v10407_v41  ;;  %v10375_v27 = vld [vmem:[#allocation11 + $0x4f8] sm:$0xf0]  ;;  %v14255_v51 = vld [vmem:[#allocation16 + $0x69c] sm:$0xf0] }
 0x31e   :  { %3676 = vmatpush.bf16.msrb.mxu2 %v10342_v40  ;;  %3689 = vmatpush.bf16.msrb.mxu3 %v10598_v60  ;;  %v12022_v40 = vor.u32 %v14295_v30, %v12021_v14  ;;  %v10471_v60 = vld [vmem:[#allocation11 + $0x5b8] sm:$0xf0]  ;;  %v3793_v0 = vadd.f32 %v3777_v42, %v16039_v7  ;;  %v3794_v14 = vadd.f32 %v3778_v35, %v16053_v58  ;;  %v11253_v1 = vld [vmem:[#allocation16 + $0x1c0] sm:$0xf] }
 0x31f   :  { %v10474_v4 = vor.u32 %v13854_v56, %v10471_v60  ;;  %v10119_v30 = vld [vmem:[#allocation11 + $0x2f8] sm:$0xf0]  ;;  %v14103_v41 = vld [vmem:[#allocation16 + $0x1dc] sm:$0xf0] }
 0x320   :  { %7081 = vmatpush.bf16.msra.mxu0 %v11638_v2  ;;  %7090 = vmatpush.bf16.msra.mxu1 %v12022_v40  ;;  %v13846_v2 = vld [vmem:[#allocation11 + $0x55c] sm:$0xf]  ;;  %v11019_v25 = vmul.f32 -1.442695, %v3793_v0  ;;  %v11894_v40 = vor.u32 %v14263_v36, %v11893_v63  ;;  %v11020_v47 = vmul.f32 -1.442695, %v3794_v14 }
 0x321   :  { %v14816_v54 = vpop.eup %14815  ;;  %v10442_v21 = vor.u32 %v13846_v2, %v10439_v18  ;;  %v13758_v44 = vld [vmem:[#allocation11 + $0x29c] sm:$0xf]  ;;  %v11829_v2 = vld [vmem:[#allocation16 + $0x640] sm:$0xf] }
 0x322   :  { %3677 = vmatpush.bf16.msrb.mxu2 %v10310_v9  ;;  %3690 = vmatpush.bf16.msrb.mxu3 %v10566_v15  ;;  %v11541_v9 = vld [vmem:[#allocation16 + $0x400] sm:$0xf]  ;;  %v10151_v15 = vld [vmem:[#allocation11 + $0x338] sm:$0xf0]  ;;  %v16077_v7 = vadd.f32 1.0, %v14816_v54  ;;  %v10090_v52 = vor.u32 %v13758_v44, %v10087_v45  ;;  %v11254_v44 = vor.u32 %v14103_v41, %v11253_v1 }
 0x323   :  { %v11542_v12 = vor.u32 %v14175_v53, %v11541_v9  ;;  %v13822_v50 = vld [vmem:[#allocation11 + $0x49c] sm:$0xf]  ;;  %v14247_v18 = vld [vmem:[#allocation16 + $0x65c] sm:$0xf0] }
 0x324   :  { %7082 = vmatpush.bf16.msra.mxu0 %v11606_v28  ;;  %7091 = vmatpush.bf16.msra.mxu1 %v11990_v5  ;;  %14817 = vrcp.f32 %v16077_v7  ;;  %v13830_v28 = vld [vmem:[#allocation11 + $0x4dc] sm:$0xf]  ;;  %v3874_v8 = vand.u32 2147483648, %v16077_v7  ;;  %v3872_v33 = vand.u32 2147483647, %v16077_v7  ;;  %vm3868_vm6 = vweird.f32 %v16077_v7 }
 0x325   :  { %14819 = vpow2.f32 %v11019_v25  ;;  %v10343_v42 = vld [vmem:[#allocation11 + $0x4b8] sm:$0xf0]  ;;  %v11509_v45 = vld [vmem:[#allocation16 + $0x3c0] sm:$0xf] }
 0x326   :  { %3678 = vmatpush.bf16.msrb.mxu2 %v10278_v26  ;;  %3691 = vmatpush.bf16.msrb.mxu3 %v10534_v19  ;;  %v10154_v26 = vor.u32 %v13774_v13, %v10151_v15  ;;  %v10378_v19 = vor.u32 %v13830_v28, %v10375_v27  ;;  %14821 = vpow2.f32 %v11020_v47  ;;  %v13750_v62 = vld [vmem:[#allocation11 + $0x25c] sm:$0xf]  ;;  %v10346_v53 = vor.u32 %v13822_v50, %v10343_v42 }
 0x327   :  { %v13814_v54 = vld [vmem:[#allocation11 + $0x45c] sm:$0xf]  ;;  %v11830_v13 = vor.u32 %v14247_v18, %v11829_v2  ;;  %vm3873_vm8 = vcmp.eq.f32.partialorder %v3872_v33, 8.507059e+37  ;;  %v14151_v2 = vld [vmem:[#allocation16 + $0x35c] sm:$0xf0] }
 0x328   :  { %7083 = vmatpush.bf16.msra.mxu0 %v11574_v3  ;;  %7092 = vmatpush.bf16.msra.mxu1 %v11958_v20  ;;  %v10055_v3 = vld [vmem:[#allocation11 + $0x278] sm:$0xf0]  ;;  %v11157_v18 = vld [vmem:[#allocation16 + $0x100] sm:$0xf] }
 0x329   :  { %3679 = vmatmul.bf16.vlgmr.msrb.gmra.mxu2 %v15948_v10  ;;  %3692 = vmatmul.bf16.vlgmr.msrb.gmra.mxu3 %v15950_v48  ;;  %v13766_v48 = vld [vmem:[#allocation11 + $0x2dc] sm:$0xf]  ;;  %v10058_v20 = vor.u32 %v13750_v62, %v10055_v3  ;;  %v11477_v62 = vld [vmem:[#allocation16 + $0x380] sm:$0xf] }
 0x32a   :  { %3723 = vmatpush.bf16.msra.mxu2 %v10250_v32  ;;  %3736 = vmatpush.bf16.msra.mxu3 %v10506_v49  ;;  %v11926_v32 = vor.u32 %v14271_v16, %v11925_v22  ;;  %v10122_v37 = vor.u32 %v13766_v48, %v10119_v30  ;;  %v14818_v46 = vpop.eup %14817  ;;  %v11861_v49 = vld [vmem:[#allocation16 + $0x680] sm:$0xf]  ;;  %v10311_v35 = vld [vmem:[#allocation11 + $0x478] sm:$0xf0]  ;;  %v3875_v16 = vor.u32 1.1754944e-38, %v3874_v8 }
 0x32b   :  { %v3864_v58 = vmul.f32 %v14818_v46, %v16077_v7  ;;  %v14820_v56 = vpop.eup %14819  ;;  %vm3869_vm10 = vweird.f32 %v14818_v46  ;;  %v10023_v22 = vld [vmem:[#allocation11 + $0x238] sm:$0xf0]  ;;  %v10314_v30 = vor.u32 %v13814_v54, %v10311_v35  ;;  %v14159_v3 = vld [vmem:[#allocation16 + $0x39c] sm:$0xf0] }
 0x32c   :  { %7084 = vmatpush.bf16.msra.mxu0 %v11542_v12  ;;  %7093 = vmatpush.bf16.msra.mxu1 %v11926_v32  ;;  %v16082_v5 = vpop.f32.mrf.mxu0  ;;  %v3472_v9 = vpop.f32.mrf.mxu2  ;;  %v16089_v12 = vadd.f32 1.0, %v14820_v56  ;;  %vm16093_vm7 = vmor %vm3868_vm6, %vm3869_vm10  ;;  %v11797_v32 = vld [vmem:[#allocation16 + $0x600] sm:$0xf]  ;;  %v10279_v28 = vld [vmem:[#allocation11 + $0x438] sm:$0xf0] }
 0x32d   :  { %v3865_v60 = vsub.f32 1.0, %v3864_v58  ;;  %v16085_v0 = vpop.f32.mrf.mxu1  ;;  %v3473_v29 = vadd.f32 %v3472_v9, %v16036_v6  ;;  %v14822_v14 = vpop.eup %14821  ;;  %v11221_v58 = vld [vmem:[#allocation16 + $0x180] sm:$0xf] }
 0x32e   :  { %3724 = vmatpush.bf16.msra.mxu2 %v10218_v43  ;;  %3737 = vmatpush.bf16.msra.mxu3 %v10474_v4  ;;  %v11862_v43 = vor.u32 %v14255_v51, %v11861_v49  ;;  %14823 = vrcp.f32 %v16089_v12  ;;  %v16105_v50 = vadd.f32 1.0, %v14822_v14  ;;  %v11189_v9 = vld [vmem:[#allocation16 + $0x140] sm:$0xf]  ;;  %vm3838_vm11 = vweird.f32 %v16089_v12 }
 0x32f   :  { %v3866_v4 = vmul.f32 %v14818_v46, %v3865_v60  ;;  %v11125_v6 = vld [vmem:[#allocation16 + $0xc0] sm:$0xf] }
 0x330   :  { %7094 = vmatpush.bf16.msra.mxu1 %v11894_v40  ;;  %14825 = vrcp.f32 %v16105_v50  ;;  %v11381_v14 = vld [vmem:[#allocation16 + $0x2c0] sm:$0xf]  ;;  %vm3853_vm15 = vweird.f32 %v16105_v50 }
 0x331   :  { %v3867_v15 = vadd.f32 %v14818_v46, %v3866_v4  ;;  %v11478_v4 = vor.u32 %v14159_v3, %v11477_v62 }
 0x332   :  { %3725 = vmatpush.bf16.msra.mxu2 %v10186_v34  ;;  %3738 = vmatpush.bf16.msra.mxu3 %v10442_v21  ;;  %v3485_v34 = vpop.f32.mrf.mxu3  ;;  %v13742_v21 = vld [vmem:[#allocation11 + $0x21c] sm:$0xf] }
 0x333   :  { %v3486_v25 = vadd.f32 %v3485_v34, %v3473_v29  ;;  %v3871_v48 = vsel %vm16093_vm7, %v14818_v46, %v3867_v15  ;;  %v10026_v36 = vor.u32 %v13742_v21, %v10023_v22  ;;  %v11445_v34 = vld [vmem:[#allocation16 + $0x340] sm:$0xf] }
 0x334   :  { %7095 = vmatpush.bf16.msra.mxu1 %v11862_v43  ;;  %v3876_v63 = vsel %vm3873_vm8, %v3875_v16, %v3871_v48  ;;  %v3604_v46 = vpop.f32.mrf.mxu0  ;;  %v3474_v42 = vpop.f32.mrf.mxu2  ;;  %v11446_v35 = vor.u32 %v14151_v2, %v11445_v34  ;;  %v14143_v21 = vld [vmem:[#allocation16 + $0x31c] sm:$0xf0] }
 0x335   :  { %v3499_v7 = vadd.f32 %v16055_v23, %v3486_v25  ;;  %v16102_v40 = vpack.c.bf16 %v3876_v63, %v3876_v63  ;;  %v14167_v23 = vld [vmem:[#allocation16 + $0x3dc] sm:$0xf0]  ;;  %v3617_v49 = vpop.f32.mrf.mxu1  ;;  %v16108_v8 = vpop.eup %14823 }
 0x336   :  { %3726 = vmatpush.bf16.msra.mxu2 %v10154_v26  ;;  %3739 = vmatpush.bf16.msra.mxu3 %v10410_v17  ;;  %v3780_v26 = vperm.slane %v16067_v59, 3  ;;  %v14239_v17 = vld [vmem:[#allocation16 + $0x61c] sm:$0xf0]  ;;  %v11510_v56 = vor.u32 %v14167_v23, %v11509_v45  ;;  %v3834_v33 = vmul.f32 %v16108_v8, %v16089_v12  ;;  %v16115_v54 = vpop.eup %14825  ;;  %vm3839_vm9 = vweird.f32 %v16108_v8 }
 0x337   :  { %v11798_v27 = vor.u32 %v14239_v17, %v11797_v32  ;;  %v3512_v47 = vadd.f32 %v16057_v55, %v3499_v7  ;;  %7085 = vmatmul.bf16.vlgmr.msra.gmra.mxu0 %v16102_v40  ;;  %v11413_v25 = vld [vmem:[#allocation16 + $0x300] sm:$0xf]  ;;  %vm16134_vm12 = vmor %vm3838_vm11, %vm3839_vm9  ;;  %v3842_v49 = vand.u32 2147483647, %v16089_v12  ;;  %vm3854_vm13 = vweird.f32 %v16115_v54 }
 0x338   :  { %7096 = vmatpush.bf16.msra.mxu1 %v11830_v13  ;;  %v3835_v15 = vsub.f32 1.0, %v3834_v33  ;;  %v14071_v16 = vld [vmem:[#allocation16 + $0xdc] sm:$0xf0]  ;;  %vm16158_vm0 = vmor %vm3853_vm15, %vm3854_vm13 }
 0x339   :  { %v3796_v51 = vadd.f32 %v3780_v26, %v3512_v47  ;;  %v3849_v26 = vmul.f32 %v16115_v54, %v16105_v50  ;;  %v11126_v41 = vor.u32 %v14071_v16, %v11125_v6  ;;  %v14135_v48 = vld [vmem:[#allocation16 + $0x2dc] sm:$0xf0]  ;;  %vm3843_vm2 = vcmp.eq.f32.partialorder %v3842_v49, 8.507059e+37 }
 0x33a   :  { %3727 = vmatpush.bf16.msra.mxu2 %v10122_v37  ;;  %3740 = vmatpush.bf16.msra.mxu3 %v10378_v19  ;;  %v13806_v37 = vld [vmem:[#allocation11 + $0x41c] sm:$0xf]  ;;  %v14095_v19 = vld [vmem:[#allocation16 + $0x19c] sm:$0xf0]  ;;  %v3487_v43 = vpop.f32.mrf.mxu3  ;;  %v3836_v1 = vmul.f32 %v16108_v8, %v3835_v15  ;;  %v11382_v17 = vor.u32 %v14135_v48, %v11381_v14 }
 0x33b   :  { %v11022_v55 = vmul.f32 -1.442695, %v3796_v51  ;;  %v11222_v60 = vor.u32 %v14095_v19, %v11221_v58  ;;  %v11093_v7 = vld [vmem:[#allocation16 + $0x80] sm:$0xf]  ;;  %v3850_v32 = vsub.f32 1.0, %v3849_v26 }
 0x33c   :  { %7097 = vmatpush.bf16.msra.mxu1 %v11798_v27  ;;  %v16124_v63 = vadd.f32 %v16108_v8, %v3836_v1  ;;  %v14127_v27 = vld [vmem:[#allocation16 + $0x29c] sm:$0xf0] }
 0x33d   :  { %14827 = vpow2.f32 %v11022_v55  ;;  %v14055_v45 = vld [vmem:[#allocation16 + $0x5c] sm:$0xf0]  ;;  %v3851_v23 = vmul.f32 %v16115_v54, %v3850_v32 }
 0x33e   :  { %3728 = vmatpush.bf16.msra.mxu2 %v10090_v52  ;;  %3741 = vmatpush.bf16.msra.mxu3 %v10346_v53  ;;  %v10282_v52 = vor.u32 %v13806_v37, %v10279_v28  ;;  %v14087_v53 = vld [vmem:[#allocation16 + $0x15c] sm:$0xf0] }
 0x33f   :  { %v11190_v29 = vor.u32 %v14087_v53, %v11189_v9  ;;  %v11349_v28 = vld [vmem:[#allocation16 + $0x280] sm:$0xf]  ;;  %v3852_v34 = vadd.f32 %v16115_v54, %v3851_v23 }
 0x340   :  { %v11350_v55 = vor.u32 %v14127_v27, %v11349_v28  ;;  %v11317_v53 = vld [vmem:[#allocation16 + $0x240] sm:$0xf] }
 0x341   :  { %v11029_v33 = vld [vmem:[#allocation16] sm:$0xf] }
 0x342   :  { %3729 = vmatpush.bf16.msra.mxu2 %v10058_v20  ;;  %3742 = vmatpush.bf16.msra.mxu3 %v10314_v30  ;;  %v14079_v20 = vld [vmem:[#allocation16 + $0x11c] sm:$0xf0] }
 0x343   :  { %v14828_v13 = vpop.eup %14827  ;;  %v14063_v30 = vld [vmem:[#allocation16 + $0x9c] sm:$0xf0] }
 0x344   :  { %v16117_v22 = vadd.f32 1.0, %v14828_v13  ;;  %v11094_v37 = vor.u32 %v14063_v30, %v11093_v7  ;;  %v11285_v16 = vld [vmem:[#allocation16 + $0x200] sm:$0xf] }
 0x345   :  { %v14111_v26 = vld [vmem:[#allocation16 + $0x21c] sm:$0xf0] }
 0x346   :  { %3730 = vmatpush.bf16.msra.mxu2 %v10026_v36  ;;  %3743 = vmatpush.bf16.msra.mxu3 %v10282_v52  ;;  %14829 = vrcp.f32 %v16117_v22  ;;  %v3844_v36 = vand.u32 2147483648, %v16089_v12  ;;  %vm3883_vm1 = vweird.f32 %v16117_v22  ;;  %v14423_v14 = vld [vmem:[#allocation16 + $0xbdc] sm:$0xf0] }
 0x347   :  { %v12245_v30 = vld [vmem:[#allocation16 + $0x980] sm:$0xf] }
 0x348   :  { %v3845_v62 = vor.u32 1.1754944e-38, %v3844_v36  ;;  %v14351_v32 = vld [vmem:[#allocation16 + $0x99c] sm:$0xf0] }
 0x349   :  { %3731 = vmatmul.bf16.vlgmr.msra.gmra.mxu2 %v15961_v11  ;;  %3744 = vmatmul.bf16.vlgmr.msra.gmra.mxu3 %v15948_v10  ;;  %v11158_v11 = vor.u32 %v14079_v20, %v11157_v18  ;;  %v11414_v10 = vor.u32 %v14143_v21, %v11413_v25  ;;  %v12277_v18 = vld [vmem:[#allocation16 + $0x9c0] sm:$0xf]  ;;  %v3857_v25 = vand.u32 2147483647, %v16105_v50 }
 0x34a   :  { %7051 = vmatpush.bf16.msrb.mxu2 %v11254_v44  ;;  %7064 = vmatpush.bf16.msrb.mxu3 %v11510_v56  ;;  %v11061_v44 = vld [vmem:[#allocation16 + $0x40] sm:$0xf] }
 0x34b   :  { %v11062_v9 = vor.u32 %v14055_v45, %v11061_v44  ;;  %v14359_v20 = vld [vmem:[#allocation16 + $0x9dc] sm:$0xf0]  ;;  %vm3858_vm5 = vcmp.eq.f32.partialorder %v3857_v25, 8.507059e+37 }
 0x34c   :  { %v16128_v47 = vpop.eup %14829  ;;  %v3654_v58 = vpop.f32.mrf.mxu0  ;;  %v12278_v1 = vor.u32 %v14359_v20, %v12277_v18  ;;  %v14343_v42 = vld [vmem:[#allocation16 + $0x95c] sm:$0xf0] }
 0x34d   :  { %v3879_v46 = vmul.f32 %v16128_v47, %v16117_v22  ;;  %v3524_v19 = vpop.f32.mrf.mxu2  ;;  %v3655_v51 = vadd.f32 %v3654_v58, %v15991_v39  ;;  %v3667_v43 = vpop.f32.mrf.mxu1  ;;  %v3889_v39 = vand.u32 2147483648, %v16117_v22  ;;  %vm3884_vm14 = vweird.f32 %v16128_v47  ;;  %v14415_v58 = vld [vmem:[#allocation16 + $0xb9c] sm:$0xf0] }
 0x34e   :  { %7052 = vmatpush.bf16.msrb.mxu2 %v11222_v60  ;;  %7065 = vmatpush.bf16.msrb.mxu3 %v11478_v4  ;;  %v3525_v52 = vadd.f32 %v3524_v19, %v16015_v24  ;;  %v3537_v56 = vpop.f32.mrf.mxu3  ;;  %v3841_v60 = vsel %vm16134_vm12, %v16108_v8, %v16124_v63  ;;  %v14119_v4 = vld [vmem:[#allocation16 + $0x25c] sm:$0xf0]  ;;  %v3887_v8 = vand.u32 2147483647, %v16117_v22  ;;  %vm16167_vm3 = vmor %vm3883_vm1, %vm3884_vm14  ;;  %v3856_v22 = vsel %vm16158_vm0, %v16115_v54, %v3852_v34 }
 0x34f   :  { %v3880_v3 = vsub.f32 1.0, %v3879_v46  ;;  %v16147_v12 = vadd.f32 %v3667_v43, %v3655_v51  ;;  %v11318_v15 = vor.u32 %v14119_v4, %v11317_v53  ;;  %v3846_v48 = vsel %vm3843_vm2, %v3845_v62, %v3841_v60  ;;  %v12501_v46 = vld [vmem:[#allocation16 + $0xb80] sm:$0xf] }
 0x350   :  { %v3538_v24 = vadd.f32 %v3537_v56, %v3525_v52  ;;  %vm3888_vm4 = vcmp.eq.f32.partialorder %v3887_v8, 8.507059e+37  ;;  %v16182_v45 = vpack.c.bf16 %v3846_v48, %v3846_v48  ;;  %v12213_v19 = vld [vmem:[#allocation16 + $0x940] sm:$0xf]  ;;  %v12502_v51 = vor.u32 %v14415_v58, %v12501_v46  ;;  %v14091_v58 = vld [vmem:[#allocation16 + $0x184] sm:$0xf] }
 0x351   :  { %v3881_v2 = vmul.f32 %v16128_v47, %v3880_v3  ;;  %v12214_v52 = vor.u32 %v14343_v42, %v12213_v19  ;;  %v12469_v43 = vld [vmem:[#allocation16 + $0xb40] sm:$0xf]  ;;  %v11223_v19 = vld [vmem:[#allocation16 + $0x1a0] sm:$0xf0] }
 0x352   :  { %7053 = vmatpush.bf16.msrb.mxu2 %v11190_v29  ;;  %7066 = vmatpush.bf16.msrb.mxu3 %v11446_v35  ;;  %v14047_v29 = vld [vmem:[#allocation16 + $0x1c] sm:$0xf0]  ;;  %v3859_v35 = vand.u32 2147483648, %v16105_v50  ;;  %v3551_v13 = vadd.f32 %v16062_v38, %v3538_v24 }
 0x353   :  { %v3882_v21 = vadd.f32 %v16128_v47, %v3881_v2  ;;  %v11030_v6 = vor.u32 %v14047_v29, %v11029_v33  ;;  %v12533_v50 = vld [vmem:[#allocation16 + $0xbc0] sm:$0xf] }
 0x354   :  { %v3656_v63 = vpop.f32.mrf.mxu0  ;;  %v3860_v36 = vor.u32 1.1754944e-38, %v3859_v35  ;;  %v12534_v54 = vor.u32 %v14423_v14, %v12533_v50  ;;  %v14407_v56 = vld [vmem:[#allocation16 + $0xb5c] sm:$0xf0] }
 0x355   :  { %v3886_v7 = vsel %vm16167_vm3, %v16128_v47, %v3882_v21  ;;  %v3669_v28 = vpop.f32.mrf.mxu1  ;;  %v12246_v47 = vor.u32 %v14351_v32, %v12245_v30  ;;  %v14335_v60 = vld [vmem:[#allocation16 + $0x91c] sm:$0xf0]  ;;  %v12470_v62 = vor.u32 %v14407_v56, %v12469_v43  ;;  %v14099_v30 = vld [vmem:[#allocation16 + $0x1c4] sm:$0xf] }
 0x356   :  { %7054 = vmatpush.bf16.msrb.mxu2 %v11158_v11  ;;  %7067 = vmatpush.bf16.msrb.mxu3 %v11414_v10  ;;  %v3890_v10 = vor.u32 1.1754944e-38, %v3889_v39  ;;  %v3539_v27 = vpop.f32.mrf.mxu3  ;;  %v3861_v23 = vsel %vm3858_vm5, %v3860_v36, %v3856_v22  ;;  %v14399_v53 = vld [vmem:[#allocation16 + $0xb1c] sm:$0xf0]  ;;  %v11255_v32 = vld [vmem:[#allocation16 + $0x1e0] sm:$0xf0] }
 0x357   :  { %v16186_v49 = vpack.c.bf16 %v3861_v23, %v3861_v23  ;;  %v12149_v4 = vld [vmem:[#allocation16 + $0x8c0] sm:$0xf] }
 0x358   :  { %v14327_v39 = vld [vmem:[#allocation16 + $0x8dc] sm:$0xf0] }
 0x359   :  { %v12150_v33 = vor.u32 %v14327_v39, %v12149_v4  ;;  %v12405_v29 = vld [vmem:[#allocation16 + $0xac0] sm:$0xf] }
 0x35a   :  { %7055 = vmatpush.bf16.msrb.mxu2 %v11126_v41  ;;  %7068 = vmatpush.bf16.msrb.mxu3 %v11382_v17  ;;  %v16172_v41 = vadd.f32 %v16065_v57, %v3551_v13  ;;  %v3526_v17 = vpop.f32.mrf.mxu2  ;;  %v11286_v57 = vor.u32 %v14111_v26, %v11285_v16  ;;  %v14391_v34 = vld [vmem:[#allocation16 + $0xadc] sm:$0xf0] }
 0x35b   :  { %v12117_v2 = vld [vmem:[#allocation16 + $0x880] sm:$0xf]  ;;  %v12406_v18 = vor.u32 %v14391_v34, %v12405_v29 }
 0x35c   :  { %v14319_v8 = vld [vmem:[#allocation16 + $0x89c] sm:$0xf0] }
 0x35d   :  { %v12118_v20 = vor.u32 %v14319_v8, %v12117_v2  ;;  %v12373_v35 = vld [vmem:[#allocation16 + $0xa80] sm:$0xf]  ;;  %v14147_v8 = vld [vmem:[#allocation16 + $0x344] sm:$0xf] }
 0x35e   :  { %7056 = vmatpush.bf16.msrb.mxu2 %v11094_v37  ;;  %7069 = vmatpush.bf16.msrb.mxu3 %v11350_v55  ;;  %v3891_v37 = vsel %vm3888_vm4, %v3890_v10, %v3886_v7  ;;  %v12181_v55 = vld [vmem:[#allocation16 + $0x900] sm:$0xf] }
 0x35f   :  { %v16180_v44 = vpack.c.bf16 %v3891_v37, %v3891_v37  ;;  %v12182_v3 = vor.u32 %v14335_v60, %v12181_v55  ;;  %v14383_v13 = vld [vmem:[#allocation16 + $0xa9c] sm:$0xf0]  ;;  %v11226_v60 = vor.u32 %v14091_v58, %v11223_v19  ;;  %v14123_v19 = vld [vmem:[#allocation16 + $0x284] sm:$0xf] }
 0x360   :  { %v12085_v11 = vld [vmem:[#allocation16 + $0x840] sm:$0xf]  ;;  %v12374_v26 = vor.u32 %v14383_v13, %v12373_v35  ;;  %v14075_v35 = vld [vmem:[#allocation16 + $0x104] sm:$0xf] }
 0x361   :  { %7098 = vmatmul.bf16.vlgmr.msra.gmra.mxu1 %v16180_v44  ;;  %v14311_v25 = vld [vmem:[#allocation16 + $0x85c] sm:$0xf0]  ;;  %v11159_v13 = vld [vmem:[#allocation16 + $0x120] sm:$0xf0] }
 0x362   :  { %7057 = vmatpush.bf16.msrb.mxu2 %v11062_v9  ;;  %7070 = vmatpush.bf16.msrb.mxu3 %v11318_v15  ;;  %v12437_v9 = vld [vmem:[#allocation16 + $0xb00] sm:$0xf]  ;;  %v3781_v15 = vperm.slane %v16067_v59, 4  ;;  %v12086_v10 = vor.u32 %v14311_v25, %v12085_v11 }
 0x363   :  { %v12438_v24 = vor.u32 %v14399_v53, %v12437_v9  ;;  %v14375_v50 = vld [vmem:[#allocation16 + $0xa5c] sm:$0xf0]  ;;  %v14083_v9 = vld [vmem:[#allocation16 + $0x144] sm:$0xf] }
 0x364   :  { %v12053_v22 = vld [vmem:[#allocation16 + $0x800] sm:$0xf]  ;;  %v11191_v53 = vld [vmem:[#allocation16 + $0x160] sm:$0xf0] }
 0x365   :  { %v14303_v7 = vld [vmem:[#allocation16 + $0x81c] sm:$0xf0]  ;;  %v11194_v34 = vor.u32 %v14083_v9, %v11191_v53 }
 0x366   :  { %7058 = vmatpush.bf16.msrb.mxu2 %v11030_v6  ;;  %7071 = vmatpush.bf16.msrb.mxu3 %v11286_v57  ;;  %v12054_v37 = vor.u32 %v14303_v7, %v12053_v22  ;;  %v14367_v57 = vld [vmem:[#allocation16 + $0xa1c] sm:$0xf0] }
 0x367   :  { %v12789_v28 = vld [vmem:[#allocation16 + $0xdc0] sm:$0xf] }
 0x368   :  { %v14487_v27 = vld [vmem:[#allocation16 + $0xddc] sm:$0xf0] }
 0x369   :  { %7059 = vmatmul.bf16.vlgmr.msrb.gmra.mxu2 %v16182_v45  ;;  %7072 = vmatmul.bf16.vlgmr.msrb.gmra.mxu3 %v16186_v49  ;;  %v12790_v46 = vor.u32 %v14487_v27, %v12789_v28  ;;  %v12757_v56 = vld [vmem:[#allocation16 + $0xd80] sm:$0xf] }
 0x36a   :  { %7103 = vmatpush.bf16.msra.mxu2 %v12278_v1  ;;  %7116 = vmatpush.bf16.msra.mxu3 %v12534_v54  ;;  %v12341_v1 = vld [vmem:[#allocation16 + $0xa40] sm:$0xf]  ;;  %v11258_v54 = vor.u32 %v14099_v30, %v11255_v32 }
 0x36b   :  { %v12342_v36 = vor.u32 %v14375_v50, %v12341_v1  ;;  %7129 = vmatpush.bf16.msrb.mxu0 %v12790_v46  ;;  %v14479_v55 = vld [vmem:[#allocation16 + $0xd9c] sm:$0xf0]  ;;  %v11127_v1 = vld [vmem:[#allocation16 + $0xe0] sm:$0xf0] }
 0x36c   :  { %v16190_v21 = vpop.f32.mrf.mxu1  ;;  %v3576_v6 = vpop.f32.mrf.mxu2  ;;  %v14471_v29 = vld [vmem:[#allocation16 + $0xd5c] sm:$0xf0] }
 0x36d   :  { %v3577_v16 = vadd.f32 %v3576_v6, %v16172_v41  ;;  %v3589_v38 = vpop.f32.mrf.mxu3  ;;  %v12309_v41 = vld [vmem:[#allocation16 + $0xa00] sm:$0xf]  ;;  %v16200_v2 = vpop.f32.mrf.mxu0  ;;  %v11162_v6 = vor.u32 %v14075_v35, %v11159_v13  ;;  %v14355_v35 = vld [vmem:[#allocation16 + $0x9c4] sm:$0xf] }
 0x36e   :  { %7104 = vmatpush.bf16.msra.mxu2 %v12246_v47  ;;  %7117 = vmatpush.bf16.msra.mxu3 %v12502_v51  ;;  %v3590_v48 = vadd.f32 %v3589_v38, %v16017_v61  ;;  %v14163_v61 = vld [vmem:[#allocation16 + $0x3c4] sm:$0xf]  ;;  %v12310_v51 = vor.u32 %v14367_v57, %v12309_v41  ;;  %v12693_v11 = vld [vmem:[#allocation16 + $0xd00] sm:$0xf] }
 0x36f   :  { %v3797_v14 = vadd.f32 %v3781_v15, %v3577_v16  ;;  %v11511_v47 = vld [vmem:[#allocation16 + $0x3e0] sm:$0xf0]  ;;  %v14463_v25 = vld [vmem:[#allocation16 + $0xd1c] sm:$0xf0] }
 0x370   :  { %v3603_v63 = vadd.f32 %v16082_v5, %v3590_v48  ;;  %v11514_v43 = vor.u32 %v14163_v61, %v11511_v47  ;;  %v14139_v16 = vld [vmem:[#allocation16 + $0x304] sm:$0xf]  ;;  %v12694_v38 = vor.u32 %v14463_v25, %v12693_v11  ;;  %v12661_v22 = vld [vmem:[#allocation16 + $0xcc0] sm:$0xf] }
 0x371   :  { %v11023_v17 = vmul.f32 -1.442695, %v3797_v14  ;;  %v14059_v14 = vld [vmem:[#allocation16 + $0x84] sm:$0xf]  ;;  %v14455_v7 = vld [vmem:[#allocation16 + $0xcdc] sm:$0xf0] }
 0x372   :  { %7105 = vmatpush.bf16.msra.mxu2 %v12214_v52  ;;  %7118 = vmatpush.bf16.msra.mxu3 %v12470_v62  ;;  %v16196_v23 = vadd.f32 %v16085_v0, %v3603_v63  ;;  %v14155_v62 = vld [vmem:[#allocation16 + $0x384] sm:$0xf]  ;;  %v12629_v61 = vld [vmem:[#allocation16 + $0xc80] sm:$0xf] }
 0x373   :  { %14831 = vpow2.f32 %v11023_v17  ;;  %v11479_v0 = vld [vmem:[#allocation16 + $0x3a0] sm:$0xf0]  ;;  %v14447_v47 = vld [vmem:[#allocation16 + $0xc9c] sm:$0xf0] }
 0x374   :  { %v3578_v42 = vpop.f32.mrf.mxu2  ;;  %v3721_v5 = vpop.f32.mrf.mxu1  ;;  %v11095_v17 = vld [vmem:[#allocation16 + $0xa0] sm:$0xf0]  ;;  %v14439_v9 = vld [vmem:[#allocation16 + $0xc5c] sm:$0xf0] }
 0x375   :  { %v3591_v52 = vpop.f32.mrf.mxu3  ;;  %v3708_v63 = vpop.f32.mrf.mxu0  ;;  %v11383_v41 = vld [vmem:[#allocation16 + $0x2e0] sm:$0xf0]  ;;  %v11098_v27 = vor.u32 %v14059_v14, %v11095_v17  ;;  %v12630_v5 = vor.u32 %v14447_v47, %v12629_v61  ;;  %v13013_v47 = vld [vmem:[#allocation16 + $0xf80] sm:$0xf] }
 0x376   :  { %7106 = vmatpush.bf16.msra.mxu2 %v12182_v3  ;;  %7119 = vmatpush.bf16.msra.mxu3 %v12438_v24  ;;  %v12758_v3 = vor.u32 %v14479_v55, %v12757_v56  ;;  %v11482_v24 = vor.u32 %v14155_v62, %v11479_v0  ;;  %v11351_v42 = vld [vmem:[#allocation16 + $0x2a0] sm:$0xf0]  ;;  %v3782_v62 = vperm.slane %v16067_v59, 5 }
 0x377   :  { %v14051_v56 = vld [vmem:[#allocation16 + $0x44] sm:$0xf]  ;;  %v11354_v0 = vor.u32 %v14123_v19, %v11351_v42 }
 0x378   :  { %7130 = vmatpush.bf16.msrb.mxu0 %v12758_v3  ;;  %v11063_v55 = vld [vmem:[#allocation16 + $0x60] sm:$0xf0]  ;;  %v12597_v3 = vld [vmem:[#allocation16 + $0xc40] sm:$0xf] }
 0x379   :  { %v14832_v4 = vpop.eup %14831  ;;  %v11031_v59 = vld [vmem:[#allocation16 + $0x20] sm:$0xf0] }
 0x37a   :  { %7107 = vmatpush.bf16.msra.mxu2 %v12150_v33  ;;  %7120 = vmatpush.bf16.msra.mxu3 %v12406_v18  ;;  %v16198_v39 = vadd.f32 1.0, %v14832_v4  ;;  %v12725_v33 = vld [vmem:[#allocation16 + $0xd40] sm:$0xf]  ;;  %v11447_v18 = vld [vmem:[#allocation16 + $0x360] sm:$0xf0] }
 0x37b   :  { %v11450_v15 = vor.u32 %v14147_v8, %v11447_v18  ;;  %v14043_v8 = vld [vmem:[#allocation16 + $0x4] sm:$0xf] }
 0x37c   :  { %14833 = vrcp.f32 %v16198_v39  ;;  %v3904_v28 = vand.u32 2147483648, %v16198_v39  ;;  %v3902_v58 = vand.u32 2147483647, %v16198_v39  ;;  %vm3898_vm6 = vweird.f32 %v16198_v39  ;;  %v12279_v13 = vld [vmem:[#allocation16 + $0x9e0] sm:$0xf0] }
 0x37d   :  { %v14107_v25 = vld [vmem:[#allocation16 + $0x204] sm:$0xf]  ;;  %v11034_v14 = vor.u32 %v14043_v8, %v11031_v59 }
 0x37e   :  { %7108 = vmatpush.bf16.msra.mxu2 %v12118_v20  ;;  %7121 = vmatpush.bf16.msra.mxu3 %v12374_v26  ;;  %v12726_v20 = vor.u32 %v14471_v29, %v12725_v33  ;;  %v11415_v26 = vld [vmem:[#allocation16 + $0x320] sm:$0xf0]  ;;  %vm3903_vm8 = vcmp.eq.f32.partialorder %v3902_v58, 8.507059e+37 }
 0x37f   :  { %v11418_v48 = vor.u32 %v14139_v16, %v11415_v26  ;;  %v11319_v33 = vld [vmem:[#allocation16 + $0x260] sm:$0xf0]  ;;  %v14431_v16 = vld [vmem:[#allocation16 + $0xc1c] sm:$0xf0] }
 0x380   :  { %7131 = vmatpush.bf16.msrb.mxu0 %v12726_v20  ;;  %v11287_v26 = vld [vmem:[#allocation16 + $0x220] sm:$0xf0] }
 0x381   :  { %v14347_v17 = vld [vmem:[#allocation16 + $0x984] sm:$0xf] }
 0x382   :  { %7109 = vmatpush.bf16.msra.mxu2 %v12086_v10  ;;  %7122 = vmatpush.bf16.msra.mxu3 %v12342_v36  ;;  %v14067_v10 = vld [vmem:[#allocation16 + $0xc4] sm:$0xf]  ;;  %v14834_v50 = vpop.eup %14833 }
 0x383   :  { %v3894_v30 = vmul.f32 %v14834_v50, %v16198_v39  ;;  %v11130_v32 = vor.u32 %v14067_v10, %v11127_v1  ;;  %v14131_v36 = vld [vmem:[#allocation16 + $0x2c4] sm:$0xf]  ;;  %vm3899_vm10 = vweird.f32 %v14834_v50  ;;  %v12598_v39 = vor.u32 %v14439_v9, %v12597_v3 }
 0x384   :  { %7132 = vmatpush.bf16.msrb.mxu0 %v12694_v38  ;;  %vm3900_vm7 = vmor %vm3898_vm6, %vm3899_vm10  ;;  %v14227_v10 = vld [vmem:[#allocation16 + $0x5c4] sm:$0xf] }
 0x385   :  { %v3895_v57 = vsub.f32 1.0, %v3894_v30  ;;  %v11767_v1 = vld [vmem:[#allocation16 + $0x5e0] sm:$0xf0]  ;;  %v13045_v30 = vld [vmem:[#allocation16 + $0xfc0] sm:$0xf] }
 0x386   :  { %7110 = vmatpush.bf16.msra.mxu2 %v12054_v37  ;;  %7123 = vmatpush.bf16.msra.mxu3 %v12310_v51  ;;  %v12662_v37 = vor.u32 %v14455_v7, %v12661_v22  ;;  %v11770_v22 = vor.u32 %v14227_v10, %v11767_v1  ;;  %v12282_v7 = vor.u32 %v14355_v35, %v12279_v13  ;;  %v12247_v63 = vld [vmem:[#allocation16 + $0x9a0] sm:$0xf0] }
 0x387   :  { %v3896_v46 = vmul.f32 %v14834_v50, %v3895_v57  ;;  %v14219_v57 = vld [vmem:[#allocation16 + $0x584] sm:$0xf]  ;;  %v12250_v61 = vor.u32 %v14347_v17, %v12247_v63  ;;  %v12885_v63 = vld [vmem:[#allocation16 + $0xe80] sm:$0xf] }
 0x388   :  { %7133 = vmatpush.bf16.msrb.mxu0 %v12662_v37  ;;  %v14339_v58 = vld [vmem:[#allocation16 + $0x944] sm:$0xf] }
 0x389   :  { %v3897_v52 = vadd.f32 %v14834_v50, %v3896_v46  ;;  %v14543_v46 = vld [vmem:[#allocation16 + $0xf9c] sm:$0xf0]  ;;  %v12215_v19 = vld [vmem:[#allocation16 + $0x960] sm:$0xf0] }
 0x38a   :  { %7155 = vmatpush.bf16.msrb.mxu2 %v11258_v54  ;;  %7168 = vmatpush.bf16.msrb.mxu3 %v11514_v43  ;;  %v11386_v54 = vor.u32 %v14131_v36, %v11383_v41  ;;  %v11290_v36 = vor.u32 %v14107_v25, %v11287_v26  ;;  %v13014_v42 = vor.u32 %v14543_v46, %v13013_v47  ;;  %v12183_v3 = vld [vmem:[#allocation16 + $0x920] sm:$0xf0]  ;;  %v12917_v25 = vld [vmem:[#allocation16 + $0xec0] sm:$0xf] }
 0x38b   :  { %v3901_v53 = vsel %vm3900_vm7, %v14834_v50, %v3897_v52  ;;  %v14195_v59 = vld [vmem:[#allocation16 + $0x4c4] sm:$0xf] }
 0x38c   :  { %v3628_v51 = vpop.f32.mrf.mxu2  ;;  %7134 = vmatpush.bf16.msrb.mxu0 %v12630_v5  ;;  %v3641_v4 = vpop.f32.mrf.mxu3  ;;  %v14211_v5 = vld [vmem:[#allocation16 + $0x544] sm:$0xf] }
 0x38d   :  { %v3629_v43 = vadd.f32 %v3628_v51, %v16196_v23  ;;  %v16209_v18 = vpop.f32.mrf.mxu0  ;;  %v11703_v51 = vld [vmem:[#allocation16 + $0x560] sm:$0xf0] }
 0x38e   :  { %7156 = vmatpush.bf16.msrb.mxu2 %v11226_v60  ;;  %7169 = vmatpush.bf16.msrb.mxu3 %v11482_v24  ;;  %v3905_v60 = vor.u32 1.1754944e-38, %v3904_v28  ;;  %v14115_v24 = vld [vmem:[#allocation16 + $0x244] sm:$0xf] }
 0x38f   :  { %v3642_v23 = vadd.f32 %v3641_v4, %v3629_v43  ;;  %v11322_v11 = vor.u32 %v14115_v24, %v11319_v33  ;;  %v11735_v28 = vld [vmem:[#allocation16 + $0x5a0] sm:$0xf0]  ;;  %v11706_v43 = vor.u32 %v14211_v5, %v11703_v51 }
 0x390   :  { %v3906_v29 = vsel %vm3903_vm8, %v3905_v60, %v3901_v53  ;;  %7135 = vmatpush.bf16.msrb.mxu0 %v12598_v39  ;;  %v12981_v60 = vld [vmem:[#allocation16 + $0xf40] sm:$0xf]  ;;  %v14203_v53 = vld [vmem:[#allocation16 + $0x504] sm:$0xf] }
 0x391   :  { %v16211_v20 = vpack.c.bf16 %v3906_v29, %v3906_v29  ;;  %v11671_v4 = vld [vmem:[#allocation16 + $0x520] sm:$0xf0]  ;;  %v12949_v39 = vld [vmem:[#allocation16 + $0xf00] sm:$0xf] }
 0x392   :  { %7157 = vmatpush.bf16.msrb.mxu2 %v11194_v34  ;;  %7170 = vmatpush.bf16.msrb.mxu3 %v11450_v15  ;;  %v11066_v34 = vor.u32 %v14051_v56, %v11063_v55  ;;  %v3798_v15 = vadd.f32 %v3782_v62, %v3642_v23  ;;  %v12218_v55 = vor.u32 %v14339_v58, %v12215_v19  ;;  %v14535_v62 = vld [vmem:[#allocation16 + $0xf5c] sm:$0xf0]  ;;  %v14323_v23 = vld [vmem:[#allocation16 + $0x8c4] sm:$0xf] }
 0x393   :  { %7111 = vmatmul.bf16.vlgmr.msra.gmra.mxu2 %v16211_v20  ;;  %v12982_v9 = vor.u32 %v14535_v62, %v12981_v60  ;;  %v11674_v33 = vor.u32 %v14203_v53, %v11671_v4  ;;  %v14527_v29 = vld [vmem:[#allocation16 + $0xf1c] sm:$0xf0]  ;;  %v11639_v35 = vld [vmem:[#allocation16 + $0x4e0] sm:$0xf0] }
 0x394   :  { %v11024_v50 = vmul.f32 -1.442695, %v3798_v15  ;;  %v3643_v37 = vpop.f32.mrf.mxu3  ;;  %v12950_v8 = vor.u32 %v14527_v29, %v12949_v39  ;;  %v11642_v13 = vor.u32 %v14195_v59, %v11639_v35  ;;  %v14315_v26 = vld [vmem:[#allocation16 + $0x884] sm:$0xf]  ;;  %v14503_v60 = vld [vmem:[#allocation16 + $0xe5c] sm:$0xf0] }
 0x395   :  { %v14419_v58 = vld [vmem:[#allocation16 + $0xbc4] sm:$0xf]  ;;  %v14104_v39 = vld [vmem:[#allocation16 + $0x1e4] sm:$0xf0] }
 0x396   :  { %7158 = vmatpush.bf16.msrb.mxu2 %v11162_v6  ;;  %7171 = vmatpush.bf16.msrb.mxu3 %v11418_v48  ;;  %v12565_v6 = vld [vmem:[#allocation16 + $0xc00] sm:$0xf]  ;;  %v3630_v48 = vpop.f32.mrf.mxu2  ;;  %14835 = vpow2.f32 %v11024_v50  ;;  %v14187_v50 = vld [vmem:[#allocation16 + $0x484] sm:$0xf] }
 0x397   :  { %v12566_v38 = vor.u32 %v14431_v16, %v12565_v6  ;;  %v14519_v6 = vld [vmem:[#allocation16 + $0xedc] sm:$0xf0]  ;;  %v12535_v19 = vld [vmem:[#allocation16 + $0xbe0] sm:$0xf0] }
 0x398   :  { %v12918_v10 = vor.u32 %v14519_v6, %v12917_v25  ;;  %v12538_v4 = vor.u32 %v14419_v58, %v12535_v19  ;;  %v11543_v59 = vld [vmem:[#allocation16 + $0x420] sm:$0xf0]  ;;  %v12821_v25 = vld [vmem:[#allocation16 + $0xe00] sm:$0xf] }
 0x399   :  { %7136 = vmatpush.bf16.msrb.mxu0 %v12566_v38  ;;  %v12119_v38 = vld [vmem:[#allocation16 + $0x8a0] sm:$0xf0]  ;;  %v16219_v1 = vpop.f32.mrf.mxu1  ;;  %v14495_v6 = vld [vmem:[#allocation16 + $0xe1c] sm:$0xf0] }
 0x39a   :  { %7159 = vmatpush.bf16.msrb.mxu2 %v11130_v32  ;;  %7172 = vmatpush.bf16.msrb.mxu3 %v11386_v54  ;;  %v14551_v32 = vld [vmem:[#allocation16 + $0xfdc] sm:$0xf0]  ;;  %v11738_v54 = vor.u32 %v14219_v57, %v11735_v28  ;;  %v12122_v17 = vor.u32 %v14315_v26, %v12119_v38  ;;  %v14307_v57 = vld [vmem:[#allocation16 + $0x844] sm:$0xf]  ;;  %v12822_v26 = vor.u32 %v14495_v6, %v12821_v25 }
 0x39b   :  { %v13046_v41 = vor.u32 %v14551_v32, %v13045_v30  ;;  %v12087_v28 = vld [vmem:[#allocation16 + $0x860] sm:$0xf0] }
 0x39c   :  { %v14836_v52 = vpop.eup %14835  ;;  %v14291_v38 = vld [vmem:[#allocation16 + $0x7c4] sm:$0xf] }
 0x39d   :  { %7181 = vmatpush.bf16.msra.mxu0 %v11770_v22  ;;  %7142 = vmatpush.bf16.msrb.mxu1 %v13046_v41  ;;  %v16214_v56 = vadd.f32 1.0, %v14836_v52  ;;  %v16226_v52 = vld [vmem:[#allocation14] sm:$0xff]  ;;  %v14371_v25 = vld [vmem:[#allocation16 + $0xa44] sm:$0xf] }
 0x39e   :  { %7160 = vmatpush.bf16.msrb.mxu2 %v11098_v27  ;;  %7173 = vmatpush.bf16.msrb.mxu3 %v11354_v0  ;;  %v3760_v27 = vpop.f32.mrf.mxu0  ;;  %v14331_v0 = vld [vmem:[#allocation16 + $0x904] sm:$0xf] }
 0x39f   :  { %14837 = vrcp.f32 %v16214_v56  ;;  %v12186_v24 = vor.u32 %v14331_v0, %v12183_v3  ;;  %v3917_v22 = vand.u32 2147483647, %v16214_v56  ;;  %v3919_v30 = vand.u32 2147483648, %v16214_v56  ;;  %v12055_v0 = vld [vmem:[#allocation16 + $0x820] sm:$0xf0] }
 0x3a0   :  { %vm3913_vm11 = vweird.f32 %v16214_v56  ;;  %v12343_v6 = vld [vmem:[#allocation16 + $0xa60] sm:$0xf0] }
 0x3a1   :  { %7182 = vmatpush.bf16.msra.mxu0 %v11738_v54  ;;  %7143 = vmatpush.bf16.msrb.mxu1 %v13014_v42  ;;  %v14179_v54 = vld [vmem:[#allocation16 + $0x444] sm:$0xf]  ;;  %v3920_v5 = vor.u32 1.1754944e-38, %v3919_v30  ;;  %vm3918_vm13 = vcmp.eq.f32.partialorder %v3917_v22, 8.507059e+37  ;;  %v3773_v29 = vpop.f32.mrf.mxu1 }
 0x3a2   :  { %7161 = vmatpush.bf16.msrb.mxu2 %v11066_v34  ;;  %7174 = vmatpush.bf16.msrb.mxu3 %v11322_v11  ;;  %v12151_v34 = vld [vmem:[#allocation16 + $0x8e0] sm:$0xf0] }
 0x3a3   :  { %v12154_v11 = vor.u32 %v14323_v23, %v12151_v34  ;;  %v12503_v34 = vld [vmem:[#allocation16 + $0xba0] sm:$0xf0] }
 0x3a4   :  { %v12471_v30 = vld [vmem:[#allocation16 + $0xb60] sm:$0xf0] }
 0x3a5   :  { %7183 = vmatpush.bf16.msra.mxu0 %v11706_v43  ;;  %7144 = vmatpush.bf16.msrb.mxu1 %v12982_v9  ;;  %v14838_v15 = vpop.eup %14837  ;;  %v12090_v43 = vor.u32 %v14307_v57, %v12087_v28  ;;  %v14088_v57 = vld [vmem:[#allocation16 + $0x164] sm:$0xf0]  ;;  %v14259_v29 = vld [vmem:[#allocation16 + $0x6c4] sm:$0xf] }
 0x3a6   :  { %7162 = vmatpush.bf16.msrb.mxu2 %v11034_v14  ;;  %7175 = vmatpush.bf16.msrb.mxu3 %v11290_v36  ;;  %v3909_v16 = vmul.f32 %v14838_v15, %v16214_v56  ;;  %v11607_v14 = vld [vmem:[#allocation16 + $0x4a0] sm:$0xf0]  ;;  %v14511_v36 = vld [vmem:[#allocation16 + $0xe9c] sm:$0xf0]  ;;  %vm3914_vm9 = vweird.f32 %v14838_v15 }
 0x3a7   :  { %v12886_v27 = vor.u32 %v14511_v36, %v12885_v63  ;;  %vm3915_vm12 = vmor %vm3913_vm11, %vm3914_vm9  ;;  %v14299_v56 = vld [vmem:[#allocation16 + $0x804] sm:$0xf] }
 0x3a8   :  { %v3910_v48 = vsub.f32 1.0, %v3909_v16  ;;  %v11229_v16 = vld [vmem:[#allocation16 + $0x188] sm:$0xf]  ;;  %v14283_v63 = vld [vmem:[#allocation16 + $0x784] sm:$0xf] }
 0x3a9   :  { %7163 = vmatmul.bf16.vlgmr.msrb.gmra.mxu2 %v16182_v45  ;;  %7184 = vmatpush.bf16.msra.mxu0 %v11674_v33  ;;  %v11261_v33 = vld [vmem:[#allocation16 + $0x1c8] sm:$0xf]  ;;  %v11991_v36 = vld [vmem:[#allocation16 + $0x7a0] sm:$0xf0] }
 0x3aa   :  { %7207 = vmatpush.bf16.msra.mxu2 %v12282_v7  ;;  %7145 = vmatpush.bf16.msrb.mxu1 %v12950_v8  ;;  %v11610_v7 = vor.u32 %v14187_v50, %v11607_v14  ;;  %v3911_v41 = vmul.f32 %v14838_v15, %v3910_v48  ;;  %v14171_v8 = vld [vmem:[#allocation16 + $0x404] sm:$0xf]  ;;  %v14096_v14 = vld [vmem:[#allocation16 + $0x1a4] sm:$0xf0]  ;;  %v11994_v28 = vor.u32 %v14283_v63, %v11991_v36 }
 0x3ab   :  { %v12023_v48 = vld [vmem:[#allocation16 + $0x7e0] sm:$0xf0] }
 0x3ac   :  { %v3680_v32 = vpop.f32.mrf.mxu2  ;;  %v3912_v47 = vadd.f32 %v14838_v15, %v3911_v41  ;;  %v3693_v46 = vpop.f32.mrf.mxu3  ;;  %v14363_v63 = vld [vmem:[#allocation16 + $0xa04] sm:$0xf] }
 0x3ad   :  { %7185 = vmatpush.bf16.msra.mxu0 %v11642_v13  ;;  %v3681_v37 = vadd.f32 %v3680_v32, %v16147_v12  ;;  %v3783_v12 = vperm.slane %v16226_v52, 6  ;;  %v12058_v13 = vor.u32 %v14299_v56, %v12055_v0  ;;  %v12026_v32 = vor.u32 %v14291_v38, %v12023_v48  ;;  %v14267_v56 = vld [vmem:[#allocation16 + $0x704] sm:$0xf] }
 0x3ae   :  { %7208 = vmatpush.bf16.msra.mxu2 %v12250_v61  ;;  %7146 = vmatpush.bf16.msrb.mxu1 %v12918_v10  ;;  %v11575_v61 = vld [vmem:[#allocation16 + $0x460] sm:$0xf0]  ;;  %v3916_v62 = vsel %vm3915_vm12, %v14838_v15, %v3912_v47 }
 0x3af   :  { %v11578_v42 = vor.u32 %v14179_v54, %v11575_v61  ;;  %v3694_v51 = vadd.f32 %v3693_v46, %v3681_v37  ;;  %v3921_v9 = vsel %vm3918_vm13, %v3920_v5, %v3916_v62  ;;  %v11197_v37 = vld [vmem:[#allocation16 + $0x148] sm:$0xf]  ;;  %v12439_v54 = vld [vmem:[#allocation16 + $0xb20] sm:$0xf0] }
 0x3b0   :  { %v16230_v23 = vpack.c.bf16 %v3921_v9, %v3921_v9  ;;  %v11198_v61 = vor.u32 %v14088_v57, %v11197_v37  ;;  %v14275_v47 = vld [vmem:[#allocation16 + $0x744] sm:$0xf]  ;;  %v14080_v5 = vld [vmem:[#allocation16 + $0x124] sm:$0xf0] }
 0x3b1   :  { %7186 = vmatpush.bf16.msra.mxu0 %v11610_v7  ;;  %v3707_v53 = vadd.f32 %v16200_v2, %v3694_v51  ;;  %v11262_v2 = vor.u32 %v14104_v39, %v11261_v33  ;;  %v14403_v7 = vld [vmem:[#allocation16 + $0xb44] sm:$0xf]  ;;  %v14072_v9 = vld [vmem:[#allocation16 + $0xe4] sm:$0xf0] }
 0x3b2   :  { %7209 = vmatpush.bf16.msra.mxu2 %v12218_v55  ;;  %7147 = vmatpush.bf16.msrb.mxu1 %v12886_v27  ;;  %v12853_v55 = vld [vmem:[#allocation16 + $0xe40] sm:$0xf]  ;;  %v12474_v41 = vor.u32 %v14403_v7, %v12471_v30  ;;  %v14395_v27 = vld [vmem:[#allocation16 + $0xb04] sm:$0xf]  ;;  %v11069_v7 = vld [vmem:[#allocation16 + $0x48] sm:$0xf] }
 0x3b3   :  { %v12854_v3 = vor.u32 %v14503_v60, %v12853_v55  ;;  %v3799_v35 = vadd.f32 %v3783_v12, %v3707_v53  ;;  %7124 = vmatmul.bf16.vlgmr.msra.gmra.mxu3 %v16230_v23  ;;  %v11959_v46 = vld [vmem:[#allocation16 + $0x760] sm:$0xf0]  ;;  %v12442_v19 = vor.u32 %v14395_v27, %v12439_v54  ;;  %v14056_v30 = vld [vmem:[#allocation16 + $0x64] sm:$0xf0] }
 0x3b4   :  { %v3682_v15 = vpop.f32.mrf.mxu2  ;;  %7220 = vmatpush.bf16.msra.mxu3 %v12538_v4  ;;  %v3695_v22 = vpop.f32.mrf.mxu3  ;;  %v11962_v51 = vor.u32 %v14275_v47, %v11959_v46  ;;  %v14387_v55 = vld [vmem:[#allocation16 + $0xac4] sm:$0xf]  ;;  %v11517_v37 = vld [vmem:[#allocation16 + $0x3c8] sm:$0xf]  ;;  %v11070_v27 = vor.u32 %v14056_v30, %v11069_v7 }
 0x3b5   :  { %7187 = vmatpush.bf16.msra.mxu0 %v11578_v42  ;;  %v11025_v10 = vmul.f32 -1.442695, %v3799_v35  ;;  %v11165_v42 = vld [vmem:[#allocation16 + $0x108] sm:$0xf]  ;;  %v12407_v60 = vld [vmem:[#allocation16 + $0xae0] sm:$0xf0]  ;;  %v12346_v22 = vor.u32 %v14371_v25, %v12343_v6 }
 0x3b6   :  { %7210 = vmatpush.bf16.msra.mxu2 %v12186_v24  ;;  %v14411_v24 = vld [vmem:[#allocation16 + $0xb84] sm:$0xf]  ;;  %7148 = vmatpush.bf16.msrb.mxu1 %v12854_v3  ;;  %v11166_v62 = vor.u32 %v14080_v5, %v11165_v42  ;;  %v12410_v0 = vor.u32 %v14387_v55, %v12407_v60  ;;  %v11133_v3 = vld [vmem:[#allocation16 + $0xc8] sm:$0xf] }
 0x3b7   :  { %v12506_v50 = vor.u32 %v14411_v24, %v12503_v34  ;;  %14839 = vpow2.f32 %v11025_v10  ;;  %v11927_v53 = vld [vmem:[#allocation16 + $0x720] sm:$0xf0]  ;;  %v11134_v39 = vor.u32 %v14072_v9, %v11133_v3  ;;  %v14064_v35 = vld [vmem:[#allocation16 + $0xa4] sm:$0xf0] }
 0x3b8   :  { %v14379_v4 = vld [vmem:[#allocation16 + $0xa84] sm:$0xf]  ;;  %v11930_v33 = vor.u32 %v14267_v56, %v11927_v53  ;;  %v14168_v57 = vld [vmem:[#allocation16 + $0x3e4] sm:$0xf0] }
 0x3b9   :  { %7221 = vmatpush.bf16.msra.mxu3 %v12506_v50  ;;  %v12375_v24 = vld [vmem:[#allocation16 + $0xaa0] sm:$0xf0]  ;;  %v11037_v42 = vld [vmem:[#allocation16 + $0x8] sm:$0xf]  ;;  %v11518_v56 = vor.u32 %v14168_v57, %v11517_v37 }
 0x3ba   :  { %7211 = vmatpush.bf16.msra.mxu2 %v12154_v11  ;;  %v11546_v11 = vor.u32 %v14171_v8, %v11543_v59  ;;  %7149 = vmatpush.bf16.msrb.mxu1 %v12822_v26  ;;  %v11895_v34 = vld [vmem:[#allocation16 + $0x6e0] sm:$0xf0]  ;;  %v12378_v8 = vor.u32 %v14379_v4, %v12375_v24  ;;  %v11101_v59 = vld [vmem:[#allocation16 + $0x88] sm:$0xf] }
 0x3bb   :  { %v11102_v38 = vor.u32 %v14064_v35, %v11101_v59  ;;  %v14251_v10 = vld [vmem:[#allocation16 + $0x684] sm:$0xf]  ;;  %v14048_v5 = vld [vmem:[#allocation16 + $0x24] sm:$0xf0] }
 0x3bc   :  { %7188 = vmatpush.bf16.msra.mxu0 %v11546_v11  ;;  %v11863_v50 = vld [vmem:[#allocation16 + $0x6a0] sm:$0xf0]  ;;  %v14160_v3 = vld [vmem:[#allocation16 + $0x3a4] sm:$0xf0] }
 0x3bd   :  { %v14840_v58 = vpop.eup %14839  ;;  %7222 = vmatpush.bf16.msra.mxu3 %v12474_v41  ;;  %v12311_v36 = vld [vmem:[#allocation16 + $0xa20] sm:$0xf0]  ;;  %v14360_v53 = vld [vmem:[#allocation16 + $0x9e4] sm:$0xf0] }
 0x3be   :  { %7212 = vmatpush.bf16.msra.mxu2 %v12122_v17  ;;  %v11230_v17 = vor.u32 %v14096_v14, %v11229_v16  ;;  %7194 = vmatpush.bf16.msra.mxu1 %v12026_v32  ;;  %v16234_v12 = vadd.f32 1.0, %v14840_v58  ;;  %v11866_v32 = vor.u32 %v14251_v10, %v11863_v50  ;;  %v14483_v54 = vld [vmem:[#allocation16 + $0xdc4] sm:$0xf]  ;;  %v12314_v58 = vor.u32 %v14363_v63, %v12311_v36  ;;  %v11453_v25 = vld [vmem:[#allocation16 + $0x348] sm:$0xf] }
 0x3bf   :  { %v11831_v47 = vld [vmem:[#allocation16 + $0x660] sm:$0xf0]  ;;  %v14144_v7 = vld [vmem:[#allocation16 + $0x324] sm:$0xf0] }
 0x3c0   :  { %14841 = vrcp.f32 %v16234_v12  ;;  %vm3928_vm15 = vweird.f32 %v16234_v12  ;;  %v12759_v59 = vld [vmem:[#allocation16 + $0xda0] sm:$0xf0]  ;;  %v12221_v30 = vld [vmem:[#allocation16 + $0x948] sm:$0xf] }
 0x3c1   :  { %7223 = vmatpush.bf16.msra.mxu3 %v12442_v19  ;;  %v12791_v19 = vld [vmem:[#allocation16 + $0xde0] sm:$0xf0]  ;;  %v14136_v37 = vld [vmem:[#allocation16 + $0x2e4] sm:$0xf0] }
 0x3c2   :  { %7213 = vmatpush.bf16.msra.mxu2 %v12090_v43  ;;  %7195 = vmatpush.bf16.msra.mxu1 %v11994_v28  ;;  %v16236_v43 = vpop.f32.mrf.mxu0  ;;  %v14467_v10 = vld [vmem:[#allocation16 + $0xd44] sm:$0xf]  ;;  %v12189_v57 = vld [vmem:[#allocation16 + $0x908] sm:$0xf] }
 0x3c3   :  { %7176 = vmatmul.bf16.vlgmr.msrb.gmra.mxu3 %v16186_v49  ;;  %v12727_v50 = vld [vmem:[#allocation16 + $0xd60] sm:$0xf0] }
 0x3c4   :  { %v14459_v63 = vld [vmem:[#allocation16 + $0xd04] sm:$0xf] }
 0x3c5   :  { %7224 = vmatpush.bf16.msra.mxu3 %v12410_v0  ;;  %v11485_v0 = vld [vmem:[#allocation16 + $0x388] sm:$0xf]  ;;  %v12695_v36 = vld [vmem:[#allocation16 + $0xd20] sm:$0xf0] }
 0x3c6   :  { %7214 = vmatpush.bf16.msra.mxu2 %v12058_v13  ;;  %7196 = vmatpush.bf16.msra.mxu1 %v11962_v51  ;;  %v11898_v13 = vor.u32 %v14259_v29, %v11895_v34  ;;  %v14842_v15 = vpop.eup %14841  ;;  %v14235_v29 = vld [vmem:[#allocation16 + $0x604] sm:$0xf] }
 0x3c7   :  { %v3924_v16 = vmul.f32 %v14842_v15, %v16234_v12  ;;  %vm3929_vm14 = vweird.f32 %v14842_v15  ;;  %v11799_v34 = vld [vmem:[#allocation16 + $0x620] sm:$0xf0] }
 0x3c8   :  { %vm3930_vm0 = vmor %vm3928_vm15, %vm3929_vm14  ;;  %v11802_v35 = vor.u32 %v14235_v29, %v11799_v34 }
 0x3c9   :  { %7215 = vmatmul.bf16.vlgmr.msra.gmra.mxu2 %v16211_v20  ;;  %v3925_v14 = vsub.f32 1.0, %v3924_v16  ;;  %7225 = vmatpush.bf16.msra.mxu3 %v12378_v8  ;;  %v14352_v16 = vld [vmem:[#allocation16 + $0x9a4] sm:$0xf0] }
 0x3ca   :  { %7259 = vmatpush.bf16.msrb.mxu2 %v11262_v2  ;;  %7197 = vmatpush.bf16.msra.mxu1 %v11930_v33  ;;  %v7088_v11 = vpop.f32.mrf.mxu0  ;;  %v3720_v2 = vadd.f32 %v16190_v21, %v15993_v31  ;;  %v3932_v21 = vand.u32 2147483647, %v16234_v12 }
 0x3cb   :  { %v3926_v31 = vmul.f32 %v14842_v15, %v3925_v14 }
 0x3cc   :  { %v3732_v26 = vpop.f32.mrf.mxu2  ;;  %v3745_v41 = vpop.f32.mrf.mxu3  ;;  %vm3933_vm1 = vcmp.eq.f32.partialorder %v3932_v21, 8.507059e+37 }
 0x3cd   :  { %v3733_v48 = vadd.f32 %v3732_v26, %v3720_v2  ;;  %v3927_v46 = vadd.f32 %v14842_v15, %v3926_v31  ;;  %7226 = vmatpush.bf16.msra.mxu3 %v12346_v22  ;;  %v12253_v2 = vld [vmem:[#allocation16 + $0x988] sm:$0xf] }
 0x3ce   :  { %7260 = vmatpush.bf16.msrb.mxu2 %v11230_v17  ;;  %7198 = vmatpush.bf16.msra.mxu1 %v11898_v13  ;;  %v3934_v17 = vand.u32 2147483648, %v16234_v12  ;;  %v12285_v12 = vld [vmem:[#allocation16 + $0x9c8] sm:$0xf] }
 0x3cf   :  { %v3746_v28 = vadd.f32 %v3745_v41, %v3733_v48  ;;  %v3931_v9 = vsel %vm3930_vm0, %v14842_v15, %v3927_v46  ;;  %v11486_v15 = vor.u32 %v14160_v3, %v11485_v0  ;;  %v12286_v11 = vor.u32 %v14360_v53, %v12285_v12  ;;  %v11421_v22 = vld [vmem:[#allocation16 + $0x308] sm:$0xf]  ;;  %v12663_v46 = vld [vmem:[#allocation16 + $0xce0] sm:$0xf0] }
 0x3d0   :  { %v3935_v55 = vor.u32 1.1754944e-38, %v3934_v17  ;;  %v12254_v48 = vor.u32 %v14352_v16, %v12253_v2  ;;  %v12730_v17 = vor.u32 %v14467_v10, %v12727_v50  ;;  %v11422_v31 = vor.u32 %v14144_v7, %v11421_v22  ;;  %v11389_v41 = vld [vmem:[#allocation16 + $0x2c8] sm:$0xf]  ;;  %v14443_v0 = vld [vmem:[#allocation16 + $0xc84] sm:$0xf] }
 0x3d1   :  { %v3759_v60 = vadd.f32 %v16209_v18, %v3746_v28  ;;  %7227 = vmatpush.bf16.msra.mxu3 %v12314_v58  ;;  %v11038_v18 = vor.u32 %v14048_v5, %v11037_v42  ;;  %v14336_v28 = vld [vmem:[#allocation16 + $0x924] sm:$0xf0]  ;;  %v12631_v3 = vld [vmem:[#allocation16 + $0xca0] sm:$0xf0] }
 0x3d2   :  { %7261 = vmatpush.bf16.msrb.mxu2 %v11198_v61  ;;  %v14243_v61 = vld [vmem:[#allocation16 + $0x644] sm:$0xf]  ;;  %7199 = vmatpush.bf16.msra.mxu1 %v11866_v32  ;;  %v3936_v4 = vsel %vm3933_vm1, %v3935_v55, %v3931_v9  ;;  %v14344_v32 = vld [vmem:[#allocation16 + $0x964] sm:$0xf0]  ;;  %v12190_v42 = vor.u32 %v14336_v28, %v12189_v57  ;;  %v12634_v29 = vor.u32 %v14443_v0, %v12631_v3 }
 0x3d3   :  { %v11834_v51 = vor.u32 %v14243_v61, %v11831_v47  ;;  %v3772_v24 = vadd.f32 %v16219_v1, %v3759_v60  ;;  %v16250_v8 = vpack.c.bf16 %v3936_v4, %v3936_v4  ;;  %v14152_v1 = vld [vmem:[#allocation16 + $0x364] sm:$0xf0]  ;;  %v12222_v21 = vor.u32 %v14344_v32, %v12221_v30  ;;  %v14451_v47 = vld [vmem:[#allocation16 + $0xcc4] sm:$0xf] }
 0x3d4   :  { %v3734_v33 = vpop.f32.mrf.mxu2  ;;  %v3747_v6 = vpop.f32.mrf.mxu3  ;;  %7228 = vmatmul.bf16.vlgmr.msra.gmra.mxu3 %v16230_v23  ;;  %v11454_v14 = vor.u32 %v14152_v1, %v11453_v25  ;;  %v11357_v5 = vld [vmem:[#allocation16 + $0x288] sm:$0xf]  ;;  %v14427_v30 = vld [vmem:[#allocation16 + $0xc04] sm:$0xf] }
 0x3d5   :  { %7272 = vmatpush.bf16.msrb.mxu3 %v11518_v56  ;;  %7137 = vmatmul.bf16.vlgmr.msrb.gmra.mxu0 %v16250_v8  ;;  %v12157_v55 = vld [vmem:[#allocation16 + $0x8c8] sm:$0xf]  ;;  %v12666_v56 = vor.u32 %v14451_v47, %v12663_v46  ;;  %v12567_v32 = vld [vmem:[#allocation16 + $0xc20] sm:$0xf0] }
 0x3d6   :  { %7262 = vmatpush.bf16.msrb.mxu2 %v11166_v62  ;;  %v3784_v62 = vperm.slane %v16226_v52, 7  ;;  %v14475_v52 = vld [vmem:[#allocation16 + $0xd84] sm:$0xf]  ;;  %7200 = vmatpush.bf16.msra.mxu1 %v11834_v51  ;;  %v14128_v51 = vld [vmem:[#allocation16 + $0x2a4] sm:$0xf0]  ;;  %v12570_v47 = vor.u32 %v14427_v30, %v12567_v32 }
 0x3d7   :  { %v14328_v60 = vld [vmem:[#allocation16 + $0x8e4] sm:$0xf0]  ;;  %v11358_v9 = vor.u32 %v14128_v51, %v11357_v5  ;;  %v13047_v46 = vld [vmem:[#allocation16 + $0xfe0] sm:$0xf0] }
 0x3d8   :  { %v3800_v13 = vadd.f32 %v3784_v62, %v3772_v24  ;;  %v16260_v62 = vld [vmem:[#allocation17] sm:$0xff]  ;;  %v12158_v12 = vor.u32 %v14328_v60, %v12157_v55  ;;  %v11325_v4 = vld [vmem:[#allocation16 + $0x248] sm:$0xf]  ;;  %v14100_v60 = vld [vmem:[#allocation16 + $0x1cc] sm:$0xf] }
 0x3d9   :  { %7273 = vmatpush.bf16.msrb.mxu3 %v11486_v15  ;;  %v4475_v53 = vperm.slane %v16260_v62, 0  ;;  %v14120_v24 = vld [vmem:[#allocation16 + $0x264] sm:$0xf0]  ;;  %v14523_v30 = vld [vmem:[#allocation16 + $0xf04] sm:$0xf] }
 0x3da   :  { %7263 = vmatpush.bf16.msrb.mxu2 %v11134_v39  ;;  %v12794_v39 = vor.u32 %v14483_v54, %v12791_v19  ;;  %v11026_v26 = vmul.f32 -1.442695, %v3800_v13  ;;  %7201 = vmatpush.bf16.msra.mxu1 %v11802_v35  ;;  %v12698_v54 = vor.u32 %v14459_v63, %v12695_v36  ;;  %v11390_v19 = vor.u32 %v14136_v37, %v11389_v41  ;;  %v12125_v33 = vld [vmem:[#allocation16 + $0x888] sm:$0xf]  ;;  %v12599_v35 = vld [vmem:[#allocation16 + $0xc60] sm:$0xf0] }
 0x3db   :  { %v11293_v6 = vld [vmem:[#allocation16 + $0x208] sm:$0xf] }
 0x3dc   :  { %7233 = vmatpush.bf16.msrb.mxu0 %v12794_v39  ;;  %14843 = vpow2.f32 %v11026_v26  ;;  %v14320_v39 = vld [vmem:[#allocation16 + $0x8a4] sm:$0xf0] }
 0x3dd   :  { %7274 = vmatpush.bf16.msrb.mxu3 %v11454_v14  ;;  %v12126_v25 = vor.u32 %v14320_v39, %v12125_v33  ;;  %v14112_v1 = vld [vmem:[#allocation16 + $0x224] sm:$0xf0] }
 0x3de   :  { %7264 = vmatpush.bf16.msrb.mxu2 %v11102_v38  ;;  %v12762_v38 = vor.u32 %v14475_v52, %v12759_v59  ;;  %v16257_v58 = vpop.f32.mrf.mxu1  ;;  %v11326_v52 = vor.u32 %v14120_v24, %v11325_v4  ;;  %v14435_v59 = vld [vmem:[#allocation16 + $0xc44] sm:$0xf]  ;;  %v12093_v2 = vld [vmem:[#allocation16 + $0x848] sm:$0xf]  ;;  %v11294_v7 = vor.u32 %v14112_v1, %v11293_v6 }
 0x3df   :  { %v14312_v16 = vld [vmem:[#allocation16 + $0x864] sm:$0xf0]  ;;  %v12602_v10 = vor.u32 %v14435_v59, %v12599_v35  ;;  %v14539_v24 = vld [vmem:[#allocation16 + $0xf84] sm:$0xf]  ;;  %v14092_v59 = vld [vmem:[#allocation16 + $0x18c] sm:$0xf] }
 0x3e0   :  { %7234 = vmatpush.bf16.msrb.mxu0 %v12762_v38  ;;  %v12541_v50 = vld [vmem:[#allocation16 + $0xbc8] sm:$0xf]  ;;  %v12094_v36 = vor.u32 %v14312_v16, %v12093_v2  ;;  %v11231_v35 = vld [vmem:[#allocation16 + $0x1a8] sm:$0xf0]  ;;  %v14531_v6 = vld [vmem:[#allocation16 + $0xf44] sm:$0xf] }
 0x3e1   :  { %7275 = vmatpush.bf16.msrb.mxu3 %v11422_v31  ;;  %v14424_v14 = vld [vmem:[#allocation16 + $0xbe4] sm:$0xf0]  ;;  %v11234_v1 = vor.u32 %v14092_v59, %v11231_v35  ;;  %v12983_v2 = vld [vmem:[#allocation16 + $0xf60] sm:$0xf0] }
 0x3e2   :  { %7265 = vmatpush.bf16.msrb.mxu2 %v11070_v27  ;;  %v14844_v27 = vpop.eup %14843  ;;  %v11773_v31 = vld [vmem:[#allocation16 + $0x5c8] sm:$0xf]  ;;  %v12542_v37 = vor.u32 %v14424_v14, %v12541_v50  ;;  %v11199_v50 = vld [vmem:[#allocation16 + $0x168] sm:$0xf0]  ;;  %v14499_v59 = vld [vmem:[#allocation16 + $0xe44] sm:$0xf] }
 0x3e3   :  { %v16255_v61 = vadd.f32 1.0, %v14844_v27  ;;  %v12061_v57 = vld [vmem:[#allocation16 + $0x808] sm:$0xf]  ;;  %v14547_v27 = vld [vmem:[#allocation16 + $0xfc4] sm:$0xf] }
 0x3e4   :  { %7235 = vmatpush.bf16.msrb.mxu0 %v12730_v17  ;;  %v14304_v28 = vld [vmem:[#allocation16 + $0x824] sm:$0xf0]  ;;  %v12855_v35 = vld [vmem:[#allocation16 + $0xe60] sm:$0xf0] }
 0x3e5   :  { %14845 = vrcp.f32 %v16255_v61  ;;  %7276 = vmatpush.bf16.msrb.mxu3 %v11390_v19  ;;  %7189 = vmatmul.bf16.vlgmr.msra.gmra.mxu0 %v16102_v40  ;;  %v3947_v63 = vand.u32 2147483647, %v16255_v61  ;;  %vm3943_vm3 = vweird.f32 %v16255_v61  ;;  %v12509_v19 = vld [vmem:[#allocation16 + $0xb88] sm:$0xf] }
 0x3e6   :  { %7266 = vmatpush.bf16.msrb.mxu2 %v11038_v18  ;;  %v11741_v3 = vld [vmem:[#allocation16 + $0x588] sm:$0xf] }
 0x3e7   :  { %vm3948_vm5 = vcmp.eq.f32.partialorder %v3947_v63, 8.507059e+37  ;;  %v12445_v16 = vld [vmem:[#allocation16 + $0xb08] sm:$0xf] }
 0x3e8   :  { %7236 = vmatpush.bf16.msrb.mxu0 %v12698_v54  ;;  %v11677_v14 = vld [vmem:[#allocation16 + $0x508] sm:$0xf] }
 0x3e9   :  { %7267 = vmatmul.bf16.vlgmr.msrb.gmra.mxu2 %v16182_v45  ;;  %7277 = vmatpush.bf16.msrb.mxu3 %v11358_v9  ;;  %v14224_v9 = vld [vmem:[#allocation16 + $0x5a4] sm:$0xf0] }
 0x3ea   :  { %7311 = vmatpush.bf16.msra.mxu2 %v12286_v11  ;;  %v7101_v11 = vpop.f32.mrf.mxu1  ;;  %v12413_v63 = vld [vmem:[#allocation16 + $0xac8] sm:$0xf] }
 0x3eb   :  { %v14846_v34 = vpop.eup %14845 }
 0x3ec   :  { %7237 = vmatpush.bf16.msrb.mxu0 %v12666_v56  ;;  %v7060_v18 = vpop.f32.mrf.mxu2  ;;  %v3939_v13 = vmul.f32 %v14846_v34, %v16255_v61  ;;  %v7073_v38 = vpop.f32.mrf.mxu3  ;;  %vm3944_vm2 = vweird.f32 %v14846_v34  ;;  %v11263_v56 = vld [vmem:[#allocation16 + $0x1e8] sm:$0xf0] }
 0x3ed   :  { %v7061_v15 = vadd.f32 %v7060_v18, %v4475_v53  ;;  %7278 = vmatpush.bf16.msrb.mxu3 %v11326_v52  ;;  %vm3945_vm4 = vmor %vm3943_vm3, %vm3944_vm2  ;;  %v13050_v53 = vor.u32 %v14547_v27, %v13047_v46  ;;  %v13015_v18 = vld [vmem:[#allocation16 + $0xfa0] sm:$0xf0]  ;;  %v14408_v52 = vld [vmem:[#allocation16 + $0xb64] sm:$0xf0] }
 0x3ee   :  { %7312 = vmatpush.bf16.msra.mxu2 %v12254_v48  ;;  %v3940_v26 = vsub.f32 1.0, %v3939_v13  ;;  %v3949_v48 = vand.u32 2147483648, %v16255_v61  ;;  %v12062_v61 = vor.u32 %v14304_v28, %v12061_v57  ;;  %v11709_v13 = vld [vmem:[#allocation16 + $0x548] sm:$0xf]  ;;  %v13018_v11 = vor.u32 %v14539_v24, %v13015_v18  ;;  %v12919_v46 = vld [vmem:[#allocation16 + $0xee0] sm:$0xf0] }
 0x3ef   :  { %v7074_v22 = vadd.f32 %v7073_v38, %v7061_v15  ;;  %v14216_v15 = vld [vmem:[#allocation16 + $0x564] sm:$0xf0] }
 0x3f0   :  { %7238 = vmatpush.bf16.msrb.mxu0 %v12634_v29  ;;  %v3941_v17 = vmul.f32 %v14846_v34, %v3940_v26  ;;  %v3950_v5 = vor.u32 1.1754944e-38, %v3949_v48  ;;  %v11266_v29 = vor.u32 %v14100_v60, %v11263_v56  ;;  %v14400_v26 = vld [vmem:[#allocation16 + $0xb24] sm:$0xf0]  ;;  %v11710_v38 = vor.u32 %v14216_v15, %v11709_v13 }
 0x3f1   :  { %v7087_v41 = vadd.f32 %v16236_v43, %v7074_v22  ;;  %7279 = vmatpush.bf16.msrb.mxu3 %v11294_v7  ;;  %v14208_v48 = vld [vmem:[#allocation16 + $0x524] sm:$0xf0]  ;;  %v12986_v22 = vor.u32 %v14531_v6, %v12983_v2  ;;  %v12446_v7 = vor.u32 %v14400_v26, %v12445_v16  ;;  %v14164_v2 = vld [vmem:[#allocation16 + $0x3cc] sm:$0xf] }
 0x3f2   :  { %7313 = vmatpush.bf16.msra.mxu2 %v12222_v21  ;;  %v14232_v21 = vld [vmem:[#allocation16 + $0x5e4] sm:$0xf0]  ;;  %v3942_v54 = vadd.f32 %v14846_v34, %v3941_v17  ;;  %v12951_v17 = vld [vmem:[#allocation16 + $0xf20] sm:$0xf0]  ;;  %v11519_v16 = vld [vmem:[#allocation16 + $0x3e8] sm:$0xf0] }
 0x3f3   :  { %v11774_v55 = vor.u32 %v14232_v21, %v11773_v31  ;;  %v16271_v43 = vadd.f32 %v16257_v58, %v7087_v41  ;;  %v12477_v58 = vld [vmem:[#allocation16 + $0xb48] sm:$0xf]  ;;  %v11678_v31 = vor.u32 %v14208_v48, %v11677_v14  ;;  %v14076_v21 = vld [vmem:[#allocation16 + $0x10c] sm:$0xf]  ;;  %v12954_v28 = vor.u32 %v14523_v30, %v12951_v17  ;;  %v14491_v30 = vld [vmem:[#allocation16 + $0xe04] sm:$0xf] }
 0x3f4   :  { %7239 = vmatpush.bf16.msrb.mxu0 %v12602_v10  ;;  %v7062_v51 = vpop.f32.mrf.mxu2  ;;  %v3946_v0 = vsel %vm3945_vm4, %v14846_v34, %v3942_v54  ;;  %v7075_v39 = vpop.f32.mrf.mxu3  ;;  %7280 = vmatmul.bf16.vlgmr.msrb.gmra.mxu3 %v16186_v49  ;;  %v11742_v34 = vor.u32 %v14224_v9, %v11741_v3  ;;  %v14084_v10 = vld [vmem:[#allocation16 + $0x14c] sm:$0xf]  ;;  %v14200_v57 = vld [vmem:[#allocation16 + $0x4e4] sm:$0xf0]  ;;  %v14515_v54 = vld [vmem:[#allocation16 + $0xec4] sm:$0xf] }
 0x3f5   :  { %7324 = vmatpush.bf16.msra.mxu3 %v12542_v37  ;;  %v11202_v32 = vor.u32 %v14084_v10, %v11199_v50  ;;  %v11167_v41 = vld [vmem:[#allocation16 + $0x128] sm:$0xf0]  ;;  %v11645_v37 = vld [vmem:[#allocation16 + $0x4c8] sm:$0xf]  ;;  %v14507_v3 = vld [vmem:[#allocation16 + $0xe84] sm:$0xf]  ;;  %v12858_v10 = vor.u32 %v14499_v59, %v12855_v35 }
 0x3f6   :  { %7314 = vmatpush.bf16.msra.mxu2 %v12190_v42  ;;  %v14416_v42 = vld [vmem:[#allocation16 + $0xba4] sm:$0xf0]  ;;  %v14068_v51 = vld [vmem:[#allocation16 + $0xcc] sm:$0xf] }
 0x3f7   :  { %v12510_v4 = vor.u32 %v14416_v42, %v12509_v19  ;;  %v12381_v19 = vld [vmem:[#allocation16 + $0xa88] sm:$0xf]  ;;  %v14060_v39 = vld [vmem:[#allocation16 + $0x8c] sm:$0xf] }
 0x3f8   :  { %7240 = vmatpush.bf16.msrb.mxu0 %v12570_v47  ;;  %v11170_v47 = vor.u32 %v14076_v21, %v11167_v41  ;;  %v14384_v42 = vld [vmem:[#allocation16 + $0xaa4] sm:$0xf0]  ;;  %v14044_v17 = vld [vmem:[#allocation16 + $0xc] sm:$0xf] }
 0x3f9   :  { %7325 = vmatpush.bf16.msra.mxu3 %v12510_v4  ;;  %v11613_v60 = vld [vmem:[#allocation16 + $0x488] sm:$0xf]  ;;  %v14340_v59 = vld [vmem:[#allocation16 + $0x94c] sm:$0xf] }
 0x3fa   :  { %7315 = vmatpush.bf16.msra.mxu2 %v12158_v12  ;;  %v3951_v12 = vsel %vm3948_vm5, %v3950_v5, %v3946_v0  ;;  %v11646_v5 = vor.u32 %v14200_v57, %v11645_v37  ;;  %v14192_v56 = vld [vmem:[#allocation16 + $0x4a4] sm:$0xf0]  ;;  %v12922_v0 = vor.u32 %v14515_v54, %v12919_v46  ;;  %v14156_v37 = vld [vmem:[#allocation16 + $0x38c] sm:$0xf] }
 0x3fb   :  { %v16273_v33 = vpack.c.bf16 %v3951_v12, %v3951_v12  ;;  %7241 = vmatmul.bf16.vlgmr.msrb.gmra.mxu0 %v16250_v8  ;;  %v12887_v12 = vld [vmem:[#allocation16 + $0xea0] sm:$0xf0]  ;;  %v14376_v4 = vld [vmem:[#allocation16 + $0xa64] sm:$0xf0]  ;;  %v11614_v24 = vor.u32 %v14192_v56, %v11613_v60  ;;  %v11487_v57 = vld [vmem:[#allocation16 + $0x3a8] sm:$0xf0] }
 0x3fc   :  { %7285 = vmatpush.bf16.msra.mxu0 %v11774_v55  ;;  %v11135_v55 = vld [vmem:[#allocation16 + $0xe8] sm:$0xf0]  ;;  %v11581_v18 = vld [vmem:[#allocation16 + $0x448] sm:$0xf] }
 0x3fd   :  { %7150 = vmatmul.bf16.vlgmr.msrb.gmra.mxu1 %v16273_v33  ;;  %v11138_v9 = vor.u32 %v14068_v51, %v11135_v55  ;;  %v12317_v15 = vld [vmem:[#allocation16 + $0xa08] sm:$0xf]  ;;  %v12287_v54 = vld [vmem:[#allocation16 + $0x9e8] sm:$0xf0] }
 0x3fe   :  { %7316 = vmatpush.bf16.msra.mxu2 %v12126_v25  ;;  %7246 = vmatpush.bf16.msrb.mxu1 %v13050_v53  ;;  %v12478_v25 = vor.u32 %v14408_v52, %v12477_v58  ;;  %v12349_v53 = vld [vmem:[#allocation16 + $0xa48] sm:$0xf]  ;;  %v12890_v52 = vor.u32 %v14507_v3, %v12887_v12  ;;  %v14348_v3 = vld [vmem:[#allocation16 + $0x98c] sm:$0xf] }
 0x3ff   :  { %v14184_v58 = vld [vmem:[#allocation16 + $0x464] sm:$0xf0]  ;;  %v12223_v35 = vld [vmem:[#allocation16 + $0x968] sm:$0xf0] }
 0x400   :  { %7286 = vmatpush.bf16.msra.mxu0 %v11742_v34  ;;  %7326 = vmatpush.bf16.msra.mxu3 %v12478_v25  ;;  %v12350_v34 = vor.u32 %v14376_v4, %v12349_v53  ;;  %v14052_v25 = vld [vmem:[#allocation16 + $0x4c] sm:$0xf]  ;;  %v11582_v6 = vor.u32 %v14184_v58, %v11581_v18  ;;  %v11549_v26 = vld [vmem:[#allocation16 + $0x408] sm:$0xf] }
 0x401   :  { %v12797_v14 = vld [vmem:[#allocation16 + $0xdc8] sm:$0xf] }
 0x402   :  { %7317 = vmatpush.bf16.msra.mxu2 %v12094_v36  ;;  %7247 = vmatpush.bf16.msrb.mxu1 %v13018_v11  ;;  %v14392_v36 = vld [vmem:[#allocation16 + $0xae4] sm:$0xf0] }
 0x403   :  { %v12414_v27 = vor.u32 %v14392_v36, %v12413_v63  ;;  %v14368_v11 = vld [vmem:[#allocation16 + $0xa24] sm:$0xf0]  ;;  %v11039_v36 = vld [vmem:[#allocation16 + $0x28] sm:$0xf0] }
 0x404   :  { %7287 = vmatpush.bf16.msra.mxu0 %v11710_v38  ;;  %7327 = vmatpush.bf16.msra.mxu3 %v12446_v7  ;;  %v14176_v38 = vld [vmem:[#allocation16 + $0x424] sm:$0xf0]  ;;  %v12318_v50 = vor.u32 %v14368_v11, %v12317_v15  ;;  %v11522_v7 = vor.u32 %v14164_v2, %v11519_v16  ;;  %v12226_v2 = vor.u32 %v14340_v59, %v12223_v35 }
 0x405   :  { %v14488_v48 = vld [vmem:[#allocation16 + $0xde4] sm:$0xf0]  ;;  %v11550_v63 = vor.u32 %v14176_v38, %v11549_v26  ;;  %v14132_v26 = vld [vmem:[#allocation16 + $0x2cc] sm:$0xf] }
 0x406   :  { %7318 = vmatpush.bf16.msra.mxu2 %v12062_v61  ;;  %7248 = vmatpush.bf16.msrb.mxu1 %v12986_v22  ;;  %v12382_v61 = vor.u32 %v14384_v42, %v12381_v19  ;;  %v14296_v21 = vld [vmem:[#allocation16 + $0x7e4] sm:$0xf0]  ;;  %v12798_v41 = vor.u32 %v14488_v48, %v12797_v14  ;;  %v11042_v19 = vor.u32 %v14044_v17, %v11039_v36  ;;  %v11391_v38 = vld [vmem:[#allocation16 + $0x2e8] sm:$0xf0] }
 0x407   :  { %v14480_v46 = vld [vmem:[#allocation16 + $0xda4] sm:$0xf0] }
 0x408   :  { %7288 = vmatpush.bf16.msra.mxu0 %v11678_v31  ;;  %7328 = vmatpush.bf16.msra.mxu3 %v12414_v27  ;;  %v12029_v31 = vld [vmem:[#allocation16 + $0x7c8] sm:$0xf] }
 0x409   :  { %7319 = vmatmul.bf16.vlgmr.msra.gmra.mxu2 %v16211_v20  ;;  %v12030_v42 = vor.u32 %v14296_v21, %v12029_v31  ;;  %v11997_v51 = vld [vmem:[#allocation16 + $0x788] sm:$0xf]  ;;  %v14124_v21 = vld [vmem:[#allocation16 + $0x28c] sm:$0xf] }
 0x40a   :  { %7363 = vmatpush.bf16.msrb.mxu2 %v11266_v29  ;;  %7249 = vmatpush.bf16.msrb.mxu1 %v12954_v28  ;;  %v11103_v29 = vld [vmem:[#allocation16 + $0xa8] sm:$0xf0]  ;;  %v14288_v55 = vld [vmem:[#allocation16 + $0x7a4] sm:$0xf0] }
 0x40b   :  { %v11106_v13 = vor.u32 %v14060_v39, %v11103_v29  ;;  %v14356_v28 = vld [vmem:[#allocation16 + $0x9cc] sm:$0xf]  ;;  %v12733_v12 = vld [vmem:[#allocation16 + $0xd48] sm:$0xf]  ;;  %v11998_v4 = vor.u32 %v14288_v55, %v11997_v51 }
 0x40c   :  { %7289 = vmatpush.bf16.msra.mxu0 %v11646_v5  ;;  %7329 = vmatpush.bf16.msra.mxu3 %v12382_v61  ;;  %v11490_v5 = vor.u32 %v14156_v37, %v11487_v57  ;;  %v12290_v60 = vor.u32 %v14356_v28, %v12287_v54  ;;  %v11455_v61 = vld [vmem:[#allocation16 + $0x368] sm:$0xf0]  ;;  %v14472_v53 = vld [vmem:[#allocation16 + $0xd64] sm:$0xf0] }
 0x40d   :  { %7202 = vmatmul.bf16.vlgmr.msra.gmra.mxu1 %v16180_v44  ;;  %v11965_v39 = vld [vmem:[#allocation16 + $0x748] sm:$0xf]  ;;  %v12734_v58 = vor.u32 %v14472_v53, %v12733_v12  ;;  %v14324_v37 = vld [vmem:[#allocation16 + $0x8cc] sm:$0xf] }
 0x40e   :  { %7364 = vmatpush.bf16.msrb.mxu2 %v11234_v1  ;;  %7250 = vmatpush.bf16.msrb.mxu1 %v12922_v0  ;;  %v11071_v1 = vld [vmem:[#allocation16 + $0x68] sm:$0xf0]  ;;  %v14280_v29 = vld [vmem:[#allocation16 + $0x764] sm:$0xf0] }
 0x40f   :  { %v11074_v22 = vor.u32 %v14052_v25, %v11071_v1  ;;  %v14148_v0 = vld [vmem:[#allocation16 + $0x34c] sm:$0xf]  ;;  %v14464_v15 = vld [vmem:[#allocation16 + $0xd24] sm:$0xf0]  ;;  %v11966_v11 = vor.u32 %v14280_v29, %v11965_v39 }
 0x410   :  { %7290 = vmatpush.bf16.msra.mxu0 %v11614_v24  ;;  %7330 = vmatpush.bf16.msra.mxu3 %v12350_v34  ;;  %v11458_v24 = vor.u32 %v14148_v0, %v11455_v61  ;;  %v11423_v34 = vld [vmem:[#allocation16 + $0x328] sm:$0xf0]  ;;  %v14272_v1 = vld [vmem:[#allocation16 + $0x724] sm:$0xf0] }
 0x411   :  { %v12669_v14 = vld [vmem:[#allocation16 + $0xcc8] sm:$0xf]  ;;  %v12159_v57 = vld [vmem:[#allocation16 + $0x8e8] sm:$0xf0] }
 0x412   :  { %7365 = vmatpush.bf16.msrb.mxu2 %v11202_v32  ;;  %7251 = vmatpush.bf16.msrb.mxu1 %v12890_v52  ;;  %v12823_v32 = vld [vmem:[#allocation16 + $0xe20] sm:$0xf0]  ;;  %v14140_v52 = vld [vmem:[#allocation16 + $0x30c] sm:$0xf]  ;;  %v14456_v48 = vld [vmem:[#allocation16 + $0xce4] sm:$0xf0] }
 0x413   :  { %v12826_v27 = vor.u32 %v14491_v30, %v12823_v32  ;;  %v11426_v25 = vor.u32 %v14140_v52, %v11423_v34  ;;  %v11394_v32 = vor.u32 %v14132_v26, %v11391_v38  ;;  %v11901_v17 = vld [vmem:[#allocation16 + $0x6c8] sm:$0xf]  ;;  %v12670_v31 = vor.u32 %v14456_v48, %v12669_v14  ;;  %v11327_v51 = vld [vmem:[#allocation16 + $0x268] sm:$0xf0] }
 0x414   :  { %7291 = vmatpush.bf16.msra.mxu0 %v11582_v6  ;;  %7331 = vmatpush.bf16.msra.mxu3 %v12318_v50  ;;  %v11933_v6 = vld [vmem:[#allocation16 + $0x708] sm:$0xf]  ;;  %v12191_v50 = vld [vmem:[#allocation16 + $0x928] sm:$0xf0] }
 0x415   :  { %v11934_v30 = vor.u32 %v14272_v1, %v11933_v6  ;;  %v12637_v28 = vld [vmem:[#allocation16 + $0xc88] sm:$0xf]  ;;  %v14316_v55 = vld [vmem:[#allocation16 + $0x88c] sm:$0xf] }
 0x416   :  { %7366 = vmatpush.bf16.msrb.mxu2 %v11170_v47  ;;  %7252 = vmatpush.bf16.msrb.mxu1 %v12858_v10  ;;  %v12765_v47 = vld [vmem:[#allocation16 + $0xd88] sm:$0xf]  ;;  %v14332_v10 = vld [vmem:[#allocation16 + $0x90c] sm:$0xf] }
 0x417   :  { %7332 = vmatmul.bf16.vlgmr.msra.gmra.mxu3 %v16230_v23  ;;  %v12766_v56 = vor.u32 %v14480_v46, %v12765_v47  ;;  %v12194_v36 = vor.u32 %v14332_v10, %v12191_v50  ;;  %v14256_v46 = vld [vmem:[#allocation16 + $0x6a4] sm:$0xf0]  ;;  %v14108_v39 = vld [vmem:[#allocation16 + $0x20c] sm:$0xf] }
 0x418   :  { %7376 = vmatpush.bf16.msrb.mxu3 %v11522_v7  ;;  %7292 = vmatpush.bf16.msra.mxu0 %v11550_v63  ;;  %v14264_v63 = vld [vmem:[#allocation16 + $0x6e4] sm:$0xf0]  ;;  %v11295_v29 = vld [vmem:[#allocation16 + $0x228] sm:$0xf0] }
 0x419   :  { %v11902_v54 = vor.u32 %v14264_v63, %v11901_v17  ;;  %v14440_v0 = vld [vmem:[#allocation16 + $0xc64] sm:$0xf0]  ;;  %v14420_v52 = vld [vmem:[#allocation16 + $0xbcc] sm:$0xf]  ;;  %v11269_v63 = vld [vmem:[#allocation16 + $0x1d0] sm:$0xf] }
 0x41a   :  { %7367 = vmatpush.bf16.msrb.mxu2 %v11138_v9  ;;  %7253 = vmatpush.bf16.msrb.mxu1 %v12826_v27  ;;  %v12255_v9 = vld [vmem:[#allocation16 + $0x9a8] sm:$0xf0]  ;;  %v14448_v27 = vld [vmem:[#allocation16 + $0xca4] sm:$0xf0] }
 0x41b   :  { %7293 = vmatmul.bf16.vlgmr.msra.gmra.mxu0 %v16102_v40  ;;  %v12258_v18 = vor.u32 %v14348_v3, %v12255_v9  ;;  %v11837_v12 = vld [vmem:[#allocation16 + $0x648] sm:$0xf]  ;;  %v12543_v34 = vld [vmem:[#allocation16 + $0xbe8] sm:$0xf0] }
 0x41c   :  { %7337 = vmatpush.bf16.msrb.mxu0 %v12798_v41  ;;  %7377 = vmatpush.bf16.msrb.mxu3 %v11490_v5  ;;  %v11359_v41 = vld [vmem:[#allocation16 + $0x2a8] sm:$0xf0]  ;;  %v14248_v53 = vld [vmem:[#allocation16 + $0x664] sm:$0xf0]  ;;  %v12546_v1 = vor.u32 %v14420_v52, %v12543_v34 }
 0x41d   :  { %7254 = vmatmul.bf16.vlgmr.msrb.gmra.mxu1 %v16273_v33  ;;  %v11362_v47 = vor.u32 %v14124_v21, %v11359_v41  ;;  %v14116_v5 = vld [vmem:[#allocation16 + $0x24c] sm:$0xf]  ;;  %v12573_v59 = vld [vmem:[#allocation16 + $0xc08] sm:$0xf] }
 0x41e   :  { %7368 = vmatpush.bf16.msrb.mxu2 %v11106_v13  ;;  %7298 = vmatpush.bf16.msra.mxu1 %v12030_v42  ;;  %v12701_v13 = vld [vmem:[#allocation16 + $0xd08] sm:$0xf]  ;;  %v12638_v42 = vor.u32 %v14448_v27, %v12637_v28  ;;  %v11330_v9 = vor.u32 %v14116_v5, %v11327_v51  ;;  %v14300_v38 = vld [vmem:[#allocation16 + $0x80c] sm:$0xf] }
 0x41f   :  { %v12702_v16 = vor.u32 %v14464_v15, %v12701_v13  ;;  %v14432_v35 = vld [vmem:[#allocation16 + $0xc24] sm:$0xf0]  ;;  %v11838_v13 = vor.u32 %v14248_v53, %v11837_v12  ;;  %v11298_v15 = vor.u32 %v14108_v39, %v11295_v29  ;;  %v12063_v10 = vld [vmem:[#allocation16 + $0x828] sm:$0xf0] }
 0x420   :  { %7338 = vmatpush.bf16.msrb.mxu0 %v12766_v56  ;;  %7378 = vmatpush.bf16.msrb.mxu3 %v11458_v24  ;;  %v12605_v56 = vld [vmem:[#allocation16 + $0xc48] sm:$0xf]  ;;  %v12574_v26 = vor.u32 %v14432_v35, %v12573_v59  ;;  %v14220_v21 = vld [vmem:[#allocation16 + $0x58c] sm:$0xf] }
 0x421   :  { %v12606_v24 = vor.u32 %v14440_v0, %v12605_v56  ;;  %v13053_v50 = vld [vmem:[#allocation16 + $0xfc8] sm:$0xf]  ;;  %v11743_v41 = vld [vmem:[#allocation16 + $0x5a8] sm:$0xf0] }
 0x422   :  { %7369 = vmatpush.bf16.msrb.mxu2 %v11074_v22  ;;  %7299 = vmatpush.bf16.msra.mxu1 %v11998_v4  ;;  %v7112_v22 = vpop.f32.mrf.mxu2  ;;  %v13021_v28 = vld [vmem:[#allocation16 + $0xf88] sm:$0xf]  ;;  %v14212_v5 = vld [vmem:[#allocation16 + $0x54c] sm:$0xf] }
 0x423   :  { %v16285_v7 = vadd.f32 %v7112_v22, %v16271_v43  ;;  %v11869_v43 = vld [vmem:[#allocation16 + $0x688] sm:$0xf]  ;;  %v11711_v51 = vld [vmem:[#allocation16 + $0x568] sm:$0xf0] }
 0x424   :  { %7339 = vmatpush.bf16.msrb.mxu0 %v12734_v58  ;;  %7379 = vmatpush.bf16.msrb.mxu3 %v11426_v25  ;;  %v11870_v3 = vor.u32 %v14256_v46, %v11869_v43  ;;  %v12095_v58 = vld [vmem:[#allocation16 + $0x868] sm:$0xf0]  ;;  %v14552_v22 = vld [vmem:[#allocation16 + $0xfe4] sm:$0xf0]  ;;  %v11746_v46 = vor.u32 %v14220_v21, %v11743_v41  ;;  %v11714_v53 = vor.u32 %v14212_v5, %v11711_v51 }
 0x425   :  { %v11775_v25 = vld [vmem:[#allocation16 + $0x5e8] sm:$0xf0]  ;;  %v12989_v56 = vld [vmem:[#allocation16 + $0xf48] sm:$0xf] }
 0x426   :  { %7370 = vmatpush.bf16.msrb.mxu2 %v11042_v19  ;;  %7300 = vmatpush.bf16.msra.mxu1 %v11966_v11  ;;  %v12162_v19 = vor.u32 %v14324_v37, %v12159_v57  ;;  %v14228_v11 = vld [vmem:[#allocation16 + $0x5cc] sm:$0xf]  ;;  %v13054_v37 = vor.u32 %v14552_v22, %v13053_v50  ;;  %v12957_v52 = vld [vmem:[#allocation16 + $0xf08] sm:$0xf] }
 0x427   :  { %v11778_v48 = vor.u32 %v14228_v11, %v11775_v25  ;;  %v12479_v43 = vld [vmem:[#allocation16 + $0xb68] sm:$0xf0]  ;;  %v14528_v59 = vld [vmem:[#allocation16 + $0xf24] sm:$0xf0]  ;;  %v11173_v11 = vld [vmem:[#allocation16 + $0x110] sm:$0xf] }
 0x428   :  { %7340 = vmatpush.bf16.msrb.mxu0 %v12702_v16  ;;  %7380 = vmatpush.bf16.msrb.mxu3 %v11394_v32  ;;  %v14240_v16 = vld [vmem:[#allocation16 + $0x624] sm:$0xf0]  ;;  %v12511_v32 = vld [vmem:[#allocation16 + $0xba8] sm:$0xf0]  ;;  %v14081_v25 = vld [vmem:[#allocation16 + $0x12c] sm:$0xf0] }
 0x429   :  { %7371 = vmatmul.bf16.vlgmr.msrb.gmra.mxu2 %v16182_v45  ;;  %v12447_v12 = vld [vmem:[#allocation16 + $0xb28] sm:$0xf0]  ;;  %v11174_v50 = vor.u32 %v14081_v25, %v11173_v11  ;;  %v14496_v11 = vld [vmem:[#allocation16 + $0xe24] sm:$0xf0] }
 0x42a   :  { %7415 = vmatpush.bf16.msra.mxu2 %v12290_v60  ;;  %7301 = vmatpush.bf16.msra.mxu1 %v11934_v30  ;;  %v12127_v60 = vld [vmem:[#allocation16 + $0x8a8] sm:$0xf0]  ;;  %v7114_v61 = vpop.f32.mrf.mxu2 }
 0x42b   :  { %v12130_v4 = vor.u32 %v14316_v55, %v12127_v60  ;;  %v14412_v30 = vld [vmem:[#allocation16 + $0xb8c] sm:$0xf] }
 0x42c   :  { %7341 = vmatpush.bf16.msrb.mxu0 %v12670_v31  ;;  %7381 = vmatpush.bf16.msrb.mxu3 %v11362_v47  ;;  %v12066_v31 = vor.u32 %v14300_v38, %v12063_v10  ;;  %v12514_v57 = vor.u32 %v14412_v30, %v12511_v32  ;;  %v14404_v47 = vld [vmem:[#allocation16 + $0xb4c] sm:$0xf]  ;;  %v12925_v38 = vld [vmem:[#allocation16 + $0xec8] sm:$0xf] }
 0x42d   :  { %v12482_v60 = vor.u32 %v14404_v47, %v12479_v43  ;;  %v14204_v39 = vld [vmem:[#allocation16 + $0x50c] sm:$0xf]  ;;  %v11109_v43 = vld [vmem:[#allocation16 + $0x90] sm:$0xf] }
 0x42e   :  { %7416 = vmatpush.bf16.msra.mxu2 %v12258_v18  ;;  %7302 = vmatpush.bf16.msra.mxu1 %v11902_v54  ;;  %v14308_v18 = vld [vmem:[#allocation16 + $0x84c] sm:$0xf]  ;;  %v14544_v54 = vld [vmem:[#allocation16 + $0xfa4] sm:$0xf0] }
 0x42f   :  { %v12098_v6 = vor.u32 %v14308_v18, %v12095_v58  ;;  %v13022_v55 = vor.u32 %v14544_v54, %v13021_v28  ;;  %v11679_v29 = vld [vmem:[#allocation16 + $0x528] sm:$0xf0]  ;;  %v14512_v28 = vld [vmem:[#allocation16 + $0xea4] sm:$0xf0] }
 0x430   :  { %7342 = vmatpush.bf16.msrb.mxu0 %v12638_v42  ;;  %7382 = vmatpush.bf16.msrb.mxu3 %v11330_v9  ;;  %v14097_v42 = vld [vmem:[#allocation16 + $0x1ac] sm:$0xf0]  ;;  %v14396_v9 = vld [vmem:[#allocation16 + $0xb0c] sm:$0xf] }
 0x431   :  { %v12450_v58 = vor.u32 %v14396_v9, %v12447_v12  ;;  %v14388_v35 = vld [vmem:[#allocation16 + $0xacc] sm:$0xf]  ;;  %v11077_v9 = vld [vmem:[#allocation16 + $0x50] sm:$0xf] }
 0x432   :  { %7417 = vmatpush.bf16.msra.mxu2 %v12226_v2  ;;  %7303 = vmatpush.bf16.msra.mxu1 %v11870_v3  ;;  %v11805_v2 = vld [vmem:[#allocation16 + $0x608] sm:$0xf]  ;;  %v16287_v14 = vpop.f32.mrf.mxu2  ;;  %v14380_v22 = vld [vmem:[#allocation16 + $0xa8c] sm:$0xf] }
 0x433   :  { %v11806_v17 = vor.u32 %v14240_v16, %v11805_v2  ;;  %v14536_v3 = vld [vmem:[#allocation16 + $0xf64] sm:$0xf0]  ;;  %v12958_v16 = vor.u32 %v14528_v59, %v12957_v52  ;;  %v12383_v30 = vld [vmem:[#allocation16 + $0xaa8] sm:$0xf0] }
 0x434   :  { %7343 = vmatpush.bf16.msrb.mxu0 %v12606_v24  ;;  %7383 = vmatpush.bf16.msrb.mxu3 %v11298_v15  ;;  %v14089_v24 = vld [vmem:[#allocation16 + $0x16c] sm:$0xf0]  ;;  %v12990_v18 = vor.u32 %v14536_v3, %v12989_v56  ;;  %v11682_v15 = vor.u32 %v14204_v39, %v11679_v29  ;;  %v12386_v41 = vor.u32 %v14380_v22, %v12383_v30  ;;  %v14504_v56 = vld [vmem:[#allocation16 + $0xe64] sm:$0xf0]  ;;  %v12319_v3 = vld [vmem:[#allocation16 + $0xa28] sm:$0xf0] }
 0x435   :  { %v4476_v39 = vperm.slane %v16260_v62, 1  ;;  %v14172_v29 = vld [vmem:[#allocation16 + $0x40c] sm:$0xf] }
 0x436   :  { %7418 = vmatpush.bf16.msra.mxu2 %v12194_v36  ;;  %7304 = vmatpush.bf16.msra.mxu1 %v11838_v13  ;;  %v14105_v36 = vld [vmem:[#allocation16 + $0x1ec] sm:$0xf0]  ;;  %v12415_v13 = vld [vmem:[#allocation16 + $0xae8] sm:$0xf0]  ;;  %v7125_v2 = vpop.f32.mrf.mxu3 }
 0x437   :  { %7384 = vmatmul.bf16.vlgmr.msrb.gmra.mxu3 %v16186_v49  ;;  %v11270_v27 = vor.u32 %v14105_v36, %v11269_v63  ;;  %v16294_v10 = vadd.f32 %v7125_v2, %v16285_v7  ;;  %v14073_v63 = vld [vmem:[#allocation16 + $0xec] sm:$0xf0]  ;;  %v14188_v36 = vld [vmem:[#allocation16 + $0x48c] sm:$0xf]  ;;  %v7165_v62 = vadd.f32 %v16287_v14, %v4476_v39 }
 0x438   :  { %7428 = vmatpush.bf16.msra.mxu3 %v12546_v1  ;;  %7344 = vmatpush.bf16.msrb.mxu0 %v12574_v26  ;;  %v11647_v1 = vld [vmem:[#allocation16 + $0x4e8] sm:$0xf0]  ;;  %v12418_v26 = vor.u32 %v14388_v35, %v12415_v13  ;;  %v14049_v2 = vld [vmem:[#allocation16 + $0x2c] sm:$0xf0] }
 0x439   :  { %v14372_v7 = vld [vmem:[#allocation16 + $0xa4c] sm:$0xf] }
 0x43a   :  { %7419 = vmatpush.bf16.msra.mxu2 %v12162_v19  ;;  %7305 = vmatpush.bf16.msra.mxu1 %v11806_v17  ;;  %v11237_v19 = vld [vmem:[#allocation16 + $0x190] sm:$0xf]  ;;  %v7166_v0 = vpop.f32.mrf.mxu2  ;;  %v12799_v59 = vld [vmem:[#allocation16 + $0xde8] sm:$0xf0] }
 0x43b   :  { %7345 = vmatmul.bf16.vlgmr.msrb.gmra.mxu0 %v16250_v8  ;;  %v11238_v61 = vor.u32 %v14097_v42, %v11237_v19  ;;  %v11141_v17 = vld [vmem:[#allocation16 + $0xd0] sm:$0xf]  ;;  %v14180_v19 = vld [vmem:[#allocation16 + $0x44c] sm:$0xf] }
 0x43c   :  { %7389 = vmatpush.bf16.msra.mxu0 %v11778_v48  ;;  %7429 = vmatpush.bf16.msra.mxu3 %v12514_v57  ;;  %v14520_v48 = vld [vmem:[#allocation16 + $0xee4] sm:$0xf0]  ;;  %v11142_v57 = vor.u32 %v14073_v63, %v11141_v17  ;;  %v11583_v42 = vld [vmem:[#allocation16 + $0x468] sm:$0xf0]  ;;  %v14361_v17 = vld [vmem:[#allocation16 + $0x9ec] sm:$0xf0] }
 0x43d   :  { %7306 = vmatmul.bf16.vlgmr.msra.gmra.mxu1 %v16180_v44  ;;  %v12926_v21 = vor.u32 %v14520_v48, %v12925_v38  ;;  %v11586_v12 = vor.u32 %v14180_v19, %v11583_v42  ;;  %v12031_v38 = vld [vmem:[#allocation16 + $0x7e8] sm:$0xf0]  ;;  %v14161_v48 = vld [vmem:[#allocation16 + $0x3ac] sm:$0xf0] }
 0x43e   :  { %7420 = vmatpush.bf16.msra.mxu2 %v12130_v4  ;;  %7350 = vmatpush.bf16.msrb.mxu1 %v13054_v37  ;;  %v11205_v4 = vld [vmem:[#allocation16 + $0x150] sm:$0xf]  ;;  %v12893_v37 = vld [vmem:[#allocation16 + $0xe88] sm:$0xf]  ;;  %v7127_v5 = vpop.f32.mrf.mxu3  ;;  %v14468_v19 = vld [vmem:[#allocation16 + $0xd4c] sm:$0xf] }
 0x43f   :  { %v11206_v34 = vor.u32 %v14089_v24, %v11205_v4  ;;  %v12894_v51 = vor.u32 %v14512_v28, %v12893_v37  ;;  %v11525_v4 = vld [vmem:[#allocation16 + $0x3d0] sm:$0xf]  ;;  %v14284_v37 = vld [vmem:[#allocation16 + $0x78c] sm:$0xf] }
 0x440   :  { %7390 = vmatpush.bf16.msra.mxu0 %v11746_v46  ;;  %7430 = vmatpush.bf16.msra.mxu3 %v12482_v60  ;;  %v14065_v46 = vld [vmem:[#allocation16 + $0xac] sm:$0xf0]  ;;  %v12861_v60 = vld [vmem:[#allocation16 + $0xe48] sm:$0xf]  ;;  %v11999_v28 = vld [vmem:[#allocation16 + $0x7a8] sm:$0xf0] }
 0x441   :  { %v11110_v0 = vor.u32 %v14065_v46, %v11109_v43  ;;  %v14169_v24 = vld [vmem:[#allocation16 + $0x3ec] sm:$0xf0]  ;;  %v12735_v42 = vld [vmem:[#allocation16 + $0xd68] sm:$0xf0]  ;;  %v12002_v5 = vor.u32 %v14284_v37, %v11999_v28 }
 0x442   :  { %7421 = vmatpush.bf16.msra.mxu2 %v12098_v6  ;;  %7351 = vmatpush.bf16.msrb.mxu1 %v13022_v55  ;;  %v14196_v6 = vld [vmem:[#allocation16 + $0x4cc] sm:$0xf]  ;;  %v11526_v13 = vor.u32 %v14169_v24, %v11525_v4  ;;  %v12261_v43 = vld [vmem:[#allocation16 + $0x990] sm:$0xf] }
 0x443   :  { %v11650_v32 = vor.u32 %v14196_v6, %v11647_v1  ;;  %v11045_v1 = vld [vmem:[#allocation16 + $0x10] sm:$0xf]  ;;  %v14460_v24 = vld [vmem:[#allocation16 + $0xd0c] sm:$0xf] }
 0x444   :  { %7391 = vmatpush.bf16.msra.mxu0 %v11714_v53  ;;  %7431 = vmatpush.bf16.msra.mxu3 %v12450_v58  ;;  %v14057_v53 = vld [vmem:[#allocation16 + $0x6c] sm:$0xf0]  ;;  %v12862_v58 = vor.u32 %v14504_v56, %v12861_v60  ;;  %v11967_v56 = vld [vmem:[#allocation16 + $0x768] sm:$0xf0] }
 0x445   :  { %v11078_v35 = vor.u32 %v14057_v53, %v11077_v9  ;;  %v14353_v46 = vld [vmem:[#allocation16 + $0x9ac] sm:$0xf0]  ;;  %v12738_v9 = vor.u32 %v14468_v19, %v12735_v42  ;;  %v12703_v39 = vld [vmem:[#allocation16 + $0xd28] sm:$0xf0] }
 0x446   :  { %7422 = vmatpush.bf16.msra.mxu2 %v12066_v31  ;;  %7352 = vmatpush.bf16.msrb.mxu1 %v12990_v18  ;;  %v11615_v31 = vld [vmem:[#allocation16 + $0x4a8] sm:$0xf0]  ;;  %v7177_v22 = vpop.f32.mrf.mxu3  ;;  %v12262_v60 = vor.u32 %v14353_v46, %v12261_v43  ;;  %v14345_v53 = vld [vmem:[#allocation16 + $0x96c] sm:$0xf0] }
 0x447   :  { %v11618_v47 = vor.u32 %v14188_v36, %v11615_v31  ;;  %v11551_v18 = vld [vmem:[#allocation16 + $0x428] sm:$0xf0]  ;;  %v16300_v63 = vadd.f32 %v7177_v22, %v7165_v62  ;;  %v11046_v36 = vor.u32 %v14049_v2, %v11045_v1  ;;  %v11333_v28 = vld [vmem:[#allocation16 + $0x250] sm:$0xf] }
 0x448   :  { %7392 = vmatpush.bf16.msra.mxu0 %v11682_v15  ;;  %7432 = vmatpush.bf16.msra.mxu3 %v12418_v26  ;;  %v12829_v15 = vld [vmem:[#allocation16 + $0xe08] sm:$0xf]  ;;  %v11554_v6 = vor.u32 %v14172_v29, %v11551_v18  ;;  %v14476_v31 = vld [vmem:[#allocation16 + $0xd8c] sm:$0xf]  ;;  %v12133_v43 = vld [vmem:[#allocation16 + $0x890] sm:$0xf] }
 0x449   :  { %7423 = vmatmul.bf16.vlgmr.msra.gmra.mxu2 %v16211_v20  ;;  %v12830_v30 = vor.u32 %v14496_v11, %v12829_v15  ;;  %v12706_v15 = vor.u32 %v14460_v24, %v12703_v39  ;;  %v12197_v11 = vld [vmem:[#allocation16 + $0x910] sm:$0xf]  ;;  %v12671_v1 = vld [vmem:[#allocation16 + $0xce8] sm:$0xf0] }
 0x44a   :  { %7467 = vmatpush.bf16.msrb.mxu2 %v11270_v27  ;;  %7353 = vmatpush.bf16.msrb.mxu1 %v12958_v16  ;;  %v12351_v27 = vld [vmem:[#allocation16 + $0xa68] sm:$0xf0]  ;;  %v14321_v46 = vld [vmem:[#allocation16 + $0x8ac] sm:$0xf0] }
 0x44b   :  { %v12354_v55 = vor.u32 %v14372_v7, %v12351_v27  ;;  %v14292_v16 = vld [vmem:[#allocation16 + $0x7cc] sm:$0xf]  ;;  %v11461_v7 = vld [vmem:[#allocation16 + $0x350] sm:$0xf] }
 0x44c   :  { %7393 = vmatpush.bf16.msra.mxu0 %v11650_v32  ;;  %v16296_v54 = vpop.f32.mrf.mxu2  ;;  %7433 = vmatpush.bf16.msra.mxu3 %v12386_v41  ;;  %v12293_v32 = vld [vmem:[#allocation16 + $0x9d0] sm:$0xf]  ;;  %v12034_v41 = vor.u32 %v14292_v16, %v12031_v38  ;;  %v14436_v19 = vld [vmem:[#allocation16 + $0xc4c] sm:$0xf] }
 0x44d   :  { %v14153_v27 = vld [vmem:[#allocation16 + $0x36c] sm:$0xf0]  ;;  %v12607_v42 = vld [vmem:[#allocation16 + $0xc68] sm:$0xf0] }
 0x44e   :  { %7468 = vmatpush.bf16.msrb.mxu2 %v11238_v61  ;;  %7354 = vmatpush.bf16.msrb.mxu1 %v12926_v21  ;;  %v14364_v61 = vld [vmem:[#allocation16 + $0xa0c] sm:$0xf]  ;;  %v11365_v38 = vld [vmem:[#allocation16 + $0x290] sm:$0xf] }
 0x44f   :  { %v12322_v52 = vor.u32 %v14364_v61, %v12319_v3  ;;  %v12767_v21 = vld [vmem:[#allocation16 + $0xda8] sm:$0xf0]  ;;  %v14145_v61 = vld [vmem:[#allocation16 + $0x32c] sm:$0xf0]  ;;  %v7179_v3 = vpop.f32.mrf.mxu3 }
 0x450   :  { %7394 = vmatpush.bf16.msra.mxu0 %v11618_v47  ;;  %7434 = vmatpush.bf16.msra.mxu3 %v12354_v55  ;;  %v12770_v47 = vor.u32 %v14476_v31, %v12767_v21  ;;  %v14276_v55 = vld [vmem:[#allocation16 + $0x74c] sm:$0xf]  ;;  %v12101_v3 = vld [vmem:[#allocation16 + $0x850] sm:$0xf] }
 0x451   :  { %v11970_v18 = vor.u32 %v14276_v55, %v11967_v56  ;;  %v12639_v31 = vld [vmem:[#allocation16 + $0xca8] sm:$0xf0]  ;;  %v12134_v56 = vor.u32 %v14321_v46, %v12133_v43  ;;  %v14425_v24 = vld [vmem:[#allocation16 + $0xbec] sm:$0xf0]  ;;  %v14093_v46 = vld [vmem:[#allocation16 + $0x194] sm:$0xf] }
 0x452   :  { %7469 = vmatpush.bf16.msrb.mxu2 %v11206_v34  ;;  %7355 = vmatpush.bf16.msrb.mxu1 %v12894_v51  ;;  %v14484_v34 = vld [vmem:[#allocation16 + $0xdcc] sm:$0xf]  ;;  %v11462_v51 = vor.u32 %v14153_v27, %v11461_v7  ;;  %v7138_v4 = vpop.f32.mrf.mxu0  ;;  %v14121_v7 = vld [vmem:[#allocation16 + $0x26c] sm:$0xf0] }
 0x453   :  { %v12802_v26 = vor.u32 %v14484_v34, %v12799_v59  ;;  %v16307_v29 = vadd.f32 %v7138_v4, %v16294_v10  ;;  %v11935_v59 = vld [vmem:[#allocation16 + $0x728] sm:$0xf0]  ;;  %v12549_v4 = vld [vmem:[#allocation16 + $0xbd0] sm:$0xf] }
 0x454   :  { %7395 = vmatpush.bf16.msra.mxu0 %v11586_v12  ;;  %v7218_v25 = vpop.f32.mrf.mxu2  ;;  %7435 = vmatpush.bf16.msra.mxu3 %v12322_v52  ;;  %v12229_v12 = vld [vmem:[#allocation16 + $0x950] sm:$0xf]  ;;  %v14268_v52 = vld [vmem:[#allocation16 + $0x70c] sm:$0xf] }
 0x455   :  { %v12230_v34 = vor.u32 %v14345_v53, %v12229_v12  ;;  %v14337_v25 = vld [vmem:[#allocation16 + $0x92c] sm:$0xf0]  ;;  %v11938_v2 = vor.u32 %v14268_v52, %v11935_v59  ;;  %v14260_v10 = vld [vmem:[#allocation16 + $0x6cc] sm:$0xf]  ;;  %v12610_v12 = vor.u32 %v14436_v19, %v12607_v42  ;;  %v11239_v19 = vld [vmem:[#allocation16 + $0x1b0] sm:$0xf0] }
 0x456   :  { %7470 = vmatpush.bf16.msrb.mxu2 %v11174_v50  ;;  %v11493_v50 = vld [vmem:[#allocation16 + $0x390] sm:$0xf]  ;;  %7356 = vmatpush.bf16.msrb.mxu1 %v12862_v58  ;;  %v12198_v62 = vor.u32 %v14337_v25, %v12197_v11  ;;  %v14244_v55 = vld [vmem:[#allocation16 + $0x64c] sm:$0xf]  ;;  %v12550_v11 = vor.u32 %v14425_v24, %v12549_v4 }
 0x457   :  { %v11494_v14 = vor.u32 %v14161_v48, %v11493_v50  ;;  %7436 = vmatmul.bf16.vlgmr.msra.gmra.mxu3 %v16230_v23  ;;  %v14129_v50 = vld [vmem:[#allocation16 + $0x2ac] sm:$0xf0]  ;;  %v16309_v48 = vpop.f32.mrf.mxu3  ;;  %v14236_v25 = vld [vmem:[#allocation16 + $0x60c] sm:$0xf] }
 0x458   :  { %7480 = vmatpush.bf16.msrb.mxu3 %v11526_v13  ;;  %7396 = vmatpush.bf16.msra.mxu0 %v11554_v6  ;;  %v14137_v13 = vld [vmem:[#allocation16 + $0x2ec] sm:$0xf0]  ;;  %v14452_v6 = vld [vmem:[#allocation16 + $0xccc] sm:$0xf] }
 0x459   :  { %v12674_v22 = vor.u32 %v14452_v6, %v12671_v1  ;;  %v14313_v53 = vld [vmem:[#allocation16 + $0x86c] sm:$0xf0]  ;;  %v11807_v6 = vld [vmem:[#allocation16 + $0x628] sm:$0xf0] }
 0x45a   :  { %7471 = vmatpush.bf16.msrb.mxu2 %v11142_v57  ;;  %v12294_v57 = vor.u32 %v14361_v17, %v12293_v32  ;;  %7357 = vmatpush.bf16.msrb.mxu1 %v12830_v30  ;;  %v12165_v30 = vld [vmem:[#allocation16 + $0x8d0] sm:$0xf]  ;;  %v7140_v17 = vpop.f32.mrf.mxu0 }
 0x45b   :  { %7397 = vmatmul.bf16.vlgmr.msra.gmra.mxu0 %v16102_v40  ;;  %v14329_v32 = vld [vmem:[#allocation16 + $0x8ec] sm:$0xf0] }
 0x45c   :  { %7441 = vmatpush.bf16.msrb.mxu0 %v12802_v26  ;;  %7481 = vmatpush.bf16.msrb.mxu3 %v11494_v14  ;;  %v11903_v26 = vld [vmem:[#allocation16 + $0x6e8] sm:$0xf0]  ;;  %v12166_v37 = vor.u32 %v14329_v32, %v12165_v30  ;;  %v14101_v30 = vld [vmem:[#allocation16 + $0x1d4] sm:$0xf]  ;;  %v11717_v42 = vld [vmem:[#allocation16 + $0x550] sm:$0xf] }
 0x45d   :  { %7358 = vmatmul.bf16.vlgmr.msrb.gmra.mxu1 %v16273_v33  ;;  %v11906_v21 = vor.u32 %v14260_v10, %v11903_v26  ;;  %v14252_v14 = vld [vmem:[#allocation16 + $0x68c] sm:$0xf]  ;;  %v14305_v10 = vld [vmem:[#allocation16 + $0x82c] sm:$0xf0]  ;;  %v11271_v32 = vld [vmem:[#allocation16 + $0x1f0] sm:$0xf0] }
 0x45e   :  { %7472 = vmatpush.bf16.msrb.mxu2 %v11110_v0  ;;  %7402 = vmatpush.bf16.msra.mxu1 %v12034_v41  ;;  %v11429_v0 = vld [vmem:[#allocation16 + $0x310] sm:$0xf]  ;;  %v11366_v41 = vor.u32 %v14129_v50, %v11365_v38  ;;  %v13055_v38 = vld [vmem:[#allocation16 + $0xfe8] sm:$0xf0] }
 0x45f   :  { %v11430_v58 = vor.u32 %v14145_v61, %v11429_v0  ;;  %v11301_v0 = vld [vmem:[#allocation16 + $0x210] sm:$0xf] }
 0x460   :  { %7442 = vmatpush.bf16.msrb.mxu0 %v12770_v47  ;;  %7482 = vmatpush.bf16.msrb.mxu3 %v11462_v51  ;;  %v11334_v51 = vor.u32 %v14121_v7, %v11333_v28  ;;  %v14113_v61 = vld [vmem:[#allocation16 + $0x22c] sm:$0xf0]  ;;  %v13023_v28 = vld [vmem:[#allocation16 + $0xfa8] sm:$0xf0] }
 0x461   :  { %v11302_v59 = vor.u32 %v14113_v61, %v11301_v0  ;;  %v12517_v50 = vld [vmem:[#allocation16 + $0xb90] sm:$0xf]  ;;  %v12991_v0 = vld [vmem:[#allocation16 + $0xf68] sm:$0xf0] }
 0x462   :  { %7473 = vmatpush.bf16.msrb.mxu2 %v11078_v35  ;;  %7403 = vmatpush.bf16.msra.mxu1 %v12002_v5  ;;  %v11397_v35 = vld [vmem:[#allocation16 + $0x2d0] sm:$0xf]  ;;  %v7190_v39 = vpop.f32.mrf.mxu0 }
 0x463   :  { %v11398_v16 = vor.u32 %v14137_v13, %v11397_v35  ;;  %v16314_v52 = vadd.f32 %v7190_v39, %v16300_v63  ;;  %v11781_v35 = vld [vmem:[#allocation16 + $0x5d0] sm:$0xf]  ;;  %v16320_v39 = vld [vmem:[#allocation17] sm:$0xff] }
 0x464   :  { %7443 = vmatpush.bf16.msrb.mxu0 %v12738_v9  ;;  %7483 = vmatpush.bf16.msrb.mxu3 %v11430_v58  ;;  %v7231_v9 = vpop.f32.mrf.mxu3  ;;  %v12575_v58 = vld [vmem:[#allocation16 + $0xc28] sm:$0xf0]  ;;  %v14233_v13 = vld [vmem:[#allocation16 + $0x5ec] sm:$0xf0] }
 0x465   :  { %v11782_v26 = vor.u32 %v14233_v13, %v11781_v35  ;;  %v14417_v63 = vld [vmem:[#allocation16 + $0xbac] sm:$0xf0]  ;;  %v14524_v35 = vld [vmem:[#allocation16 + $0xf0c] sm:$0xf] }
 0x466   :  { %7474 = vmatpush.bf16.msrb.mxu2 %v11046_v36  ;;  %7404 = vmatpush.bf16.msra.mxu1 %v11970_v18  ;;  %v14444_v36 = vld [vmem:[#allocation16 + $0xc8c] sm:$0xf]  ;;  %v12485_v7 = vld [vmem:[#allocation16 + $0xb50] sm:$0xf] }
 0x467   :  { %v12642_v47 = vor.u32 %v14444_v36, %v12639_v31  ;;  %v14428_v18 = vld [vmem:[#allocation16 + $0xc0c] sm:$0xf]  ;;  %v11749_v36 = vld [vmem:[#allocation16 + $0x590] sm:$0xf] }
 0x468   :  { %7444 = vmatpush.bf16.msrb.mxu0 %v12706_v15  ;;  %7484 = vmatpush.bf16.msrb.mxu3 %v11398_v16  ;;  %v12102_v15 = vor.u32 %v14313_v53, %v12101_v3  ;;  %v12069_v16 = vld [vmem:[#allocation16 + $0x810] sm:$0xf]  ;;  %v11207_v53 = vld [vmem:[#allocation16 + $0x170] sm:$0xf0] }
 0x469   :  { %7475 = vmatmul.bf16.vlgmr.msrb.gmra.mxu2 %v16182_v45  ;;  %v12070_v17 = vor.u32 %v14305_v10, %v12069_v16  ;;  %v14225_v31 = vld [vmem:[#allocation16 + $0x5ac] sm:$0xf0]  ;;  %v14077_v16 = vld [vmem:[#allocation16 + $0x114] sm:$0xf] }
 0x46a   :  { %7519 = vmatpush.bf16.msra.mxu2 %v12294_v57  ;;  %7405 = vmatpush.bf16.msra.mxu1 %v11938_v2  ;;  %v11871_v57 = vld [vmem:[#allocation16 + $0x6a8] sm:$0xf0]  ;;  %v12578_v2 = vor.u32 %v14428_v18, %v12575_v58  ;;  %v11750_v43 = vor.u32 %v14225_v31, %v11749_v36  ;;  %v12453_v61 = vld [vmem:[#allocation16 + $0xb10] sm:$0xf]  ;;  %v4477_v18 = vperm.slane %v16320_v39, 2 }
 0x46b   :  { %v11874_v5 = vor.u32 %v14252_v14, %v11871_v57  ;;  %v14540_v14 = vld [vmem:[#allocation16 + $0xf8c] sm:$0xf]  ;;  %v7192_v57 = vpop.f32.mrf.mxu0  ;;  %v14401_v3 = vld [vmem:[#allocation16 + $0xb2c] sm:$0xf0]  ;;  %v11175_v10 = vld [vmem:[#allocation16 + $0x130] sm:$0xf0] }
 0x46c   :  { %7445 = vmatpush.bf16.msrb.mxu0 %v12674_v22  ;;  %v16311_v27 = vpop.f32.mrf.mxu2  ;;  %7485 = vmatpush.bf16.msrb.mxu3 %v11366_v41  ;;  %v11810_v22 = vor.u32 %v14236_v25, %v11807_v6  ;;  %v12518_v41 = vor.u32 %v14417_v63, %v12517_v50  ;;  %v11685_v4 = vld [vmem:[#allocation16 + $0x510] sm:$0xf] }
 0x46d   :  { %v14209_v24 = vld [vmem:[#allocation16 + $0x52c] sm:$0xf0] }
 0x46e   :  { %7520 = vmatpush.bf16.msra.mxu2 %v12262_v60  ;;  %7406 = vmatpush.bf16.msra.mxu1 %v11906_v21  ;;  %v11839_v60 = vld [vmem:[#allocation16 + $0x668] sm:$0xf0]  ;;  %v12421_v25 = vld [vmem:[#allocation16 + $0xad0] sm:$0xf] }
 0x46f   :  { %v14393_v6 = vld [vmem:[#allocation16 + $0xaec] sm:$0xf0] }
 0x470   :  { %7446 = vmatpush.bf16.msrb.mxu0 %v12642_v47  ;;  %7486 = vmatpush.bf16.msrb.mxu3 %v11334_v51  ;;  %v14409_v47 = vld [vmem:[#allocation16 + $0xb6c] sm:$0xf0]  ;;  %v13026_v51 = vor.u32 %v14540_v14, %v13023_v28  ;;  %v12422_v63 = vor.u32 %v14393_v6, %v12421_v25  ;;  %v11143_v14 = vld [vmem:[#allocation16 + $0xf0] sm:$0xf0] }
 0x471   :  { %v14385_v36 = vld [vmem:[#allocation16 + $0xaac] sm:$0xf0] }
 0x472   :  { %7521 = vmatpush.bf16.msra.mxu2 %v12230_v34  ;;  %7407 = vmatpush.bf16.msra.mxu1 %v11874_v5  ;;  %v11842_v34 = vor.u32 %v14244_v55, %v11839_v60  ;;  %v14217_v5 = vld [vmem:[#allocation16 + $0x56c] sm:$0xf0]  ;;  %v12486_v55 = vor.u32 %v14409_v47, %v12485_v7  ;;  %v14532_v60 = vld [vmem:[#allocation16 + $0xf4c] sm:$0xf] }
 0x473   :  { %v11718_v9 = vor.u32 %v14217_v5, %v11717_v42  ;;  %v12994_v58 = vor.u32 %v14532_v60, %v12991_v0  ;;  %v14193_v57 = vld [vmem:[#allocation16 + $0x4ac] sm:$0xf0]  ;;  %v14508_v47 = vld [vmem:[#allocation16 + $0xe8c] sm:$0xf]  ;;  %v14061_v60 = vld [vmem:[#allocation16 + $0x94] sm:$0xf] }
 0x474   :  { %7447 = vmatpush.bf16.msrb.mxu0 %v12610_v12  ;;  %v7270_v1 = vpop.f32.mrf.mxu2  ;;  %7487 = vmatpush.bf16.msrb.mxu3 %v11302_v59  ;;  %v14085_v12 = vld [vmem:[#allocation16 + $0x154] sm:$0xf]  ;;  %v12357_v42 = vld [vmem:[#allocation16 + $0xa50] sm:$0xf] }
 0x475   :  { %v11210_v13 = vor.u32 %v14085_v12, %v11207_v53  ;;  %v14377_v5 = vld [vmem:[#allocation16 + $0xa6c] sm:$0xf0]  ;;  %v14500_v12 = vld [vmem:[#allocation16 + $0xe4c] sm:$0xf] }
 0x476   :  { %7522 = vmatpush.bf16.msra.mxu2 %v12198_v62  ;;  %v14548_v62 = vld [vmem:[#allocation16 + $0xfcc] sm:$0xf]  ;;  %7408 = vmatpush.bf16.msra.mxu1 %v11842_v34  ;;  %v12454_v34 = vor.u32 %v14401_v3, %v12453_v61  ;;  %v11589_v0 = vld [vmem:[#allocation16 + $0x450] sm:$0xf] }
 0x477   :  { %v13058_v21 = vor.u32 %v14548_v62, %v13055_v38  ;;  %7488 = vmatmul.bf16.vlgmr.msrb.gmra.mxu3 %v16186_v49  ;;  %v11653_v62 = vld [vmem:[#allocation16 + $0x4d0] sm:$0xf]  ;;  %v7269_v38 = vadd.f32 %v16311_v27, %v4477_v18  ;;  %v12863_v53 = vld [vmem:[#allocation16 + $0xe68] sm:$0xf0] }
 0x478   :  { %7532 = vmatpush.bf16.msra.mxu3 %v12550_v11  ;;  %7448 = vmatpush.bf16.msrb.mxu0 %v12578_v2  ;;  %v12959_v11 = vld [vmem:[#allocation16 + $0xf28] sm:$0xf0]  ;;  %v16326_v1 = vpop.f32.mrf.mxu0  ;;  %v11686_v2 = vor.u32 %v14209_v24, %v11685_v4  ;;  %v14185_v61 = vld [vmem:[#allocation16 + $0x46c] sm:$0xf0] }
 0x479   :  { %v12962_v50 = vor.u32 %v14524_v35, %v12959_v11  ;;  %v12325_v18 = vld [vmem:[#allocation16 + $0xa10] sm:$0xf]  ;;  %v11079_v35 = vld [vmem:[#allocation16 + $0x70] sm:$0xf0] }
 0x47a   :  { %7523 = vmatpush.bf16.msra.mxu2 %v12166_v37  ;;  %v11274_v37 = vor.u32 %v14101_v30, %v11271_v32  ;;  %7409 = vmatpush.bf16.msra.mxu1 %v11810_v22  ;;  %v7151_v59 = vpop.f32.mrf.mxu1  ;;  %v14516_v22 = vld [vmem:[#allocation16 + $0xecc] sm:$0xf]  ;;  %v7281_v30 = vpop.f32.mrf.mxu3  ;;  %v11527_v11 = vld [vmem:[#allocation16 + $0x3f0] sm:$0xf0]  ;;  %v11557_v25 = vld [vmem:[#allocation16 + $0x410] sm:$0xf] }
 0x47b   :  { %7449 = vmatmul.bf16.vlgmr.msrb.gmra.mxu0 %v16250_v8  ;;  %v12927_v32 = vld [vmem:[#allocation16 + $0xee8] sm:$0xf0]  ;;  %v16329_v31 = vadd.f32 %v7281_v30, %v7269_v38  ;;  %v14177_v6 = vld [vmem:[#allocation16 + $0x42c] sm:$0xf0] }
 0x47c   :  { %7493 = vmatpush.bf16.msra.mxu0 %v11782_v26  ;;  %7533 = vmatpush.bf16.msra.mxu3 %v12518_v41  ;;  %v14201_v26 = vld [vmem:[#allocation16 + $0x4ec] sm:$0xf0]  ;;  %v14069_v41 = vld [vmem:[#allocation16 + $0xd4] sm:$0xf]  ;;  %v12930_v27 = vor.u32 %v14516_v22, %v12927_v32  ;;  %v12831_v30 = vld [vmem:[#allocation16 + $0xe28] sm:$0xf0]  ;;  %v11558_v32 = vor.u32 %v14177_v6, %v11557_v25 }
 0x47d   :  { %7410 = vmatmul.bf16.vlgmr.msra.gmra.mxu1 %v16180_v44  ;;  %v12231_v25 = vld [vmem:[#allocation16 + $0x970] sm:$0xf0]  ;;  %v12709_v6 = vld [vmem:[#allocation16 + $0xd10] sm:$0xf] }
 0x47e   :  { %7524 = vmatpush.bf16.msra.mxu2 %v12134_v56  ;;  %7454 = vmatpush.bf16.msrb.mxu1 %v13058_v21  ;;  %v11242_v56 = vor.u32 %v14093_v46, %v11239_v19  ;;  %v11654_v21 = vor.u32 %v14201_v26, %v11653_v62  ;;  %v12895_v19 = vld [vmem:[#allocation16 + $0xea8] sm:$0xf0]  ;;  %v12805_v62 = vld [vmem:[#allocation16 + $0xdd0] sm:$0xf] }
 0x47f   :  { %v12898_v3 = vor.u32 %v14508_v47, %v12895_v19  ;;  %v14489_v26 = vld [vmem:[#allocation16 + $0xdec] sm:$0xf0] }
 0x480   :  { %7494 = vmatpush.bf16.msra.mxu0 %v11750_v43  ;;  %7534 = vmatpush.bf16.msra.mxu3 %v12486_v55  ;;  %v11146_v43 = vor.u32 %v14069_v41, %v11143_v14  ;;  %v12806_v14 = vor.u32 %v14489_v26, %v12805_v62  ;;  %v14481_v19 = vld [vmem:[#allocation16 + $0xdac] sm:$0xf0] }
 0x481   :  { %v11941_v26 = vld [vmem:[#allocation16 + $0x710] sm:$0xf] }
 0x482   :  { %7525 = vmatpush.bf16.msra.mxu2 %v12102_v15  ;;  %7455 = vmatpush.bf16.msrb.mxu1 %v13026_v51  ;;  %v16324_v15 = vadd.f32 %v7151_v59, %v16307_v29  ;;  %v11178_v29 = vor.u32 %v14077_v16, %v11175_v10  ;;  %v7153_v7 = vpop.f32.mrf.mxu1  ;;  %v7244_v51 = vpop.f32.mrf.mxu0  ;;  %v11590_v59 = vor.u32 %v14185_v61, %v11589_v0  ;;  %v11463_v0 = vld [vmem:[#allocation16 + $0x370] sm:$0xf0] }
 0x483   :  { %v7283_v24 = vpop.f32.mrf.mxu3  ;;  %v14357_v7 = vld [vmem:[#allocation16 + $0x9d4] sm:$0xf] }
 0x484   :  { %7495 = vmatpush.bf16.msra.mxu0 %v11718_v9  ;;  %7535 = vmatpush.bf16.msra.mxu3 %v12454_v34  ;;  %v12358_v9 = vor.u32 %v14377_v5, %v12357_v42  ;;  %v14053_v34 = vld [vmem:[#allocation16 + $0x54] sm:$0xf] }
 0x485   :  { %v11082_v38 = vor.u32 %v14053_v34, %v11079_v35  ;;  %v11431_v35 = vld [vmem:[#allocation16 + $0x330] sm:$0xf0] }
 0x486   :  { %7526 = vmatpush.bf16.msra.mxu2 %v12070_v17  ;;  %7456 = vmatpush.bf16.msrb.mxu1 %v12994_v58  ;;  %v12389_v17 = vld [vmem:[#allocation16 + $0xa90] sm:$0xf] }
 0x487   :  { %v12390_v28 = vor.u32 %v14385_v36, %v12389_v17  ;;  %v14369_v58 = vld [vmem:[#allocation16 + $0xa2c] sm:$0xf0]  ;;  %v14045_v17 = vld [vmem:[#allocation16 + $0x14] sm:$0xf] }
 0x488   :  { %7496 = vmatpush.bf16.msra.mxu0 %v11686_v2  ;;  %7536 = vmatpush.bf16.msra.mxu3 %v12422_v63  ;;  %v12866_v2 = vor.u32 %v14500_v12, %v12863_v53  ;;  %v12326_v16 = vor.u32 %v14369_v58, %v12325_v18  ;;  %v11047_v36 = vld [vmem:[#allocation16 + $0x30] sm:$0xf0]  ;;  %v11973_v58 = vld [vmem:[#allocation16 + $0x750] sm:$0xf] }
 0x489   :  { %7527 = vmatmul.bf16.vlgmr.msra.gmra.mxu2 %v16211_v20  ;;  %v11050_v47 = vor.u32 %v14045_v17, %v11047_v36  ;;  %v14349_v12 = vld [vmem:[#allocation16 + $0x994] sm:$0xf] }
 0x48a   :  { %7571 = vmatpush.bf16.msrb.mxu2 %v11274_v37  ;;  %v11621_v37 = vld [vmem:[#allocation16 + $0x490] sm:$0xf]  ;;  %7457 = vmatpush.bf16.msrb.mxu1 %v12962_v50  ;;  %v7203_v10 = vpop.f32.mrf.mxu1  ;;  %v12263_v53 = vld [vmem:[#allocation16 + $0x9b0] sm:$0xf0] }
 0x48b   :  { %v11622_v55 = vor.u32 %v14193_v57, %v11621_v37  ;;  %v7204_v50 = vadd.f32 %v7203_v10, %v16314_v52  ;;  %v14297_v37 = vld [vmem:[#allocation16 + $0x7ec] sm:$0xf0]  ;;  %v14157_v57 = vld [vmem:[#allocation16 + $0x394] sm:$0xf]  ;;  %v12266_v34 = vor.u32 %v14349_v12, %v12263_v53 }
 0x48c   :  { %v16331_v46 = vpop.f32.mrf.mxu2  ;;  %7497 = vmatpush.bf16.msra.mxu0 %v11654_v21  ;;  %7537 = vmatpush.bf16.msra.mxu3 %v12390_v28  ;;  %v12037_v21 = vld [vmem:[#allocation16 + $0x7d0] sm:$0xf]  ;;  %v12295_v52 = vld [vmem:[#allocation16 + $0x9f0] sm:$0xf0] }
 0x48d   :  { %v7217_v41 = vadd.f32 %v16296_v54, %v7204_v50  ;;  %v12038_v5 = vor.u32 %v14297_v37, %v12037_v21  ;;  %v12005_v54 = vld [vmem:[#allocation16 + $0x790] sm:$0xf]  ;;  %v12199_v17 = vld [vmem:[#allocation16 + $0x930] sm:$0xf0] }
 0x48e   :  { %7572 = vmatpush.bf16.msrb.mxu2 %v11242_v56  ;;  %v11111_v56 = vld [vmem:[#allocation16 + $0xb0] sm:$0xf0]  ;;  %7458 = vmatpush.bf16.msrb.mxu1 %v12930_v27  ;;  %v12677_v21 = vld [vmem:[#allocation16 + $0xcd0] sm:$0xf] }
 0x48f   :  { %v11114_v4 = vor.u32 %v14061_v60, %v11111_v56  ;;  %v11495_v27 = vld [vmem:[#allocation16 + $0x3b0] sm:$0xf0]  ;;  %v7230_v42 = vadd.f32 %v16309_v48, %v7217_v41  ;;  %v14289_v60 = vld [vmem:[#allocation16 + $0x7ac] sm:$0xf0] }
 0x490   :  { %7498 = vmatpush.bf16.msra.mxu0 %v11622_v55  ;;  %7538 = vmatpush.bf16.msra.mxu3 %v12358_v9  ;;  %v11498_v51 = vor.u32 %v14157_v57, %v11495_v27  ;;  %v12298_v55 = vor.u32 %v14357_v7, %v12295_v52  ;;  %v14149_v56 = vld [vmem:[#allocation16 + $0x354] sm:$0xf]  ;;  %v12741_v48 = vld [vmem:[#allocation16 + $0xd50] sm:$0xf]  ;;  %v12006_v24 = vor.u32 %v14289_v60, %v12005_v54 }
 0x491   :  { %v7243_v61 = vadd.f32 %v16326_v1, %v7230_v42  ;;  %v11466_v18 = vor.u32 %v14149_v56, %v11463_v0  ;;  %v14281_v1 = vld [vmem:[#allocation16 + $0x76c] sm:$0xf0]  ;;  %v14125_v52 = vld [vmem:[#allocation16 + $0x294] sm:$0xf] }
 0x492   :  { %7573 = vmatpush.bf16.msrb.mxu2 %v11210_v13  ;;  %v14165_v13 = vld [vmem:[#allocation16 + $0x3d4] sm:$0xf]  ;;  %7459 = vmatpush.bf16.msrb.mxu1 %v12898_v3  ;;  %v7205_v9 = vpop.f32.mrf.mxu1  ;;  %v14457_v41 = vld [vmem:[#allocation16 + $0xcec] sm:$0xf0] }
 0x493   :  { %v11530_v22 = vor.u32 %v14165_v13, %v11527_v11  ;;  %v14341_v11 = vld [vmem:[#allocation16 + $0x954] sm:$0xf]  ;;  %v14265_v7 = vld [vmem:[#allocation16 + $0x6ec] sm:$0xf0] }
 0x494   :  { %v7322_v63 = vpop.f32.mrf.mxu2  ;;  %7499 = vmatpush.bf16.msra.mxu0 %v11590_v59  ;;  %7539 = vmatpush.bf16.msra.mxu3 %v12326_v16  ;;  %v14141_v59 = vld [vmem:[#allocation16 + $0x314] sm:$0xf]  ;;  %v11974_v16 = vor.u32 %v14281_v1, %v11973_v58  ;;  %v11877_v56 = vld [vmem:[#allocation16 + $0x690] sm:$0xf] }
 0x495   :  { %v11434_v10 = vor.u32 %v14141_v59, %v11431_v35  ;;  %v14273_v63 = vld [vmem:[#allocation16 + $0x72c] sm:$0xf0]  ;;  %v12167_v42 = vld [vmem:[#allocation16 + $0x8f0] sm:$0xf0] }
 0x496   :  { %7574 = vmatpush.bf16.msrb.mxu2 %v11178_v29  ;;  %v14492_v29 = vld [vmem:[#allocation16 + $0xe0c] sm:$0xf]  ;;  %7460 = vmatpush.bf16.msrb.mxu1 %v12866_v2  ;;  %v14465_v2 = vld [vmem:[#allocation16 + $0xd2c] sm:$0xf0]  ;;  %v11942_v37 = vor.u32 %v14273_v63, %v11941_v26  ;;  %v14117_v9 = vld [vmem:[#allocation16 + $0x254] sm:$0xf] }
 0x497   :  { %v12834_v28 = vor.u32 %v14492_v29, %v12831_v30  ;;  %7540 = vmatmul.bf16.vlgmr.msra.gmra.mxu3 %v16230_v23  ;;  %v11399_v29 = vld [vmem:[#allocation16 + $0x2f0] sm:$0xf0]  ;;  %v12710_v30 = vor.u32 %v14465_v2, %v12709_v6  ;;  %v14441_v58 = vld [vmem:[#allocation16 + $0xc6c] sm:$0xf0] }
 0x498   :  { %7584 = vmatpush.bf16.msrb.mxu3 %v11530_v22  ;;  %7500 = vmatpush.bf16.msra.mxu0 %v11558_v32  ;;  %v7294_v62 = vpop.f32.mrf.mxu0  ;;  %v14133_v22 = vld [vmem:[#allocation16 + $0x2d4] sm:$0xf]  ;;  %v11845_v35 = vld [vmem:[#allocation16 + $0x650] sm:$0xf] }
 0x499   :  { %v16342_v50 = vadd.f32 %v7294_v62, %v16329_v31  ;;  %v14333_v32 = vld [vmem:[#allocation16 + $0x914] sm:$0xf]  ;;  %v11402_v57 = vor.u32 %v14133_v22, %v11399_v29  ;;  %v11909_v31 = vld [vmem:[#allocation16 + $0x6d0] sm:$0xf] }
 0x49a   :  { %7575 = vmatpush.bf16.msrb.mxu2 %v11146_v43  ;;  %v12773_v43 = vld [vmem:[#allocation16 + $0xd90] sm:$0xf]  ;;  %7461 = vmatpush.bf16.msrb.mxu1 %v12834_v28  ;;  %v7255_v36 = vpop.f32.mrf.mxu1  ;;  %v16346_v27 = vpop.f32.mrf.mxu3  ;;  %v12202_v28 = vor.u32 %v14333_v32, %v12199_v17  ;;  %v11910_v54 = vor.u32 %v14265_v7, %v11909_v31  ;;  %v11335_v12 = vld [vmem:[#allocation16 + $0x270] sm:$0xf0] }
 0x49b   :  { %v12774_v3 = vor.u32 %v14481_v19, %v12773_v43  ;;  %7501 = vmatmul.bf16.vlgmr.msra.gmra.mxu0 %v16102_v40  ;;  %v12678_v43 = vor.u32 %v14457_v41, %v12677_v21  ;;  %v14325_v19 = vld [vmem:[#allocation16 + $0x8d4] sm:$0xf]  ;;  %v11338_v1 = vor.u32 %v14117_v9, %v11335_v12  ;;  %v14433_v63 = vld [vmem:[#allocation16 + $0xc2c] sm:$0xf0] }
 0x49c   :  { %7545 = vmatpush.bf16.msrb.mxu0 %v12806_v14  ;;  %7585 = vmatpush.bf16.msrb.mxu3 %v11498_v51  ;;  %v16344_v14 = vadd.f32 %v7255_v36, %v7243_v61  ;;  %v14449_v51 = vld [vmem:[#allocation16 + $0xcac] sm:$0xf0]  ;;  %v12170_v0 = vor.u32 %v14325_v19, %v12167_v42  ;;  %v11303_v6 = vld [vmem:[#allocation16 + $0x230] sm:$0xf0] }
 0x49d   :  { %7462 = vmatmul.bf16.vlgmr.msrb.gmra.mxu1 %v16273_v33  ;;  %v14309_v2 = vld [vmem:[#allocation16 + $0x854] sm:$0xf]  ;;  %v11813_v41 = vld [vmem:[#allocation16 + $0x610] sm:$0xf] }
 0x49e   :  { %7576 = vmatpush.bf16.msrb.mxu2 %v11114_v4  ;;  %v14473_v4 = vld [vmem:[#allocation16 + $0xd6c] sm:$0xf0]  ;;  %7506 = vmatpush.bf16.msra.mxu1 %v12038_v5  ;;  %v14421_v62 = vld [vmem:[#allocation16 + $0xbd4] sm:$0xf] }
 0x49f   :  { %v12742_v13 = vor.u32 %v14473_v4, %v12741_v48  ;;  %v12645_v5 = vld [vmem:[#allocation16 + $0xc90] sm:$0xf]  ;;  %v14317_v48 = vld [vmem:[#allocation16 + $0x894] sm:$0xf] }
 0x4a0   :  { %7546 = vmatpush.bf16.msrb.mxu0 %v12774_v3  ;;  %7586 = vmatpush.bf16.msrb.mxu3 %v11466_v18  ;;  %v7296_v60 = vpop.f32.mrf.mxu0  ;;  %v14257_v3 = vld [vmem:[#allocation16 + $0x6ac] sm:$0xf0]  ;;  %v12646_v53 = vor.u32 %v14449_v51, %v12645_v5  ;;  %v12135_v4 = vld [vmem:[#allocation16 + $0x8b0] sm:$0xf0]  ;;  %v11277_v5 = vld [vmem:[#allocation16 + $0x1d8] sm:$0xf] }
 0x4a1   :  { %v12613_v18 = vld [vmem:[#allocation16 + $0xc50] sm:$0xf]  ;;  %v12551_v26 = vld [vmem:[#allocation16 + $0xbf0] sm:$0xf0]  ;;  %v14106_v51 = vld [vmem:[#allocation16 + $0x1f4] sm:$0xf0] }
 0x4a2   :  { %7577 = vmatpush.bf16.msrb.mxu2 %v11082_v38  ;;  %7507 = vmatpush.bf16.msra.mxu1 %v12006_v24  ;;  %v12234_v38 = vor.u32 %v14341_v11, %v12231_v25  ;;  %v7257_v24 = vpop.f32.mrf.mxu1  ;;  %v7335_v59 = vpop.f32.mrf.mxu3  ;;  %v12138_v11 = vor.u32 %v14317_v48, %v12135_v4  ;;  %v14109_v25 = vld [vmem:[#allocation16 + $0x214] sm:$0xf]  ;;  %v12554_v21 = vor.u32 %v14421_v62, %v12551_v26  ;;  %v13061_v7 = vld [vmem:[#allocation16 + $0xfd0] sm:$0xf]  ;;  %v4478_v62 = vperm.slane %v16320_v39, 3 }
 0x4a3   :  { %v11306_v29 = vor.u32 %v14109_v25, %v11303_v6  ;;  %v11783_v32 = vld [vmem:[#allocation16 + $0x5f0] sm:$0xf0]  ;;  %v11278_v9 = vor.u32 %v14106_v51, %v11277_v5  ;;  %v14545_v12 = vld [vmem:[#allocation16 + $0xfac] sm:$0xf0]  ;;  %v11245_v24 = vld [vmem:[#allocation16 + $0x198] sm:$0xf] }
 0x4a4   :  { %7547 = vmatpush.bf16.msrb.mxu0 %v12742_v13  ;;  %7587 = vmatpush.bf16.msrb.mxu3 %v11434_v10  ;;  %v14249_v13 = vld [vmem:[#allocation16 + $0x66c] sm:$0xf0]  ;;  %v12103_v10 = vld [vmem:[#allocation16 + $0x870] sm:$0xf0] }
 0x4a5   :  { %v11846_v22 = vor.u32 %v14249_v13, %v11845_v35  ;;  %v12106_v17 = vor.u32 %v14309_v2, %v12103_v10  ;;  %v14301_v31 = vld [vmem:[#allocation16 + $0x814] sm:$0xf]  ;;  %v12997_v35 = vld [vmem:[#allocation16 + $0xf50] sm:$0xf]  ;;  %v14090_v10 = vld [vmem:[#allocation16 + $0x174] sm:$0xf0] }
 0x4a6   :  { %7578 = vmatpush.bf16.msrb.mxu2 %v11050_v47  ;;  %7508 = vmatpush.bf16.msra.mxu1 %v11974_v16  ;;  %v11367_v47 = vld [vmem:[#allocation16 + $0x2b0] sm:$0xf0]  ;;  %v12614_v16 = vor.u32 %v14441_v58, %v12613_v18  ;;  %v14098_v18 = vld [vmem:[#allocation16 + $0x1b4] sm:$0xf0] }
 0x4a7   :  { %v12519_v19 = vld [vmem:[#allocation16 + $0xbb0] sm:$0xf0]  ;;  %v11246_v13 = vor.u32 %v14098_v18, %v11245_v24 }
 0x4a8   :  { %7548 = vmatpush.bf16.msrb.mxu0 %v12710_v30  ;;  %7588 = vmatpush.bf16.msrb.mxu3 %v11402_v57  ;;  %v14229_v30 = vld [vmem:[#allocation16 + $0x5d4] sm:$0xf] }
 0x4a9   :  { %7579 = vmatmul.bf16.vlgmr.msrb.gmra.mxu2 %v16182_v45  ;;  %v11751_v60 = vld [vmem:[#allocation16 + $0x5b0] sm:$0xf0] }
 0x4aa   :  { %7623 = vmatpush.bf16.msra.mxu2 %v12298_v55  ;;  %7509 = vmatpush.bf16.msra.mxu1 %v11942_v37  ;;  %v11370_v55 = vor.u32 %v14125_v52, %v11367_v47  ;;  %v14241_v37 = vld [vmem:[#allocation16 + $0x62c] sm:$0xf0]  ;;  %v11786_v52 = vor.u32 %v14229_v30, %v11783_v32  ;;  %v12487_v48 = vld [vmem:[#allocation16 + $0xb70] sm:$0xf0] }
 0x4ab   :  { %v14553_v47 = vld [vmem:[#allocation16 + $0xfec] sm:$0xf0]  ;;  %v11814_v42 = vor.u32 %v14241_v37, %v11813_v41  ;;  %v14213_v58 = vld [vmem:[#allocation16 + $0x554] sm:$0xf] }
 0x4ac   :  { %v16348_v61 = vpop.f32.mrf.mxu2  ;;  %7549 = vmatpush.bf16.msrb.mxu0 %v12678_v43  ;;  %7589 = vmatpush.bf16.msrb.mxu3 %v11370_v55  ;;  %v14413_v43 = vld [vmem:[#allocation16 + $0xb94] sm:$0xf]  ;;  %v12965_v30 = vld [vmem:[#allocation16 + $0xf10] sm:$0xf] }
 0x4ad   :  { %v14221_v55 = vld [vmem:[#allocation16 + $0x594] sm:$0xf]  ;;  %v7373_v39 = vadd.f32 %v16348_v61, %v4478_v62  ;;  %v12869_v62 = vld [vmem:[#allocation16 + $0xe50] sm:$0xf] }
 0x4ae   :  { %7624 = vmatpush.bf16.msra.mxu2 %v12266_v34  ;;  %7510 = vmatpush.bf16.msra.mxu1 %v11910_v54  ;;  %v11878_v34 = vor.u32 %v14257_v3, %v11877_v56  ;;  %v13062_v56 = vor.u32 %v14553_v47, %v13061_v7  ;;  %v13029_v3 = vld [vmem:[#allocation16 + $0xf90] sm:$0xf]  ;;  %v11754_v4 = vor.u32 %v14221_v55, %v11751_v60  ;;  %v14397_v25 = vld [vmem:[#allocation16 + $0xb14] sm:$0xf] }
 0x4af   :  { %v12455_v6 = vld [vmem:[#allocation16 + $0xb30] sm:$0xf0]  ;;  %v14521_v55 = vld [vmem:[#allocation16 + $0xeec] sm:$0xf0] }
 0x4b0   :  { %7550 = vmatpush.bf16.msrb.mxu0 %v12646_v53  ;;  %7590 = vmatpush.bf16.msrb.mxu3 %v11338_v1  ;;  %v14405_v53 = vld [vmem:[#allocation16 + $0xb54] sm:$0xf]  ;;  %v13030_v1 = vor.u32 %v14545_v12, %v13029_v3 }
 0x4b1   :  { %v12490_v59 = vor.u32 %v14405_v53, %v12487_v48  ;;  %v14205_v26 = vld [vmem:[#allocation16 + $0x514] sm:$0xf] }
 0x4b2   :  { %7625 = vmatpush.bf16.msra.mxu2 %v12234_v38  ;;  %v12581_v38 = vld [vmem:[#allocation16 + $0xc10] sm:$0xf]  ;;  %7511 = vmatpush.bf16.msra.mxu1 %v11878_v34  ;;  %v11719_v34 = vld [vmem:[#allocation16 + $0x570] sm:$0xf0] }
 0x4b3   :  { %v12582_v57 = vor.u32 %v14433_v63, %v12581_v38  ;;  %v11722_v2 = vor.u32 %v14213_v58, %v11719_v34  ;;  %v11687_v38 = vld [vmem:[#allocation16 + $0x530] sm:$0xf0]  ;;  %v14513_v58 = vld [vmem:[#allocation16 + $0xeac] sm:$0xf0] }
 0x4b4   :  { %v7374_v36 = vpop.f32.mrf.mxu2  ;;  %7551 = vmatpush.bf16.msrb.mxu0 %v12614_v16  ;;  %7591 = vmatpush.bf16.msrb.mxu3 %v11306_v29  ;;  %v11213_v16 = vld [vmem:[#allocation16 + $0x158] sm:$0xf]  ;;  %v11690_v41 = vor.u32 %v14205_v26, %v11687_v38  ;;  %v14197_v7 = vld [vmem:[#allocation16 + $0x4d4] sm:$0xf]  ;;  %v14505_v26 = vld [vmem:[#allocation16 + $0xe6c] sm:$0xf0] }
 0x4b5   :  { %v11214_v32 = vor.u32 %v14090_v10, %v11213_v16  ;;  %v14389_v36 = vld [vmem:[#allocation16 + $0xad4] sm:$0xf] }
 0x4b6   :  { %7626 = vmatpush.bf16.msra.mxu2 %v12202_v28  ;;  %v12071_v28 = vld [vmem:[#allocation16 + $0x830] sm:$0xf0]  ;;  %7512 = vmatpush.bf16.msra.mxu1 %v11846_v22  ;;  %v12458_v22 = vor.u32 %v14397_v25, %v12455_v6 }
 0x4b7   :  { %v12074_v54 = vor.u32 %v14301_v31, %v12071_v28  ;;  %7592 = vmatmul.bf16.vlgmr.msrb.gmra.mxu3 %v16186_v49  ;;  %v14082_v31 = vld [vmem:[#allocation16 + $0x134] sm:$0xf0]  ;;  %v14381_v60 = vld [vmem:[#allocation16 + $0xa94] sm:$0xf] }
 0x4b8   :  { %7636 = vmatpush.bf16.msra.mxu3 %v12554_v21  ;;  %7552 = vmatpush.bf16.msrb.mxu0 %v12582_v57  ;;  %v7346_v29 = vpop.f32.mrf.mxu0  ;;  %v12423_v21 = vld [vmem:[#allocation16 + $0xaf0] sm:$0xf0]  ;;  %v11181_v57 = vld [vmem:[#allocation16 + $0x118] sm:$0xf] }
 0x4b9   :  { %v11182_v51 = vor.u32 %v14082_v31, %v11181_v57  ;;  %v14189_v3 = vld [vmem:[#allocation16 + $0x494] sm:$0xf] }
 0x4ba   :  { %7627 = vmatpush.bf16.msra.mxu2 %v12170_v0  ;;  %v12522_v0 = vor.u32 %v14413_v43, %v12519_v19  ;;  %7513 = vmatpush.bf16.msra.mxu1 %v11814_v42  ;;  %v7307_v37 = vpop.f32.mrf.mxu1  ;;  %v12426_v43 = vor.u32 %v14389_v36, %v12423_v21  ;;  %v7385_v19 = vpop.f32.mrf.mxu3  ;;  %v12933_v42 = vld [vmem:[#allocation16 + $0xed0] sm:$0xf]  ;;  %v14373_v34 = vld [vmem:[#allocation16 + $0xa54] sm:$0xf]  ;;  %v14170_v36 = vld [vmem:[#allocation16 + $0x3f4] sm:$0xf0] }
 0x4bb   :  { %7553 = vmatmul.bf16.vlgmr.msrb.gmra.mxu0 %v16250_v8  ;;  %v7308_v28 = vadd.f32 %v7307_v37, %v16342_v50  ;;  %v11149_v50 = vld [vmem:[#allocation16 + $0xd8] sm:$0xf]  ;;  %v12934_v53 = vor.u32 %v14521_v55, %v12933_v42  ;;  %v14181_v25 = vld [vmem:[#allocation16 + $0x454] sm:$0xf]  ;;  %v12870_v37 = vor.u32 %v14505_v26, %v12869_v62 }
 0x4bc   :  { %7597 = vmatpush.bf16.msra.mxu0 %v11786_v52  ;;  %7637 = vmatpush.bf16.msra.mxu3 %v12522_v0  ;;  %v11655_v52 = vld [vmem:[#allocation16 + $0x4f0] sm:$0xf0]  ;;  %v14074_v0 = vld [vmem:[#allocation16 + $0xf4] sm:$0xf0] }
 0x4bd   :  { %7514 = vmatmul.bf16.vlgmr.msra.gmra.mxu1 %v16180_v44  ;;  %v7321_v5 = vadd.f32 %v16331_v46, %v7308_v28  ;;  %v11658_v61 = vor.u32 %v14197_v7, %v11655_v52  ;;  %v12901_v46 = vld [vmem:[#allocation16 + $0xe90] sm:$0xf]  ;;  %v11150_v24 = vor.u32 %v14074_v0, %v11149_v50  ;;  %v11591_v6 = vld [vmem:[#allocation16 + $0x470] sm:$0xf0]  ;;  %v11053_v42 = vld [vmem:[#allocation16 + $0x18] sm:$0xf] }
 0x4be   :  { %7628 = vmatpush.bf16.msra.mxu2 %v12138_v11  ;;  %7558 = vmatpush.bf16.msrb.mxu1 %v13062_v56  ;;  %v14537_v11 = vld [vmem:[#allocation16 + $0xf6c] sm:$0xf0]  ;;  %v12391_v56 = vld [vmem:[#allocation16 + $0xab0] sm:$0xf0]  ;;  %v12301_v0 = vld [vmem:[#allocation16 + $0x9d8] sm:$0xf] }
 0x4bf   :  { %v12998_v63 = vor.u32 %v14537_v11, %v12997_v35  ;;  %v7334_v12 = vadd.f32 %v16346_v27, %v7321_v5  ;;  %v12394_v48 = vor.u32 %v14381_v60, %v12391_v56  ;;  %v11117_v11 = vld [vmem:[#allocation16 + $0x98] sm:$0xf]  ;;  %v14173_v21 = vld [vmem:[#allocation16 + $0x414] sm:$0xf] }
 0x4c0   :  { %7598 = vmatpush.bf16.msra.mxu0 %v11754_v4  ;;  %7638 = vmatpush.bf16.msra.mxu3 %v12490_v59  ;;  %v7348_v4 = vpop.f32.mrf.mxu0  ;;  %v14066_v27 = vld [vmem:[#allocation16 + $0xb4] sm:$0xf0]  ;;  %v14485_v31 = vld [vmem:[#allocation16 + $0xdd4] sm:$0xf] }
 0x4c1   :  { %v16363_v59 = vadd.f32 %v7346_v29, %v7334_v12  ;;  %v11118_v38 = vor.u32 %v14066_v27, %v11117_v11  ;;  %v11085_v29 = vld [vmem:[#allocation16 + $0x58] sm:$0xf]  ;;  %v12039_v60 = vld [vmem:[#allocation16 + $0x7f0] sm:$0xf0] }
 0x4c2   :  { %7629 = vmatpush.bf16.msra.mxu2 %v12106_v17  ;;  %7559 = vmatpush.bf16.msrb.mxu1 %v13030_v1  ;;  %v14529_v17 = vld [vmem:[#allocation16 + $0xf2c] sm:$0xf0]  ;;  %v12359_v1 = vld [vmem:[#allocation16 + $0xa70] sm:$0xf0]  ;;  %v7387_v10 = vpop.f32.mrf.mxu3  ;;  %v14050_v5 = vld [vmem:[#allocation16 + $0x34] sm:$0xf0] }
 0x4c3   :  { %v12966_v47 = vor.u32 %v14529_v17, %v12965_v30  ;;  %v12362_v16 = vor.u32 %v14373_v34, %v12359_v1  ;;  %v11594_v30 = vor.u32 %v14181_v25, %v11591_v6  ;;  %v11533_v17 = vld [vmem:[#allocation16 + $0x3d8] sm:$0xf]  ;;  %v14477_v12 = vld [vmem:[#allocation16 + $0xd94] sm:$0xf] }
 0x4c4   :  { %7599 = vmatpush.bf16.msra.mxu0 %v11722_v2  ;;  %7639 = vmatpush.bf16.msra.mxu3 %v12458_v22  ;;  %v12902_v2 = vor.u32 %v14513_v58, %v12901_v46  ;;  %v12327_v22 = vld [vmem:[#allocation16 + $0xa30] sm:$0xf0]  ;;  %v11534_v52 = vor.u32 %v14170_v36, %v11533_v17  ;;  %v11501_v56 = vld [vmem:[#allocation16 + $0x398] sm:$0xf] }
 0x4c5   :  { %v14285_v46 = vld [vmem:[#allocation16 + $0x794] sm:$0xf]  ;;  %v11469_v34 = vld [vmem:[#allocation16 + $0x358] sm:$0xf] }
 0x4c6   :  { %7630 = vmatpush.bf16.msra.mxu2 %v12074_v54  ;;  %7560 = vmatpush.bf16.msrb.mxu1 %v12998_v63  ;;  %v16358_v54 = vadd.f32 %v7385_v19, %v7373_v39  ;;  %v14365_v63 = vld [vmem:[#allocation16 + $0xa14] sm:$0xf]  ;;  %v14154_v1 = vld [vmem:[#allocation16 + $0x374] sm:$0xf0] }
 0x4c7   :  { %v12330_v57 = vor.u32 %v14365_v63, %v12327_v22  ;;  %v12807_v39 = vld [vmem:[#allocation16 + $0xdf0] sm:$0xf0]  ;;  %v14354_v11 = vld [vmem:[#allocation16 + $0x9b4] sm:$0xf0] }
 0x4c8   :  { %7600 = vmatpush.bf16.msra.mxu0 %v11690_v41  ;;  %7640 = vmatpush.bf16.msra.mxu3 %v12426_v43  ;;  %v11559_v41 = vld [vmem:[#allocation16 + $0x430] sm:$0xf0]  ;;  %v14497_v43 = vld [vmem:[#allocation16 + $0xe2c] sm:$0xf0]  ;;  %v12810_v55 = vor.u32 %v14485_v31, %v12807_v39  ;;  %v11437_v26 = vld [vmem:[#allocation16 + $0x318] sm:$0xf] }
 0x4c9   :  { %7631 = vmatmul.bf16.vlgmr.msra.gmra.mxu2 %v16211_v20  ;;  %v11562_v19 = vor.u32 %v14173_v21, %v11559_v41  ;;  %v12007_v58 = vld [vmem:[#allocation16 + $0x7b0] sm:$0xf0]  ;;  %v12237_v22 = vld [vmem:[#allocation16 + $0x958] sm:$0xf] }
 0x4ca   :  { %7675 = vmatpush.bf16.msrb.mxu2 %v11278_v9  ;;  %v11623_v9 = vld [vmem:[#allocation16 + $0x4b0] sm:$0xf0]  ;;  %7561 = vmatpush.bf16.msrb.mxu1 %v12966_v47  ;;  %v12837_v47 = vld [vmem:[#allocation16 + $0xe10] sm:$0xf]  ;;  %v12010_v6 = vor.u32 %v14285_v46, %v12007_v58  ;;  %v11405_v39 = vld [vmem:[#allocation16 + $0x2d8] sm:$0xf] }
 0x4cb   :  { %v11626_v35 = vor.u32 %v14189_v3, %v11623_v9  ;;  %v12838_v50 = vor.u32 %v14497_v43, %v12837_v47  ;;  %v14362_v3 = vld [vmem:[#allocation16 + $0x9f4] sm:$0xf0]  ;;  %v11054_v9 = vor.u32 %v14050_v5, %v11053_v42  ;;  %v14469_v27 = vld [vmem:[#allocation16 + $0xd54] sm:$0xf] }
 0x4cc   :  { %v16361_v18 = vpop.f32.mrf.mxu2  ;;  %7601 = vmatpush.bf16.msra.mxu0 %v11658_v61  ;;  %7641 = vmatpush.bf16.msra.mxu3 %v12394_v48  ;;  %v14162_v61 = vld [vmem:[#allocation16 + $0x3b4] sm:$0xf0]  ;;  %v12743_v25 = vld [vmem:[#allocation16 + $0xd70] sm:$0xf0] }
 0x4cd   :  { %v11502_v4 = vor.u32 %v14162_v61, %v11501_v56  ;;  %v11975_v62 = vld [vmem:[#allocation16 + $0x770] sm:$0xf0]  ;;  %v12746_v63 = vor.u32 %v14469_v27, %v12743_v25  ;;  %v12205_v47 = vld [vmem:[#allocation16 + $0x918] sm:$0xf] }
 0x4ce   :  { %7676 = vmatpush.bf16.msrb.mxu2 %v11246_v13  ;;  %v7309_v13 = vpop.f32.mrf.mxu1  ;;  %7562 = vmatpush.bf16.msrb.mxu1 %v12934_v53  ;;  %v12775_v53 = vld [vmem:[#allocation16 + $0xdb0] sm:$0xf0]  ;;  %v14338_v43 = vld [vmem:[#allocation16 + $0x934] sm:$0xf0] }
 0x4cf   :  { %v12269_v13 = vld [vmem:[#allocation16 + $0x998] sm:$0xf]  ;;  %v14269_v41 = vld [vmem:[#allocation16 + $0x714] sm:$0xf]  ;;  %v12206_v56 = vor.u32 %v14338_v43, %v12205_v47 }
 0x4d0   :  { %7602 = vmatpush.bf16.msra.mxu0 %v11626_v35  ;;  %7642 = vmatpush.bf16.msra.mxu3 %v12362_v16  ;;  %v12778_v35 = vor.u32 %v14477_v12, %v12775_v53  ;;  %v14277_v16 = vld [vmem:[#allocation16 + $0x754] sm:$0xf]  ;;  %v12270_v10 = vor.u32 %v14354_v11, %v12269_v13  ;;  %v14330_v12 = vld [vmem:[#allocation16 + $0x8f4] sm:$0xf0] }
 0x4d1   :  { %v11978_v17 = vor.u32 %v14277_v16, %v11975_v62  ;;  %v11943_v31 = vld [vmem:[#allocation16 + $0x730] sm:$0xf0]  ;;  %v14122_v13 = vld [vmem:[#allocation16 + $0x274] sm:$0xf0] }
 0x4d2   :  { %7677 = vmatpush.bf16.msrb.mxu2 %v11214_v32  ;;  %v14058_v32 = vld [vmem:[#allocation16 + $0x74] sm:$0xf0]  ;;  %7563 = vmatpush.bf16.msrb.mxu1 %v12902_v2  ;;  %v11470_v2 = vor.u32 %v14154_v1, %v11469_v34  ;;  %v14453_v42 = vld [vmem:[#allocation16 + $0xcd4] sm:$0xf] }
 0x4d3   :  { %v11086_v28 = vor.u32 %v14058_v32, %v11085_v29  ;;  %v14346_v29 = vld [vmem:[#allocation16 + $0x974] sm:$0xf0]  ;;  %v12711_v32 = vld [vmem:[#allocation16 + $0xd30] sm:$0xf0] }
 0x4d4   :  { %v7426_v7 = vpop.f32.mrf.mxu2  ;;  %7603 = vmatpush.bf16.msra.mxu0 %v11594_v30  ;;  %7643 = vmatpush.bf16.msra.mxu3 %v12330_v57  ;;  %v14461_v30 = vld [vmem:[#allocation16 + $0xd14] sm:$0xf]  ;;  %v12141_v25 = vld [vmem:[#allocation16 + $0x898] sm:$0xf] }
 0x4d5   :  { %v12714_v7 = vor.u32 %v14461_v30, %v12711_v32  ;;  %v12679_v5 = vld [vmem:[#allocation16 + $0xcf0] sm:$0xf0]  ;;  %v14114_v30 = vld [vmem:[#allocation16 + $0x234] sm:$0xf0] }
 0x4d6   :  { %7678 = vmatpush.bf16.msrb.mxu2 %v11182_v51  ;;  %v14293_v51 = vld [vmem:[#allocation16 + $0x7d4] sm:$0xf]  ;;  %7564 = vmatpush.bf16.msrb.mxu1 %v12870_v37  ;;  %v12238_v37 = vor.u32 %v14346_v29, %v12237_v22  ;;  %v11309_v29 = vld [vmem:[#allocation16 + $0x218] sm:$0xf] }
 0x4d7   :  { %v12042_v48 = vor.u32 %v14293_v51, %v12039_v60  ;;  %7644 = vmatmul.bf16.vlgmr.msra.gmra.mxu3 %v16230_v23  ;;  %v11946_v51 = vor.u32 %v14269_v41, %v11943_v31  ;;  %v11911_v61 = vld [vmem:[#allocation16 + $0x6f0] sm:$0xf0]  ;;  %v12109_v32 = vld [vmem:[#allocation16 + $0x858] sm:$0xf] }
 0x4d8   :  { %7688 = vmatpush.bf16.msrb.mxu3 %v11534_v52  ;;  %7604 = vmatpush.bf16.msra.mxu0 %v11562_v19  ;;  %v7398_v21 = vpop.f32.mrf.mxu0  ;;  %v12647_v53 = vld [vmem:[#allocation16 + $0xcb0] sm:$0xf0]  ;;  %v14426_v41 = vld [vmem:[#allocation16 + $0xbf4] sm:$0xf0] }
 0x4d9   :  { %v16370_v57 = vadd.f32 %v7398_v21, %v16358_v54  ;;  %v14261_v54 = vld [vmem:[#allocation16 + $0x6d4] sm:$0xf]  ;;  %v12557_v21 = vld [vmem:[#allocation16 + $0xbd8] sm:$0xf] }
 0x4da   :  { %7679 = vmatpush.bf16.msrb.mxu2 %v11150_v24  ;;  %v12302_v24 = vor.u32 %v14362_v3, %v12301_v0  ;;  %7565 = vmatpush.bf16.msrb.mxu1 %v12838_v50  ;;  %v7359_v52 = vpop.f32.mrf.mxu1  ;;  %v16375_v60 = vpop.f32.mrf.mxu3  ;;  %v11373_v50 = vld [vmem:[#allocation16 + $0x298] sm:$0xf]  ;;  %v12682_v3 = vor.u32 %v14453_v42, %v12679_v5  ;;  %v11879_v1 = vld [vmem:[#allocation16 + $0x6b0] sm:$0xf0]  ;;  %v12558_v42 = vor.u32 %v14426_v41, %v12557_v21  ;;  %v16383_v21 = vld [vmem:[#allocation17] sm:$0xff] }
 0x4db   :  { %7605 = vmatmul.bf16.vlgmr.msra.gmra.mxu0 %v16102_v40  ;;  %v16373_v19 = vadd.f32 %v7359_v52, %v16363_v59  ;;  %v14130_v0 = vld [vmem:[#allocation16 + $0x2b4] sm:$0xf0]  ;;  %v14445_v59 = vld [vmem:[#allocation16 + $0xc94] sm:$0xf]  ;;  %v4479_v41 = vperm.slane %v16383_v21, 4 }
 0x4dc   :  { %7649 = vmatpush.bf16.msrb.mxu0 %v12810_v55  ;;  %7689 = vmatpush.bf16.msrb.mxu3 %v11502_v4  ;;  %v11374_v4 = vor.u32 %v14130_v0, %v11373_v50  ;;  %v12650_v11 = vor.u32 %v14445_v59, %v12647_v53  ;;  %v12615_v16 = vld [vmem:[#allocation16 + $0xc70] sm:$0xf0]  ;;  %v14234_v52 = vld [vmem:[#allocation16 + $0x5f4] sm:$0xf0]  ;;  %v14102_v59 = vld [vmem:[#allocation16 + $0x1dc] sm:$0xf] }
 0x4dd   :  { %7566 = vmatmul.bf16.vlgmr.msrb.gmra.mxu1 %v16273_v33  ;;  %v12583_v31 = vld [vmem:[#allocation16 + $0xc30] sm:$0xf0]  ;;  %v11279_v53 = vld [vmem:[#allocation16 + $0x1f8] sm:$0xf0] }
 0x4de   :  { %7680 = vmatpush.bf16.msrb.mxu2 %v11118_v38  ;;  %7610 = vmatpush.bf16.msra.mxu1 %v12042_v48  ;;  %v14146_v38 = vld [vmem:[#allocation16 + $0x334] sm:$0xf0]  ;;  %v11914_v48 = vor.u32 %v14261_v54, %v11911_v61  ;;  %v14237_v5 = vld [vmem:[#allocation16 + $0x614] sm:$0xf] }
 0x4df   :  { %v11438_v36 = vor.u32 %v14146_v38, %v11437_v26  ;;  %v14245_v38 = vld [vmem:[#allocation16 + $0x654] sm:$0xf]  ;;  %v12077_v54 = vld [vmem:[#allocation16 + $0x818] sm:$0xf] }
 0x4e0   :  { %7650 = vmatpush.bf16.msrb.mxu0 %v12778_v35  ;;  %7690 = vmatpush.bf16.msrb.mxu3 %v11470_v2  ;;  %v7400_v46 = vpop.f32.mrf.mxu0  ;;  %v11341_v35 = vld [vmem:[#allocation16 + $0x258] sm:$0xf]  ;;  %v14437_v2 = vld [vmem:[#allocation16 + $0xc54] sm:$0xf] }
 0x4e1   :  { %v11342_v62 = vor.u32 %v14122_v13, %v11341_v35  ;;  %v14549_v61 = vld [vmem:[#allocation16 + $0xfd4] sm:$0xf]  ;;  %v14226_v46 = vld [vmem:[#allocation16 + $0x5b4] sm:$0xf0]  ;;  %v11282_v35 = vor.u32 %v14102_v59, %v11279_v53 }
 0x4e2   :  { %7681 = vmatpush.bf16.msrb.mxu2 %v11086_v28  ;;  %7611 = vmatpush.bf16.msra.mxu1 %v12010_v6  ;;  %v14138_v28 = vld [vmem:[#allocation16 + $0x2f4] sm:$0xf0]  ;;  %v7361_v27 = vpop.f32.mrf.mxu1  ;;  %v7439_v26 = vpop.f32.mrf.mxu3  ;;  %v13063_v0 = vld [vmem:[#allocation16 + $0xff0] sm:$0xf0] }
 0x4e3   :  { %v11406_v55 = vor.u32 %v14138_v28, %v11405_v39  ;;  %v14322_v6 = vld [vmem:[#allocation16 + $0x8b4] sm:$0xf0]  ;;  %v11310_v28 = vor.u32 %v14114_v30, %v11309_v29  ;;  %v13031_v13 = vld [vmem:[#allocation16 + $0xfb0] sm:$0xf0] }
 0x4e4   :  { %7651 = vmatpush.bf16.msrb.mxu0 %v12746_v63  ;;  %7691 = vmatpush.bf16.msrb.mxu3 %v11438_v36  ;;  %v11847_v63 = vld [vmem:[#allocation16 + $0x670] sm:$0xf0]  ;;  %v12142_v22 = vor.u32 %v14322_v6, %v12141_v25  ;;  %v14314_v36 = vld [vmem:[#allocation16 + $0x874] sm:$0xf0]  ;;  %v14094_v6 = vld [vmem:[#allocation16 + $0x19c] sm:$0xf] }
 0x4e5   :  { %v11850_v39 = vor.u32 %v14245_v38, %v11847_v63  ;;  %v12110_v47 = vor.u32 %v14314_v36, %v12109_v32  ;;  %v14410_v27 = vld [vmem:[#allocation16 + $0xb74] sm:$0xf0]  ;;  %v14533_v38 = vld [vmem:[#allocation16 + $0xf54] sm:$0xf]  ;;  %v11215_v36 = vld [vmem:[#allocation16 + $0x178] sm:$0xf0] }
 0x4e6   :  { %7682 = vmatpush.bf16.msrb.mxu2 %v11054_v9  ;;  %7612 = vmatpush.bf16.msra.mxu1 %v11978_v17  ;;  %v12173_v9 = vld [vmem:[#allocation16 + $0x8d8] sm:$0xf]  ;;  %v12618_v17 = vor.u32 %v14437_v2, %v12615_v16  ;;  %v11247_v2 = vld [vmem:[#allocation16 + $0x1b8] sm:$0xf0]  ;;  %v14517_v53 = vld [vmem:[#allocation16 + $0xed4] sm:$0xf] }
 0x4e7   :  { %v12174_v58 = vor.u32 %v14330_v12, %v12173_v9  ;;  %v14418_v9 = vld [vmem:[#allocation16 + $0xbb4] sm:$0xf0]  ;;  %v11250_v63 = vor.u32 %v14094_v6, %v11247_v2 }
 0x4e8   :  { %7652 = vmatpush.bf16.msrb.mxu0 %v12714_v7  ;;  %7692 = vmatpush.bf16.msrb.mxu3 %v11406_v55  ;;  %v11789_v7 = vld [vmem:[#allocation16 + $0x5d8] sm:$0xf] }
 0x4e9   :  { %7683 = vmatmul.bf16.vlgmr.msrb.gmra.mxu2 %v16182_v45  ;;  %v11790_v50 = vor.u32 %v14234_v52, %v11789_v7  ;;  %v11725_v16 = vld [vmem:[#allocation16 + $0x558] sm:$0xf]  ;;  %v14525_v52 = vld [vmem:[#allocation16 + $0xf14] sm:$0xf] }
 0x4ea   :  { %7727 = vmatpush.bf16.msra.mxu2 %v12302_v24  ;;  %7613 = vmatpush.bf16.msra.mxu1 %v11946_v51  ;;  %v14253_v24 = vld [vmem:[#allocation16 + $0x694] sm:$0xf]  ;;  %v12461_v29 = vld [vmem:[#allocation16 + $0xb18] sm:$0xf] }
 0x4eb   :  { %v11815_v51 = vld [vmem:[#allocation16 + $0x630] sm:$0xf0]  ;;  %v14402_v30 = vld [vmem:[#allocation16 + $0xb34] sm:$0xf0] }
 0x4ec   :  { %v16377_v34 = vpop.f32.mrf.mxu2  ;;  %7653 = vmatpush.bf16.msrb.mxu0 %v12682_v3  ;;  %7693 = vmatpush.bf16.msrb.mxu3 %v11374_v4  ;;  %v12525_v3 = vld [vmem:[#allocation16 + $0xb98] sm:$0xf]  ;;  %v11818_v12 = vor.u32 %v14237_v5, %v11815_v51 }
 0x4ed   :  { %v11757_v4 = vld [vmem:[#allocation16 + $0x598] sm:$0xf] }
 0x4ee   :  { %7728 = vmatpush.bf16.msra.mxu2 %v12270_v10  ;;  %7614 = vmatpush.bf16.msra.mxu1 %v11914_v48  ;;  %v11882_v10 = vor.u32 %v14253_v24, %v11879_v1  ;;  %v13066_v24 = vor.u32 %v14549_v61, %v13063_v0  ;;  %v14541_v1 = vld [vmem:[#allocation16 + $0xf94] sm:$0xf]  ;;  %v11758_v25 = vor.u32 %v14226_v46, %v11757_v4  ;;  %v14394_v5 = vld [vmem:[#allocation16 + $0xaf4] sm:$0xf0] }
 0x4ef   :  { %v7477_v61 = vadd.f32 %v16377_v34, %v4479_v41  ;;  %v11661_v0 = vld [vmem:[#allocation16 + $0x4d8] sm:$0xf] }
 0x4f0   :  { %7654 = vmatpush.bf16.msrb.mxu0 %v12650_v11  ;;  %7694 = vmatpush.bf16.msrb.mxu3 %v11342_v62  ;;  %v12493_v11 = vld [vmem:[#allocation16 + $0xb58] sm:$0xf]  ;;  %v13034_v62 = vor.u32 %v14541_v1, %v13031_v13 }
 0x4f1   :  { %v12494_v26 = vor.u32 %v14410_v27, %v12493_v11  ;;  %v14386_v1 = vld [vmem:[#allocation16 + $0xab4] sm:$0xf0] }
 0x4f2   :  { %7729 = vmatpush.bf16.msra.mxu2 %v12238_v37  ;;  %v14429_v37 = vld [vmem:[#allocation16 + $0xc14] sm:$0xf]  ;;  %7615 = vmatpush.bf16.msra.mxu1 %v11882_v10  ;;  %v14218_v10 = vld [vmem:[#allocation16 + $0x574] sm:$0xf0] }
 0x4f3   :  { %v12586_v55 = vor.u32 %v14429_v37, %v12583_v31  ;;  %v11726_v32 = vor.u32 %v14218_v10, %v11725_v16  ;;  %v11693_v37 = vld [vmem:[#allocation16 + $0x518] sm:$0xf] }
 0x4f4   :  { %v7478_v43 = vpop.f32.mrf.mxu2  ;;  %7655 = vmatpush.bf16.msrb.mxu0 %v12618_v17  ;;  %7695 = vmatpush.bf16.msrb.mxu3 %v11310_v28  ;;  %v14086_v17 = vld [vmem:[#allocation16 + $0x15c] sm:$0xf]  ;;  %v14210_v31 = vld [vmem:[#allocation16 + $0x534] sm:$0xf0]  ;;  %v12462_v28 = vor.u32 %v14402_v30, %v12461_v29 }
 0x4f5   :  { %v12967_v43 = vld [vmem:[#allocation16 + $0xf30] sm:$0xf0]  ;;  %v11694_v51 = vor.u32 %v14210_v31, %v11693_v37  ;;  %v11629_v13 = vld [vmem:[#allocation16 + $0x498] sm:$0xf]  ;;  %v14062_v30 = vld [vmem:[#allocation16 + $0x9c] sm:$0xf] }
 0x4f6   :  { %7730 = vmatpush.bf16.msra.mxu2 %v12206_v56  ;;  %v14306_v56 = vld [vmem:[#allocation16 + $0x834] sm:$0xf0]  ;;  %7616 = vmatpush.bf16.msra.mxu1 %v11850_v39  ;;  %v14501_v31 = vld [vmem:[#allocation16 + $0xe54] sm:$0xf] }
 0x4f7   :  { %v12078_v48 = vor.u32 %v14306_v56, %v12077_v54  ;;  %7696 = vmatmul.bf16.vlgmr.msrb.gmra.mxu3 %v16186_v49  ;;  %v14078_v54 = vld [vmem:[#allocation16 + $0x11c] sm:$0xf]  ;;  %v14194_v11 = vld [vmem:[#allocation16 + $0x4b4] sm:$0xf0] }
 0x4f8   :  { %7740 = vmatpush.bf16.msra.mxu3 %v12558_v42  ;;  %7656 = vmatpush.bf16.msrb.mxu0 %v12586_v55  ;;  %v7450_v7 = vpop.f32.mrf.mxu0  ;;  %v12429_v42 = vld [vmem:[#allocation16 + $0xad8] sm:$0xf]  ;;  %v11183_v56 = vld [vmem:[#allocation16 + $0x138] sm:$0xf0] }
 0x4f9   :  { %v11186_v4 = vor.u32 %v14078_v54, %v11183_v56  ;;  %v14178_v54 = vld [vmem:[#allocation16 + $0x434] sm:$0xf0] }
 0x4fa   :  { %7731 = vmatpush.bf16.msra.mxu2 %v12174_v58  ;;  %v12526_v58 = vor.u32 %v14418_v9, %v12525_v3  ;;  %7617 = vmatpush.bf16.msra.mxu1 %v11818_v12  ;;  %v7411_v55 = vpop.f32.mrf.mxu1  ;;  %v14202_v3 = vld [vmem:[#allocation16 + $0x4f4] sm:$0xf0]  ;;  %v12970_v9 = vor.u32 %v14525_v52, %v12967_v43  ;;  %v12430_v12 = vor.u32 %v14394_v5, %v12429_v42  ;;  %v7489_v59 = vpop.f32.mrf.mxu3  ;;  %v11087_v42 = vld [vmem:[#allocation16 + $0x78] sm:$0xf0] }
 0x4fb   :  { %7657 = vmatmul.bf16.vlgmr.msrb.gmra.mxu0 %v16250_v8  ;;  %v16389_v46 = vadd.f32 %v7489_v59, %v7477_v61  ;;  %v11662_v34 = vor.u32 %v14202_v3, %v11661_v0  ;;  %v12333_v52 = vld [vmem:[#allocation16 + $0xa18] sm:$0xf]  ;;  %v14166_v5 = vld [vmem:[#allocation16 + $0x3dc] sm:$0xf]  ;;  %v14493_v59 = vld [vmem:[#allocation16 + $0xe14] sm:$0xf] }
 0x4fc   :  { %7701 = vmatpush.bf16.msra.mxu0 %v11790_v50  ;;  %7741 = vmatpush.bf16.msra.mxu3 %v12526_v58  ;;  %v7412_v50 = vadd.f32 %v7411_v55, %v16370_v57  ;;  %v12397_v58 = vld [vmem:[#allocation16 + $0xa98] sm:$0xf]  ;;  %v14070_v57 = vld [vmem:[#allocation16 + $0xdc] sm:$0xf] }
 0x4fd   :  { %7618 = vmatmul.bf16.vlgmr.msra.gmra.mxu1 %v16180_v44  ;;  %v12398_v6 = vor.u32 %v14386_v1, %v12397_v58  ;;  %v11565_v55 = vld [vmem:[#allocation16 + $0x418] sm:$0xf] }
 0x4fe   :  { %7732 = vmatpush.bf16.msra.mxu2 %v12142_v22  ;;  %7662 = vmatpush.bf16.msrb.mxu1 %v13066_v24  ;;  %v12999_v22 = vld [vmem:[#allocation16 + $0xf70] sm:$0xf0]  ;;  %v14490_v0 = vld [vmem:[#allocation16 + $0xdf4] sm:$0xf0] }
 0x4ff   :  { %v13002_v39 = vor.u32 %v14533_v38, %v12999_v22  ;;  %v12935_v24 = vld [vmem:[#allocation16 + $0xef0] sm:$0xf0]  ;;  %v14378_v38 = vld [vmem:[#allocation16 + $0xa74] sm:$0xf0]  ;;  %v11630_v22 = vor.u32 %v14194_v11, %v11629_v13  ;;  %v14358_v11 = vld [vmem:[#allocation16 + $0x9dc] sm:$0xf] }
 0x500   :  { %7702 = vmatpush.bf16.msra.mxu0 %v11758_v25  ;;  %7742 = vmatpush.bf16.msra.mxu3 %v12494_v26  ;;  %v12938_v25 = vor.u32 %v14517_v53, %v12935_v24  ;;  %v7452_v2 = vpop.f32.mrf.mxu0  ;;  %v12365_v26 = vld [vmem:[#allocation16 + $0xa58] sm:$0xf]  ;;  %v12839_v53 = vld [vmem:[#allocation16 + $0xe30] sm:$0xf0]  ;;  %v11055_v24 = vld [vmem:[#allocation16 + $0x38] sm:$0xf0] }
 0x501   :  { %v12366_v41 = vor.u32 %v14378_v38, %v12365_v26  ;;  %v12045_v58 = vld [vmem:[#allocation16 + $0x7d8] sm:$0xf]  ;;  %v12842_v13 = vor.u32 %v14493_v59, %v12839_v53  ;;  %v14334_v59 = vld [vmem:[#allocation16 + $0x91c] sm:$0xf] }
 0x502   :  { %7733 = vmatpush.bf16.msra.mxu2 %v12110_v47  ;;  %7663 = vmatpush.bf16.msrb.mxu1 %v13034_v62  ;;  %v11218_v47 = vor.u32 %v14086_v17, %v11215_v36  ;;  %v12903_v62 = vld [vmem:[#allocation16 + $0xeb0] sm:$0xf0]  ;;  %v7413_v29 = vpop.f32.mrf.mxu1  ;;  %v14186_v17 = vld [vmem:[#allocation16 + $0x474] sm:$0xf0]  ;;  %v7491_v37 = vpop.f32.mrf.mxu3  ;;  %v12207_v53 = vld [vmem:[#allocation16 + $0x938] sm:$0xf0] }
 0x503   :  { %v14482_v2 = vld [vmem:[#allocation16 + $0xdb4] sm:$0xf0]  ;;  %v11471_v29 = vld [vmem:[#allocation16 + $0x378] sm:$0xf0] }
 0x504   :  { %7703 = vmatpush.bf16.msra.mxu0 %v11726_v32  ;;  %7743 = vmatpush.bf16.msra.mxu3 %v12462_v28  ;;  %v11597_v32 = vld [vmem:[#allocation16 + $0x458] sm:$0xf] }
 0x505   :  { %v11598_v43 = vor.u32 %v14186_v17, %v11597_v32  ;;  %v14290_v38 = vld [vmem:[#allocation16 + $0x7b4] sm:$0xf0]  ;;  %v12271_v32 = vld [vmem:[#allocation16 + $0x9b8] sm:$0xf0] }
 0x506   :  { %7734 = vmatpush.bf16.msra.mxu2 %v12078_v48  ;;  %7664 = vmatpush.bf16.msrb.mxu1 %v13002_v39  ;;  %v7425_v48 = vadd.f32 %v16361_v18, %v7412_v50  ;;  %v14509_v18 = vld [vmem:[#allocation16 + $0xe94] sm:$0xf]  ;;  %v12813_v50 = vld [vmem:[#allocation16 + $0xdd8] sm:$0xf] }
 0x507   :  { %v12906_v36 = vor.u32 %v14509_v18, %v12903_v62  ;;  %v12871_v39 = vld [vmem:[#allocation16 + $0xe70] sm:$0xf0]  ;;  %v12814_v1 = vor.u32 %v14490_v0, %v12813_v50  ;;  %v12013_v62 = vld [vmem:[#allocation16 + $0x798] sm:$0xf] }
 0x508   :  { %7704 = vmatpush.bf16.msra.mxu0 %v11694_v51  ;;  %v7438_v27 = vadd.f32 %v16375_v60, %v7425_v48  ;;  %7744 = vmatpush.bf16.msra.mxu3 %v12430_v12  ;;  %v11119_v60 = vld [vmem:[#allocation16 + $0xb8] sm:$0xf0]  ;;  %v12874_v56 = vor.u32 %v14501_v31, %v12871_v39  ;;  %v11566_v48 = vor.u32 %v14178_v54, %v11565_v55  ;;  %v12749_v17 = vld [vmem:[#allocation16 + $0xd58] sm:$0xf] }
 0x509   :  { %7735 = vmatmul.bf16.vlgmr.msra.gmra.mxu2 %v16211_v20  ;;  %v11122_v28 = vor.u32 %v14062_v30, %v11119_v60  ;;  %v11535_v51 = vld [vmem:[#allocation16 + $0x3f8] sm:$0xf0]  ;;  %v11981_v31 = vld [vmem:[#allocation16 + $0x758] sm:$0xf] }
 0x50a   :  { %7779 = vmatpush.bf16.msrb.mxu2 %v11282_v35  ;;  %v11151_v35 = vld [vmem:[#allocation16 + $0xf8] sm:$0xf0]  ;;  %7665 = vmatpush.bf16.msrb.mxu1 %v12970_v9  ;;  %v11538_v12 = vor.u32 %v14166_v5, %v11535_v51  ;;  %v12717_v5 = vld [vmem:[#allocation16 + $0xd18] sm:$0xf] }
 0x50b   :  { %v11154_v16 = vor.u32 %v14070_v57, %v11151_v35  ;;  %v14158_v57 = vld [vmem:[#allocation16 + $0x39c] sm:$0xf]  ;;  %v14466_v51 = vld [vmem:[#allocation16 + $0xd34] sm:$0xf0] }
 0x50c   :  { %v16392_v10 = vpop.f32.mrf.mxu2  ;;  %7705 = vmatpush.bf16.msra.mxu0 %v11662_v34  ;;  %7745 = vmatpush.bf16.msra.mxu3 %v12398_v6  ;;  %v14298_v34 = vld [vmem:[#allocation16 + $0x7f4] sm:$0xf0]  ;;  %v11503_v35 = vld [vmem:[#allocation16 + $0x3b8] sm:$0xf0] }
 0x50d   :  { %v12781_v6 = vld [vmem:[#allocation16 + $0xd98] sm:$0xf]  ;;  %v12046_v18 = vor.u32 %v14298_v34, %v12045_v58  ;;  %v14350_v60 = vld [vmem:[#allocation16 + $0x99c] sm:$0xf] }
 0x50e   :  { %7780 = vmatpush.bf16.msrb.mxu2 %v11250_v63  ;;  %v16394_v63 = vadd.f32 %v7450_v7, %v7438_v27  ;;  %7666 = vmatpush.bf16.msrb.mxu1 %v12938_v25  ;;  %v14054_v7 = vld [vmem:[#allocation16 + $0x5c] sm:$0xf]  ;;  %v12782_v30 = vor.u32 %v14482_v2, %v12781_v6  ;;  %v12274_v39 = vor.u32 %v14350_v60, %v12271_v32  ;;  %v14274_v0 = vld [vmem:[#allocation16 + $0x734] sm:$0xf0] }
 0x50f   :  { %v11090_v3 = vor.u32 %v14054_v7, %v11087_v42  ;;  %v12303_v27 = vld [vmem:[#allocation16 + $0x9f8] sm:$0xf0]  ;;  %v14258_v60 = vld [vmem:[#allocation16 + $0x6b4] sm:$0xf0] }
 0x510   :  { %7706 = vmatpush.bf16.msra.mxu0 %v11630_v22  ;;  %7746 = vmatpush.bf16.msra.mxu3 %v12366_v41  ;;  %v12306_v26 = vor.u32 %v14358_v11, %v12303_v27  ;;  %v14150_v22 = vld [vmem:[#allocation16 + $0x35c] sm:$0xf]  ;;  %v12014_v41 = vor.u32 %v14290_v38, %v12013_v62 }
 0x511   :  { %v11474_v37 = vor.u32 %v14150_v22, %v11471_v29  ;;  %v12239_v42 = vld [vmem:[#allocation16 + $0x978] sm:$0xf0]  ;;  %v11885_v22 = vld [vmem:[#allocation16 + $0x698] sm:$0xf] }
 0x512   :  { %7781 = vmatpush.bf16.msrb.mxu2 %v11218_v47  ;;  %v14370_v47 = vld [vmem:[#allocation16 + $0xa34] sm:$0xf0]  ;;  %7667 = vmatpush.bf16.msrb.mxu1 %v12906_v36  ;;  %v14126_v11 = vld [vmem:[#allocation16 + $0x29c] sm:$0xf] }
 0x513   :  { %v12334_v61 = vor.u32 %v14370_v47, %v12333_v52  ;;  %v14474_v36 = vld [vmem:[#allocation16 + $0xd74] sm:$0xf0]  ;;  %v14142_v52 = vld [vmem:[#allocation16 + $0x31c] sm:$0xf] }
 0x514   :  { %v7530_v9 = vpop.f32.mrf.mxu2  ;;  %7707 = vmatpush.bf16.msra.mxu0 %v11598_v43  ;;  %v11439_v47 = vld [vmem:[#allocation16 + $0x338] sm:$0xf0]  ;;  %v12750_v7 = vor.u32 %v14474_v36, %v12749_v17 }
 0x515   :  { %7747 = vmatpush.bf16.msra.mxu3 %v12334_v61  ;;  %v14342_v43 = vld [vmem:[#allocation16 + $0x95c] sm:$0xf]  ;;  %v11442_v54 = vor.u32 %v14142_v52, %v11439_v47  ;;  %v11949_v61 = vld [vmem:[#allocation16 + $0x718] sm:$0xf] }
 0x516   :  { %7782 = vmatpush.bf16.msrb.mxu2 %v11186_v4  ;;  %v14046_v4 = vld [vmem:[#allocation16 + $0x1c] sm:$0xf]  ;;  %7668 = vmatpush.bf16.msrb.mxu1 %v12874_v56  ;;  %v12242_v50 = vor.u32 %v14342_v43, %v12239_v42  ;;  %v11950_v58 = vor.u32 %v14274_v0, %v11949_v61  ;;  %v14250_v43 = vld [vmem:[#allocation16 + $0x674] sm:$0xf0] }
 0x517   :  { %v11058_v25 = vor.u32 %v14046_v4, %v11055_v24  ;;  %v11407_v9 = vld [vmem:[#allocation16 + $0x2f8] sm:$0xf0]  ;;  %v12685_v4 = vld [vmem:[#allocation16 + $0xcd8] sm:$0xf] }
 0x518   :  { %7708 = vmatpush.bf16.msra.mxu0 %v11566_v48  ;;  %7748 = vmatmul.bf16.vlgmr.msra.gmra.mxu3 %v16230_v23  ;;  %v16400_v56 = vpop.f32.mrf.mxu0  ;;  %v14458_v24 = vld [vmem:[#allocation16 + $0xcf4] sm:$0xf0]  ;;  %v11375_v27 = vld [vmem:[#allocation16 + $0x2b8] sm:$0xf0] }
 0x519   :  { %7792 = vmatpush.bf16.msrb.mxu3 %v11538_v12  ;;  %v12718_v12 = vor.u32 %v14466_v51, %v12717_v5  ;;  %v14326_v6 = vld [vmem:[#allocation16 + $0x8dc] sm:$0xf] }
 0x51a   :  { %7783 = vmatpush.bf16.msrb.mxu2 %v11154_v16  ;;  %v11506_v16 = vor.u32 %v14158_v57, %v11503_v35  ;;  %7669 = vmatpush.bf16.msrb.mxu1 %v12842_v13  ;;  %v16405_v34 = vpop.f32.mrf.mxu3  ;;  %v11917_v57 = vld [vmem:[#allocation16 + $0x6d8] sm:$0xf]  ;;  %v12210_v35 = vor.u32 %v14334_v59, %v12207_v53  ;;  %v12175_v2 = vld [vmem:[#allocation16 + $0x8f8] sm:$0xf0] }
 0x51b   :  { %7709 = vmatmul.bf16.vlgmr.msra.gmra.mxu0 %v16102_v40  ;;  %v14266_v13 = vld [vmem:[#allocation16 + $0x6f4] sm:$0xf0]  ;;  %v12178_v29 = vor.u32 %v14326_v6, %v12175_v2  ;;  %v14118_v32 = vld [vmem:[#allocation16 + $0x25c] sm:$0xf] }
 0x51c   :  { %7753 = vmatpush.bf16.msrb.mxu0 %v12814_v1  ;;  %v11918_v62 = vor.u32 %v14266_v13, %v11917_v57  ;;  %v11343_v17 = vld [vmem:[#allocation16 + $0x278] sm:$0xf0]  ;;  %v14242_v57 = vld [vmem:[#allocation16 + $0x634] sm:$0xf0] }
 0x51d   :  { %7793 = vmatpush.bf16.msrb.mxu3 %v11506_v16  ;;  %7670 = vmatmul.bf16.vlgmr.msrb.gmra.mxu1 %v16273_v33  ;;  %v13075_v16 = vmul.f32 -1.442695, %v16324_v15  ;;  %v14442_v15 = vld [vmem:[#allocation16 + $0xc74] sm:$0xf0]  ;;  %v11346_v52 = vor.u32 %v14118_v32, %v11343_v17  ;;  %v14110_v5 = vld [vmem:[#allocation16 + $0x21c] sm:$0xf] }
 0x51e   :  { %7784 = vmatpush.bf16.msrb.mxu2 %v11122_v28  ;;  %7714 = vmatpush.bf16.msra.mxu1 %v12046_v18  ;;  %v14282_v28 = vld [vmem:[#allocation16 + $0x774] sm:$0xf0]  ;;  %v11311_v51 = vld [vmem:[#allocation16 + $0x238] sm:$0xf0] }
 0x51f   :  { %v11982_v55 = vor.u32 %v14282_v28, %v11981_v31  ;;  %v14450_v18 = vld [vmem:[#allocation16 + $0xcb4] sm:$0xf0]  ;;  %v12143_v31 = vld [vmem:[#allocation16 + $0x8b8] sm:$0xf0]  ;;  %14847 = vpow2.f32 %v13075_v16  ;;  %v11886_v28 = vor.u32 %v14258_v60, %v11885_v22 }
 0x520   :  { %7754 = vmatpush.bf16.msrb.mxu0 %v12782_v30  ;;  %v7504_v38 = vpop.f32.mrf.mxu0  ;;  %v12111_v61 = vld [vmem:[#allocation16 + $0x878] sm:$0xf0]  ;;  %v14554_v2 = vld [vmem:[#allocation16 + $0xff4] sm:$0xf0] }
 0x521   :  { %7794 = vmatpush.bf16.msrb.mxu3 %v11474_v37  ;;  %v14318_v37 = vld [vmem:[#allocation16 + $0x89c] sm:$0xf] }
 0x522   :  { %7785 = vmatpush.bf16.msrb.mxu2 %v11090_v3  ;;  %7715 = vmatpush.bf16.msra.mxu1 %v12014_v41  ;;  %v14134_v3 = vld [vmem:[#allocation16 + $0x2dc] sm:$0xf]  ;;  %v7543_v47 = vpop.f32.mrf.mxu3  ;;  %v12146_v42 = vor.u32 %v14318_v37, %v12143_v31  ;;  %v14546_v37 = vld [vmem:[#allocation16 + $0xfb4] sm:$0xf0] }
 0x523   :  { %v11410_v1 = vor.u32 %v14134_v3, %v11407_v9  ;;  %v12559_v0 = vld [vmem:[#allocation16 + $0xbf8] sm:$0xf0]  ;;  %v12589_v3 = vld [vmem:[#allocation16 + $0xc18] sm:$0xf] }
 0x524   :  { %7755 = vmatpush.bf16.msrb.mxu0 %v12750_v7  ;;  %v11853_v7 = vld [vmem:[#allocation16 + $0x658] sm:$0xf]  ;;  %v14230_v59 = vld [vmem:[#allocation16 + $0x5dc] sm:$0xf] }
 0x525   :  { %7795 = vmatpush.bf16.msrb.mxu3 %v11442_v54  ;;  %v14434_v9 = vld [vmem:[#allocation16 + $0xc34] sm:$0xf0]  ;;  %v11791_v53 = vld [vmem:[#allocation16 + $0x5f8] sm:$0xf0] }
 0x526   :  { %7786 = vmatpush.bf16.msrb.mxu2 %v11058_v25  ;;  %7716 = vmatpush.bf16.msra.mxu1 %v11982_v55  ;;  %v12686_v25 = vor.u32 %v14458_v24, %v12685_v4  ;;  %v14310_v55 = vld [vmem:[#allocation16 + $0x85c] sm:$0xf]  ;;  %v12590_v13 = vor.u32 %v14434_v9, %v12589_v3  ;;  %v11794_v6 = vor.u32 %v14230_v59, %v11791_v53  ;;  %v4480_v3 = vperm.slane %v16383_v21, 5 }
 0x527   :  { %v12114_v4 = vor.u32 %v14310_v55, %v12111_v61  ;;  %v11759_v60 = vld [vmem:[#allocation16 + $0x5b8] sm:$0xf0] }
 0x528   :  { %7756 = vmatpush.bf16.msrb.mxu0 %v12718_v12  ;;  %v11854_v12 = vor.u32 %v14250_v43, %v11853_v7  ;;  %v14406_v31 = vld [vmem:[#allocation16 + $0xb5c] sm:$0xf] }
 0x529   :  { %7787 = vmatmul.bf16.vlgmr.msrb.gmra.mxu2 %v16182_v45  ;;  %v7463_v45 = vpop.f32.mrf.mxu1  ;;  %7796 = vmatpush.bf16.msrb.mxu3 %v11410_v1  ;;  %v11821_v1 = vld [vmem:[#allocation16 + $0x618] sm:$0xf]  ;;  %v14214_v47 = vld [vmem:[#allocation16 + $0x55c] sm:$0xf] }
 0x52a   :  { %7831 = vmatpush.bf16.msra.mxu2 %v12306_v26  ;;  %v16403_v48 = vadd.f32 %v7463_v45, %v16394_v63  ;;  %v12653_v63 = vld [vmem:[#allocation16 + $0xc98] sm:$0xf]  ;;  %7717 = vmatpush.bf16.msra.mxu1 %v11950_v58  ;;  %v11378_v26 = vor.u32 %v14126_v11, %v11375_v27  ;;  %v11314_v45 = vor.u32 %v14110_v5, %v11311_v51  ;;  %v14302_v11 = vld [vmem:[#allocation16 + $0x81c] sm:$0xf] }
 0x52b   :  { %v12654_v36 = vor.u32 %v14450_v18, %v12653_v63  ;;  %v12079_v27 = vld [vmem:[#allocation16 + $0x838] sm:$0xf0]  ;;  %v11822_v16 = vor.u32 %v14242_v57, %v11821_v1  ;;  %v14538_v51 = vld [vmem:[#allocation16 + $0xf74] sm:$0xf0] }
 0x52c   :  { %v16408_v30 = vpop.f32.mrf.mxu2  ;;  %7757 = vmatpush.bf16.msrb.mxu0 %v12686_v25  ;;  %v13069_v25 = vld [vmem:[#allocation16 + $0xfd8] sm:$0xf]  ;;  %v14414_v63 = vld [vmem:[#allocation16 + $0xb9c] sm:$0xf]  ;;  %v12082_v22 = vor.u32 %v14302_v11, %v12079_v27  ;;  %v13117_v11 = vld [vmem:[#allocation19 + $0x40] sm:$0xf] }
 0x52d   :  { %7797 = vmatpush.bf16.msrb.mxu3 %v11378_v26  ;;  %v12527_v18 = vld [vmem:[#allocation16 + $0xbb8] sm:$0xf0]  ;;  %v14570_v26 = vld [vmem:[#allocation19 + $0x74] sm:$0xf0]  ;;  %v13070_v32 = vor.u32 %v14554_v2, %v13069_v25  ;;  %v14530_v1 = vld [vmem:[#allocation16 + $0xf34] sm:$0xf0] }
 0x52e   :  { %7832 = vmatpush.bf16.msra.mxu2 %v12274_v39  ;;  %v12621_v39 = vld [vmem:[#allocation16 + $0xc58] sm:$0xf]  ;;  %7718 = vmatpush.bf16.msra.mxu1 %v11918_v62  ;;  %v12530_v17 = vor.u32 %v14414_v63, %v12527_v18  ;;  %v11727_v7 = vld [vmem:[#allocation16 + $0x578] sm:$0xf0]  ;;  %v14564_v27 = vld [vmem:[#allocation19 + $0x44] sm:$0xf0] }
 0x52f   :  { %v12622_v54 = vor.u32 %v14442_v15, %v12621_v39  ;;  %v13141_v62 = vld [vmem:[#allocation19 + $0x70] sm:$0xf]  ;;  %v12495_v39 = vld [vmem:[#allocation16 + $0xb78] sm:$0xf0]  ;;  %v11730_v61 = vor.u32 %v14214_v47, %v11727_v7  ;;  %v13076_v25 = vmul.f32 -1.442695, %v16344_v14 }
 0x530   :  { %7758 = vmatpush.bf16.msrb.mxu0 %v12654_v36  ;;  %v13037_v36 = vld [vmem:[#allocation16 + $0xf98] sm:$0xf]  ;;  %v14398_v55 = vld [vmem:[#allocation16 + $0xb1c] sm:$0xf] }
 0x531   :  { %v7465_v41 = vpop.f32.mrf.mxu1  ;;  %7798 = vmatpush.bf16.msrb.mxu3 %v11346_v52  ;;  %v14568_v52 = vld [vmem:[#allocation19 + $0x64] sm:$0xf0]  ;;  %v13038_v43 = vor.u32 %v14546_v37, %v13037_v36  ;;  %v14206_v9 = vld [vmem:[#allocation16 + $0x51c] sm:$0xf]  ;;  %v13109_v36 = vld [vmem:[#allocation19 + $0x30] sm:$0xf] }
 0x532   :  { %7833 = vmatpush.bf16.msra.mxu2 %v12242_v50  ;;  %v14422_v50 = vld [vmem:[#allocation16 + $0xbdc] sm:$0xf]  ;;  %7719 = vmatpush.bf16.msra.mxu1 %v11886_v28  ;;  %v13142_v41 = vor.u32 %v14570_v26, %v13141_v62  ;;  %v13133_v28 = vld [vmem:[#allocation19 + $0x60] sm:$0xf]  ;;  %v12941_v26 = vld [vmem:[#allocation16 + $0xed8] sm:$0xf] }
 0x533   :  { %v12562_v58 = vor.u32 %v14422_v50, %v12559_v0  ;;  %v13134_v5 = vor.u32 %v14568_v52, %v13133_v28  ;;  %v13125_v50 = vld [vmem:[#allocation19 + $0x50] sm:$0xf]  ;;  %v14566_v0 = vld [vmem:[#allocation19 + $0x54] sm:$0xf0]  ;;  %v14390_v57 = vld [vmem:[#allocation16 + $0xadc] sm:$0xf] }
 0x534   :  { %v7582_v24 = vpop.f32.mrf.mxu2  ;;  %7759 = vmatpush.bf16.msrb.mxu0 %v12622_v54  ;;  %v12463_v54 = vld [vmem:[#allocation16 + $0xb38] sm:$0xf0]  ;;  %v12909_v52 = vld [vmem:[#allocation16 + $0xe98] sm:$0xf] }
 0x535   :  { %7799 = vmatpush.bf16.msrb.mxu3 %v11314_v45  ;;  %v12466_v59 = vor.u32 %v14398_v55, %v12463_v54  ;;  %v14198_v63 = vld [vmem:[#allocation16 + $0x4dc] sm:$0xf]  ;;  %v13101_v55 = vld [vmem:[#allocation19 + $0x20] sm:$0xf]  ;;  %v14560_v54 = vld [vmem:[#allocation19 + $0x24] sm:$0xf0] }
 0x536   :  { %7834 = vmatpush.bf16.msra.mxu2 %v12210_v35  ;;  %v14848_v35 = vpop.eup %14847  ;;  %7720 = vmatpush.bf16.msra.mxu1 %v11854_v12  ;;  %v11695_v12 = vld [vmem:[#allocation16 + $0x538] sm:$0xf0] }
 0x537   :  { %v16410_v38 = vadd.f32 1.0, %v14848_v35  ;;  %v12431_v35 = vld [vmem:[#allocation16 + $0xaf8] sm:$0xf0]  ;;  %v11698_v21 = vor.u32 %v14206_v9, %v11695_v12 }
 0x538   :  { %7760 = vmatpush.bf16.msrb.mxu0 %v12590_v13  ;;  %7800 = vmatmul.bf16.vlgmr.msrb.gmra.mxu3 %v16186_v49  ;;  %v12498_v49 = vor.u32 %v14406_v31, %v12495_v39  ;;  %v16418_v53 = vpop.f32.mrf.mxu0  ;;  %v11663_v18 = vld [vmem:[#allocation16 + $0x4f8] sm:$0xf0] }
 0x539   :  { %7844 = vmatpush.bf16.msra.mxu3 %v12562_v58  ;;  %14849 = vrcp.f32 %v16410_v38  ;;  %v7503_v58 = vadd.f32 %v16400_v56, %v16389_v46  ;;  %v14190_v37 = vld [vmem:[#allocation16 + $0x49c] sm:$0xf]  ;;  %vm7920_vm6 = vweird.f32 %v16410_v38 }
 0x53a   :  { %7835 = vmatpush.bf16.msra.mxu2 %v12178_v29  ;;  %v14222_v29 = vld [vmem:[#allocation16 + $0x59c] sm:$0xf]  ;;  %7721 = vmatpush.bf16.msra.mxu1 %v11822_v16  ;;  %v7515_v13 = vpop.f32.mrf.mxu1  ;;  %v12434_v16 = vor.u32 %v14390_v57, %v12431_v35  ;;  %v7593_v62 = vpop.f32.mrf.mxu3  ;;  %14851 = vpow2.f32 %v13076_v25  ;;  %v13093_v57 = vld [vmem:[#allocation19 + $0x10] sm:$0xf] }
 0x53b   :  { %v11762_v15 = vor.u32 %v14222_v29, %v11759_v60  ;;  %7761 = vmatmul.bf16.vlgmr.msrb.gmra.mxu0 %v16250_v8  ;;  %v7516_v2 = vadd.f32 %v7515_v13, %v7503_v58  ;;  %v13118_v29 = vor.u32 %v14564_v27, %v13117_v11  ;;  %v14382_v60 = vld [vmem:[#allocation16 + $0xa9c] sm:$0xf]  ;;  %v13102_v58 = vor.u32 %v14560_v54, %v13101_v55  ;;  %v13205_v13 = vld [vmem:[#allocation19 + $0xf0] sm:$0xf]  ;;  %v14586_v11 = vld [vmem:[#allocation19 + $0xf4] sm:$0xf0] }
 0x53c   :  { %7805 = vmatpush.bf16.msra.mxu0 %v11794_v6  ;;  %v7581_v6 = vadd.f32 %v16408_v30, %v4480_v3  ;;  %v14522_v30 = vld [vmem:[#allocation16 + $0xef4] sm:$0xf0]  ;;  %v11631_v31 = vld [vmem:[#allocation16 + $0x4b8] sm:$0xf0]  ;;  %v7926_v27 = vand.u32 2147483648, %v16410_v38 }
 0x53d   :  { %7845 = vmatpush.bf16.msra.mxu3 %v12530_v17  ;;  %7722 = vmatmul.bf16.vlgmr.msra.gmra.mxu1 %v16180_v44  ;;  %v11666_v17 = vor.u32 %v14198_v63, %v11663_v18  ;;  %v14174_v25 = vld [vmem:[#allocation16 + $0x41c] sm:$0xf] }
 0x53e   :  { %7836 = vmatpush.bf16.msra.mxu2 %v12146_v42  ;;  %7766 = vmatpush.bf16.msrb.mxu1 %v13070_v32  ;;  %v13005_v42 = vld [vmem:[#allocation16 + $0xf58] sm:$0xf]  ;;  %v16431_v14 = vadd.f32 %v7593_v62, %v7581_v6  ;;  %v12399_v32 = vld [vmem:[#allocation16 + $0xab8] sm:$0xf0] }
 0x53f   :  { %v13006_v45 = vor.u32 %v14538_v51, %v13005_v42  ;;  %v16420_v24 = vpop.eup %14849  ;;  %v12402_v28 = vor.u32 %v14382_v60, %v12399_v32  ;;  %v12367_v42 = vld [vmem:[#allocation16 + $0xa78] sm:$0xf0]  ;;  %v14498_v60 = vld [vmem:[#allocation16 + $0xe34] sm:$0xf0]  ;;  %v14578_v32 = vld [vmem:[#allocation19 + $0xb4] sm:$0xf0] }
 0x540   :  { %7806 = vmatpush.bf16.msra.mxu0 %v11762_v15  ;;  %v7916_v46 = vmul.f32 %v16420_v24, %v16410_v38  ;;  %v12942_v15 = vor.u32 %v14522_v30, %v12941_v26  ;;  %vm7921_vm10 = vweird.f32 %v16420_v24  ;;  %v11567_v6 = vld [vmem:[#allocation16 + $0x438] sm:$0xf0]  ;;  %v12845_v30 = vld [vmem:[#allocation16 + $0xe18] sm:$0xf] }
 0x541   :  { %7846 = vmatpush.bf16.msra.mxu3 %v12498_v49  ;;  %v14374_v49 = vld [vmem:[#allocation16 + $0xa5c] sm:$0xf]  ;;  %vm16446_vm7 = vmor %vm7920_vm6, %vm7921_vm10 }
 0x542   :  { %7837 = vmatpush.bf16.msra.mxu2 %v12114_v4  ;;  %7767 = vmatpush.bf16.msrb.mxu1 %v13038_v43  ;;  %v12973_v4 = vld [vmem:[#allocation16 + $0xf18] sm:$0xf]  ;;  %v7917_v39 = vsub.f32 1.0, %v7916_v46  ;;  %v7517_v51 = vpop.f32.mrf.mxu1  ;;  %v12370_v9 = vor.u32 %v14374_v49, %v12367_v42  ;;  %v7595_v12 = vpop.f32.mrf.mxu3  ;;  %v14486_v46 = vld [vmem:[#allocation16 + $0xddc] sm:$0xf]  ;;  %v7927_v49 = vor.u32 1.1754944e-38, %v7926_v27 }
 0x543   :  { %v12974_v56 = vor.u32 %v14530_v1, %v12973_v4  ;;  %v14514_v43 = vld [vmem:[#allocation16 + $0xeb4] sm:$0xf0]  ;;  %v14852_v4 = vpop.eup %14851  ;;  %v12335_v1 = vld [vmem:[#allocation16 + $0xa38] sm:$0xf0]  ;;  %v14582_v12 = vld [vmem:[#allocation19 + $0xd4] sm:$0xf0] }
 0x544   :  { %7807 = vmatpush.bf16.msra.mxu0 %v11730_v61  ;;  %v14182_v61 = vld [vmem:[#allocation16 + $0x45c] sm:$0xf]  ;;  %v12910_v3 = vor.u32 %v14514_v43, %v12909_v52  ;;  %v12846_v52 = vor.u32 %v14498_v60, %v12845_v30  ;;  %v14634_v43 = vld [vmem:[#allocation19 + $0x274] sm:$0xf0]  ;;  %v14580_v27 = vld [vmem:[#allocation19 + $0xc4] sm:$0xf0] }
 0x545   :  { %7847 = vmatpush.bf16.msra.mxu3 %v12466_v59  ;;  %v14506_v59 = vld [vmem:[#allocation16 + $0xe74] sm:$0xf0]  ;;  %v12783_v51 = vld [vmem:[#allocation16 + $0xdb8] sm:$0xf0] }
 0x546   :  { %7838 = vmatpush.bf16.msra.mxu2 %v12082_v22  ;;  %7768 = vmatpush.bf16.msrb.mxu1 %v13006_v45  ;;  %v16429_v22 = vadd.f32 %v16392_v10, %v7516_v2  ;;  %v7556_v10 = vpop.f32.mrf.mxu0  ;;  %v12877_v45 = vld [vmem:[#allocation16 + $0xe58] sm:$0xf]  ;;  %v16439_v2 = vadd.f32 1.0, %v14852_v4  ;;  %v14470_v4 = vld [vmem:[#allocation16 + $0xd5c] sm:$0xf] }
 0x547   :  { %v12878_v63 = vor.u32 %v14506_v59, %v12877_v45  ;;  %v14584_v10 = vld [vmem:[#allocation19 + $0xe4] sm:$0xf0]  ;;  %v13389_v45 = vld [vmem:[#allocation19 + $0x260] sm:$0xf]  ;;  %v11951_v30 = vld [vmem:[#allocation16 + $0x738] sm:$0xf0] }
 0x548   :  { %7808 = vmatpush.bf16.msra.mxu0 %v11698_v21  ;;  %v14558_v21 = vld [vmem:[#allocation19 + $0x14] sm:$0xf0]  ;;  %14853 = vrcp.f32 %v16439_v2  ;;  %v14632_v59 = vld [vmem:[#allocation19 + $0x264] sm:$0xf0]  ;;  %v13173_v60 = vld [vmem:[#allocation19 + $0xb0] sm:$0xf]  ;;  %vm7935_vm11 = vweird.f32 %v16439_v2 }
 0x549   :  { %7839 = vmatmul.bf16.vlgmr.msra.gmra.mxu2 %v16211_v20  ;;  %v13126_v20 = vor.u32 %v14566_v0, %v13125_v50  ;;  %7848 = vmatpush.bf16.msra.mxu3 %v12434_v16  ;;  %v11599_v50 = vld [vmem:[#allocation16 + $0x478] sm:$0xf0]  ;;  %v7918_v0 = vmul.f32 %v16420_v24, %v7917_v39  ;;  %v13094_v62 = vor.u32 %v14558_v21, %v13093_v57 }
 0x54a   :  { %8817 = vmatpush.bf16.msrb.mxu2 %v13142_v41  ;;  %v14562_v41 = vld [vmem:[#allocation19 + $0x34] sm:$0xf0]  ;;  %7769 = vmatpush.bf16.msrb.mxu1 %v12974_v56  ;;  %v11602_v35 = vor.u32 %v14182_v61, %v11599_v50  ;;  %v12815_v56 = vld [vmem:[#allocation16 + $0xdf8] sm:$0xf0]  ;;  %v13390_v21 = vor.u32 %v14632_v59, %v13389_v45 }
 0x54b   :  { %v13110_v47 = vor.u32 %v14562_v41, %v13109_v36  ;;  %v7919_v16 = vadd.f32 %v16420_v24, %v7918_v0  ;;  %v11570_v36 = vor.u32 %v14174_v25, %v11567_v6  ;;  %v13085_v41 = vld [vmem:[#allocation19] sm:$0xf]  ;;  %v12818_v39 = vor.u32 %v14486_v46, %v12815_v56  ;;  %v14286_v61 = vld [vmem:[#allocation16 + $0x79c] sm:$0xf]  ;;  %v13381_v6 = vld [vmem:[#allocation19 + $0x250] sm:$0xf] }
 0x54c   :  { %v16433_v7 = vpop.f32.mrf.mxu2  ;;  %7809 = vmatpush.bf16.msra.mxu0 %v11666_v17  ;;  %v7924_v17 = vand.u32 2147483647, %v16410_v38  ;;  %v14462_v46 = vld [vmem:[#allocation16 + $0xd1c] sm:$0xf] }
 0x54d   :  { %7849 = vmatpush.bf16.msra.mxu3 %v12402_v28  ;;  %v13197_v28 = vld [vmem:[#allocation19 + $0xe0] sm:$0xf]  ;;  %v7923_v38 = vsel %vm16446_vm7, %v16420_v24, %v7919_v16  ;;  %v12719_v56 = vld [vmem:[#allocation16 + $0xd38] sm:$0xf0] }
 0x54e   :  { %8818 = vmatpush.bf16.msrb.mxu2 %v13134_v5  ;;  %v11634_v5 = vor.u32 %v14190_v37, %v11631_v31  ;;  %7770 = vmatpush.bf16.msrb.mxu1 %v12942_v15  ;;  %v14556_v37 = vld [vmem:[#allocation19 + $0x4] sm:$0xf0]  ;;  %v14294_v31 = vld [vmem:[#allocation16 + $0x7dc] sm:$0xf]  ;;  %v13198_v54 = vor.u32 %v14584_v10, %v13197_v28  ;;  %vm7925_vm8 = vcmp.eq.f32.partialorder %v7924_v17, 8.507059e+37  ;;  %v12722_v17 = vor.u32 %v14462_v46, %v12719_v56 }
 0x54f   :  { %v12047_v15 = vld [vmem:[#allocation16 + $0x7f8] sm:$0xf0]  ;;  %v13086_v42 = vor.u32 %v14556_v37, %v13085_v41  ;;  %v7928_v0 = vsel %vm7925_vm8, %v7927_v49, %v7923_v38  ;;  %v13373_v41 = vld [vmem:[#allocation19 + $0x240] sm:$0xf]  ;;  %v14628_v37 = vld [vmem:[#allocation19 + $0x244] sm:$0xf0] }
 0x550   :  { %7810 = vmatpush.bf16.msra.mxu0 %v11634_v5  ;;  %v14478_v5 = vld [vmem:[#allocation16 + $0xd9c] sm:$0xf]  ;;  %v12050_v55 = vor.u32 %v14294_v31, %v12047_v15  ;;  %v13077_v10 = vmul.f32 -1.442695, %v16373_v19 }
 0x551   :  { %7850 = vmatpush.bf16.msra.mxu3 %v12370_v9  ;;  %v13189_v9 = vld [vmem:[#allocation19 + $0xd0] sm:$0xf]  ;;  %v12786_v24 = vor.u32 %v14478_v5, %v12783_v51  ;;  %v14454_v15 = vld [vmem:[#allocation16 + $0xcdc] sm:$0xf]  ;;  %v13165_v5 = vld [vmem:[#allocation19 + $0xa0] sm:$0xf] }
 0x552   :  { %8819 = vmatpush.bf16.msrb.mxu2 %v13126_v20  ;;  %v14366_v20 = vld [vmem:[#allocation16 + $0xa1c] sm:$0xf]  ;;  %7771 = vmatpush.bf16.msrb.mxu1 %v12910_v3  ;;  %v13190_v57 = vor.u32 %v14582_v12, %v13189_v9  ;;  %v14576_v51 = vld [vmem:[#allocation19 + $0xa4] sm:$0xf0] }
 0x553   :  { %v12338_v18 = vor.u32 %v14366_v20, %v12335_v1  ;;  %v12015_v3 = vld [vmem:[#allocation16 + $0x7b8] sm:$0xf0]  ;;  %v16457_v20 = vpop.eup %14853  ;;  %v13166_v9 = vor.u32 %v14576_v51, %v13165_v5 }
 0x554   :  { %v7634_v26 = vpop.f32.mrf.mxu2  ;;  %7811 = vmatpush.bf16.msra.mxu0 %v11602_v35  ;;  %v12018_v1 = vor.u32 %v14286_v61, %v12015_v3  ;;  %v14278_v35 = vld [vmem:[#allocation16 + $0x75c] sm:$0xf]  ;;  %v14626_v61 = vld [vmem:[#allocation19 + $0x234] sm:$0xf0]  ;;  %vm7936_vm9 = vweird.f32 %v16457_v20 }
 0x555   :  { %7851 = vmatpush.bf16.msra.mxu3 %v12338_v18  ;;  %v7931_v18 = vmul.f32 %v16457_v20, %v16439_v2  ;;  %v12687_v28 = vld [vmem:[#allocation16 + $0xcf8] sm:$0xf0]  ;;  %vm16485_vm12 = vmor %vm7935_vm11, %vm7936_vm9 }
 0x556   :  { %8820 = vmatpush.bf16.msrb.mxu2 %v13118_v29  ;;  %v13206_v29 = vor.u32 %v14586_v11, %v13205_v13  ;;  %7772 = vmatpush.bf16.msrb.mxu1 %v12878_v63  ;;  %v11983_v13 = vld [vmem:[#allocation16 + $0x778] sm:$0xf0]  ;;  %v13181_v11 = vld [vmem:[#allocation19 + $0xc0] sm:$0xf]  ;;  %v14630_v63 = vld [vmem:[#allocation19 + $0x254] sm:$0xf0] }
 0x557   :  { %v11986_v16 = vor.u32 %v14278_v35, %v11983_v13  ;;  %v7932_v31 = vsub.f32 1.0, %v7931_v18  ;;  %v11919_v38 = vld [vmem:[#allocation16 + $0x6f8] sm:$0xf0]  ;;  %v13357_v13 = vld [vmem:[#allocation19 + $0x220] sm:$0xf] }
 0x558   :  { %7812 = vmatpush.bf16.msra.mxu0 %v11570_v36  ;;  %7852 = vmatmul.bf16.vlgmr.msra.gmra.mxu3 %v16230_v23  ;;  %v16459_v23 = vpack.c.bf16 %v7928_v0, %v7928_v0  ;;  %v16467_v26 = vpop.f32.mrf.mxu0  ;;  %v14446_v19 = vld [vmem:[#allocation16 + $0xc9c] sm:$0xf] }
 0x559   :  { %8830 = vmatpush.bf16.msrb.mxu3 %v13206_v29  ;;  %v14270_v29 = vld [vmem:[#allocation16 + $0x71c] sm:$0xf] }
 0x55a   :  { %8821 = vmatpush.bf16.msrb.mxu2 %v13110_v47  ;;  %v13397_v47 = vld [vmem:[#allocation19 + $0x270] sm:$0xf]  ;;  %7773 = vmatpush.bf16.msrb.mxu1 %v12846_v52  ;;  %v7567_v36 = vpop.f32.mrf.mxu1  ;;  %v11954_v52 = vor.u32 %v14270_v29, %v11951_v30  ;;  %v12655_v0 = vld [vmem:[#allocation16 + $0xcb8] sm:$0xf0] }
 0x55b   :  { %v13398_v50 = vor.u32 %v14634_v43, %v13397_v47  ;;  %7813 = vmatmul.bf16.vlgmr.msra.gmra.mxu0 %v16102_v40  ;;  %v7542_v40 = vadd.f32 %v16405_v34, %v16429_v22  ;;  %v13382_v34 = vor.u32 %v14630_v63, %v13381_v6  ;;  %v13174_v47 = vor.u32 %v14578_v32, %v13173_v60  ;;  %v16471_v43 = vpop.f32.mrf.mxu3  ;;  %v14246_v56 = vld [vmem:[#allocation16 + $0x65c] sm:$0xf]  ;;  %v13349_v30 = vld [vmem:[#allocation19 + $0x210] sm:$0xf]  ;;  %v14622_v60 = vld [vmem:[#allocation19 + $0x214] sm:$0xf0] }
 0x55c   :  { %7857 = vmatpush.bf16.msrb.mxu0 %v12818_v39  ;;  %v12658_v35 = vor.u32 %v14446_v19, %v12655_v0  ;;  %v7939_v6 = vand.u32 2147483647, %v16439_v2  ;;  %v14238_v5 = vld [vmem:[#allocation16 + $0x61c] sm:$0xf] }
 0x55d   :  { %8831 = vmatpush.bf16.msrb.mxu3 %v13198_v54  ;;  %7774 = vmatmul.bf16.vlgmr.msrb.gmra.mxu1 %v16273_v33  ;;  %v7555_v22 = vadd.f32 %v16418_v53, %v7542_v40  ;;  %v14262_v53 = vld [vmem:[#allocation16 + $0x6dc] sm:$0xf]  ;;  %v13365_v54 = vld [vmem:[#allocation19 + $0x230] sm:$0xf] }
 0x55e   :  { %8822 = vmatpush.bf16.msrb.mxu2 %v13102_v58  ;;  %v12751_v58 = vld [vmem:[#allocation16 + $0xd78] sm:$0xf0]  ;;  %7818 = vmatpush.bf16.msra.mxu1 %v12050_v55  ;;  %v12690_v55 = vor.u32 %v14454_v15, %v12687_v28  ;;  %v11922_v3 = vor.u32 %v14262_v53, %v11919_v38  ;;  %v13366_v45 = vor.u32 %v14626_v61, %v13365_v54  ;;  %v14602_v53 = vld [vmem:[#allocation19 + $0x174] sm:$0xf0]  ;;  %vm7940_vm13 = vcmp.eq.f32.partialorder %v7939_v6, 8.507059e+37 }
 0x55f   :  { %v12754_v25 = vor.u32 %v14470_v4, %v12751_v58  ;;  %v7568_v39 = vadd.f32 %v7567_v36, %v7555_v22  ;;  %v11887_v4 = vld [vmem:[#allocation16 + $0x6b8] sm:$0xf0]  ;;  %v13157_v58 = vld [vmem:[#allocation19 + $0x90] sm:$0xf]  ;;  %v14572_v22 = vld [vmem:[#allocation19 + $0x84] sm:$0xf0] }
 0x560   :  { %7858 = vmatpush.bf16.msrb.mxu0 %v12786_v24  ;;  %v7608_v12 = vpop.f32.mrf.mxu0  ;;  %v14254_v24 = vld [vmem:[#allocation16 + $0x69c] sm:$0xf]  ;;  %v13341_v61 = vld [vmem:[#allocation19 + $0x200] sm:$0xf] }
 0x561   :  { %8832 = vmatpush.bf16.msrb.mxu3 %v13190_v57  ;;  %v13079_v49 = vmul.f32 -1.442695, %v7568_v39  ;;  %v7941_v57 = vand.u32 2147483648, %v16439_v2  ;;  %v12623_v40 = vld [vmem:[#allocation16 + $0xc78] sm:$0xf0]  ;;  %v11890_v63 = vor.u32 %v14254_v24, %v11887_v4 }
 0x562   :  { %8823 = vmatpush.bf16.msrb.mxu2 %v13094_v62  ;;  %7819 = vmatpush.bf16.msra.mxu1 %v12018_v1  ;;  %v13182_v62 = vor.u32 %v14580_v27, %v13181_v11  ;;  %v14574_v1 = vld [vmem:[#allocation19 + $0x94] sm:$0xf0]  ;;  %v14624_v11 = vld [vmem:[#allocation19 + $0x224] sm:$0xf0]  ;;  %v14438_v27 = vld [vmem:[#allocation16 + $0xc5c] sm:$0xf] }
 0x563   :  { %14855 = vpow2.f32 %v13079_v49  ;;  %v13158_v18 = vor.u32 %v14574_v1, %v13157_v58  ;;  %v7647_v46 = vpop.f32.mrf.mxu3  ;;  %v12626_v36 = vor.u32 %v14438_v27, %v12623_v40  ;;  %v14430_v39 = vld [vmem:[#allocation16 + $0xc1c] sm:$0xf]  ;;  %v7942_v28 = vor.u32 1.1754944e-38, %v7941_v57  ;;  %v13143_v12 = vld [vmem:[#allocation19 + $0x78] sm:$0xf0] }
 0x564   :  { %7859 = vmatpush.bf16.msrb.mxu0 %v12754_v25  ;;  %14857 = vpow2.f32 %v13077_v10  ;;  %v12591_v2 = vld [vmem:[#allocation16 + $0xc38] sm:$0xf0]  ;;  %v13350_v49 = vor.u32 %v14622_v60, %v13349_v30  ;;  %v14600_v4 = vld [vmem:[#allocation19 + $0x164] sm:$0xf0]  ;;  %v13453_v57 = vld [vmem:[#allocation19 + $0x2e0] sm:$0xf] }
 0x565   :  { %8833 = vmatpush.bf16.msrb.mxu3 %v13182_v62  ;;  %v13149_v62 = vld [vmem:[#allocation19 + $0x80] sm:$0xf]  ;;  %v11823_v51 = vld [vmem:[#allocation16 + $0x638] sm:$0xf0]  ;;  %v13253_v46 = vld [vmem:[#allocation19 + $0x150] sm:$0xf] }
 0x566   :  { %8824 = vmatpush.bf16.msrb.mxu2 %v13086_v42  ;;  %7820 = vmatpush.bf16.msra.mxu1 %v11986_v16  ;;  %v13374_v42 = vor.u32 %v14628_v37, %v13373_v41  ;;  %v11855_v16 = vld [vmem:[#allocation16 + $0x678] sm:$0xf0]  ;;  %v13461_v37 = vld [vmem:[#allocation19 + $0x2f0] sm:$0xf]  ;;  %v11826_v24 = vor.u32 %v14238_v5, %v11823_v51 }
 0x567   :  { %v11858_v10 = vor.u32 %v14246_v56, %v11855_v16  ;;  %v14550_v19 = vld [vmem:[#allocation16 + $0xfdc] sm:$0xf]  ;;  %v14598_v56 = vld [vmem:[#allocation19 + $0x154] sm:$0xf0] }
 0x568   :  { %7860 = vmatpush.bf16.msrb.mxu0 %v12722_v17  ;;  %v14542_v27 = vld [vmem:[#allocation16 + $0xf9c] sm:$0xf] }
 0x569   :  { %8825 = vmatmul.bf16.vlgmr.msrb.gmra.mxu2 %v16459_v23  ;;  %8834 = vmatpush.bf16.msrb.mxu3 %v13174_v47  ;;  %v14856_v29 = vpop.eup %14855  ;;  %v13269_v47 = vld [vmem:[#allocation19 + $0x170] sm:$0xf]  ;;  %v13039_v6 = vld [vmem:[#allocation16 + $0xfb8] sm:$0xf0] }
 0x56a   :  { %8869 = vmatpush.bf16.msra.mxu2 %v13398_v50  ;;  %v7933_v50 = vmul.f32 %v16457_v20, %v7932_v31  ;;  %7821 = vmatpush.bf16.msra.mxu1 %v11954_v52  ;;  %v14858_v32 = vpop.eup %14857  ;;  %v16481_v17 = vadd.f32 1.0, %v14856_v29  ;;  %v14650_v31 = vld [vmem:[#allocation19 + $0x2f4] sm:$0xf0]  ;;  %v13150_v52 = vor.u32 %v14572_v22, %v13149_v62  ;;  %v13270_v0 = vor.u32 %v14602_v53, %v13269_v47  ;;  %v13445_v29 = vld [vmem:[#allocation19 + $0x2d0] sm:$0xf] }
 0x56b   :  { %v16493_v38 = vadd.f32 1.0, %v14858_v32  ;;  %v13042_v30 = vor.u32 %v14542_v27, %v13039_v6  ;;  %v14534_v32 = vld [vmem:[#allocation16 + $0xf5c] sm:$0xf]  ;;  %v13437_v53 = vld [vmem:[#allocation19 + $0x2c0] sm:$0xf] }
 0x56c   :  { %v16474_v59 = vpop.f32.mrf.mxu2  ;;  %7861 = vmatpush.bf16.msrb.mxu0 %v12690_v55  ;;  %v7934_v25 = vadd.f32 %v16457_v20, %v7933_v50  ;;  %14859 = vrcp.f32 %v16481_v17  ;;  %v13462_v55 = vor.u32 %v14650_v31, %v13461_v37  ;;  %v14620_v50 = vld [vmem:[#allocation19 + $0x204] sm:$0xf0]  ;;  %v7986_v22 = vand.u32 2147483648, %v16481_v17 }
 0x56d   :  { %8835 = vmatpush.bf16.msrb.mxu3 %v13166_v9  ;;  %v14569_v9 = vld [vmem:[#allocation19 + $0x74] sm:$0xf]  ;;  %14861 = vrcp.f32 %v16493_v38  ;;  %v13342_v1 = vor.u32 %v14620_v50, %v13341_v61  ;;  %v13254_v31 = vor.u32 %v14598_v56, %v13253_v46  ;;  %vm7980_vm15 = vweird.f32 %v16481_v17  ;;  %v13111_v46 = vld [vmem:[#allocation19 + $0x38] sm:$0xf0] }
 0x56e   :  { %8870 = vmatpush.bf16.msra.mxu2 %v13390_v21  ;;  %v7569_v21 = vpop.f32.mrf.mxu1  ;;  %7822 = vmatpush.bf16.msra.mxu1 %v11922_v3  ;;  %v7938_v15 = vsel %vm16485_vm12, %v16457_v20, %v7934_v25  ;;  %v12594_v20 = vor.u32 %v14430_v39, %v12591_v2  ;;  %v13071_v3 = vld [vmem:[#allocation16 + $0xff8] sm:$0xf0]  ;;  %v7984_v2 = vand.u32 2147483647, %v16481_v17  ;;  %v7987_v5 = vor.u32 1.1754944e-38, %v7986_v22 }
 0x56f   :  { %v7943_v54 = vsel %vm7940_vm13, %v7942_v28, %v7938_v15  ;;  %v14565_v39 = vld [vmem:[#allocation19 + $0x54] sm:$0xf]  ;;  %v13245_v15 = vld [vmem:[#allocation19 + $0x140] sm:$0xf]  ;;  %v14596_v28 = vld [vmem:[#allocation19 + $0x144] sm:$0xf0]  ;;  %v7607_v50 = vadd.f32 %v16467_v26, %v16431_v14  ;;  %vm7950_vm3 = vweird.f32 %v16493_v38 }
 0x570   :  { %7862 = vmatpush.bf16.msrb.mxu0 %v12658_v35  ;;  %v16496_v58 = vpack.c.bf16 %v7943_v54, %v7943_v54  ;;  %v14648_v35 = vld [vmem:[#allocation19 + $0x2e4] sm:$0xf0]  ;;  %v14526_v54 = vld [vmem:[#allocation16 + $0xf1c] sm:$0xf]  ;;  %vm7985_vm1 = vcmp.eq.f32.partialorder %v7984_v2, 8.507059e+37 }
 0x571   :  { %8836 = vmatpush.bf16.msrb.mxu3 %v13158_v18  ;;  %v13135_v18 = vld [vmem:[#allocation19 + $0x68] sm:$0xf0]  ;;  %v13454_v16 = vor.u32 %v14648_v35, %v13453_v57  ;;  %v12975_v61 = vld [vmem:[#allocation16 + $0xf38] sm:$0xf0]  ;;  %v14642_v14 = vld [vmem:[#allocation19 + $0x2b4] sm:$0xf0] }
 0x572   :  { %8871 = vmatpush.bf16.msra.mxu2 %v13382_v34  ;;  %v13358_v34 = vor.u32 %v14624_v11, %v13357_v13  ;;  %7823 = vmatpush.bf16.msra.mxu1 %v11890_v63  ;;  %v16498_v21 = vpop.eup %14859  ;;  %v13074_v13 = vor.u32 %v14550_v19, %v13071_v3  ;;  %v13146_v11 = vor.u32 %v14569_v9, %v13143_v12  ;;  %v14567_v63 = vld [vmem:[#allocation19 + $0x64] sm:$0xf]  ;;  %v13119_v3 = vld [vmem:[#allocation19 + $0x48] sm:$0xf0]  ;;  %v13078_v56 = vmul.f32 -1.442695, %v16403_v48 }
 0x573   :  { %v7976_v40 = vmul.f32 %v16498_v21, %v16481_v17  ;;  %v13138_v60 = vor.u32 %v14567_v63, %v13135_v18  ;;  %v16505_v41 = vpop.eup %14861  ;;  %vm7981_vm14 = vweird.f32 %v16498_v21  ;;  %v13246_v19 = vor.u32 %v14596_v28, %v13245_v15  ;;  %v14561_v18 = vld [vmem:[#allocation19 + $0x34] sm:$0xf]  ;;  %v14640_v22 = vld [vmem:[#allocation19 + $0x2a4] sm:$0xf0]  ;;  %v14559_v48 = vld [vmem:[#allocation19 + $0x24] sm:$0xf] }
 0x574   :  { %7863 = vmatpush.bf16.msrb.mxu0 %v12626_v36  ;;  %v13007_v36 = vld [vmem:[#allocation16 + $0xf78] sm:$0xf0]  ;;  %vm7982_vm0 = vmor %vm7980_vm15, %vm7981_vm14  ;;  %14863 = vpow2.f32 %v13078_v56  ;;  %v13221_v15 = vld [vmem:[#allocation19 + $0x110] sm:$0xf]  ;;  %vm7951_vm2 = vweird.f32 %v16505_v41 }
 0x575   :  { %8837 = vmatpush.bf16.msrb.mxu3 %v13150_v52  ;;  %v7977_v62 = vsub.f32 1.0, %v7976_v40  ;;  %v16512_v52 = vld [vmem:[#allocation17] sm:$0xff]  ;;  %v13010_v51 = vor.u32 %v14534_v32, %v13007_v36  ;;  %v14518_v40 = vld [vmem:[#allocation16 + $0xedc] sm:$0xf]  ;;  %vm16544_vm4 = vmor %vm7950_vm3, %vm7951_vm2 }
 0x576   :  { %8872 = vmatpush.bf16.msra.mxu2 %v13374_v42  ;;  %v7686_v42 = vpop.f32.mrf.mxu2  ;;  %7824 = vmatpush.bf16.msra.mxu1 %v11858_v10  ;;  %v4481_v47 = vperm.slane %v16512_v52, 6  ;;  %v14510_v32 = vld [vmem:[#allocation16 + $0xe9c] sm:$0xf]  ;;  %v14590_v28 = vld [vmem:[#allocation19 + $0x114] sm:$0xf0] }
 0x577   :  { %v7978_v37 = vmul.f32 %v16498_v21, %v7977_v62  ;;  %v7946_v42 = vmul.f32 %v16505_v41, %v16493_v38  ;;  %v14592_v62 = vld [vmem:[#allocation19 + $0x124] sm:$0xf0] }
 0x578   :  { %7864 = vmatpush.bf16.msrb.mxu0 %v12594_v20  ;;  %8838 = vmatmul.bf16.vlgmr.msrb.gmra.mxu3 %v16496_v58  ;;  %v16518_v20 = vpop.f32.mrf.mxu0  ;;  %v7685_v57 = vadd.f32 %v16474_v59, %v4481_v47  ;;  %v12943_v59 = vld [vmem:[#allocation16 + $0xef8] sm:$0xf0]  ;;  %v13413_v47 = vld [vmem:[#allocation19 + $0x290] sm:$0xf] }
 0x579   :  { %8882 = vmatpush.bf16.msra.mxu3 %v13462_v55  ;;  %v7947_v26 = vsub.f32 1.0, %v7946_v42 }
 0x57a   :  { %8873 = vmatpush.bf16.msra.mxu2 %v13366_v45  ;;  %v13261_v45 = vld [vmem:[#allocation19 + $0x160] sm:$0xf]  ;;  %7825 = vmatpush.bf16.msra.mxu1 %v11826_v24  ;;  %v7619_v12 = vpop.f32.mrf.mxu1  ;;  %v13237_v24 = vld [vmem:[#allocation19 + $0x130] sm:$0xf] }
 0x57b   :  { %v13262_v25 = vor.u32 %v14600_v4, %v13261_v45  ;;  %7865 = vmatmul.bf16.vlgmr.msrb.gmra.mxu0 %v16250_v8  ;;  %v13127_v8 = vld [vmem:[#allocation19 + $0x58] sm:$0xf0]  ;;  %v14594_v45 = vld [vmem:[#allocation19 + $0x134] sm:$0xf0]  ;;  %v7620_v17 = vadd.f32 %v7619_v12, %v7607_v50  ;;  %v7948_v36 = vmul.f32 %v16505_v41, %v7947_v26  ;;  %v14627_v12 = vld [vmem:[#allocation19 + $0x244] sm:$0xf] }
 0x57c   :  { %8843 = vmatpush.bf16.msra.mxu0 %v13270_v0  ;;  %v13130_v55 = vor.u32 %v14565_v39, %v13127_v8  ;;  %v14563_v0 = vld [vmem:[#allocation19 + $0x44] sm:$0xf]  ;;  %v13238_v63 = vor.u32 %v14594_v45, %v13237_v24  ;;  %v12911_v39 = vld [vmem:[#allocation16 + $0xeb8] sm:$0xf0]  ;;  %v13103_v8 = vld [vmem:[#allocation19 + $0x28] sm:$0xf0] }
 0x57d   :  { %7826 = vmatmul.bf16.vlgmr.msra.gmra.mxu1 %v16180_v44  ;;  %8883 = vmatpush.bf16.msra.mxu3 %v13454_v16  ;;  %v7979_v44 = vadd.f32 %v16498_v21, %v7978_v37  ;;  %v13122_v27 = vor.u32 %v14563_v0, %v13119_v3  ;;  %v13229_v16 = vld [vmem:[#allocation19 + $0x120] sm:$0xf]  ;;  %v7949_v50 = vadd.f32 %v16505_v41, %v7948_v36  ;;  %v14588_v3 = vld [vmem:[#allocation19 + $0x104] sm:$0xf0]  ;;  %v7954_v24 = vand.u32 2147483647, %v16493_v38 }
 0x57e   :  { %8874 = vmatpush.bf16.msra.mxu2 %v13358_v34  ;;  %v14646_v34 = vld [vmem:[#allocation19 + $0x2d4] sm:$0xf0]  ;;  %7870 = vmatpush.bf16.msrb.mxu1 %v13074_v13  ;;  %v13429_v13 = vld [vmem:[#allocation19 + $0x2b0] sm:$0xf]  ;;  %v13213_v0 = vld [vmem:[#allocation19 + $0x100] sm:$0xf] }
 0x57f   :  { %v13446_v10 = vor.u32 %v14646_v34, %v13445_v29  ;;  %v7983_v9 = vsel %vm7982_vm0, %v16498_v21, %v7979_v44  ;;  %v7697_v21 = vpop.f32.mrf.mxu3  ;;  %v13430_v29 = vor.u32 %v14642_v14, %v13429_v13  ;;  %v13421_v34 = vld [vmem:[#allocation19 + $0x2a0] sm:$0xf]  ;;  %v14638_v44 = vld [vmem:[#allocation19 + $0x294] sm:$0xf0]  ;;  %v14494_v13 = vld [vmem:[#allocation16 + $0xe1c] sm:$0xf] }
 0x580   :  { %8844 = vmatpush.bf16.msra.mxu0 %v13262_v25  ;;  %v7988_v4 = vsel %vm7985_vm1, %v7987_v5, %v7983_v9  ;;  %v16531_v25 = vadd.f32 %v16433_v7, %v7620_v17  ;;  %v16533_v6 = vadd.f32 %v7697_v21, %v7685_v57  ;;  %v12946_v7 = vor.u32 %v14518_v40, %v12943_v59  ;;  %v14502_v5 = vld [vmem:[#allocation16 + $0xe5c] sm:$0xf]  ;;  %v13405_v45 = vld [vmem:[#allocation19 + $0x280] sm:$0xf]  ;;  %v13207_v26 = vld [vmem:[#allocation19 + $0xf8] sm:$0xf0] }
 0x581   :  { %8884 = vmatpush.bf16.msra.mxu3 %v13446_v10  ;;  %v16528_v35 = vpack.c.bf16 %v7988_v4, %v7988_v4  ;;  %v13422_v10 = vor.u32 %v14640_v22, %v13421_v34  ;;  %v13414_v9 = vor.u32 %v14638_v44, %v13413_v47  ;;  %v14636_v4 = vld [vmem:[#allocation19 + $0x284] sm:$0xf0]  ;;  %v14585_v14 = vld [vmem:[#allocation19 + $0xf4] sm:$0xf]  ;;  %v14555_v40 = vld [vmem:[#allocation19 + $0x4] sm:$0xf] }
 0x582   :  { %8875 = vmatpush.bf16.msra.mxu2 %v13350_v49  ;;  %v14644_v49 = vld [vmem:[#allocation19 + $0x2c4] sm:$0xf0]  ;;  %7871 = vmatpush.bf16.msrb.mxu1 %v13042_v30  ;;  %v13114_v30 = vor.u32 %v14561_v18, %v13111_v46  ;;  %v7621_v2 = vpop.f32.mrf.mxu1  ;;  %v12847_v21 = vld [vmem:[#allocation16 + $0xe38] sm:$0xf0]  ;;  %v13333_v18 = vld [vmem:[#allocation19 + $0x1f0] sm:$0xf]  ;;  %v13406_v56 = vor.u32 %v14636_v4, %v13405_v45  ;;  %v13210_v34 = vor.u32 %v14585_v14, %v13207_v26 }
 0x583   :  { %v14618_v46 = vld [vmem:[#allocation19 + $0x1f4] sm:$0xf0]  ;;  %vm7955_vm5 = vcmp.eq.f32.partialorder %v7954_v24, 8.507059e+37  ;;  %v12850_v22 = vor.u32 %v14494_v13, %v12847_v21  ;;  %v13391_v2 = vld [vmem:[#allocation19 + $0x268] sm:$0xf0] }
 0x584   :  { %8845 = vmatpush.bf16.msra.mxu0 %v13254_v31  ;;  %v13230_v31 = vor.u32 %v14592_v62, %v13229_v16  ;;  %v14633_v62 = vld [vmem:[#allocation19 + $0x274] sm:$0xf]  ;;  %v13191_v47 = vld [vmem:[#allocation19 + $0xd8] sm:$0xf0]  ;;  %v13375_v24 = vld [vmem:[#allocation19 + $0x248] sm:$0xf0] }
 0x585   :  { %v13525_v13 = vld [vmem:[#allocation19 + $0x370] sm:$0xf]  ;;  %v13378_v14 = vor.u32 %v14627_v12, %v13375_v24  ;;  %v13151_v24 = vld [vmem:[#allocation19 + $0x88] sm:$0xf0] }
 0x586   :  { %8876 = vmatpush.bf16.msra.mxu2 %v13342_v1  ;;  %v13438_v1 = vor.u32 %v14644_v49, %v13437_v53  ;;  %7872 = vmatpush.bf16.msrb.mxu1 %v13010_v51  ;;  %v12914_v53 = vor.u32 %v14510_v32, %v12911_v39  ;;  %v13106_v49 = vor.u32 %v14559_v48, %v13103_v8  ;;  %v14583_v32 = vld [vmem:[#allocation19 + $0xe4] sm:$0xf]  ;;  %v14616_v39 = vld [vmem:[#allocation19 + $0x1e4] sm:$0xf0] }
 0x587   :  { %v7699_v42 = vpop.f32.mrf.mxu3  ;;  %v13222_v51 = vor.u32 %v14590_v28, %v13221_v15  ;;  %v14631_v8 = vld [vmem:[#allocation19 + $0x264] sm:$0xf] }
 0x588   :  { %8846 = vmatpush.bf16.msra.mxu0 %v13246_v19  ;;  %8885 = vmatpush.bf16.msra.mxu3 %v13438_v1  ;;  %v7956_v19 = vand.u32 2147483648, %v16493_v38  ;;  %v14864_v1 = vpop.eup %14863  ;;  %v7953_v38 = vsel %vm16544_vm4, %v16505_v41, %v7949_v50  ;;  %v13199_v41 = vld [vmem:[#allocation19 + $0xe8] sm:$0xf0]  ;;  %v13394_v44 = vor.u32 %v14631_v8, %v13391_v2  ;;  %v14629_v42 = vld [vmem:[#allocation19 + $0x254] sm:$0xf] }
 0x589   :  { %8877 = vmatmul.bf16.vlgmr.msra.gmra.mxu2 %v16528_v35  ;;  %v16552_v16 = vadd.f32 1.0, %v14864_v1  ;;  %v13202_v15 = vor.u32 %v14583_v32, %v13199_v41  ;;  %v14579_v50 = vld [vmem:[#allocation19 + $0xc4] sm:$0xf] }
 0x58a   :  { %8921 = vmatpush.bf16.msrb.mxu2 %v13146_v11  ;;  %v12978_v11 = vor.u32 %v14526_v54, %v12975_v61  ;;  %v14557_v54 = vld [vmem:[#allocation19 + $0x14] sm:$0xf]  ;;  %v13095_v61 = vld [vmem:[#allocation19 + $0x18] sm:$0xf0]  ;;  %v7957_v59 = vor.u32 1.1754944e-38, %v7956_v19 }
 0x58b   :  { %v13098_v17 = vor.u32 %v14557_v54, %v13095_v61  ;;  %14865 = vrcp.f32 %v16552_v16  ;;  %v13183_v19 = vld [vmem:[#allocation19 + $0xc8] sm:$0xf0]  ;;  %v14623_v41 = vld [vmem:[#allocation19 + $0x224] sm:$0xf]  ;;  %vm7965_vm6 = vweird.f32 %v16552_v16 }
 0x58c   :  { %7873 = vmatpush.bf16.msrb.mxu1 %v12978_v11  ;;  %8847 = vmatpush.bf16.msra.mxu0 %v13238_v63  ;;  %v16538_v37 = vpop.f32.mrf.mxu2  ;;  %v13087_v63 = vld [vmem:[#allocation19 + $0x8] sm:$0xf0]  ;;  %v13186_v45 = vor.u32 %v14579_v50, %v13183_v19  ;;  %v14621_v50 = vld [vmem:[#allocation19 + $0x214] sm:$0xf]  ;;  %v13351_v19 = vld [vmem:[#allocation19 + $0x218] sm:$0xf0] }
 0x58d   :  { %8886 = vmatpush.bf16.msra.mxu3 %v13430_v29  ;;  %v13399_v29 = vld [vmem:[#allocation19 + $0x278] sm:$0xf0] }
 0x58e   :  { %8922 = vmatpush.bf16.msrb.mxu2 %v13138_v60  ;;  %v7660_v60 = vpop.f32.mrf.mxu0  ;;  %v13402_v36 = vor.u32 %v14633_v62, %v13399_v29  ;;  %v14575_v62 = vld [vmem:[#allocation19 + $0xa4] sm:$0xf]  ;;  %v13167_v29 = vld [vmem:[#allocation19 + $0xa8] sm:$0xf0] }
 0x58f   :  { %v13334_v60 = vor.u32 %v14618_v46, %v13333_v18  ;;  %v13170_v2 = vor.u32 %v14575_v62, %v13167_v29 }
 0x590   :  { %7874 = vmatpush.bf16.msrb.mxu1 %v12946_v7  ;;  %8848 = vmatpush.bf16.msra.mxu0 %v13230_v31  ;;  %v13090_v7 = vor.u32 %v14555_v40, %v13087_v63  ;;  %v13325_v31 = vld [vmem:[#allocation19 + $0x1e0] sm:$0xf]  ;;  %v14625_v40 = vld [vmem:[#allocation19 + $0x234] sm:$0xf]  ;;  %v13367_v63 = vld [vmem:[#allocation19 + $0x238] sm:$0xf0] }
 0x591   :  { %8887 = vmatpush.bf16.msra.mxu3 %v13422_v10  ;;  %v13326_v28 = vor.u32 %v14616_v39, %v13325_v31  ;;  %v14581_v10 = vld [vmem:[#allocation19 + $0xd4] sm:$0xf]  ;;  %v16562_v54 = vpop.eup %14865 }
 0x592   :  { %8923 = vmatpush.bf16.msrb.mxu2 %v13130_v55  ;;  %v12879_v55 = vld [vmem:[#allocation16 + $0xe78] sm:$0xf0]  ;;  %vm7966_vm10 = vweird.f32 %v16562_v54 }
 0x593   :  { %v12882_v57 = vor.u32 %v14502_v5, %v12879_v55  ;;  %v13383_v5 = vld [vmem:[#allocation19 + $0x258] sm:$0xf0]  ;;  %v13194_v55 = vor.u32 %v14581_v10, %v13191_v47  ;;  %v14573_v47 = vld [vmem:[#allocation19 + $0x94] sm:$0xf]  ;;  %vm16584_vm7 = vmor %vm7965_vm6, %vm7966_vm10 }
 0x594   :  { %7875 = vmatpush.bf16.msrb.mxu1 %v12914_v53  ;;  %8849 = vmatpush.bf16.msra.mxu0 %v13222_v51  ;;  %v7738_v11 = vpop.f32.mrf.mxu2  ;;  %v13317_v53 = vld [vmem:[#allocation19 + $0x1d0] sm:$0xf]  ;;  %v7646_v51 = vadd.f32 %v16471_v43, %v16531_v25  ;;  %v7961_v43 = vmul.f32 %v16562_v54, %v16552_v16 }
 0x595   :  { %8888 = vmatpush.bf16.msra.mxu3 %v13414_v9  ;;  %v14612_v9 = vld [vmem:[#allocation19 + $0x1c4] sm:$0xf0]  ;;  %v13301_v11 = vld [vmem:[#allocation19 + $0x1b0] sm:$0xf] }
 0x596   :  { %8924 = vmatpush.bf16.msrb.mxu2 %v13122_v27  ;;  %v13214_v27 = vor.u32 %v14588_v3, %v13213_v0  ;;  %v13386_v0 = vor.u32 %v14629_v42, %v13383_v5  ;;  %v13285_v5 = vld [vmem:[#allocation19 + $0x190] sm:$0xf] }
 0x598   :  { %7876 = vmatpush.bf16.msrb.mxu1 %v12882_v57  ;;  %8850 = vmatpush.bf16.msra.mxu0 %v13214_v27  ;;  %v16564_v3 = vpop.f32.mrf.mxu0  ;;  %v14577_v57 = vld [vmem:[#allocation19 + $0xb4] sm:$0xf]  ;;  %v14666_v27 = vld [vmem:[#allocation19 + $0x374] sm:$0xf0] }
 0x599   :  { %8889 = vmatpush.bf16.msra.mxu3 %v13406_v56  ;;  %v13293_v56 = vld [vmem:[#allocation19 + $0x1a0] sm:$0xf] }
 0x59a   :  { %8925 = vmatpush.bf16.msrb.mxu2 %v13114_v30  ;;  %v7958_v30 = vsel %vm7955_vm5, %v7957_v59, %v7953_v38  ;;  %v7671_v25 = vpop.f32.mrf.mxu1  ;;  %v13526_v38 = vor.u32 %v14666_v27, %v13525_v13  ;;  %v7962_v59 = vsub.f32 1.0, %v7961_v43  ;;  %v13501_v43 = vld [vmem:[#allocation19 + $0x340] sm:$0xf]  ;;  %v14619_v13 = vld [vmem:[#allocation19 + $0x204] sm:$0xf] }
 0x59b   :  { %v16555_v48 = vpack.c.bf16 %v7958_v30, %v7958_v30  ;;  %v16569_v26 = vpop.f32.mrf.mxu3  ;;  %v13517_v30 = vld [vmem:[#allocation19 + $0x360] sm:$0xf] }
 0x59c   :  { %7877 = vmatpush.bf16.msrb.mxu1 %v12850_v22  ;;  %8895 = vmatpush.bf16.msrb.mxu0 %v13526_v38  ;;  %v7963_v39 = vmul.f32 %v16562_v54, %v7962_v59  ;;  %v14658_v38 = vld [vmem:[#allocation19 + $0x334] sm:$0xf0] }
 0x59d   :  { %8934 = vmatpush.bf16.msrb.mxu3 %v13210_v34  ;;  %8851 = vmatmul.bf16.vlgmr.msra.gmra.mxu0 %v16555_v48  ;;  %v13370_v34 = vor.u32 %v14625_v40, %v13367_v63 }
 0x59e   :  { %8926 = vmatpush.bf16.msrb.mxu2 %v13106_v49  ;;  %v14614_v49 = vld [vmem:[#allocation19 + $0x1d4] sm:$0xf0] }
 0x59f   :  { %7878 = vmatmul.bf16.vlgmr.msrb.gmra.mxu1 %v16273_v33  ;;  %v13318_v61 = vor.u32 %v14614_v49, %v13317_v53  ;;  %v13309_v33 = vld [vmem:[#allocation19 + $0x1c0] sm:$0xf] }
 0x5a0   :  { %8856 = vmatpush.bf16.msra.mxu1 %v13334_v60  ;;  %v13310_v1 = vor.u32 %v14612_v9, %v13309_v33  ;;  %v7712_v22 = vpop.f32.mrf.mxu0  ;;  %v14664_v60 = vld [vmem:[#allocation19 + $0x364] sm:$0xf0]  ;;  %v7964_v33 = vadd.f32 %v16562_v54, %v7963_v39  ;;  %v14649_v39 = vld [vmem:[#allocation19 + $0x2f4] sm:$0xf] }
 0x5a1   :  { %8935 = vmatpush.bf16.msrb.mxu3 %v13202_v15  ;;  %v13518_v31 = vor.u32 %v14664_v60, %v13517_v30  ;;  %v13509_v15 = vld [vmem:[#allocation19 + $0x350] sm:$0xf] }
 0x5a2   :  { %8927 = vmatpush.bf16.msrb.mxu2 %v13098_v17  ;;  %v13175_v17 = vld [vmem:[#allocation19 + $0xb8] sm:$0xf0]  ;;  %v7673_v8 = vpop.f32.mrf.mxu1  ;;  %v7968_v27 = vsel %vm16584_vm7, %v16562_v54, %v7964_v33 }
 0x5a3   :  { %v13178_v18 = vor.u32 %v14577_v57, %v13175_v17  ;;  %8896 = vmatpush.bf16.msrb.mxu0 %v13518_v31  ;;  %v7751_v42 = vpop.f32.mrf.mxu3  ;;  %v7969_v57 = vand.u32 2147483647, %v16552_v16  ;;  %v13463_v8 = vld [vmem:[#allocation19 + $0x2f8] sm:$0xf0] }
 0x5a4   :  { %8857 = vmatpush.bf16.msra.mxu1 %v13326_v28  ;;  %v14662_v28 = vld [vmem:[#allocation19 + $0x354] sm:$0xf0] }
 0x5a5   :  { %8936 = vmatpush.bf16.msrb.mxu3 %v13194_v55  ;;  %v13510_v53 = vor.u32 %v14662_v28, %v13509_v15  ;;  %vm7970_vm8 = vcmp.eq.f32.partialorder %v7969_v57, 8.507059e+37  ;;  %v7711_v28 = vadd.f32 %v16564_v3, %v16533_v6  ;;  %v13469_v3 = vld [vmem:[#allocation19 + $0x300] sm:$0xf]  ;;  %v13263_v57 = vld [vmem:[#allocation19 + $0x168] sm:$0xf0] }
 0x5a6   :  { %8928 = vmatpush.bf16.msrb.mxu2 %v13090_v7  ;;  %v14608_v7 = vld [vmem:[#allocation19 + $0x1a4] sm:$0xf0] }
 0x5a7   :  { %v13294_v10 = vor.u32 %v14608_v7, %v13293_v56  ;;  %8897 = vmatpush.bf16.msrb.mxu0 %v13510_v53  ;;  %v14656_v56 = vld [vmem:[#allocation19 + $0x324] sm:$0xf0] }
 0x5a8   :  { %8858 = vmatpush.bf16.msra.mxu1 %v13318_v61  ;;  %v7971_v61 = vand.u32 2147483648, %v16552_v16  ;;  %v13493_v16 = vld [vmem:[#allocation19 + $0x330] sm:$0xf] }
 0x5a9   :  { %8929 = vmatmul.bf16.vlgmr.msrb.gmra.mxu2 %v16459_v23  ;;  %v7659_v23 = vadd.f32 %v16518_v20, %v7646_v51  ;;  %v14610_v20 = vld [vmem:[#allocation19 + $0x1b4] sm:$0xf0]  ;;  %8937 = vmatpush.bf16.msrb.mxu3 %v13186_v45  ;;  %v13354_v45 = vor.u32 %v14621_v50, %v13351_v19 }
 0x5aa   :  { %8973 = vmatpush.bf16.msra.mxu2 %v13402_v36  ;;  %v13302_v46 = vor.u32 %v14610_v20, %v13301_v11  ;;  %v13359_v36 = vld [vmem:[#allocation19 + $0x228] sm:$0xf0]  ;;  %v14606_v51 = vld [vmem:[#allocation19 + $0x194] sm:$0xf0]  ;;  %v7972_v40 = vor.u32 1.1754944e-38, %v7971_v61 }
 0x5ab   :  { %v7672_v4 = vadd.f32 %v7671_v25, %v7659_v23  ;;  %v13362_v49 = vor.u32 %v14623_v41, %v13359_v36  ;;  %v14571_v23 = vld [vmem:[#allocation19 + $0x84] sm:$0xf]  ;;  %v13286_v12 = vor.u32 %v14606_v51, %v13285_v5  ;;  %v14660_v25 = vld [vmem:[#allocation19 + $0x344] sm:$0xf0]  ;;  %v4482_v36 = vperm.slane %v16512_v52, 7 }
 0x5ac   :  { %8859 = vmatpush.bf16.msra.mxu1 %v13310_v1  ;;  %v16571_v32 = vpop.f32.mrf.mxu2  ;;  %v14604_v1 = vld [vmem:[#allocation19 + $0x184] sm:$0xf0]  ;;  %v13502_v20 = vor.u32 %v14660_v25, %v13501_v43  ;;  %v7973_v62 = vsel %vm7970_vm8, %v7972_v40, %v7968_v27  ;;  %v13455_v61 = vld [vmem:[#allocation19 + $0x2e8] sm:$0xf0]  ;;  %v14597_v27 = vld [vmem:[#allocation19 + $0x154] sm:$0xf] }
 0x5ad   :  { %v13080_v21 = vmul.f32 -1.442695, %v7672_v4  ;;  %8938 = vmatpush.bf16.msrb.mxu3 %v13178_v18  ;;  %v13277_v4 = vld [vmem:[#allocation19 + $0x180] sm:$0xf]  ;;  %v13494_v18 = vor.u32 %v14658_v38, %v13493_v16  ;;  %v16592_v22 = vpack.c.bf16 %v7973_v62, %v7973_v62  ;;  %v7789_v52 = vadd.f32 %v16571_v32, %v4482_v36  ;;  %v13271_v32 = vld [vmem:[#allocation19 + $0x178] sm:$0xf0] }
 0x5ae   :  { %8974 = vmatpush.bf16.msra.mxu2 %v13394_v44  ;;  %v13159_v44 = vld [vmem:[#allocation19 + $0x98] sm:$0xf0]  ;;  %v13278_v63 = vor.u32 %v14604_v1, %v13277_v4  ;;  %8898 = vmatpush.bf16.msrb.mxu0 %v13502_v20  ;;  %v14599_v1 = vld [vmem:[#allocation19 + $0x164] sm:$0xf]  ;;  %v14641_v40 = vld [vmem:[#allocation19 + $0x2b4] sm:$0xf] }
 0x5af   :  { %14867 = vpow2.f32 %v13080_v21  ;;  %v13162_v9 = vor.u32 %v14573_v47, %v13159_v44  ;;  %v13154_v21 = vor.u32 %v14571_v23, %v13151_v24  ;;  %v14654_v47 = vld [vmem:[#allocation19 + $0x314] sm:$0xf0]  ;;  %v14601_v23 = vld [vmem:[#allocation19 + $0x174] sm:$0xf]  ;;  %v13447_v24 = vld [vmem:[#allocation19 + $0x2d8] sm:$0xf0] }
 0x5b0   :  { %8860 = vmatpush.bf16.msra.mxu1 %v13302_v46  ;;  %v13485_v46 = vld [vmem:[#allocation19 + $0x320] sm:$0xf]  ;;  %v13274_v43 = vor.u32 %v14601_v23, %v13271_v32  ;;  %v13423_v62 = vld [vmem:[#allocation19 + $0x2a8] sm:$0xf0]  ;;  %v14591_v36 = vld [vmem:[#allocation19 + $0x124] sm:$0xf] }
 0x5b1   :  { %8939 = vmatpush.bf16.msrb.mxu3 %v13170_v2  ;;  %v13486_v54 = vor.u32 %v14656_v56, %v13485_v46  ;;  %v13247_v46 = vld [vmem:[#allocation19 + $0x148] sm:$0xf0]  ;;  %v14639_v56 = vld [vmem:[#allocation19 + $0x2a4] sm:$0xf] }
 0x5b2   :  { %8975 = vmatpush.bf16.msra.mxu2 %v13386_v0  ;;  %8899 = vmatpush.bf16.msrb.mxu0 %v13494_v18  ;;  %v14595_v18 = vld [vmem:[#allocation19 + $0x144] sm:$0xf] }
 0x5b4   :  { %8861 = vmatpush.bf16.msra.mxu1 %v13294_v10  ;;  %v7790_v17 = vpop.f32.mrf.mxu2 }
 0x5b5   :  { %v14868_v55 = vpop.eup %14867  ;;  %8940 = vmatpush.bf16.msrb.mxu3 %v13162_v9  ;;  %v14643_v17 = vld [vmem:[#allocation19 + $0x2c4] sm:$0xf] }
 0x5b6   :  { %8976 = vmatpush.bf16.msra.mxu2 %v13378_v14  ;;  %v16575_v0 = vadd.f32 1.0, %v14868_v55  ;;  %v13343_v14 = vld [vmem:[#allocation19 + $0x208] sm:$0xf0]  ;;  %8900 = vmatpush.bf16.msrb.mxu0 %v13486_v54  ;;  %v14647_v55 = vld [vmem:[#allocation19 + $0x2e4] sm:$0xf] }
 0x5b7   :  { %v13346_v59 = vor.u32 %v14619_v13, %v13343_v14  ;;  %v13458_v33 = vor.u32 %v14647_v55, %v13455_v61  ;;  %v13439_v13 = vld [vmem:[#allocation19 + $0x2c8] sm:$0xf0]  ;;  %v13266_v14 = vor.u32 %v14599_v1, %v13263_v57  ;;  %v14593_v54 = vld [vmem:[#allocation19 + $0x134] sm:$0xf]  ;;  %v13589_v61 = vld [vmem:[#allocation19 + $0x3f0] sm:$0xf] }
 0x5b8   :  { %14869 = vrcp.f32 %v16575_v0  ;;  %8862 = vmatpush.bf16.msra.mxu1 %v13286_v12  ;;  %v8001_v30 = vand.u32 2147483648, %v16575_v0  ;;  %v7999_v41 = vand.u32 2147483647, %v16575_v0  ;;  %vm7995_vm11 = vweird.f32 %v16575_v0  ;;  %v16600_v15 = vpop.f32.mrf.mxu0  ;;  %v14645_v12 = vld [vmem:[#allocation19 + $0x2d4] sm:$0xf] }
 0x5b9   :  { %8941 = vmatpush.bf16.msrb.mxu3 %v13154_v21  ;;  %v13450_v4 = vor.u32 %v14645_v12, %v13447_v24  ;;  %v13442_v20 = vor.u32 %v14643_v17, %v13439_v13  ;;  %v13255_v21 = vld [vmem:[#allocation19 + $0x158] sm:$0xf0]  ;;  %v13215_v55 = vld [vmem:[#allocation19 + $0x108] sm:$0xf0]  ;;  %v13573_v24 = vld [vmem:[#allocation19 + $0x3d0] sm:$0xf] }
 0x5ba   :  { %8977 = vmatpush.bf16.msra.mxu2 %v13370_v34  ;;  %v8002_v2 = vor.u32 1.1754944e-38, %v8001_v30  ;;  %vm8000_vm13 = vcmp.eq.f32.partialorder %v7999_v41, 8.507059e+37  ;;  %v7723_v44 = vpop.f32.mrf.mxu1  ;;  %v13258_v16 = vor.u32 %v14597_v27, %v13255_v21  ;;  %v14637_v30 = vld [vmem:[#allocation19 + $0x294] sm:$0xf]  ;;  %v13565_v1 = vld [vmem:[#allocation19 + $0x3c0] sm:$0xf] }
 0x5bb   :  { %v7724_v5 = vadd.f32 %v7723_v44, %v7711_v28  ;;  %v7801_v50 = vpop.f32.mrf.mxu3  ;;  %v14635_v28 = vld [vmem:[#allocation19 + $0x284] sm:$0xf]  ;;  %v13223_v44 = vld [vmem:[#allocation19 + $0x118] sm:$0xf0]  ;;  %v14676_v57 = vld [vmem:[#allocation19 + $0x3c4] sm:$0xf0] }
 0x5bc   :  { %8863 = vmatpush.bf16.msra.mxu1 %v13278_v63  ;;  %v16608_v6 = vadd.f32 %v7801_v50, %v7789_v52  ;;  %v13431_v63 = vld [vmem:[#allocation19 + $0x2b8] sm:$0xf0]  ;;  %v13549_v27 = vld [vmem:[#allocation19 + $0x3a0] sm:$0xf]  ;;  %v14672_v21 = vld [vmem:[#allocation19 + $0x3a4] sm:$0xf0] }
 0x5bd   :  { %v7737_v19 = vadd.f32 %v16538_v37, %v7724_v5  ;;  %v14587_v5 = vld [vmem:[#allocation19 + $0x104] sm:$0xf] }
 0x5be   :  { %8978 = vmatpush.bf16.msra.mxu2 %v13362_v49  ;;  %v14870_v29 = vpop.eup %14869  ;;  %v13466_v49 = vor.u32 %v14649_v39, %v13463_v8 }
 0x5bf   :  { %v7991_v34 = vmul.f32 %v14870_v29, %v16575_v0  ;;  %8864 = vmatmul.bf16.vlgmr.msra.gmra.mxu1 %v16592_v22  ;;  %vm7996_vm9 = vweird.f32 %v14870_v29  ;;  %v14652_v0 = vld [vmem:[#allocation19 + $0x304] sm:$0xf0] }
 0x5c0   :  { %vm7997_vm12 = vmor %vm7995_vm11, %vm7996_vm9  ;;  %v13470_v9 = vor.u32 %v14652_v0, %v13469_v3  ;;  %v7764_v25 = vpop.f32.mrf.mxu0 }
 0x5c1   :  { %v7992_v7 = vsub.f32 1.0, %v7991_v34  ;;  %v13426_v34 = vor.u32 %v14639_v56, %v13423_v62 }
 0x5c2   :  { %8979 = vmatpush.bf16.msra.mxu2 %v13354_v45  ;;  %v7725_v37 = vpop.f32.mrf.mxu1 }
 0x5c3   :  { %v7993_v60 = vmul.f32 %v14870_v29, %v7992_v7  ;;  %v7803_v11 = vpop.f32.mrf.mxu3  ;;  %v13239_v7 = vld [vmem:[#allocation19 + $0x138] sm:$0xf0] }
 0x5c4   :  { %v13242_v41 = vor.u32 %v14593_v54, %v13239_v7  ;;  %v14674_v11 = vld [vmem:[#allocation19 + $0x3b4] sm:$0xf0]  ;;  %v13527_v54 = vld [vmem:[#allocation19 + $0x378] sm:$0xf0]  ;;  %v13541_v7 = vld [vmem:[#allocation19 + $0x390] sm:$0xf] }
 0x5c5   :  { %v7994_v31 = vadd.f32 %v14870_v29, %v7993_v60  ;;  %v13415_v60 = vld [vmem:[#allocation19 + $0x298] sm:$0xf0] }
 0x5c6   :  { %8980 = vmatpush.bf16.msra.mxu2 %v13346_v59  ;;  %v13434_v59 = vor.u32 %v14641_v40, %v13431_v63  ;;  %v13418_v39 = vor.u32 %v14637_v30, %v13415_v60  ;;  %v14670_v30 = vld [vmem:[#allocation19 + $0x394] sm:$0xf0] }
 0x5c7   :  { %v7998_v10 = vsel %vm7997_vm12, %v14870_v29, %v7994_v31  ;;  %v13250_v29 = vor.u32 %v14595_v18, %v13247_v46  ;;  %v13231_v31 = vld [vmem:[#allocation19 + $0x128] sm:$0xf0] }
 0x5c8   :  { %v8003_v53 = vsel %vm8000_vm13, %v8002_v2, %v7998_v10  ;;  %v13234_v8 = vor.u32 %v14591_v36, %v13231_v31  ;;  %v7750_v2 = vadd.f32 %v16569_v26, %v7737_v19  ;;  %v13407_v10 = vld [vmem:[#allocation19 + $0x288] sm:$0xf0]  ;;  %v13218_v26 = vor.u32 %v14587_v5, %v13215_v55  ;;  %v14682_v19 = vld [vmem:[#allocation19 + $0x3f4] sm:$0xf0]  ;;  %v14617_v55 = vld [vmem:[#allocation19 + $0x1f4] sm:$0xf] }
 0x5c9   :  { %8981 = vmatmul.bf16.vlgmr.msra.gmra.mxu2 %v16528_v35  ;;  %v13477_v35 = vld [vmem:[#allocation19 + $0x310] sm:$0xf]  ;;  %v16605_v51 = vpack.c.bf16 %v8003_v53, %v8003_v53  ;;  %v13590_v0 = vor.u32 %v14682_v19, %v13589_v61  ;;  %v13542_v36 = vor.u32 %v14670_v30, %v13541_v7  ;;  %v13335_v61 = vld [vmem:[#allocation19 + $0x1f8] sm:$0xf0]  ;;  %v14651_v30 = vld [vmem:[#allocation19 + $0x304] sm:$0xf] }
 0x5ca   :  { %v13478_v42 = vor.u32 %v14654_v47, %v13477_v35  ;;  %v13410_v35 = vor.u32 %v14635_v28, %v13407_v10  ;;  %v14589_v47 = vld [vmem:[#allocation19 + $0x114] sm:$0xf]  ;;  %v7763_v53 = vadd.f32 %v16600_v15, %v7750_v2  ;;  %v13581_v15 = vld [vmem:[#allocation19 + $0x3e0] sm:$0xf]  ;;  %v14663_v10 = vld [vmem:[#allocation19 + $0x364] sm:$0xf] }
 0x5cb   :  { %8890 = vmatmul.bf16.vlgmr.msra.gmra.mxu3 %v16605_v51  ;;  %8908 = vmatpush.bf16.msrb.mxu1 %v13590_v0  ;;  %v13511_v0 = vld [vmem:[#allocation19 + $0x358] sm:$0xf0] }
 0x5cc   :  { %8901 = vmatpush.bf16.msrb.mxu0 %v13478_v42  ;;  %8986 = vmatpush.bf16.msra.mxu3 %v13466_v49  ;;  %v16611_v45 = vpop.f32.mrf.mxu2  ;;  %v13226_v49 = vor.u32 %v14589_v47, %v13223_v44 }
 0x5d0   :  { %8902 = vmatpush.bf16.msrb.mxu0 %v13470_v9  ;;  %8987 = vmatpush.bf16.msra.mxu3 %v13458_v33  ;;  %v14680_v9 = vld [vmem:[#allocation19 + $0x3e4] sm:$0xf0] }
 0x5d1   :  { %v13582_v32 = vor.u32 %v14680_v9, %v13581_v15  ;;  %v14615_v15 = vld [vmem:[#allocation19 + $0x1e4] sm:$0xf]  ;;  %v13327_v9 = vld [vmem:[#allocation19 + $0x1e8] sm:$0xf0] }
 0x5d3   :  { %8909 = vmatpush.bf16.msrb.mxu1 %v13582_v32 }
 0x5d4   :  { %8947 = vmatpush.bf16.msra.mxu0 %v13274_v43  ;;  %8988 = vmatpush.bf16.msra.mxu3 %v13450_v4  ;;  %v7842_v38 = vpop.f32.mrf.mxu2  ;;  %v14678_v43 = vld [vmem:[#allocation19 + $0x3d4] sm:$0xf0] }
 0x5d5   :  { %v13574_v37 = vor.u32 %v14678_v43, %v13573_v24  ;;  %v14659_v24 = vld [vmem:[#allocation19 + $0x344] sm:$0xf]  ;;  %v13503_v43 = vld [vmem:[#allocation19 + $0x348] sm:$0xf0] }
 0x5d7   :  { %8910 = vmatpush.bf16.msrb.mxu1 %v13574_v37  ;;  %v13319_v37 = vld [vmem:[#allocation19 + $0x1d8] sm:$0xf0] }
 0x5d8   :  { %8948 = vmatpush.bf16.msra.mxu0 %v13266_v14  ;;  %8989 = vmatpush.bf16.msra.mxu3 %v13442_v20  ;;  %v13557_v14 = vld [vmem:[#allocation19 + $0x3b0] sm:$0xf] }
 0x5d9   :  { %v13558_v20 = vor.u32 %v14674_v11, %v13557_v14  ;;  %v13311_v14 = vld [vmem:[#allocation19 + $0x1c8] sm:$0xf0] }
 0x5da   :  { %v7775_v42 = vpop.f32.mrf.mxu1 }
 0x5db   :  { %8942 = vmatmul.bf16.vlgmr.msrb.gmra.mxu3 %v16496_v58  ;;  %v16615_v58 = vpop.f32.mrf.mxu0  ;;  %v7776_v52 = vadd.f32 %v7775_v42, %v7763_v53  ;;  %v16618_v50 = vpop.f32.mrf.mxu3  ;;  %v13519_v53 = vld [vmem:[#allocation19 + $0x368] sm:$0xf0]  ;;  %v14668_v42 = vld [vmem:[#allocation19 + $0x384] sm:$0xf0] }
 0x5dc   :  { %8949 = vmatpush.bf16.msra.mxu0 %v13258_v16  ;;  %8990 = vmatpush.bf16.msra.mxu3 %v13434_v59  ;;  %v13550_v16 = vor.u32 %v14672_v21, %v13549_v27  ;;  %v16621_v59 = vld [vmem:[#allocation20] sm:$0x3]  ;;  %v7815_v31 = vadd.f32 %v16615_v58, %v16608_v6  ;;  %v13522_v19 = vor.u32 %v14663_v10, %v13519_v53  ;;  %v14655_v27 = vld [vmem:[#allocation19 + $0x324] sm:$0xf]  ;;  %v13487_v21 = vld [vmem:[#allocation19 + $0x328] sm:$0xf0] }
 0x5dd   :  { %v13081_v3 = vmul.f32 -1.442695, %v7776_v52  ;;  %v8173_v62 = vperm.slane %v16621_v59, 0 }
 0x5df   :  { %14871 = vpow2.f32 %v13081_v3  ;;  %v14661_v3 = vld [vmem:[#allocation19 + $0x354] sm:$0xf] }
 0x5e0   :  { %8950 = vmatpush.bf16.msra.mxu0 %v13250_v29  ;;  %8991 = vmatpush.bf16.msra.mxu3 %v13426_v34  ;;  %v14665_v29 = vld [vmem:[#allocation19 + $0x374] sm:$0xf] }
 0x5e1   :  { %v13530_v28 = vor.u32 %v14665_v29, %v13527_v54  ;;  %v13295_v29 = vld [vmem:[#allocation19 + $0x1a8] sm:$0xf0] }
 0x5e2   :  { %v7777_v12 = vpop.f32.mrf.mxu1 }
 0x5e3   :  { %v7816_v33 = vpop.f32.mrf.mxu0  ;;  %v7855_v25 = vpop.f32.mrf.mxu3  ;;  %v13514_v12 = vor.u32 %v14661_v3, %v13511_v0 }
 0x5e4   :  { %8951 = vmatpush.bf16.msra.mxu0 %v13242_v41  ;;  %8992 = vmatpush.bf16.msra.mxu3 %v13418_v39  ;;  %v14613_v25 = vld [vmem:[#allocation19 + $0x1d4] sm:$0xf] }
 0x5e5   :  { %v14872_v4 = vpop.eup %14871 }
 0x5e6   :  { %v7913_v17 = vadd.f32 1.0, %v14872_v4  ;;  %v13322_v4 = vor.u32 %v14613_v25, %v13319_v37  ;;  %v14679_v25 = vld [vmem:[#allocation19 + $0x3e4] sm:$0xf]  ;;  %v13583_v37 = vld [vmem:[#allocation19 + $0x3e8] sm:$0xf0] }
 0x5e8   :  { %8952 = vmatpush.bf16.msra.mxu0 %v13234_v8  ;;  %8993 = vmatpush.bf16.msra.mxu3 %v13410_v35  ;;  %14873 = vrcp.f32 %v7913_v17  ;;  %v8016_v18 = vand.u32 2147483648, %v7913_v17  ;;  %v8014_v56 = vand.u32 2147483647, %v7913_v17  ;;  %vm8010_vm15 = vweird.f32 %v7913_v17 }
 0x5ea   :  { %v8017_v60 = vor.u32 1.1754944e-38, %v8016_v18  ;;  %vm8015_vm1 = vcmp.eq.f32.partialorder %v8014_v56, 8.507059e+37  ;;  %v14653_v18 = vld [vmem:[#allocation19 + $0x314] sm:$0xf] }
 0x5eb   :  { %8994 = vmatmul.bf16.vlgmr.msra.gmra.mxu3 %v16605_v51  ;;  %v13566_v51 = vor.u32 %v14676_v57, %v13565_v1  ;;  %v13506_v1 = vor.u32 %v14659_v24, %v13503_v43  ;;  %v14657_v57 = vld [vmem:[#allocation19 + $0x334] sm:$0xf] }
 0x5ec   :  { %8953 = vmatpush.bf16.msra.mxu0 %v13226_v49  ;;  %v8826_v23 = vpop.f32.mrf.mxu2  ;;  %v13533_v49 = vld [vmem:[#allocation19 + $0x380] sm:$0xf] }
 0x5ed   :  { %8911 = vmatpush.bf16.msrb.mxu1 %v13566_v51  ;;  %v8827_v35 = vadd.f32 %v8826_v23, %v8173_v62  ;;  %v13534_v5 = vor.u32 %v14668_v42, %v13533_v49  ;;  %v13330_v23 = vor.u32 %v14615_v15, %v13327_v9  ;;  %v14607_v62 = vld [vmem:[#allocation19 + $0x1a4] sm:$0xf]  ;;  %v14681_v15 = vld [vmem:[#allocation19 + $0x3f4] sm:$0xf]  ;;  %v13591_v9 = vld [vmem:[#allocation19 + $0x3f8] sm:$0xf0] }
 0x5ee   :  { %v14874_v40 = vpop.eup %14873  ;;  %v13594_v43 = vor.u32 %v14681_v15, %v13591_v9  ;;  %v14697_v15 = vld [vmem:[%s16767_s16 + $0x70] sm:$0xff] }
 0x5ef   :  { %v8006_v63 = vmul.f32 %v14874_v40, %v7913_v17  ;;  %vm8011_vm14 = vweird.f32 %v14874_v40  ;;  %v13495_v17 = vld [vmem:[#allocation19 + $0x338] sm:$0xf0] }
 0x5f0   :  { %8954 = vmatpush.bf16.msra.mxu0 %v13218_v26  ;;  %vm8012_vm0 = vmor %vm8010_vm15, %vm8011_vm14  ;;  %v13338_v26 = vor.u32 %v14617_v55, %v13335_v61  ;;  %vm9225_vm14 = vcmask 31744   ;;  %vm9256_vm15 = vcmask 1043456  }
 0x5f1   :  { %8912 = vmatpush.bf16.msrb.mxu1 %v13558_v20  ;;  %v8007_v38 = vsub.f32 1.0, %v8006_v63  ;;  %v13498_v20 = vor.u32 %v14657_v57, %v13495_v17  ;;  %v13303_v63 = vld [vmem:[#allocation19 + $0x1b8] sm:$0xf0]  ;;  %v14677_v57 = vld [vmem:[#allocation19 + $0x3d4] sm:$0xf] }
 0x5f2   :  { %v13575_v17 = vld [vmem:[#allocation19 + $0x3d8] sm:$0xf0] }
 0x5f3   :  { %v8008_v46 = vmul.f32 %v14874_v40, %v8007_v38  ;;  %v13490_v38 = vor.u32 %v14655_v27, %v13487_v21  ;;  %v13567_v27 = vld [vmem:[#allocation19 + $0x3c8] sm:$0xf0] }
 0x5f4   :  { %v8828_v13 = vpop.f32.mrf.mxu2 }
 0x5f5   :  { %8913 = vmatpush.bf16.msrb.mxu1 %v13550_v16  ;;  %v8009_v34 = vadd.f32 %v14874_v40, %v8008_v46  ;;  %v14611_v13 = vld [vmem:[#allocation19 + $0x1c4] sm:$0xf]  ;;  %v13479_v46 = vld [vmem:[#allocation19 + $0x318] sm:$0xf0] }
 0x5f6   :  { %v13314_v11 = vor.u32 %v14611_v13, %v13311_v14  ;;  %v13482_v54 = vor.u32 %v14653_v18, %v13479_v46  ;;  %v14671_v46 = vld [vmem:[#allocation19 + $0x3a4] sm:$0xf] }
 0x5f7   :  { %v8013_v39 = vsel %vm8012_vm0, %v14874_v40, %v8009_v34  ;;  %v14609_v40 = vld [vmem:[#allocation19 + $0x1b4] sm:$0xf]  ;;  %v13298_v34 = vor.u32 %v14607_v62, %v13295_v29 }
 0x5f8   :  { %v16624_v41 = vpop.f32.mrf.mxu0  ;;  %v8018_v2 = vsel %vm8015_vm1, %v8017_v60, %v8013_v39  ;;  %v13306_v16 = vor.u32 %v14609_v40, %v13303_v63  ;;  %v13471_v60 = vld [vmem:[#allocation19 + $0x308] sm:$0xf0]  ;;  %v14673_v40 = vld [vmem:[#allocation19 + $0x3b4] sm:$0xf]  ;;  %v13559_v63 = vld [vmem:[#allocation19 + $0x3b8] sm:$0xf0] }
 0x5f9   :  { %8914 = vmatpush.bf16.msrb.mxu1 %v13542_v36  ;;  %v16628_v44 = vpack.c.bf16 %v8018_v2, %v8018_v2  ;;  %v14605_v36 = vld [vmem:[#allocation19 + $0x194] sm:$0xf] }
 0x5fa   :  { %v7827_v8 = vpop.f32.mrf.mxu1  ;;  %v14669_v29 = vld [vmem:[#allocation19 + $0x394] sm:$0xf] }
 0x5fb   :  { %v7828_v47 = vadd.f32 %v7827_v8, %v7815_v31  ;;  %v8839_v52 = vpop.f32.mrf.mxu3  ;;  %8903 = vmatmul.bf16.vlgmr.msrb.gmra.mxu0 %v16628_v44  ;;  %v13287_v31 = vld [vmem:[#allocation19 + $0x198] sm:$0xf0]  ;;  %v13474_v8 = vor.u32 %v14651_v30, %v13471_v60  ;;  %v8174_v30 = vperm.slane %v16621_v59, 1  ;;  %v14667_v60 = vld [vmem:[#allocation19 + $0x384] sm:$0xf] }
 0x5fc   :  { %v8840_v58 = vadd.f32 %v8839_v52, %v8827_v35  ;;  %8999 = vmatpush.bf16.msrb.mxu0 %v13530_v28  ;;  %v14603_v35 = vld [vmem:[#allocation19 + $0x184] sm:$0xf]  ;;  %v14690_v59 = vld [vmem:[%s16767_s16 + $0x38] sm:$0xff] }
 0x5fd   :  { %v7841_v6 = vadd.f32 %v16611_v45, %v7828_v47  ;;  %8915 = vmatpush.bf16.msrb.mxu1 %v13534_v5  ;;  %v13279_v47 = vld [vmem:[#allocation19 + $0x188] sm:$0xf0]  ;;  %9199 = vmatpush.bf16.msrb.mxu2 %v14690_v59 }
 0x5fe   :  { %v13282_v49 = vor.u32 %v14603_v35, %v13279_v47 }
 0x5ff   :  { %v7854_v7 = vadd.f32 %v16618_v50, %v7841_v6 }
 0x600   :  { %v7868_v33 = vpop.f32.mrf.mxu0  ;;  %9000 = vmatpush.bf16.msrb.mxu0 %v13522_v19 }
 0x601   :  { %8960 = vmatpush.bf16.msra.mxu1 %v13338_v26  ;;  %v7867_v28 = vadd.f32 %v16624_v41, %v7854_v7 }
 0x602   :  { %v7829_v32 = vpop.f32.mrf.mxu1 }
 0x603   :  { %v8841_v45 = vpop.f32.mrf.mxu3 }
 0x604   :  { %9001 = vmatpush.bf16.msrb.mxu0 %v13514_v12 }
 0x605   :  { %8961 = vmatpush.bf16.msra.mxu1 %v13330_v23 }
 0x608   :  { %9002 = vmatpush.bf16.msrb.mxu0 %v13506_v1  ;;  %v13586_v1 = vor.u32 %v14679_v25, %v13583_v37 }
 0x609   :  { %8962 = vmatpush.bf16.msra.mxu1 %v13322_v4 }
 0x60b   :  { %8955 = vmatmul.bf16.vlgmr.msra.gmra.mxu0 %v16555_v48  ;;  %v13290_v48 = vor.u32 %v14605_v36, %v13287_v31  ;;  %v13535_v36 = vld [vmem:[#allocation19 + $0x388] sm:$0xf0] }
 0x60c   :  { %v16632_v51 = vpop.f32.mrf.mxu2  ;;  %9003 = vmatpush.bf16.msrb.mxu0 %v13498_v20  ;;  %v14675_v20 = vld [vmem:[#allocation19 + $0x3c4] sm:$0xf]  ;;  %v13538_v31 = vor.u32 %v14667_v60, %v13535_v36 }
 0x60d   :  { %8963 = vmatpush.bf16.msra.mxu1 %v13314_v11  ;;  %v13578_v11 = vor.u32 %v14677_v57, %v13575_v17  ;;  %v13570_v21 = vor.u32 %v14675_v20, %v13567_v27  ;;  %v14692_v27 = vld [vmem:[%s16767_s16 + $0x48] sm:$0xff] }
 0x610   :  { %9004 = vmatpush.bf16.msrb.mxu0 %v13490_v38 }
 0x611   :  { %8964 = vmatpush.bf16.msra.mxu1 %v13306_v16 }
 0x614   :  { %v8880_v56 = vpop.f32.mrf.mxu2  ;;  %9005 = vmatpush.bf16.msrb.mxu0 %v13482_v54 }
 0x615   :  { %8965 = vmatpush.bf16.msra.mxu1 %v13298_v34  ;;  %v13551_v56 = vld [vmem:[#allocation19 + $0x3a8] sm:$0xf0]  ;;  %v13543_v34 = vld [vmem:[#allocation19 + $0x398] sm:$0xf0] }
 0x616   :  { %v13554_v62 = vor.u32 %v14671_v46, %v13551_v56  ;;  %v13546_v7 = vor.u32 %v14669_v29, %v13543_v34 }
 0x618   :  { %9006 = vmatpush.bf16.msrb.mxu0 %v13474_v8 }
 0x619   :  { %8966 = vmatpush.bf16.msra.mxu1 %v13290_v48 }
 0x61a   :  { %v8852_v39 = vpop.f32.mrf.mxu0 }
 0x61b   :  { %v8853_v2 = vadd.f32 %v8852_v39, %v8840_v58  ;;  %9007 = vmatmul.bf16.vlgmr.msrb.gmra.mxu0 %v16628_v44 }
 0x61c   :  { %v7879_v10 = vpop.f32.mrf.mxu1 }
 0x61d   :  { %v7880_v53 = vadd.f32 %v7879_v10, %v7867_v28  ;;  %8967 = vmatpush.bf16.msra.mxu1 %v13282_v49 }
 0x61f   :  { %v13082_v50 = vmul.f32 -1.442695, %v7880_v53 }
 0x621   :  { %14875 = vpow2.f32 %v13082_v50 }
 0x622   :  { %v8854_v42 = vpop.f32.mrf.mxu0 }
 0x623   :  { %v14689_v42 = vld [vmem:[%s16767_s16 + $0x30] sm:$0xff] }
 0x624   :  { %v7881_v5 = vpop.f32.mrf.mxu1  ;;  %9200 = vmatpush.bf16.msrb.mxu2 %v14689_v42 }
 0x627   :  { %v14876_v55 = vpop.eup %14875 }
 0x628   :  { %v7914_v61 = vadd.f32 1.0, %v14876_v55  ;;  %v14687_v55 = vld [vmem:[%s16767_s16 + $0x20] sm:$0xff] }
 0x62a   :  { %14877 = vrcp.f32 %v7914_v61  ;;  %v8031_v19 = vand.u32 2147483648, %v7914_v61  ;;  %v8029_v0 = vand.u32 2147483647, %v7914_v61  ;;  %vm8025_vm3 = vweird.f32 %v7914_v61 }
 0x62c   :  { %v16638_v52 = vpop.f32.mrf.mxu2  ;;  %v8032_v44 = vor.u32 1.1754944e-38, %v8031_v19  ;;  %vm8030_vm5 = vcmp.eq.f32.partialorder %v8029_v0, 8.507059e+37  ;;  %v14698_v0 = vld [vmem:[%s16767_s16 + $0x78] sm:$0xff] }
 0x62d   :  { %v8931_v48 = vadd.f32 %v16638_v52, %v8174_v30  ;;  %v14688_v52 = vld [vmem:[%s16767_s16 + $0x28] sm:$0xff]  ;;  %9212 = vmatpush.bf16.msrb.mxu3 %v14698_v0 }
 0x62e   :  { %9201 = vmatpush.bf16.msrb.mxu2 %v14688_v52 }
 0x630   :  { %v14878_v6 = vpop.eup %14877 }
 0x631   :  { %v8021_v58 = vmul.f32 %v14878_v6, %v7914_v61  ;;  %vm8026_vm2 = vweird.f32 %v14878_v6  ;;  %v14686_v61 = vld [vmem:[%s16767_s16 + $0x18] sm:$0xff]  ;;  %9213 = vmatpush.bf16.msrb.mxu3 %v14697_v15 }
 0x632   :  { %vm8027_vm4 = vmor %vm8025_vm3, %vm8026_vm2  ;;  %9202 = vmatpush.bf16.msrb.mxu2 %v14687_v55 }
 0x633   :  { %v8022_v26 = vsub.f32 1.0, %v8021_v58  ;;  %v14683_v58 = vld [vmem:[%s16767_s16] sm:$0xff] }
 0x634   :  { %v8932_v41 = vpop.f32.mrf.mxu2 }
 0x635   :  { %v8023_v3 = vmul.f32 %v14878_v6, %v8022_v26  ;;  %v14685_v41 = vld [vmem:[%s16767_s16 + $0x10] sm:$0xff] }
 0x636   :  { %9203 = vmatpush.bf16.msrb.mxu2 %v14686_v61 }
 0x637   :  { %v8024_v33 = vadd.f32 %v14878_v6, %v8023_v3 }
 0x639   :  { %v8028_v32 = vsel %vm8027_vm4, %v14878_v6, %v8024_v33  ;;  %v14684_v6 = vld [vmem:[%s16767_s16 + $0x8] sm:$0xff]  ;;  %vm9281_vm4 = vcmask 261120  }
 0x63a   :  { %v8033_v24 = vsel %vm8030_vm5, %v8032_v44, %v8028_v32  ;;  %9204 = vmatpush.bf16.msrb.mxu2 %v14685_v41  ;;  %v14696_v44 = vld [vmem:[%s16767_s16 + $0x68] sm:$0xff] }
 0x63b   :  { %v8042_v45 = vpack.c.bf16 %v8033_v24, %v8033_v24  ;;  %9214 = vmatpush.bf16.msrb.mxu3 %v14696_v44 }
 0x63c   :  { %v8865_v23 = vpop.f32.mrf.mxu1 }
 0x63d   :  { %v8866_v12 = vadd.f32 %v8865_v23, %v8853_v2  ;;  %8916 = vmatmul.bf16.vlgmr.msrb.gmra.mxu1 %v8042_v45 }
 0x63e   :  { %9012 = vmatpush.bf16.msrb.mxu1 %v13594_v43  ;;  %9205 = vmatpush.bf16.msrb.mxu2 %v14684_v6  ;;  %v14694_v43 = vld [vmem:[%s16767_s16 + $0x58] sm:$0xff] }
 0x63f   :  { %v8879_v4 = vadd.f32 %v16632_v51, %v8866_v12  ;;  %v13562_v51 = vor.u32 %v14673_v40, %v13559_v63  ;;  %v14695_v12 = vld [vmem:[%s16767_s16 + $0x60] sm:$0xff] }
 0x640   :  { %9215 = vmatpush.bf16.msrb.mxu3 %v14695_v12 }
 0x642   :  { %9013 = vmatpush.bf16.msrb.mxu1 %v13586_v1  ;;  %9206 = vmatpush.bf16.msrb.mxu2 %v14683_v58  ;;  %v9227_v58 = vld [vmem:[#allocation23] sm:$0xf] }
 0x643   :  { %13661 = vmatpush.msk.msra.mxu0 %vm9256_vm15, %v9227_v58 }
 0x644   :  { %v8867_v14 = vpop.f32.mrf.mxu1  ;;  %9216 = vmatpush.bf16.msrb.mxu3 %v14694_v43  ;;  %v9297_v43 = vld [vmem:[#allocation2] sm:$0xff] }
 0x646   :  { %9014 = vmatpush.bf16.msrb.mxu1 %v13578_v11 }
 0x64a   :  { %9015 = vmatpush.bf16.msrb.mxu1 %v13570_v21 }
 0x64c   :  { %v16641_v13 = vpop.f32.mrf.mxu2 }
 0x64d   :  { %8968 = vmatmul.bf16.vlgmr.msra.gmra.mxu1 %v16592_v22 }
 0x64e   :  { %v8891_v38 = vpop.f32.mrf.mxu3  ;;  %9016 = vmatpush.bf16.msrb.mxu1 %v13562_v51 }
 0x64f   :  { %v8892_v18 = vadd.f32 %v8891_v38, %v8879_v4  ;;  %v14693_v4 = vld [vmem:[%s16767_s16 + $0x50] sm:$0xff] }
 0x650   :  { %9217 = vmatpush.bf16.msrb.mxu3 %v14693_v4 }
 0x652   :  { %9017 = vmatpush.bf16.msrb.mxu1 %v13554_v62 }
 0x654   :  { %v8984_v16 = vpop.f32.mrf.mxu2  ;;  %9218 = vmatpush.bf16.msrb.mxu3 %v14692_v27  ;;  %v9357_v27 = vld [vmem:[%s16848_s3] sm:$0xff] }
 0x656   :  { %v8893_v54 = vpop.f32.mrf.mxu3  ;;  %9018 = vmatpush.bf16.msrb.mxu1 %v13546_v7 }
 0x65a   :  { %9019 = vmatpush.bf16.msrb.mxu1 %v13538_v31 }
 0x65d   :  { %9020 = vmatmul.bf16.vlgmr.msrb.gmra.mxu1 %v8042_v45 }
 0x65e   :  { %v8943_v39 = vpop.f32.mrf.mxu3 }
 0x65f   :  { %v8944_v8 = vadd.f32 %v8943_v39, %v8931_v48 }
 0x666   :  { %v8945_v22 = vpop.f32.mrf.mxu3 }
 0x66e   :  { %v8995_v2 = vpop.f32.mrf.mxu3 }
 0x676   :  { %v8997_v28 = vpop.f32.mrf.mxu3 }
 0x678   :  { %v8904_v10 = vpop.f32.mrf.mxu0 }
 0x679   :  { %v8905_v26 = vadd.f32 %v8904_v10, %v8892_v18 }
 0x680   :  { %v8906_v35 = vpop.f32.mrf.mxu0 }
 0x688   :  { %v8956_v47 = vpop.f32.mrf.mxu0 }
 0x689   :  { %v8957_v53 = vadd.f32 %v8956_v47, %v8944_v8  ;;  %v14734_v47 = vld [vmem:[#allocation22] ss:$0 sm:$0xff] }
 0x690   :  { %v8958_v49 = vpop.f32.mrf.mxu0 }
 0x698   :  { %v9008_v50 = vpop.f32.mrf.mxu0 }
 0x6a0   :  { %v9010_v5 = vpop.f32.mrf.mxu0 }
 0x6ba   :  { %v8917_v19 = vpop.f32.mrf.mxu1 }
 0x6bb   :  { %v8918_v3 = vadd.f32 %v8917_v19, %v8905_v26 }
 0x6bd   :  { %v13595_v33 = vmul.f32 -1.442695, %v8918_v3 }
 0x6bf   :  { %14879 = vpow2.f32 %v13595_v33 }
 0x6c2   :  { %v8919_v9 = vpop.f32.mrf.mxu1 }
 0x6c5   :  { %v14880_v23 = vpop.eup %14879 }
 0x6c6   :  { %v9031_v32 = vadd.f32 1.0, %v14880_v23 }
 0x6c8   :  { %14881 = vrcp.f32 %v9031_v32  ;;  %v9044_v17 = vand.u32 2147483648, %v9031_v32  ;;  %v9042_v20 = vand.u32 2147483647, %v9031_v32  ;;  %vm9038_vm6 = vweird.f32 %v9031_v32 }
 0x6ca   :  { %v8969_v24 = vpop.f32.mrf.mxu1  ;;  %v9045_v63 = vor.u32 1.1754944e-38, %v9044_v17  ;;  %vm9043_vm8 = vcmp.eq.f32.partialorder %v9042_v20, 8.507059e+37  ;;  %v9388_v17 = vld [vmem:[%s16770_s19 + $0x18] sm:$0xff]  ;;  %v9385_v20 = vld [vmem:[%s16770_s19] sm:$0xff] }
 0x6cb   :  { %v8970_v45 = vadd.f32 %v8969_v24, %v8957_v53  ;;  %9404 = vmatpush.msrb.mxu0 %v9388_v17 }
 0x6cd   :  { %v8983_v57 = vadd.f32 %v16641_v13, %v8970_v45  ;;  %v14691_v13 = vld [vmem:[%s16767_s16 + $0x40] sm:$0xff]  ;;  %v9298_v45 = vmul.f32 %v9297_v43, %v9297_v43 }
 0x6ce   :  { %v14882_v25 = vpop.eup %14881  ;;  %9219 = vmatpush.bf16.msrb.mxu3 %v14691_v13 }
 0x6cf   :  { %v9034_v37 = vmul.f32 %v14882_v25, %v9031_v32  ;;  %vm9039_vm10 = vweird.f32 %v14882_v25  ;;  %v8996_v21 = vadd.f32 %v8995_v2, %v8983_v57 }
 0x6d0   :  { %vm9040_vm7 = vmor %vm9038_vm6, %vm9039_vm10 }
 0x6d1   :  { %v9035_v1 = vsub.f32 1.0, %v9034_v37  ;;  %v9009_v18 = vadd.f32 %v9008_v50, %v8996_v21  ;;  %v15329_v21 = vmov 0  }
 0x6d2   :  { %v8971_v14 = vpop.f32.mrf.mxu1  ;;  %14730 = vset.pattern.permute.xlu1 %v15329_v21  ;;  %14731 = vset.pattern.permute.xlu0 %v15329_v21 }
 0x6d3   :  { %v9036_v11 = vmul.f32 %v14882_v25, %v9035_v1  ;;  %v9387_v14 = vld [vmem:[%s16770_s19 + $0x10] sm:$0xff] }
 0x6d4   :  { %9405 = vmatpush.msrb.mxu0 %v9387_v14 }
 0x6d5   :  { %v9037_v40 = vadd.f32 %v14882_v25, %v9036_v11  ;;  %v9386_v11 = vld [vmem:[%s16770_s19 + $0x8] sm:$0xff] }
 0x6d6   :  { %9406 = vmatpush.msrb.mxu0 %v9386_v11 }
 0x6d7   :  { %v9041_v16 = vsel %vm9040_vm7, %v14882_v25, %v9037_v40  ;;  %v9299_v25 = vsel %vm9281_vm4, %v9298_v45, 0.0 }
 0x6d8   :  { %v9046_v38 = vsel %vm9043_vm8, %v9045_v63, %v9041_v16  ;;  %9300 = vadd.xlane.f32.xlu2 %v9299_v25  ;;  %9407 = vmatpush.msrb.mxu0 %v9385_v20 }
 0x6d9   :  { %v9065_v51 = vpack.c.bf16 %v9046_v38, %v9046_v38  ;;  %9063 = vst [vmem:[#allocation26] sm:$0xff] %v9046_v38 }
 0x6da   :  { %v9021_v46 = vpop.f32.mrf.mxu1 }
 0x6db   :  { %v9022_v56 = vadd.f32 %v9021_v46, %v9009_v18  ;;  %9207 = vmatmul.bf16.vlgmr.msrb.gmra.mxu2 %v9065_v51 }
 0x6dd   :  { %v13596_v62 = vmul.f32 -1.442695, %v9022_v56 }
 0x6df   :  { %14883 = vpow2.f32 %v13596_v62 }
 0x6e2   :  { %v9023_v29 = vpop.f32.mrf.mxu1 }
 0x6e5   :  { %v14884_v34 = vpop.eup %14883 }
 0x6e6   :  { %v9032_v54 = vadd.f32 1.0, %v14884_v34 }
 0x6e8   :  { %14885 = vrcp.f32 %v9032_v54  ;;  %v9059_v36 = vand.u32 2147483648, %v9032_v54  ;;  %v9057_v48 = vand.u32 2147483647, %v9032_v54  ;;  %vm9053_vm11 = vweird.f32 %v9032_v54 }
 0x6ea   :  { %v9060_v8 = vor.u32 1.1754944e-38, %v9059_v36  ;;  %vm9058_vm13 = vcmp.eq.f32.partialorder %v9057_v48, 8.507059e+37 }
 0x6ee   :  { %v14886_v7 = vpop.eup %14885 }
 0x6ef   :  { %v9049_v30 = vmul.f32 %v14886_v7, %v9032_v54  ;;  %vm9054_vm9 = vweird.f32 %v14886_v7 }
 0x6f0   :  { %vm9055_vm12 = vmor %vm9053_vm11, %vm9054_vm9  ;;  %vm9319_vm11 = vcmask 7168  }
 0x6f1   :  { %v9050_v60 = vsub.f32 1.0, %v9049_v30 }
 0x6f3   :  { %v9051_v31 = vmul.f32 %v14886_v7, %v9050_v60 }
 0x6f5   :  { %v9052_v39 = vadd.f32 %v14886_v7, %v9051_v31 }
 0x6f7   :  { %v9056_v22 = vsel %vm9055_vm12, %v14886_v7, %v9052_v39 }
 0x6f8   :  { %v9061_v2 = vsel %vm9058_vm13, %v9060_v8, %v9056_v22 }
 0x6f9   :  { %v9066_v28 = vpack.c.bf16 %v9061_v2, %v9061_v2  ;;  %9064 = vst [vmem:[#allocation26 + $0x8] sm:$0xff] %v9061_v2 }
 0x6fa   :  { %9449 = dma.vmem_to_hbm [thread:$0]  %s9445_s14, 256, %s9447_s0, [#allocation27]  }
 0x6fb   :  { %9220 = vmatmul.bf16.vlgmr.msrb.gmra.mxu3 %v9066_v28 }
 0x74b   :  { %v9301_v39 = vpop.xlane.xlu2 %9300 }
 0x74c   :  { %v9302_v8 = vmax.f32 %v9301_v39, 1e-16 }
 0x74e   :  { %vm9309_vm7 = vweird.f32 %v9302_v8 }
 0x75e   :  { %v9208_v10 = vpop.f32.mrf.mxu2 }
 0x75f   :  { %v9209_v53 = vadd.f32 %v14734_v47, %v9208_v10 }
 0x766   :  { %v9210_v35 = vpop.f32.mrf.mxu2 }
 0x77e   :  { %v9221_v49 = vpop.f32.mrf.mxu3 }
 0x77f   :  { %v16695_v59 = vadd.f32 %v9221_v49, %v9209_v53  ;;  %v9355_v53 = vlaneseq }
 0x781   :  { %9226 = vst.msk [vmem:[%s16771_s20] sm:$0xff] %vm9225_vm14, %v16695_v59  ;;  %v9228_v50 = vmul.f32 %v16695_v59, %v16695_v59  ;;  %v9342_v57 = vsel %vm9225_vm14, %v16695_v59, -inf }
 0x783   :  { %v9229_v42 = vsel %vm9225_vm14, %v9228_v50, -inf }
 0x784   :  { %9230 = vmax.xlane.f32.xlu0 %v9229_v42 }
 0x786   :  { %v9223_v52 = vpop.f32.mrf.mxu3 }
 0x7f7   :  { %v9231_v5 = vpop.xlane.xlu0 %9230 }
 0x7f8   :  { %v9232_v55 = vsub.f32 %v9228_v50, %v9231_v5  ;;  %v16731_v50 = vand.u32 127, %v9355_v53 }
 0x7fa   :  { %v9233_v61 = vmul.f32 1.442695, %v9232_v55  ;;  %vm9414_vm15 = vcmp.eq.s32.totalorder %v16731_v50, 0 }
 0x7fc   :  { %14887 = vpow2.f32 %v9233_v61 }
 0x802   :  { %v14888_v41 = vpop.eup %14887 }
 0x803   :  { %v9235_v6 = vsel %vm9225_vm14, %v14888_v41, 0.0 }
 0x804   :  { %9236 = vadd.xlane.f32.xlu0 %v9235_v6 }
 0x877   :  { %v9237_v26 = vpop.xlane.xlu0 %9236 }
 0x878   :  { %14889 = vrcp.f32 %v9237_v26  ;;  %v9249_v33 = vand.u32 2147483648, %v9237_v26  ;;  %v9247_v9 = vand.u32 2147483647, %v9237_v26  ;;  %vm9243_vm1 = vweird.f32 %v9237_v26 }
 0x87a   :  { %v9250_v23 = vor.u32 1.1754944e-38, %v9249_v33  ;;  %vm9248_vm3 = vcmp.eq.f32.partialorder %v9247_v9, 8.507059e+37 }
 0x87e   :  { %v14890_v19 = vpop.eup %14889 }
 0x87f   :  { %v9239_v3 = vmul.f32 %v14890_v19, %v9237_v26  ;;  %vm9244_vm0 = vweird.f32 %v14890_v19 }
 0x880   :  { %vm9245_vm2 = vmor %vm9243_vm1, %vm9244_vm0 }
 0x881   :  { %v9240_v0 = vsub.f32 1.0, %v9239_v3 }
 0x883   :  { %v9241_v15 = vmul.f32 %v14890_v19, %v9240_v0 }
 0x885   :  { %v9242_v44 = vadd.f32 %v14890_v19, %v9241_v15 }
 0x887   :  { %v9246_v32 = vsel %vm9245_vm2, %v14890_v19, %v9242_v44  ;;  %v15330_v19 = vmov 0.0  }
 0x888   :  { %v9251_v12 = vsel %vm9248_vm3, %v9250_v23, %v9246_v32 }
 0x889   :  { %v9252_v24 = vmul.f32 %v14888_v41, %v9251_v12 }
 0x88b   :  { %13662 = vmatmul.msk.f32.vlgmr.msra.gmra.mxu0 %vm9225_vm14, %v9252_v24 }
 0x908   :  { %v9277_v37 = vpop.f32.mrf.mxu0 }
 0x909   :  { %v9280_v4 = vmul.f32 %v9277_v37, %v9277_v37 }
 0x90b   :  { %v9282_v1 = vsel %vm9281_vm4, %v9280_v4, 0.0 }
 0x90c   :  { %9283 = vadd.xlane.f32.xlu1 %v9282_v1 }
 0x914   :  { %9343 = vmax.xlane.f32.xlu1 %v9342_v57 }
 0x92d   :  { %9359 = vperm.xlu1 %14730, %v9357_v27  }
 0x97f   :  { %v9284_v40 = vpop.xlane.xlu1 %9283 }
 0x980   :  { %v9285_v63 = vmax.f32 %v9284_v40, 1e-24 }
 0x982   :  { %14891 = vrsqrt.f32 %v9285_v63  ;;  %vm9292_vm10 = vweird.f32 %v9285_v63 }
 0x987   :  { %v9344_v13 = vpop.xlane.xlu1 %9343 }
 0x988   :  { %v14892_v16 = vpop.eup %14891  ;;  %v9345_v38 = vsub.f32 %v16695_v59, %v9344_v13 }
 0x989   :  { %v9287_v18 = vmul.f32 %v14892_v16, %v9285_v63  ;;  %vm9293_vm5 = vweird.f32 %v14892_v16 }
 0x98a   :  { %v9346_v51 = vmul.f32 1.442695, %v9345_v38  ;;  %vm9294_vm6 = vmor %vm9292_vm10, %vm9293_vm5 }
 0x98b   :  { %v9288_v46 = vmul.f32 %v14892_v16, %v9287_v18 }
 0x98c   :  { %14893 = vpow2.f32 %v9346_v51 }
 0x98d   :  { %v9289_v56 = vmul.f32 0.5, %v9288_v46  ;;  %14895 = vrsqrt.f32 %v9302_v8 }
 0x98f   :  { %v9290_v62 = vsub.f32 1.5, %v9289_v56 }
 0x991   :  { %v9291_v29 = vmul.f32 %v14892_v16, %v9290_v62 }
 0x992   :  { %v14894_v34 = vpop.eup %14893 }
 0x993   :  { %v9295_v54 = vsel %vm9294_vm6, %v14892_v16, %v9291_v29  ;;  %v9348_v7 = vsel %vm9225_vm14, %v14894_v34, 0.0  ;;  %v14896_v22 = vpop.eup %14895 }
 0x994   :  { %v9296_v30 = vmul.f32 %v9295_v54, %v9277_v37  ;;  %9349 = vadd.xlane.f32.xlu2 %v9348_v7  ;;  %v9304_v2 = vmul.f32 %v14896_v22, %v9302_v8  ;;  %vm9310_vm8 = vweird.f32 %v14896_v22 }
 0x995   :  { %vm9311_vm9 = vmor %vm9309_vm7, %vm9310_vm8 }
 0x996   :  { %13664 = vmatmul.msk.f32.vlgmr.msrb.gmra.mxu0 %vm9281_vm4, %v9296_v30  ;;  %v9313_v60 = vmul.f32 %v9297_v43, %v9296_v30  ;;  %v9339_v36 = vsub.f32 %v9296_v30, %v9297_v43  ;;  %v9305_v28 = vmul.f32 %v14896_v22, %v9304_v2 }
 0x998   :  { %v9314_v31 = vsel %vm9281_vm4, %v9313_v60, 0.0  ;;  %v9340_v48 = vmul.f32 %v9339_v36, %v9339_v36  ;;  %v9306_v10 = vmul.f32 0.5, %v9305_v28 }
 0x999   :  { %9315 = vadd.xlane.f32.xlu0 %v9314_v31 }
 0x99a   :  { %9341 = vst.msk [vmem:[#allocation25] sm:$0xff] %vm9281_vm4, %v9340_v48  ;;  %v9307_v35 = vsub.f32 1.5, %v9306_v10 }
 0x99b   :  { %9438 = dma.vmem_to_hbm [thread:$0]  %s9434_s24, 128, %s9436_s11, [#allocation4]  }
 0x99c   :  { %v9308_v49 = vmul.f32 %v14896_v22, %v9307_v35 }
 0x99e   :  { %v9312_v42 = vsel %vm9311_vm9, %v14896_v22, %v9308_v49 }
 0x99f   :  { %v9360_v5 = vpop.permute.xlu1 %9359 }
 0x9a0   :  { %vm9361_vm12 = vcmp.eq.s32.totalorder %v16731_v50, %v9360_v5 }
 0x9a1   :  { %v13663_v3 = vsel %vm9361_vm12, 1.0, %v15330_v19 }
 0xa07   :  { %v9350_v47 = vpop.xlane.xlu2 %9349 }
 0xa08   :  { %14897 = vlog2.f32 %v9350_v47 }
 0xa0c   :  { %v9316_v52 = vpop.xlane.xlu0 %9315 }
 0xa0d   :  { %v9317_v55 = vmul.f32 %v9316_v52, %v9312_v42 }
 0xa0e   :  { %v14898_v61 = vpop.eup %14897 }
 0xa0f   :  { %v9352_v41 = vmul.f32 0.6931472, %v14898_v61  ;;  %v9318_v6 = vsub.f32 1.0, %v9317_v55 }
 0xa11   :  { %v9353_v58 = vadd.f32 %v9352_v41, %v9344_v13  ;;  %v9320_v26 = vsel %vm9319_vm11, %v9318_v6, 0.0 }
 0xa12   :  { %9321 = vadd.xlane.f32.xlu2 %v9320_v26 }
 0xa13   :  { %v9409_v0 = vpop.f32.mrf.mxu0  ;;  %v9354_v33 = vsub.f32 %v16695_v59, %v9353_v58  ;;  %v15333_v59 = vmov 8.0  }
 0xa14   :  { %v9412_v15 = vsub.f32 1.0, %v9409_v0  ;;  %14899 = vrcp.f32 %v15333_v59 }
 0xa15   :  { %v9364_v9 = vmul.f32 %v13663_v3, %v9354_v33 }
 0xa16   :  { %9413 = vst.msk [vmem:[%s16772_s21] sm:$0xff] %vm9225_vm14, %v9412_v15 }
 0xa17   :  { %v9365_v44 = vsel %vm9225_vm14, %v9364_v9, 0.0  ;;  %vm9417_vm14 = vcmp.eq.s32.totalorder %v16731_v50, 1 }
 0xa18   :  { %9366 = vadd.xlane.f32.xlu0 %v9365_v44 }
 0xa1a   :  { %v14900_v23 = vpop.eup %14899 }
 0xa1b   :  { %v9331_v32 = vmul.f32 8.0, %v14900_v23  ;;  %vm9335_vm13 = vweird.f32 %v14900_v23 }
 0xa1d   :  { %v9332_v12 = vsub.f32 1.0, %v9331_v32 }
 0xa1f   :  { %v9333_v25 = vmul.f32 %v14900_v23, %v9332_v12 }
 0xa21   :  { %v9334_v17 = vadd.f32 %v14900_v23, %v9333_v25 }
 0xa23   :  { %v9336_v21 = vsel %vm9335_vm13, %v14900_v23, %v9334_v17 }
 0xa85   :  { %v9322_v24 = vpop.xlane.xlu2 %9321 }
 0xa86   :  { %v9323_v43 = vrot.slane %v9322_v24, 4 }
 0xa88   :  { %v9324_v45 = vadd.f32 %v9323_v43, %v9322_v24 }
 0xa8a   :  { %v9325_v37 = vrot.slane %v9324_v45, 2 }
 0xa8b   :  { %v9367_v4 = vpop.xlane.xlu0 %9366 }
 0xa8c   :  { %v9368_v1 = vrot.slane %v9367_v4, 4  ;;  %v9326_v57 = vadd.f32 %v9325_v37, %v9324_v45 }
 0xa8e   :  { %v9369_v14 = vadd.f32 %v9368_v1, %v9367_v4  ;;  %v9327_v11 = vrot.slane %v9326_v57, 1 }
 0xa90   :  { %v9370_v20 = vrot.slane %v9369_v14, 2  ;;  %v9328_v27 = vadd.f32 %v9327_v11, %v9326_v57 }
 0xa92   :  { %v9371_v40 = vadd.f32 %v9370_v20, %v9369_v14  ;;  %14699 = vpush %v9328_v27 }
 0xa93   :  { %14701 = vpush %v9336_v21 }
 0xa94   :  { %v9372_v63 = vrot.slane %v9371_v40, 1 }
 0xa96   :  { %v9373_v13 = vadd.f32 %v9372_v63, %v9371_v40 }
 0xa98   :  { %14703 = vpush %v9373_v13 }
 0xac3   :  { %s14700_s21 = spop %14699 }
 0xac4   :  { %s14702_s23 = spop %14701 }
 0xac5   :  { %s9338_s17 = smul.f32 %s14702_s23, %s14700_s21 }
 0xac7   :  { %v9418_v16 = vstv %s9338_s17 }
 0xac8   :  { %v9419_v18 = vsel %vm9417_vm14, %v9418_v16, 0.0 }
 0xac9   :  { %s14704_s18 = spop %14703 }
 0xaca   :  { %s9375_s27 = ssub.f32 0.0, %s14704_s18 }
 0xacc   :  { %s9384_s16 = smul.f32 %s14702_s23, %s9375_s27 }
 0xace   :  { %v9415_v38 = vstv %s9384_s16 }
 0xacf   :  { %v9416_v51 = vsel %vm9414_vm15, %v9415_v38, 0.0 }
 0xad0   :  { %v9420_v46 = vadd.f32 %v9419_v18, %v9416_v51 }
 0xad2   :  { %9421 = vst [vmem:[%s16850_s13] sm:$0x1] %v9420_v46 }
 0xad3   :  { %15305 = dma.done.wait [#allocation4], 128  }
 0xad4   :  { %15306 = vsyncadd [#allocation4], 4294967168 }
 0xad5   :  { %15307 = dma.done.wait [#allocation27], 256  }
 0xad6   :  { %15308 = vsyncadd [#allocation27], 4294967040 }
 0xad7   :  { %9464 = vsyncpa [#allocation3], 1 }
 0xad8   :  { %9465 = vsyncpa [#allocation6], 1 }
 0xad9   :  { %9466 = vsyncpa [#allocation9], 1 }
 0xada   :  { %9467 = vsyncpa [#allocation12], 1 }
 0xadb   :  { %9468 = vsyncpa [#allocation15], 1 }
 0xadc   :  { %9469 = vsyncpa [#allocation18], 1 }
 0xadd   :  { %9470 = vsyncpa [#allocation21], 1 }
 0xade   :  { %9471 = vsyncpa [#allocation24], 1 }
 0xadf   :  { %9472 = vsyncpa [#allocation4], 1 }
 0xae0   :  { %9473 = vsyncpa [#allocation27], 1 }

</bundles_post_ra>
